<compile_context>
chip_gen: v6e
topology: v6e:2x2x1
jax: 0.10.0
libtpu: 0.0.40
codegen_flags: <defaults>
</compile_context>

<pallas_src>
import functools

import numpy as np
import jax
import jax.numpy as jnp
from jax.experimental import pallas as pl
from jax.experimental.pallas import tpu as pltpu


NPAD = 128   # lane-dense projection width (att lanes 0..7, cla lanes 8..15)


# ----------------------------------------------------------------------------
# Pallas kernel: post-backbone head (eval path), single invocation, whole batch
# ----------------------------------------------------------------------------
def _head_kernel(feat_ref, w1_ref, w1s_ref, b1_ref, wac_ref, bac_ref,
                 clip_ref, fmax_ref, *, cla_off):
    B, T, F_, C = feat_ref.shape
    BT = B * T
    NP = wac_ref.shape[1]

    # torch.mean(x, dim=3): frequency mean; fold batch into rows for the MXU.
    xf = feat_ref[...].astype(jnp.float32)                        # bf16 -> f32
    xm = jnp.mean(xf, axis=2).reshape(BT, C)                      # (B*T, C) f32

    # max_pool1d(3,1,1) + avg_pool1d(3,1,1) over time, per batch element.
    # Neighbours via XLU sublane rolls; batch-boundary wrap and edge padding
    # are fixed up with masks built from a (BT, 1) column iota (broadcast).
    prev = pltpu.roll(xm, 1, axis=0)          # row r <- row r-1 (wraps, masked)
    nxt = pltpu.roll(xm, BT - 1, axis=0)      # row r <- row r+1 (wraps, masked)
    t_loc = jax.lax.broadcasted_iota(jnp.int32, (BT, 1), 0) % T
    is_first = t_loc == 0
    is_last = t_loc == (T - 1)

    neg = jnp.float32(-1e30)                               # max_pool pads with -inf
    x1 = jnp.maximum(jnp.maximum(jnp.where(is_first, neg, prev), xm),
                     jnp.where(is_last, neg, nxt))
    x2 = (jnp.where(is_first, 0.0, prev) + xm              # count_include_pad=True
          + jnp.where(is_last, 0.0, nxt)) * (1.0 / 3.0)
    xp = x1 + x2                                           # (B*T, C) f32

    # fc1 (Linear C -> FE) + ReLU.  int8 weights: the integer values are exact
    # in bf16, so convert int8->bf16, matmul with f32 accumulation on the MXU,
    # and apply the per-output-column scale on the small f32 accumulator.
    w1_bf16 = w1_ref[...].astype(jnp.bfloat16)             # (C, FE) exact ints
    h = jnp.dot(xp.astype(jnp.bfloat16), w1_bf16,
                preferred_element_type=jnp.float32)
    h = jnp.maximum(h * w1s_ref[...] + b1_ref[...], 0.0)   # (B*T, FE) f32

    # Fused AttBlock projection: single lane-dense 128-wide output.
    # att logits live in lanes [0, cla_off), cla logits in [cla_off, 2*cla_off).
    ac = jnp.dot(h.astype(jnp.bfloat16), wac_ref[...],
                 preferred_element_type=jnp.float32) + bac_ref[...]   # (B*T, NP)

    # softmax(clamp(att, -10, 10)) over the time axis (per batch element).
    # Lanes >= cla_off hold non-att values but are independent per-lane and are
    # sliced off in the wrapper.
    att = jnp.clip(ac, -10.0, 10.0).reshape(B, T, NP)
    att = att - jnp.max(att, axis=1, keepdims=True)
    e = jnp.exp(att)
    norm_att = e * pl.reciprocal(jnp.sum(e, axis=1, keepdims=True), approx=False)

    # Rotate the cla half down onto lanes [0, cla_off) so it lines up with
    # norm_att (one XLU lane rotate; the XLU slot is otherwise idle here).
    cla = jax.nn.sigmoid(pltpu.roll(ac, NP - cla_off, axis=1)).reshape(B, T, NP)

    clip_ref[...] = jnp.sum(norm_att * cla, axis=1)   # clipwise (train-path value)
    fmax_ref[...] = jnp.max(cla, axis=1)              # eval output: max_t(framewise)


def attention_head(feat, w1_i8, w1_scale, b1, wac_q, bac, num_classes, cla_off):
    """feat: (B, T, F, C) bf16; w1_i8 int8 + per-column f32 scale; wac_q bf16.
    Returns (clipwise, framewise_max), each (B, num_classes) f32."""
    B, T, F_, C = feat.shape
    FE = w1_i8.shape[1]
    NP = wac_q.shape[1]
    BT = B * T

    flops = 2 * BT * (C * FE + FE * NP)
    bytes_accessed = (feat.size * 2 + w1_i8.size * 1 + w1_scale.size * 4
                      + b1.size * 4 + wac_q.size * 2 + bac.size * 4
                      + 2 * B * NP * 4)

    kernel = functools.partial(_head_kernel, cla_off=cla_off)
    clip, fmax = pl.pallas_call(
        kernel,
        out_shape=(jax.ShapeDtypeStruct((B, NP), jnp.float32),
                   jax.ShapeDtypeStruct((B, NP), jnp.float32)),
        in_specs=[pl.BlockSpec(memory_space=pltpu.MemorySpace.VMEM)
                  for _ in range(6)],
        out_specs=(pl.BlockSpec(memory_space=pltpu.MemorySpace.VMEM),
                   pl.BlockSpec(memory_space=pltpu.MemorySpace.VMEM)),
        compiler_params=pltpu.CompilerParams(
            vmem_limit_bytes=24 * 1024 * 1024),   # residency ~10 MiB (incl. bf16 dequant temp)
        cost_estimate=pl.CostEstimate(
            flops=flops,
            transcendentals=2 * BT * NP,          # exp + sigmoid
            bytes_accessed=bytes_accessed),
    )(feat, w1_i8, w1_scale, b1, wac_q, bac)
    # slice the lane-padded (B, 128) outputs back to the real class count
    return clip[:, :num_classes], fmax[:, :num_classes]


# ----------------------------------------------------------------------------
# Plain-JAX glue: frozen front end (Spectrogram + LogmelFilterBank + bn0)
# ----------------------------------------------------------------------------
def hann_window(n):
    return (0.5 - 0.5 * np.cos(2.0 * np.pi * np.arange(n) / n)).astype(np.float32)


def dft_basis(n_fft):
    k = np.arange(n_fft // 2 + 1)
    n = np.arange(n_fft)
    ang = 2.0 * np.pi * np.outer(n, k) / n_fft
    return np.cos(ang).astype(np.float32), (-np.sin(ang)).astype(np.float32)


def mel_filterbank(sr, n_fft, n_mels, fmin, fmax):
    def hz_to_mel(f):
        return 2595.0 * np.log10(1.0 + f / 700.0)

    def mel_to_hz(m):
        return 700.0 * (10.0 ** (m / 2595.0) - 1.0)

    n_freqs = n_fft // 2 + 1
    freqs = np.linspace(0.0, sr / 2.0, n_freqs)
    hz_pts = mel_to_hz(np.linspace(hz_to_mel(fmin), hz_to_mel(fmax), n_mels + 2))
    fb = np.zeros((n_freqs, n_mels), dtype=np.float32)
    for m in range(n_mels):
        l, c, r = hz_pts[m], hz_pts[m + 1], hz_pts[m + 2]
        up = (freqs - l) / max(c - l, 1e-6)
        down = (r - freqs) / max(r - c, 1e-6)
        fb[:, m] = np.maximum(0.0, np.minimum(up, down))
    return fb


def logmel_frontend(audio, n_fft, hop, window, cos_b, sin_b, mel_fb):
    """STFT power spectrogram via strided convolutions (MXU) -> log-mel."""
    pad = n_fft // 2                                   # center=True, pad_mode='reflect'
    x = jnp.pad(audio, ((0, 0), (pad, pad)), mode="reflect")
    lhs = x[:, :, None]                                # (B, L_pad, 1)
    k_re = (window[:, None] * cos_b)[:, None, :]       # (n_fft, 1, n_freqs)
    k_im = (window[:, None] * sin_b)[:, None, :]
    dn = jax.lax.conv_dimension_numbers(lhs.shape, k_re.shape, ("NWC", "WIO", "NWC"))
    re = jax.lax.conv_general_dilated(lhs, k_re, window_strides=(hop,),
                                      padding="VALID", dimension_numbers=dn)
    im = jax.lax.conv_general_dilated(lhs, k_im, window_strides=(hop,),
                                      padding="VALID", dimension_numbers=dn)
    power = re * re + im * im                          # power spectrogram (power=2)
    mel = power @ mel_fb                               # (B, T, n_mels)
    return 10.0 * jnp.log10(jnp.maximum(mel, 1e-10))   # ref=1, amin=1e-10, top_db=None


def standin_backbone(x3, w_fe, r):
    # TODO(synk): timm tf_efficientnet_b0_ns trunk has no clean Pallas equivalent;
    # replaced by a deterministic patchify + linear-projection stand-in that
    # produces a (B, T//r, F//r, 1280) channels-last feature map (emitted bf16).
    B, Cc, T, M = x3.shape
    Tp, Mp = T // r, M // r
    p = x3[:, :, :Tp * r, :Mp * r].reshape(B, Cc, Tp, r, Mp, r)
    p = p.transpose(0, 2, 4, 1, 3, 5).reshape(B, Tp, Mp, Cc * r * r)
    return jnp.maximum(p @ w_fe, 0.0).astype(jnp.bfloat16)


# pure-JAX reference of the Pallas head (sanity check; f32 activation math)
def head_reference(feat, w1, b1, wa, ba, wc, bc):
    xm = jnp.mean(feat, axis=2)                        # (B, T, C)
    pad_neg = jnp.full_like(xm[:, :1], -jnp.inf)
    pad_zero = jnp.zeros_like(xm[:, :1])
    prev, nxt = xm[:, :-1], xm[:, 1:]
    x1 = jnp.maximum(jnp.maximum(jnp.concatenate([pad_neg, prev], 1), xm),
                     jnp.concatenate([nxt, pad_neg], 1))
    x2 = (jnp.concatenate([pad_zero, prev], 1) + xm
          + jnp.concatenate([nxt, pad_zero], 1)) / 3.0
    xp = x1 + x2
    h = jnp.maximum(xp @ w1 + b1, 0.0)
    att = jnp.clip(h @ wa + ba, -10.0, 10.0)
    norm_att = jax.nn.softmax(att, axis=1)
    cla = jax.nn.sigmoid(h @ wc + bc)
    return jnp.sum(norm_att * cla, axis=1), jnp.max(cla, axis=1)


if __name__ == "__main__":
    # hyperparameters consistent with Encoder_B0_Pretrained.__init__
    sample_rate, window_size, hop_size = 16000, 256, 64
    mel_bins, fmin, fmax_hz, classes_num = 64, 50, 8000, 8
    FE_IN, FE_FEATURES = 1280, 2048          # fe=1280, fe_features=2048 (hardcoded)
    R = 8                                    # stand-in backbone downsample factor
    CLA_OFF = classes_num                    # cla lanes start right after att lanes

    key = jax.random.PRNGKey(0)
    keys = jax.random.split(key, 12)

    B, data_length = 2, 4096
    audio = jax.random.normal(keys[0], (B, data_length), dtype=jnp.float32)

    # frozen front-end constants
    window = jnp.asarray(hann_window(window_size))
    cos_np, sin_np = dft_basis(window_size)
    cos_b, sin_b = jnp.asarray(cos_np), jnp.asarray(sin_np)
    mel_fb = jnp.asarray(mel_filterbank(sample_rate, window_size, mel_bins, fmin, fmax_hz))

    # frozen bn0 = BatchNorm2d(mel_bins), eval mode (deterministic synthetic params)
    bn_gamma = 1.0 + 0.1 * jax.random.normal(keys[1], (mel_bins,))
    bn_beta = 0.1 * jax.random.normal(keys[2], (mel_bins,))
    bn_mean = -30.0 + jax.random.normal(keys[3], (mel_bins,))
    bn_var = 400.0 * (1.0 + jnp.abs(0.1 * jax.random.normal(keys[4], (mel_bins,))))

    # stand-in backbone weights
    w_fe = (jax.random.normal(keys[5], (3 * R * R, FE_IN))
            * (0.5 / np.sqrt(3 * R * R))).astype(jnp.float32)

    # frozen fc1 (Linear 1280 -> 2048), stored transposed as (in, out)
    w1 = (0.02 * jax.random.normal(keys[6], (FE_IN, FE_FEATURES))).astype(jnp.float32)
    b1 = (0.02 * jax.random.normal(keys[7], (1, FE_FEATURES))).astype(jnp.float32)
    # AttBlock weights (Conv1d k=1 -> linear), stored (in, out)
    wa = (0.02 * jax.random.normal(keys[8], (FE_FEATURES, classes_num))).astype(jnp.float32)
    ba = (0.02 * jax.random.normal(keys[9], (1, classes_num))).astype(jnp.float32)
    wc = (0.02 * jax.random.normal(keys[10], (FE_FEATURES, classes_num))).astype(jnp.float32)
    bc = (0.02 * jax.random.normal(keys[11], (1, classes_num))).astype(jnp.float32)

    # ---- weight-only int8 quantization of fc1 (per-output-column f32 scales) ----
    w1_absmax = jnp.max(jnp.abs(w1), axis=0, keepdims=True)          # (1, 2048)
    w1_scale = (jnp.maximum(w1_absmax, 1e-8) / 127.0).astype(jnp.float32)
    w1_i8 = jnp.clip(jnp.round(w1 / w1_scale), -127, 127).astype(jnp.int8)
    w1_deq = w1_i8.astype(jnp.float32) * w1_scale                    # reference weights

    # ---- att|cla fused into ONE lane-dense 128-wide bf16 projection ----
    assert 2 * classes_num <= NPAD
    wac = jnp.zeros((FE_FEATURES, NPAD), jnp.float32)
    wac = wac.at[:, :classes_num].set(wa).at[:, CLA_OFF:CLA_OFF + classes_num].set(wc)
    wac_q = wac.astype(jnp.bfloat16)
    bac = jnp.zeros((1, NPAD), jnp.float32)
    bac = bac.at[:, :classes_num].set(ba).at[:, CLA_OFF:CLA_OFF + classes_num].set(bc)

    # ---------------- forward (eval mode) ----------------
    logmel = logmel_frontend(audio, window_size, hop_size, window, cos_b, sin_b, mel_fb)
    Tcrop = (logmel.shape[1] // R) * R
    logmel = logmel[:, :Tcrop, :]                                         # (B, T, mel)
    x = (logmel - bn_mean) / jnp.sqrt(bn_var + 1e-5) * bn_gamma + bn_beta # bn0 over mel axis
    # spec_augmenter / do_mixup / dropout are training-only -> skipped in eval path
    x3 = jnp.stack([x, x, x], axis=1)                                     # torch.cat([x, x, x], dim=1)
    feat = standin_backbone(x3, w_fe, R)                                  # (B, T', F', 1280) bf16

    clipwise, framewise_max = attention_head(
        feat, w1_i8, w1_scale, b1, wac_q, bac, classes_num, CLA_OFF)
    framewise_max = jax.block_until_ready(framewise_max)

    # sanity check against a pure-JAX reference of the head (same quantized weights,
    # same bf16-rounded feature map, f32 activation math)
    feat_f32 = feat.astype(jnp.float32)
    wa_deq = wac_q[:, :classes_num].astype(jnp.float32)
    wc_deq = wac_q[:, CLA_OFF:CLA_OFF + classes_num].astype(jnp.float32)
    ref_clip, ref_fmax = head_reference(feat_f32, w1_deq, b1, wa_deq, ba, wc_deq, bc)
    assert framewise_max.shape == (B, classes_num)
    assert bool(jnp.allclose(framewise_max, ref_fmax, atol=3e-2)), "framewise mismatch"
    assert bool(jnp.allclose(clipwise, ref_clip, atol=3e-2)), "clipwise mismatch"

    print("KERNEL_OK")
</pallas_src>

<mosaic_0001>
module attributes {stable_mosaic.version = 11 : i64} {
  func.func @_head_kernel(%arg0: memref<2x8x8x1280xbf16, #tpu.memory_space<vmem>>, %arg1: memref<1280x2048xi8, #tpu.memory_space<vmem>>, %arg2: memref<1x2048xf32, #tpu.memory_space<vmem>>, %arg3: memref<1x2048xf32, #tpu.memory_space<vmem>>, %arg4: memref<2048x128xbf16, #tpu.memory_space<vmem>>, %arg5: memref<1x128xf32, #tpu.memory_space<vmem>>, %arg6: memref<2x128xf32, #tpu.memory_space<vmem>>, %arg7: memref<2x128xf32, #tpu.memory_space<vmem>>) attributes {dimension_semantics = [], scalar_prefetch = 0 : i64, scratch_operands = 0 : i64, tpu.core_type = #tpu.core_type<tc>} {
    %c0 = arith.constant 0 : index
    %c0_0 = arith.constant 0 : index
    %c0_1 = arith.constant 0 : index
    %c0_2 = arith.constant 0 : index
    %0 = vector.load %arg0[%c0, %c0_0, %c0_1, %c0_2] : memref<2x8x8x1280xbf16, #tpu.memory_space<vmem>>, vector<2x8x8x1280xbf16>
    %1 = arith.extf %0 : vector<2x8x8x1280xbf16> to vector<2x8x8x1280xf32>
    %cst = arith.constant dense<0.000000e+00> : vector<2x8x1280xf32>
    %2 = vector.multi_reduction <add>, %1, %cst [2] : vector<2x8x8x1280xf32> to vector<2x8x1280xf32>
    %cst_3 = arith.constant 8.000000e+00 : f32
    %3 = vector.broadcast %cst_3 : f32 to vector<2x8x1280xf32>
    %4 = arith.divf %2, %3 : vector<2x8x1280xf32>
    %5 = vector.shape_cast %4 : vector<2x8x1280xf32> to vector<16x1280xf32>
    %c1_i32 = arith.constant 1 : i32
    %6 = tpu.dynamic_rotate %5 by %c1_i32 dim 0 : vector<16x1280xf32>, i32 -> vector<16x1280xf32>
    %c15_i32 = arith.constant 15 : i32
    %7 = tpu.dynamic_rotate %5 by %c15_i32 dim 0 : vector<16x1280xf32>, i32 -> vector<16x1280xf32>
    %8 = tpu.iota {dimensions = array<i32: 0>} : vector<16x1xi32>
    %c8_i32 = arith.constant 8 : i32
    %c0_i32 = arith.constant 0 : i32
    %9 = arith.cmpi eq, %c8_i32, %c0_i32 : i32
    %c1_i32_4 = arith.constant 1 : i32
    %10 = arith.select %9, %c1_i32_4, %c8_i32 : i32
    %11 = vector.broadcast %10 : i32 to vector<16x1xi32>
    %12 = arith.remsi %8, %11 : vector<16x1xi32>
    %c0_i32_5 = arith.constant 0 : i32
    %13 = vector.broadcast %c0_i32_5 : i32 to vector<16x1xi32>
    %14 = arith.cmpi ne, %12, %13 : vector<16x1xi32>
    %c0_i32_6 = arith.constant 0 : i32
    %15 = vector.broadcast %c0_i32_6 : i32 to vector<16x1xi32>
    %16 = arith.cmpi slt, %12, %15 : vector<16x1xi32>
    %c0_i32_7 = arith.constant 0 : i32
    %17 = arith.cmpi slt, %10, %c0_i32_7 : i32
    %18 = vector.broadcast %17 : i1 to vector<16x1xi1>
    %19 = vector.broadcast %18 : vector<16x1xi1> to vector<16x1xi1>
    %20 = arith.xori %16, %19 : vector<16x1xi1>
    %21 = arith.andi %20, %14 : vector<16x1xi1>
    %22 = vector.broadcast %10 : i32 to vector<16x1xi32>
    %23 = arith.addi %12, %22 : vector<16x1xi32>
    %24 = arith.select %21, %23, %12 : vector<16x1xi1>, vector<16x1xi32>
    %c0_i32_8 = arith.constant 0 : i32
    %25 = vector.broadcast %c0_i32_8 : i32 to vector<16x1xi32>
    %26 = arith.cmpi eq, %24, %25 : vector<16x1xi32>
    %c7_i32 = arith.constant 7 : i32
    %27 = vector.broadcast %c7_i32 : i32 to vector<16x1xi32>
    %28 = arith.cmpi eq, %24, %27 : vector<16x1xi32>
    %cst_9 = arith.constant -1.000000e+30 : f32
    %29 = vector.shape_cast %26 : vector<16x1xi1> to vector<16x1xi1>
    %30 = vector.broadcast %29 : vector<16x1xi1> to vector<16x1280xi1>
    %31 = vector.broadcast %cst_9 : f32 to vector<16x1280xf32>
    %32 = arith.select %30, %31, %6 : vector<16x1280xi1>, vector<16x1280xf32>
    %33 = arith.maximumf %32, %5 : vector<16x1280xf32>
    %cst_10 = arith.constant -1.000000e+30 : f32
    %34 = vector.shape_cast %28 : vector<16x1xi1> to vector<16x1xi1>
    %35 = vector.broadcast %34 : vector<16x1xi1> to vector<16x1280xi1>
    %36 = vector.broadcast %cst_10 : f32 to vector<16x1280xf32>
    %37 = arith.select %35, %36, %7 : vector<16x1280xi1>, vector<16x1280xf32>
    %38 = arith.maximumf %33, %37 : vector<16x1280xf32>
    %cst_11 = arith.constant 0.000000e+00 : f32
    %39 = vector.shape_cast %26 : vector<16x1xi1> to vector<16x1xi1>
    %40 = vector.broadcast %39 : vector<16x1xi1> to vector<16x1280xi1>
    %41 = vector.broadcast %cst_11 : f32 to vector<16x1280xf32>
    %42 = arith.select %40, %41, %6 : vector<16x1280xi1>, vector<16x1280xf32>
    %43 = arith.addf %42, %5 : vector<16x1280xf32>
    %cst_12 = arith.constant 0.000000e+00 : f32
    %44 = vector.shape_cast %28 : vector<16x1xi1> to vector<16x1xi1>
    %45 = vector.broadcast %44 : vector<16x1xi1> to vector<16x1280xi1>
    %46 = vector.broadcast %cst_12 : f32 to vector<16x1280xf32>
    %47 = arith.select %45, %46, %7 : vector<16x1280xi1>, vector<16x1280xf32>
    %48 = arith.addf %43, %47 : vector<16x1280xf32>
    %cst_13 = arith.constant 0.333333343 : f32
    %49 = vector.broadcast %cst_13 : f32 to vector<16x1280xf32>
    %50 = arith.mulf %48, %49 : vector<16x1280xf32>
    %51 = arith.addf %38, %50 : vector<16x1280xf32>
    %c0_14 = arith.constant 0 : index
    %c0_15 = arith.constant 0 : index
    %52 = vector.load %arg1[%c0_14, %c0_15] : memref<1280x2048xi8, #tpu.memory_space<vmem>>, vector<1280x2048xi8>
    %53 = arith.sitofp %52 : vector<1280x2048xi8> to vector<1280x2048xbf16>
    %54 = arith.truncf %51 : vector<16x1280xf32> to vector<16x1280xbf16>
    %cst_16 = arith.constant dense<0.000000e+00> : vector<16x2048xf32>
    %55 = tpu.matmul %54, %53, %cst_16 {dimension_numbers = #tpu.dot_dimension_numbers<[1], [0], [0], [1], [0, 0, 1, 1], [], []>} : vector<16x1280xbf16>, vector<1280x2048xbf16>, vector<16x2048xf32> -> vector<16x2048xf32>
    %c0_17 = arith.constant 0 : index
    %c0_18 = arith.constant 0 : index
    %56 = vector.load %arg2[%c0_17, %c0_18] : memref<1x2048xf32, #tpu.memory_space<vmem>>, vector<1x2048xf32>
    %57 = vector.broadcast %56 : vector<1x2048xf32> to vector<16x2048xf32>
    %58 = arith.mulf %55, %57 : vector<16x2048xf32>
    %c0_19 = arith.constant 0 : index
    %c0_20 = arith.constant 0 : index
    %59 = vector.load %arg3[%c0_19, %c0_20] : memref<1x2048xf32, #tpu.memory_space<vmem>>, vector<1x2048xf32>
    %60 = vector.broadcast %59 : vector<1x2048xf32> to vector<16x2048xf32>
    %61 = arith.addf %58, %60 : vector<16x2048xf32>
    %cst_21 = arith.constant 0.000000e+00 : f32
    %62 = vector.broadcast %cst_21 : f32 to vector<16x2048xf32>
    %63 = arith.maximumf %61, %62 : vector<16x2048xf32>
    %64 = arith.truncf %63 : vector<16x2048xf32> to vector<16x2048xbf16>
    %c0_22 = arith.constant 0 : index
    %c0_23 = arith.constant 0 : index
    %65 = vector.load %arg4[%c0_22, %c0_23] : memref<2048x128xbf16, #tpu.memory_space<vmem>>, vector<2048x128xbf16>
    %cst_24 = arith.constant dense<0.000000e+00> : vector<16x128xf32>
    %66 = tpu.matmul %64, %65, %cst_24 {dimension_numbers = #tpu.dot_dimension_numbers<[1], [0], [0], [1], [0, 0, 1, 1], [], []>} : vector<16x2048xbf16>, vector<2048x128xbf16>, vector<16x128xf32> -> vector<16x128xf32>
    %c0_25 = arith.constant 0 : index
    %c0_26 = arith.constant 0 : index
    %67 = vector.load %arg5[%c0_25, %c0_26] : memref<1x128xf32, #tpu.memory_space<vmem>>, vector<1x128xf32>
    %68 = vector.broadcast %67 : vector<1x128xf32> to vector<16x128xf32>
    %69 = arith.addf %66, %68 : vector<16x128xf32>
    %cst_27 = arith.constant -1.000000e+01 : f32
    %cst_28 = arith.constant 1.000000e+01 : f32
    %70 = vector.broadcast %cst_27 : f32 to vector<16x128xf32>
    %71 = arith.maximumf %70, %69 : vector<16x128xf32>
    %72 = vector.broadcast %cst_28 : f32 to vector<16x128xf32>
    %73 = arith.minimumf %72, %71 : vector<16x128xf32>
    %74 = vector.shape_cast %73 : vector<16x128xf32> to vector<2x8x128xf32>
    %cst_29 = arith.constant dense<0xFF800000> : vector<2x128xf32>
    %75 = vector.multi_reduction <maximumf>, %74, %cst_29 [1] : vector<2x8x128xf32> to vector<2x128xf32>
    %76 = vector.shape_cast %75 : vector<2x128xf32> to vector<2x1x128xf32>
    %77 = vector.broadcast %76 : vector<2x1x128xf32> to vector<2x8x128xf32>
    %78 = arith.subf %74, %77 : vector<2x8x128xf32>
    %79 = math.exp %78 : vector<2x8x128xf32>
    %cst_30 = arith.constant dense<0.000000e+00> : vector<2x128xf32>
    %80 = vector.multi_reduction <add>, %79, %cst_30 [1] : vector<2x8x128xf32> to vector<2x128xf32>
    %81 = vector.shape_cast %80 : vector<2x128xf32> to vector<2x1x128xf32>
    %82 = tpu.reciprocal %81 : vector<2x1x128xf32> -> vector<2x1x128xf32>
    %83 = vector.broadcast %82 : vector<2x1x128xf32> to vector<2x8x128xf32>
    %84 = arith.mulf %79, %83 : vector<2x8x128xf32>
    %c120_i32 = arith.constant 120 : i32
    %85 = tpu.dynamic_rotate %69 by %c120_i32 dim 1 : vector<16x128xf32>, i32 -> vector<16x128xf32>
    %86 = arith.negf %85 : vector<16x128xf32>
    %87 = math.exp %86 : vector<16x128xf32>
    %cst_31 = arith.constant 1.000000e+00 : f32
    %88 = vector.broadcast %cst_31 : f32 to vector<16x128xf32>
    %89 = arith.addf %88, %87 : vector<16x128xf32>
    %90 = arith.divf %88, %89 : vector<16x128xf32>
    %91 = vector.shape_cast %90 : vector<16x128xf32> to vector<2x8x128xf32>
    %92 = arith.mulf %84, %91 : vector<2x8x128xf32>
    %cst_32 = arith.constant dense<0.000000e+00> : vector<2x128xf32>
    %93 = vector.multi_reduction <add>, %92, %cst_32 [1] : vector<2x8x128xf32> to vector<2x128xf32>
    %c0_33 = arith.constant 0 : index
    %c0_34 = arith.constant 0 : index
    %94 = vector.load %arg6[%c0_33, %c0_34] : memref<2x128xf32, #tpu.memory_space<vmem>>, vector<2x128xf32>
    tpu.vector_store %arg6[%c0_33, %c0_34], %93 {strides = array<i32>} : memref<2x128xf32, #tpu.memory_space<vmem>>, vector<2x128xf32>,
    %cst_35 = arith.constant dense<0xFF800000> : vector<2x128xf32>
    %95 = vector.multi_reduction <maximumf>, %91, %cst_35 [1] : vector<2x8x128xf32> to vector<2x128xf32>
    %c0_36 = arith.constant 0 : index
    %c0_37 = arith.constant 0 : index
    %96 = vector.load %arg7[%c0_36, %c0_37] : memref<2x128xf32, #tpu.memory_space<vmem>>, vector<2x128xf32>
    tpu.vector_store %arg7[%c0_36, %c0_37], %95 {strides = array<i32>} : memref<2x128xf32, #tpu.memory_space<vmem>>, vector<2x128xf32>,
    return
  }
}

</mosaic_0001>

<bundles_post_ra>
// kernel: tpu_custom_call.1
= control target key start
LH: loop header
LB: loop body
LE: loop exit
PB: predicated region body
PF: predicated region fallthrough
CT: control target
= control target key end

     0   :  { %13 = vsyncpa [#allocation3], 0  ;;  %s10767_s0 = inlined_call_operand.hbm [shape: bf16[2,8,8,1280], index: 0, kind: input, shape index: {}]   ;;  %s10768_s1 = inlined_call_operand.hbm [shape: s8[1280,2048], index: 1, kind: input, shape index: {}]   ;;  %s10769_s2 = inlined_call_operand.hbm [shape: f32[1,2048], index: 2, kind: input, shape index: {}]   ;;  %s10770_s3 = inlined_call_operand.hbm [shape: f32[1,2048], index: 3, kind: input, shape index: {}]   ;;  %s10771_s4 = inlined_call_operand.hbm [shape: bf16[2048,128], index: 4, kind: input, shape index: {}]   ;;  %s10772_s5 = inlined_call_operand.hbm [shape: f32[1,128], index: 5, kind: input, shape index: {}]   ;;  %s10773_s6 = inlined_call_operand.hbm [shape: f32[2,128], index: 6, kind: output, shape index: {0}]   ;;  %s10774_s7 = inlined_call_operand.hbm [shape: f32[2,128], index: 7, kind: output, shape index: {1}]  }
   0x1   :  { %14 = vsyncpa [#allocation6], 0 }
   0x2   :  { %15 = vsyncpa [#allocation9], 0 }
   0x3   :  { %16 = vsyncpa [#allocation12], 0 }
   0x4   :  { %17 = vsyncpa [#allocation4], 0 }
   0x5   :  { %18 = vsyncpa [#allocation15], 0  ;;  %s8193_s24 = smov [#allocation5]  }
   0x6   :  { %s36_s25 = sshll.u32 %s8193_s24, 4  ;;  %s37_s25 = int_to_ptr.vmem [resolvable:$true] %s36_s25 }
   0x7   :  { %s8029_s26 = scalar_lea.vmem %s37_s25, 81920  ;;  %p8034_p1 = scmp.lt.s32.totalorder %s37_s25, %s37_s25 }
   0x8   :  { %p8030_p0 = scmp.ne.s32.totalorder %s37_s25, %s8029_s26  ;;  %p8035_p2 = scmp.lt.s32.totalorder %s8029_s26, %s8029_s26 }
   0xa   :  { %p8036_p3 = por %p8035_p2, %p8034_p1 }
   0xc   :  { %p8037_p4 = pnand %p8036_p3, %p8030_p0 }
   0xe   :  { %8040 = shalt.err (!%p8037_p4)
}
   0xf   :  { %s8194_s27 = smov 2048   ;;  %s8195_s28 = smov 128  }
  0x10   :  { %42 = dma.hbm_to_vmem [thread:$0]  %s10768_s1, 81920, %s37_s25, [#allocation6], %s8194_s27, %s8194_s27, %s8195_s28  }
  0x11   :  { %s8196_s8 = smov [#allocation8]   ;;  %s8197_s10 = smov [#allocation2]  }
  0x12   :  { %s59_s9 = sshll.u32 %s8196_s8, 4  ;;  %s24_s11 = sshll.u32 %s8197_s10, 4  ;;  %s60_s9 = int_to_ptr.vmem [resolvable:$true] %s59_s9  ;;  %s25_s11 = int_to_ptr.vmem [resolvable:$true] %s24_s11 }
  0x13   :  { %s8049_s12 = scalar_lea.vmem %s60_s9, 256  ;;  %p8054_p6 = scmp.lt.s32.totalorder %s60_s9, %s60_s9 }
  0x14   :  { %p8050_p5 = scmp.ne.s32.totalorder %s60_s9, %s8049_s12  ;;  %p8055_p7 = scmp.lt.s32.totalorder %s8049_s12, %s8049_s12 }
  0x16   :  { %p8056_p8 = por %p8055_p7, %p8054_p6 }
  0x18   :  { %p8057_p9 = pnand %p8056_p8, %p8050_p5 }
  0x1a   :  { %8060 = shalt.err (!%p8057_p9)
}
  0x1b   :  { %62 = dma.hbm_to_vmem [thread:$0]  %s10770_s3, 256, %s60_s9, [#allocation9]  }
  0x1c   :  { %s8069_s15 = scalar_lea.vmem %s25_s11, 10240  ;;  %p8074_p11 = scmp.lt.s32.totalorder %s25_s11, %s25_s11 }
  0x1d   :  { %p8070_p10 = scmp.ne.s32.totalorder %s25_s11, %s8069_s15  ;;  %p8075_p12 = scmp.lt.s32.totalorder %s8069_s15, %s8069_s15 }
  0x1f   :  { %p8076_p13 = por %p8075_p12, %p8074_p11 }
  0x21   :  { %p8077_p0 = pnand %p8076_p13, %p8070_p10 }
  0x23   :  { %8080 = shalt.err (!%p8077_p0)
}
  0x24   :  { %s8198_s1 = smov 640   ;;  %s8199_s16 = smov 40  }
  0x25   :  { %30 = dma.hbm_to_vmem [thread:$0]  %s10767_s0, 10240, %s25_s11, [#allocation3], %s8198_s1, %s8198_s1, %s8199_s16  }
  0x26   :  { %s8200_s19 = smov [#allocation7]   ;;  %s8201_s21 = smov [#allocation10]  }
  0x27   :  { %s49_s20 = sshll.u32 %s8200_s19, 4  ;;  %s68_s22 = sshll.u32 %s8201_s21, 4  ;;  %s50_s20 = int_to_ptr.vmem [resolvable:$true] %s49_s20  ;;  %s69_s22 = int_to_ptr.vmem [resolvable:$true] %s68_s22 }
  0x28   :  { %s8089_s3 = scalar_lea.vmem %s50_s20, 256  ;;  %p8094_p2 = scmp.lt.s32.totalorder %s50_s20, %s50_s20 }
  0x29   :  { %p8090_p1 = scmp.ne.s32.totalorder %s50_s20, %s8089_s3  ;;  %p8095_p3 = scmp.lt.s32.totalorder %s8089_s3, %s8089_s3 }
  0x2b   :  { %p8096_p4 = por %p8095_p3, %p8094_p2 }
  0x2d   :  { %p8097_p5 = pnand %p8096_p4, %p8090_p1 }
  0x2f   :  { %8100 = shalt.err (!%p8097_p5)
}
  0x30   :  { %52 = dma.hbm_to_vmem [thread:$0]  %s10769_s2, 256, %s50_s20, [#allocation6]  }
  0x31   :  { %s8109_s25 = scalar_lea.vmem %s69_s22, 16384  ;;  %p8114_p7 = scmp.lt.s32.totalorder %s69_s22, %s69_s22 }
  0x32   :  { %p8110_p6 = scmp.ne.s32.totalorder %s69_s22, %s8109_s25  ;;  %p8115_p8 = scmp.lt.s32.totalorder %s8109_s25, %s8109_s25 }
  0x34   :  { %p8116_p9 = por %p8115_p8, %p8114_p7 }
  0x36   :  { %p8117_p10 = pnand %p8116_p9, %p8110_p6 }
  0x38   :  { %8120 = shalt.err (!%p8117_p10)
}
  0x39   :  { %s8202_s0 = smov 64   ;;  %s8203_s26 = smov 4  }
  0x3a   :  { %74 = dma.hbm_to_vmem [thread:$0]  %s10771_s4, 16384, %s69_s22, [#allocation9], %s8202_s0, %s8202_s0, %s8203_s26  }
  0x3b   :  { %s8204_s29 = smov [#allocation11]  }
  0x3c   :  { %s81_s30 = sshll.u32 %s8204_s29, 4  ;;  %s82_s30 = int_to_ptr.vmem [resolvable:$true] %s81_s30 }
  0x3d   :  { %s8129_s8 = scalar_lea.vmem %s82_s30, 16  ;;  %s8133_s2 = scalar_lea.vmem %s82_s30, 32 }
  0x3e   :  { %p8130_p11 = scmp.ne.s32.totalorder %s82_s30, %s8129_s8  ;;  %p8134_p12 = scmp.lt.s32.totalorder %s82_s30, %s82_s30 }
  0x3f   :  { %p8135_p13 = scmp.lt.s32.totalorder %s8133_s2, %s8129_s8 }
  0x41   :  { %p8136_p0 = por %p8135_p13, %p8134_p12 }
  0x43   :  { %p8137_p1 = pnand %p8136_p0, %p8130_p11 }
  0x45   :  { %8140 = shalt.err (!%p8137_p1)
}
  0x46   :  { %84 = dma.hbm_to_vmem [thread:$0]  %s10772_s5, 16, %s82_s30, [#allocation12]  }
  0x47   :  { %8181 = dma.done.wait [#allocation3], 10240  }
  0x48   :  { %8182 = vsyncadd [#allocation3], 4294957056 }
  0x49   :  { %8183 = dma.done.wait [#allocation6], 82176  }
  0x4a   :  { %8184 = vsyncadd [#allocation6], 4294885120 }
  0x4b   :  { %8185 = dma.done.wait [#allocation9], 16640  }
  0x4c   :  { %8186 = vsyncadd [#allocation9], 4294950656 }
  0x4d   :  { %8187 = dma.done.wait [#allocation12], 16  }
  0x4e   :  { %8188 = vsyncadd [#allocation12], 4294967280  ;;  %v1812_v0 = vlaneseq  ;;  %v2162_v3 = vld [vmem:[#allocation5 + $0x188] sm:$0xff]  ;;  %v2161_v5 = vld [vmem:[#allocation5 + $0x180] sm:$0xff]  ;;  %vm1625_vm0 = vcmask 1041409   ;;  %vm1627_vm1 = vcmask 1042434  }
  0x4f   :  { %v2290_v4 = vld [vmem:[#allocation5 + $0x588] sm:$0xff]  ;;  %v2850_v6 = vunpack.c.l.s8.bf16 %v2162_v3  ;;  %v2866_v7 = vunpack.c.h.s8.bf16 %v2162_v3  ;;  %v2289_v10 = vld [vmem:[#allocation5 + $0x580] sm:$0xff]  ;;  %v2865_v13 = vunpack.c.h.s8.bf16 %v2161_v5  ;;  %v2849_v20 = vunpack.c.l.s8.bf16 %v2161_v5  ;;  %v114_v18 = vld [vmem:[#allocation2 + $0x50] sm:$0xff]  ;;  %s8205_s4 = smov 120   ;;  %s8206_s5 = smov [#allocation14]  }
  0x50   :  { %v8266_v1 = vshrl.u32 %v1812_v0, 7  ;;  %v3106_v8 = vunpack.c.l.s8.bf16 %v2290_v4  ;;  %v3122_v9 = vunpack.c.h.s8.bf16 %v2290_v4  ;;  %v8271_v11 = vld [vmem:[#allocation5 + $0x108] sm:$0xff]  ;;  %v3121_v14 = vunpack.c.h.s8.bf16 %v2289_v10  ;;  %v8275_v15 = vld [vmem:[#allocation5 + $0x100] sm:$0xff]  ;;  %v134_v0 = vld [vmem:[#allocation2 + $0xf0] sm:$0xff]  ;;  %s7508_s11 = sshll.u32 %s8206_s5, 4  ;;  %s8207_s12 = smov [#allocation13]   ;;  %s7509_s11 = int_to_ptr.vmem [resolvable:$true] %s7508_s11 }
  0x51   :  { %v8273_v12 = vld [vmem:[#allocation5 + $0x508] sm:$0xff]  ;;  %v8277_v16 = vld [vmem:[#allocation5 + $0x500] sm:$0xff]  ;;  %4043 = vmatprep.subr.bf16.mxu0 %v2866_v7  ;;  %v3105_v21 = vunpack.c.l.s8.bf16 %v2289_v10  ;;  %v2834_v22 = vunpack.c.h.s8.bf16 %v8271_v11  ;;  %v2833_v27 = vunpack.c.h.s8.bf16 %v8275_v15  ;;  %v2818_v29 = vunpack.c.l.s8.bf16 %v8271_v11  ;;  %v8381_v10 = vld [vmem:[#allocation2 + $0x118] sm:$0xff]  ;;  %s7498_s13 = sshll.u32 %s8207_s12, 4  ;;  %s8141_s14 = scalar_lea.vmem %s7509_s11, 32  ;;  %s7499_s13 = int_to_ptr.vmem [resolvable:$true] %s7498_s13 }
  0x52   :  { %v8269_v2 = vadd.s32 8, %v8266_v1  ;;  %v8279_v17 = vld [vmem:[#allocation5 + $0x88] sm:$0xff]  ;;  %4086 = vmatprep.subr.bf16.mxu1 %v3122_v9  ;;  %v3090_v23 = vunpack.c.h.s8.bf16 %v8273_v12  ;;  %v8287_v25 = vld [vmem:[#allocation5 + $0x80] sm:$0xff]  ;;  %4044 = vmatpush1.bf16.msra.mxu0 %v2865_v13  ;;  %v3089_v28 = vunpack.c.h.s8.bf16 %v8277_v16  ;;  %v3074_v30 = vunpack.c.l.s8.bf16 %v8273_v12  ;;  %v8395_v9 = vld [vmem:[#allocation2 + $0x190] sm:$0xff]  ;;  %p8142_p2 = scmp.ne.s32.totalorder %s7509_s11, %s8141_s14  ;;  %p8146_p3 = scmp.lt.s32.totalorder %s7509_s11, %s7509_s11 }
  0x53   :  { %v8285_v24 = vld [vmem:[#allocation5 + $0x488] sm:$0xff]  ;;  %v8289_v26 = vld [vmem:[#allocation5 + $0x480] sm:$0xff]  ;;  %4087 = vmatpush1.bf16.msra.mxu1 %v3121_v14  ;;  %4045 = vmatprep.subr.bf16.mxu0 %v2850_v6  ;;  %v2817_v33 = vunpack.c.l.s8.bf16 %v8275_v15  ;;  %v3073_v34 = vunpack.c.l.s8.bf16 %v8277_v16  ;;  %v2802_v35 = vunpack.c.h.s8.bf16 %v8279_v17  ;;  %v2801_v39 = vunpack.c.h.s8.bf16 %v8287_v25  ;;  %v8401_v15 = vld [vmem:[#allocation2 + $0x1b8] sm:$0xff]  ;;  %p8147_p4 = scmp.lt.s32.totalorder %s8141_s14, %s8141_s14 }
  0x54   :  { %v8295_v31 = vld [vmem:[#allocation5 + $0x8] sm:$0xff]  ;;  %4088 = vmatprep.subr.bf16.mxu1 %v3106_v8  ;;  %v3058_v36 = vunpack.c.h.s8.bf16 %v8285_v24  ;;  %v8303_v37 = vld [vmem:[#allocation5] sm:$0xff]  ;;  %v3057_v40 = vunpack.c.h.s8.bf16 %v8289_v26  ;;  %v2786_v41 = vunpack.c.l.s8.bf16 %v8279_v17  ;;  %v3042_v42 = vunpack.c.l.s8.bf16 %v8285_v24  ;;  %v119_v8 = vld [vmem:[#allocation2 + $0x78] sm:$0xff] }
  0x55   :  { %v8297_v32 = vld [vmem:[#allocation5 + $0x408] sm:$0xff]  ;;  %v8305_v38 = vld [vmem:[#allocation5 + $0x400] sm:$0xff]  ;;  %v2785_v45 = vunpack.c.l.s8.bf16 %v8287_v25  ;;  %v3041_v46 = vunpack.c.l.s8.bf16 %v8289_v26  ;;  %v2770_v47 = vunpack.c.h.s8.bf16 %v8295_v31  ;;  %v2769_v51 = vunpack.c.h.s8.bf16 %v8303_v37  ;;  %p8148_p5 = por %p8147_p4, %p8146_p3 }
  0x56   :  { %v8311_v43 = vld [vmem:[#allocation5 + $0x388] sm:$0xff]  ;;  %v3026_v48 = vunpack.c.h.s8.bf16 %v8297_v32  ;;  %v8319_v49 = vld [vmem:[#allocation5 + $0x380] sm:$0xff]  ;;  %4046 = vmatpush1.bf16.msra.mxu0 %v2849_v20  ;;  %v3025_v52 = vunpack.c.h.s8.bf16 %v8305_v38  ;;  %v2754_v53 = vunpack.c.l.s8.bf16 %v8295_v31  ;;  %v205_v14 = vunpack.c.h.bf16 %v114_v18 }
  0x57   :  { %v8313_v44 = vld [vmem:[#allocation5 + $0x788] sm:$0xff]  ;;  %v8321_v50 = vld [vmem:[#allocation5 + $0x780] sm:$0xff]  ;;  %4089 = vmatpush1.bf16.msra.mxu1 %v3105_v21  ;;  %4047 = vmatprep.subr.bf16.mxu0 %v2834_v22  ;;  %v245_v60 = vunpack.c.h.bf16 %v134_v0  ;;  %v255_v59 = vunpack.c.h.bf16 %v8381_v10  ;;  %vm1629_vm2 = vcmask 1043459   ;;  %vm1631_vm3 = vcmask 1044484   ;;  %p8149_p6 = pnand %p8148_p5, %p8142_p2 }
  0x58   :  { %v8327_v55 = vld [vmem:[#allocation5 + $0x308] sm:$0xff]  ;;  %4090 = vmatprep.subr.bf16.mxu1 %v3090_v23  ;;  %v8335_v61 = vld [vmem:[#allocation5 + $0x300] sm:$0xff]  ;;  %vm1633_vm4 = vcmask 1045509   ;;  %vm1635_vm5 = vcmask 1046534   ;;  %vm1637_vm6 = vcmask 1047559   ;;  %vm1814_vm7 = vcmp.lt.s32.totalorder %v8266_v1, 1 }
  0x59   :  { %v8329_v56 = vld [vmem:[#allocation5 + $0x708] sm:$0xff]  ;;  %v8337_v62 = vld [vmem:[#allocation5 + $0x700] sm:$0xff]  ;;  %v770_v18 = vrot.slane %v255_v59, 4  ;;  %vm1855_vm8 = vcmp.lt.s32.totalorder %v8266_v1, 7 }
  0x5a   :  { %v8343_v5 = vld [vmem:[#allocation5 + $0x288] sm:$0xff]  ;;  %v8351_v11 = vld [vmem:[#allocation5 + $0x280] sm:$0xff]  ;;  %4048 = vmatpush1.bf16.msra.mxu0 %v2833_v27 }
  0x5b   :  { %v8345_v6 = vld [vmem:[#allocation5 + $0x688] sm:$0xff]  ;;  %v8353_v12 = vld [vmem:[#allocation5 + $0x680] sm:$0xff]  ;;  %4091 = vmatpush1.bf16.msra.mxu1 %v3089_v28  ;;  %4049 = vmatprep.subr.bf16.mxu0 %v2818_v29  ;;  %v215_v28 = vunpack.c.h.bf16 %v119_v8 }
  0x5c   :  { %v8359_v22 = vld [vmem:[#allocation5 + $0x208] sm:$0xff]  ;;  %v8363_v19 = vld [vmem:[#allocation5 + $0x200] sm:$0xff]  ;;  %4092 = vmatprep.subr.bf16.mxu1 %v3074_v30 }
  0x5d   :  { %v8361_v23 = vld [vmem:[#allocation5 + $0x608] sm:$0xff]  ;;  %v8369_v13 = vld [vmem:[#allocation5 + $0x600] sm:$0xff] }
  0x5e   :  { %v8371_v20 = vld [vmem:[#allocation2] sm:$0xff]  ;;  %v109_v21 = vld [vmem:[#allocation2 + $0x28] sm:$0xff]  ;;  %4050 = vmatpush1.bf16.msra.mxu0 %v2817_v33 }
  0x5f   :  { %v124_v27 = vld [vmem:[#allocation2 + $0xa0] sm:$0xff]  ;;  %v129_v3 = vld [vmem:[#allocation2 + $0xc8] sm:$0xff]  ;;  %4093 = vmatpush1.bf16.msra.mxu1 %v3073_v34  ;;  %4051 = vmatprep.subr.bf16.mxu0 %v2802_v35  ;;  %v185_v34 = vunpack.c.h.bf16 %v8371_v20  ;;  %v195_v7 = vunpack.c.h.bf16 %v109_v21  ;;  %v710_v35 = vrot.slane %v245_v60, 4 }
  0x60   :  { %v8391_v29 = vld [vmem:[#allocation2 + $0x140] sm:$0xff]  ;;  %v8393_v4 = vld [vmem:[#allocation2 + $0x168] sm:$0xff]  ;;  %4094 = vmatprep.subr.bf16.mxu1 %v3058_v36  ;;  %v225_v30 = vunpack.c.h.bf16 %v124_v27  ;;  %v235_v63 = vunpack.c.h.bf16 %v129_v3  ;;  %v530_v27 = vrot.slane %v215_v28, 4 }
  0x61   :  { %v8403_v16 = vld [vmem:[#allocation2 + $0x1e0] sm:$0xff]  ;;  %v8405_v33 = vld [vmem:[#allocation2 + $0x208] sm:$0xff]  ;;  %v265_v58 = vunpack.c.h.bf16 %v8391_v29  ;;  %v350_v10 = vrot.slane %v185_v34, 4  ;;  %v410_v21 = vrot.slane %v195_v7, 4 }
  0x62   :  { %4052 = vmatpush1.bf16.msra.mxu0 %v2801_v39  ;;  %v315_v8 = vunpack.c.h.bf16 %v8405_v33  ;;  %v470_v39 = vrot.slane %v205_v14, 4  ;;  %v590_v36 = vrot.slane %v225_v30, 4  ;;  %v531_v3 = vadd.f32 %v530_v27, %v215_v28 }
  0x63   :  { %4095 = vmatpush1.bf16.msra.mxu1 %v3057_v40  ;;  %4053 = vmatprep.subr.bf16.mxu0 %v2786_v41  ;;  %v650_v40 = vrot.slane %v235_v63, 4  ;;  %v351_v57 = vadd.f32 %v350_v10, %v185_v34  ;;  %v411_v0 = vadd.f32 %v410_v21, %v195_v7  ;;  %v711_v41 = vadd.f32 %v710_v35, %v245_v60 }
  0x64   :  { %4096 = vmatprep.subr.bf16.mxu1 %v3042_v42  ;;  %v471_v54 = vadd.f32 %v470_v39, %v205_v14  ;;  %v591_v17 = vadd.f32 %v590_v36, %v225_v30  ;;  %v830_v42 = vrot.slane %v265_v58, 4  ;;  %v532_v25 = vrot.slane %v531_v3, 2 }
  0x65   :  { %v651_v24 = vadd.f32 %v650_v40, %v235_v63  ;;  %v352_v7 = vrot.slane %v351_v57, 2  ;;  %v412_v14 = vrot.slane %v411_v0, 2  ;;  %v712_v30 = vrot.slane %v711_v41, 2 }
  0x66   :  { %4054 = vmatpush1.bf16.msra.mxu0 %v2785_v45  ;;  %v472_v28 = vrot.slane %v471_v54, 2  ;;  %v8435_v45 = vld [vmem:[#allocation2 + $0x230] sm:$0xff]  ;;  %v592_v26 = vrot.slane %v591_v17, 2  ;;  %v771_v63 = vadd.f32 %v770_v18, %v255_v59  ;;  %v533_v36 = vadd.f32 %v532_v25, %v531_v3 }
  0x67   :  { %4097 = vmatpush1.bf16.msra.mxu1 %v3041_v46  ;;  %4055 = vmatprep.subr.bf16.mxu0 %v2770_v47  ;;  %v652_v46 = vrot.slane %v651_v24, 2  ;;  %v353_v60 = vadd.f32 %v352_v7, %v351_v57  ;;  %v413_v34 = vadd.f32 %v412_v14, %v411_v0  ;;  %v8441_v47 = vld [vmem:[#allocation2 + $0x258] sm:$0xff]  ;;  %v8443_v21 = vadd.f32 %v712_v30, %v711_v41 }
  0x68   :  { %4098 = vmatprep.subr.bf16.mxu1 %v3026_v48  ;;  %v473_v35 = vadd.f32 %v472_v28, %v471_v54  ;;  %v593_v48 = vadd.f32 %v592_v26, %v591_v17  ;;  %v772_v39 = vrot.slane %v771_v63, 2  ;;  %v10833_v57 = vunpack.c.l.s8.bf16 %v8297_v32 }
  0x69   :  { %v653_v10 = vadd.f32 %v652_v46, %v651_v24  ;;  %v354_v54 = vrot.slane %v353_v60, 1  ;;  %v414_v59 = vrot.slane %v413_v34, 1  ;;  %v325_v0 = vunpack.c.h.bf16 %v8435_v45 }
  0x6a   :  { %4056 = vmatpush1.bf16.msra.mxu0 %v2769_v51  ;;  %v474_v18 = vrot.slane %v473_v35, 1  ;;  %v534_v51 = vrot.slane %v533_v36, 1  ;;  %v8450_v27 = vadd.f32 %v772_v39, %v771_v63  ;;  %v335_v40 = vunpack.c.h.bf16 %v8441_v47 }
  0x6b   :  { %4099 = vmatpush1.bf16.msra.mxu1 %v3025_v52  ;;  %4057 = vmatprep.subr.bf16.mxu0 %v2754_v53  ;;  %v594_v52 = vrot.slane %v593_v48, 1  ;;  %v654_v3 = vrot.slane %v653_v10, 1  ;;  %v8453_v17 = vadd.f32 %v354_v54, %v353_v60  ;;  %v8455_v24 = vadd.f32 %v414_v59, %v413_v34 }
  0x6c   :  { %4100 = vmatprep.subr.bf16.mxu1 %v10833_v57  ;;  %v8457_v31 = vadd.f32 %v474_v18, %v473_v35  ;;  %v10834_v32 = vunpack.c.l.s8.bf16 %v8303_v37  ;;  %v10835_v53 = vunpack.c.l.s8.bf16 %v8305_v38  ;;  %v8463_v41 = vadd.f32 %v534_v51, %v533_v36 }
  0x6d   :  { %v8465_v7 = vadd.f32 %v594_v52, %v593_v48  ;;  %v8467_v14 = vadd.f32 %v654_v3, %v653_v10  ;;  %v714_v28 = vrot.slane %v8443_v21, 1  ;;  %v10836_v25 = vunpack.c.h.s8.bf16 %v8311_v43 }
  0x6e   :  { %4058 = vmatpush1.bf16.msra.mxu0 %v10834_v32  ;;  %v10837_v26 = vunpack.c.h.s8.bf16 %v8313_v44  ;;  %v831_v37 = vadd.f32 %v830_v42, %v265_v58  ;;  %v10838_v38 = vunpack.c.h.bf16 %v8393_v4  ;;  %v10839_v30 = vunpack.c.h.bf16 %v8395_v9 }
  0x6f   :  { %4101 = vmatpush1.bf16.msra.mxu1 %v10835_v53  ;;  %4059 = vmatprep.subr.bf16.mxu0 %v10836_v25  ;;  %v10840_v60 = vunpack.c.h.bf16 %v8401_v15  ;;  %v774_v35 = vrot.slane %v8450_v27, 1  ;;  %v10841_v36 = vunpack.c.h.bf16 %v8403_v16  ;;  %v1130_v10 = vrot.slane %v315_v8, 4 }
  0x70   :  { %4102 = vmatprep.subr.bf16.mxu1 %v10837_v26  ;;  %v890_v46 = vrot.slane %v10838_v38, 4  ;;  %v950_v63 = vrot.slane %v10839_v30, 4  ;;  %v1190_v39 = vrot.slane %v325_v0, 4  ;;  %v832_v29 = vrot.slane %v831_v37, 2 }
  0x71   :  { %v1010_v34 = vrot.slane %v10840_v60, 4  ;;  %v1070_v48 = vrot.slane %v10841_v36, 4  ;;  %v10842_v58 = vmov %v10838_v38  ;;  %v10843_v57 = vmov %v10839_v30 }
  0x72   :  { %v891_v42 = vadd.f32 %v890_v46, %v10842_v58  ;;  %v951_v54 = vadd.f32 %v950_v63, %v10843_v57  ;;  %v10844_v59 = vmov %v10840_v60  ;;  %v10845_v51 = vunpack.c.h.s8.bf16 %v8319_v49 }
  0x73   :  { %v1011_v18 = vadd.f32 %v1010_v34, %v10844_v59  ;;  %v10846_v52 = vunpack.c.h.s8.bf16 %v8321_v50  ;;  %v10847_v3 = vmov %v10841_v36  ;;  %v1131_v53 = vadd.f32 %v1130_v10, %v315_v8 }
  0x74   :  { %4060 = vmatpush2.bf16.msra.mxu0 %v10845_v51  ;;  %v1071_v32 = vadd.f32 %v1070_v48, %v10847_v3  ;;  %v1191_v4 = vadd.f32 %v1190_v39, %v325_v0  ;;  %v1250_v25 = vrot.slane %v335_v40, 4  ;;  %v10848_v9 = vunpack.c.l.s8.bf16 %v8311_v43 }
  0x75   :  { %4103 = vmatpush2.bf16.msra.mxu1 %v10846_v52  ;;  %v10849_v15 = vunpack.c.l.s8.bf16 %v8313_v44  ;;  %v833_v26 = vadd.f32 %v832_v29, %v831_v37  ;;  %v892_v38 = vrot.slane %v891_v42, 2  ;;  %v952_v46 = vrot.slane %v951_v54, 2 }
  0x76   :  { %4061 = vmatprep.subr.bf16.mxu0 %v10848_v9  ;;  %v1012_v30 = vrot.slane %v1011_v18, 2  ;;  %v1072_v63 = vrot.slane %v1071_v32, 2  ;;  %v1132_v60 = vrot.slane %v1131_v53, 2  ;;  %v1192_v34 = vrot.slane %v1191_v4, 2 }
  0x77   :  { %4104 = vmatprep.subr.bf16.mxu1 %v10849_v15  ;;  %v1251_v16 = vadd.f32 %v1250_v25, %v335_v40  ;;  %v834_v36 = vrot.slane %v833_v26, 1  ;;  %v893_v33 = vadd.f32 %v892_v38, %v891_v42  ;;  %v953_v8 = vadd.f32 %v952_v46, %v951_v54 }
  0x78   :  { %v1013_v0 = vadd.f32 %v1012_v30, %v1011_v18  ;;  %v10850_v43 = vunpack.c.l.s8.bf16 %v8319_v49  ;;  %v10851_v44 = vunpack.c.l.s8.bf16 %v8321_v50  ;;  %v1073_v37 = vadd.f32 %v1072_v63, %v1071_v32 }
  0x79   :  { %v1133_v48 = vadd.f32 %v1132_v60, %v1131_v53  ;;  %v1193_v10 = vadd.f32 %v1192_v34, %v1191_v4  ;;  %v1252_v39 = vrot.slane %v1251_v16, 2  ;;  %v10852_v29 = vunpack.c.h.s8.bf16 %v8327_v55  ;;  %v8526_v60 = vld [vmem:[#allocation2 + $0x8] sm:$0xff] }
  0x7a   :  { %4062 = vmatpush2.bf16.msra.mxu0 %v10850_v43  ;;  %4105 = vmatpush2.bf16.msra.mxu1 %v10851_v44  ;;  %v10853_v40 = vunpack.c.h.s8.bf16 %v8329_v56  ;;  %v715_v58 = vadd.f32 %v714_v28, %v8443_v21  ;;  %v894_v42 = vrot.slane %v893_v33, 1  ;;  %v954_v57 = vrot.slane %v953_v8, 1 }
  0x7b   :  { %4063 = vmatprep.subr.bf16.mxu0 %v10852_v29  ;;  %v1014_v49 = vrot.slane %v1013_v0, 1  ;;  %v1074_v54 = vrot.slane %v1073_v37, 1  ;;  %v1134_v50 = vrot.slane %v1133_v48, 1  ;;  %v1194_v59 = vrot.slane %v1193_v10, 1 }
  0x7c   :  { %4106 = vmatprep.subr.bf16.mxu1 %v10853_v40  ;;  %v1253_v18 = vadd.f32 %v1252_v39, %v1251_v16  ;;  %v835_v51 = vadd.f32 %v834_v36, %v833_v26  ;;  %v895_v52 = vadd.f32 %v894_v42, %v893_v33  ;;  %v955_v3 = vadd.f32 %v954_v57, %v953_v8  ;;  %v8535_v36 = vld [vmem:[#allocation2 + $0x80] sm:$0xff] }
  0x7d   :  { %v1015_v32 = vadd.f32 %v1014_v49, %v1013_v0  ;;  %v10854_v53 = vunpack.c.h.s8.bf16 %v8335_v61  ;;  %v10855_v4 = vunpack.c.h.s8.bf16 %v8337_v62  ;;  %v775_v21 = vadd.f32 %v774_v35, %v8450_v27  ;;  %v8528_v27 = vld [vmem:[#allocation2 + $0x30] sm:$0xff]  ;;  %v8563_v49 = vld [vmem:[#allocation2 + $0x148] sm:$0xff] }
  0x7e   :  { %v1075_v28 = vadd.f32 %v1074_v54, %v1073_v37  ;;  %v1135_v25 = vadd.f32 %v1134_v50, %v1133_v48  ;;  %v1254_v9 = vrot.slane %v1253_v18, 1  ;;  %v10856_v15 = vunpack.c.l.s8.bf16 %v8327_v55  ;;  %v8541_v0 = vld [vmem:[#allocation2 + $0xd0] sm:$0xff]  ;;  %v8547_v48 = vld [vmem:[#allocation2 + $0xf8] sm:$0xff] }
  0x7f   :  { %4064 = vmatpush2.bf16.msra.mxu0 %v10854_v53  ;;  %4107 = vmatpush2.bf16.msra.mxu1 %v10855_v4  ;;  %v10857_v26 = vunpack.c.l.s8.bf16 %v8329_v56  ;;  %v1195_v38 = vadd.f32 %v1194_v59, %v1193_v10  ;;  %v1306_v46 = vmul.f32 0.125, %v8453_v17  ;;  %v1316_v30 = vmul.f32 0.125, %v8455_v24  ;;  %v8533_v56 = vld [vmem:[#allocation2 + $0x58] sm:$0xff]  ;;  %v8549_v10 = vld [vmem:[#allocation2 + $0x120] sm:$0xff]  ;;  %v8565_v54 = vld [vmem:[#allocation2 + $0x170] sm:$0xff] }
  0x80   :  { %4065 = vmatprep.subr.bf16.mxu0 %v10856_v15  ;;  %v1326_v63 = vmul.f32 0.125, %v8457_v31  ;;  %v1255_v35 = vadd.f32 %v1254_v9, %v1253_v18  ;;  %v1336_v34 = vmul.f32 0.125, %v8463_v41  ;;  %v1346_v55 = vmul.f32 0.125, %v8465_v7  ;;  %v8539_v31 = vld [vmem:[#allocation2 + $0xa8] sm:$0xff]  ;;  %v8587_v4 = vld [vmem:[#allocation2 + $0x198] sm:$0xff] }
  0x81   :  { %4108 = vmatprep.subr.bf16.mxu1 %v10857_v26  ;;  %v1356_v16 = vmul.f32 0.125, %v8467_v14  ;;  %v1386_v17 = vmul.f32 0.125, %v835_v51  ;;  %v1396_v33 = vmul.f32 0.125, %v895_v52  ;;  %v1406_v24 = vmul.f32 0.125, %v955_v3 }
  0x82   :  { %v1416_v8 = vmul.f32 0.125, %v1015_v32  ;;  %v10858_v41 = vunpack.c.l.s8.bf16 %v8335_v61  ;;  %v10859_v7 = vunpack.c.l.s8.bf16 %v8337_v62  ;;  %v1366_v14 = vmul.f32 0.125, %v715_v58 }
  0x83   :  { %v1376_v43 = vmul.f32 0.125, %v775_v21  ;;  %v1426_v44 = vmul.f32 0.125, %v1075_v28  ;;  %v1436_v37 = vmul.f32 0.125, %v1135_v25  ;;  %v10860_v39 = vunpack.c.h.s8.bf16 %v8343_v5  ;;  %v8589_v21 = vld [vmem:[#allocation2 + $0x1c0] sm:$0xff] }
  0x84   :  { %4066 = vmatpush2.bf16.msra.mxu0 %v10858_v41  ;;  %4109 = vmatpush2.bf16.msra.mxu1 %v10859_v7  ;;  %v10861_v29 = vunpack.c.h.s8.bf16 %v8345_v6  ;;  %v1446_v40 = vmul.f32 0.125, %v1195_v38  ;;  %v1456_v61 = vmul.f32 0.125, %v1255_v35  ;;  %v1639_v42 = vsel %vm1625_vm0, %v1316_v30, %v1306_v46  ;;  %v8603_v35 = vld [vmem:[#allocation2 + $0x1e8] sm:$0xff] }
  0x85   :  { %4067 = vmatprep.subr.bf16.mxu0 %v10860_v39  ;;  %v1709_v62 = vsel %vm1625_vm0, %v1396_v33, %v1386_v17  ;;  %v10862_v58 = vand.u32 7, %v8266_v1  ;;  %v10863_v57 = vmov 0  ;;  %v1640_v50 = vsel %vm1627_vm1, %v1326_v63, %v1639_v42  ;;  %v8605_v17 = vld [vmem:[#allocation2 + $0x210] sm:$0xff]  ;;  %v8609_v33 = vld [vmem:[#allocation2 + $0x260] sm:$0xff] }
  0x86   :  { %4110 = vmatprep.subr.bf16.mxu1 %v10861_v29  ;;  %v1710_v59 = vsel %vm1627_vm1, %v1406_v24, %v1709_v62  ;;  %v10866_v18 = vand.u32 7, %v8269_v2  ;;  %v10867_v51 = vmov 0  ;;  %v10871_v3 = vmov 0 }
  0x87   :  { %vm8559_vm9 = vcmp.eq.s32.totalorder %v10862_v58, 0  ;;  %v10870_v52 = vmov %v10862_v58  ;;  %v10875_v53 = vmov 0  ;;  %v187_v28 = vunpack.c.h.bf16 %v8526_v60 }
  0x88   :  { %v10864_v57 = vsel %vm8559_vm9, 4294967295, %v10863_v57  ;;  %vm8571_vm10 = vcmp.eq.s32.totalorder %v10866_v18, 0  ;;  %vm8577_vm11 = vcmp.eq.s32.totalorder %v10870_v52, 7  ;;  %v10874_v32 = vmov %v10866_v18 }
  0x89   :  { %10865 = vst [vmem:[#allocation22_spill] sm:$0xff] %v10864_v57  ;;  %v10868_v51 = vsel %vm8571_vm10, 4294967295, %v10867_v51  ;;  %v10872_v3 = vsel %vm8577_vm11, 4294967295, %v10871_v3  ;;  %vm8583_vm12 = vcmp.eq.s32.totalorder %v10874_v32, 7  ;;  %v197_v25 = vunpack.c.h.bf16 %v8528_v27 }
  0x8a   :  { %10869 = vst [vmem:[#allocation23_spill] sm:$0xff] %v10868_v51  ;;  %10873 = vst [vmem:[#allocation24_spill] sm:$0xff] %v10872_v3  ;;  %v10876_v53 = vsel %vm8583_vm12, 4294967295, %v10875_v53  ;;  %v1641_v9 = vsel %vm1629_vm2, %v1336_v34, %v1640_v50  ;;  %v1711_v15 = vsel %vm1629_vm2, %v1416_v8, %v1710_v59  ;;  %v207_v26 = vunpack.c.h.bf16 %v8533_v56  ;;  %v8607_v34 = vld [vmem:[#allocation2 + $0x238] sm:$0xff] }
  0x8b   :  { %10877 = vst [vmem:[#allocation25_spill] sm:$0xff] %v10876_v53  ;;  %v217_v2 = vunpack.c.h.bf16 %v8535_v36  ;;  %v10878_v38 = vunpack.c.h.s8.bf16 %v8351_v11  ;;  %v10879_v46 = vunpack.c.h.s8.bf16 %v8353_v12  ;;  %v1642_v30 = vsel %vm1631_vm3, %v1346_v55, %v1641_v9 }
  0x8c   :  { %v1712_v63 = vsel %vm1631_vm3, %v1426_v44, %v1711_v15  ;;  %v227_v24 = vunpack.c.h.bf16 %v8539_v31  ;;  %v237_v8 = vunpack.c.h.bf16 %v8541_v0  ;;  %v10880_v41 = vunpack.c.l.s8.bf16 %v8343_v5 }
  0x8d   :  { %4068 = vmatpush2.bf16.msra.mxu0 %v10878_v38  ;;  %4111 = vmatpush2.bf16.msra.mxu1 %v10879_v46  ;;  %v10881_v7 = vunpack.c.l.s8.bf16 %v8345_v6  ;;  %v1643_v55 = vsel %vm1633_vm4, %v1356_v16, %v1642_v30  ;;  %v1713_v44 = vsel %vm1633_vm4, %v1436_v37, %v1712_v63  ;;  %v247_v39 = vunpack.c.h.bf16 %v8547_v48 }
  0x8e   :  { %4069 = vmatprep.subr.bf16.mxu0 %v10880_v41  ;;  %v257_v29 = vunpack.c.h.bf16 %v8549_v10  ;;  %v1644_v42 = vsel %vm1635_vm5, %v1366_v14, %v1643_v55  ;;  %v1714_v62 = vsel %vm1635_vm5, %v1446_v40, %v1713_v44  ;;  %v267_v58 = vunpack.c.h.bf16 %v8563_v49 }
  0x8f   :  { %4112 = vmatprep.subr.bf16.mxu1 %v10881_v7  ;;  %v277_v5 = vunpack.c.h.bf16 %v8565_v54  ;;  %v1645_v50 = vsel %vm1637_vm6, %v1376_v43, %v1644_v42  ;;  %v1715_v6 = vsel %vm1637_vm6, %v1456_v61, %v1714_v62  ;;  %v287_v16 = vunpack.c.h.bf16 %v8587_v4 }
  0x90   :  { %v297_v37 = vunpack.c.h.bf16 %v8589_v21  ;;  %v10882_v59 = vunpack.c.l.s8.bf16 %v8351_v11  ;;  %v10883_v18 = vunpack.c.l.s8.bf16 %v8353_v12  ;;  %v1793_v14 = vrot.slane %v1645_v50, 7 }
  0x91   :  { %v1803_v40 = vrot.slane %v1715_v6, 7  ;;  %v1836_v52 = vrot.slane %v1645_v50, 1  ;;  %v1846_v32 = vrot.slane %v1715_v6, 1  ;;  %v10884_v9 = vunpack.c.h.s8.bf16 %v8359_v22 }
  0x92   :  { %4070 = vmatpush2.bf16.msra.mxu0 %v10882_v59  ;;  %4113 = vmatpush2.bf16.msra.mxu1 %v10883_v18  ;;  %v10885_v43 = vunpack.c.h.s8.bf16 %v8361_v23  ;;  %v307_v61 = vunpack.c.h.bf16 %v8603_v35  ;;  %v317_v15 = vunpack.c.h.bf16 %v8605_v17  ;;  %v327_v11 = vunpack.c.h.bf16 %v8607_v34 }
  0x93   :  { %4071 = vmatprep.subr.bf16.mxu0 %v10884_v9  ;;  %v337_v38 = vunpack.c.h.bf16 %v8609_v33  ;;  %v1816_v12 = vsel %vm1814_vm7, %v1793_v14, %v1803_v40  ;;  %v1826_v46 = vsel %vm1814_vm7, %v1803_v40, %v1793_v14  ;;  %v1857_v30 = vsel %vm1855_vm8, %v1836_v52, %v1846_v32 }
  0x94   :  { %4114 = vmatprep.subr.bf16.mxu1 %v10885_v43  ;;  %v1867_v63 = vsel %vm1855_vm8, %v1846_v32, %v1836_v52  ;;  %v1910_v41 = vsel %vm8559_vm9, -1e+30, %v1826_v46  ;;  %v1920_v7 = vsel %vm8571_vm10, -1e+30, %v1816_v12  ;;  %v1954_v55 = vsel %vm8577_vm11, -1e+30, %v1857_v30 }
  0x95   :  { %v10886_v42 = vunpack.c.h.s8.bf16 %v8363_v19  ;;  %v10887_v62 = vunpack.c.h.s8.bf16 %v8369_v13  ;;  %v1930_v59 = vmax.f32 %v1910_v41, %v1645_v50  ;;  %v1940_v18 = vmax.f32 %v1920_v7, %v1715_v6 }
  0x96   :  { %v1964_v14 = vsel %vm8583_vm12, -1e+30, %v1867_v63  ;;  %v1994_v40 = vsel %vm8559_vm9, 0.0, %v1826_v46  ;;  %v10888_v52 = vunpack.c.l.s8.bf16 %v8359_v22  ;;  %v10889_v32 = vunpack.c.l.s8.bf16 %v8361_v23 }
  0x97   :  { %4072 = vmatpush2.bf16.msra.mxu0 %v10886_v42  ;;  %4115 = vmatpush2.bf16.msra.mxu1 %v10887_v62  ;;  %v2004_v9 = vsel %vm8571_vm10, 0.0, %v1816_v12  ;;  %v2014_v43 = vadd.f32 %v1994_v40, %v1645_v50  ;;  %v2034_v41 = vsel %vm8577_vm11, 0.0, %v1857_v30  ;;  %v2044_v7 = vsel %vm8583_vm12, 0.0, %v1867_v63 }
  0x98   :  { %4073 = vmatprep.subr.bf16.mxu0 %v10888_v52  ;;  %4116 = vmatprep.subr.bf16.mxu1 %v10889_v32  ;;  %v1974_v42 = vmax.f32 %v1930_v59, %v1954_v55  ;;  %v1984_v62 = vmax.f32 %v1940_v18, %v1964_v14  ;;  %v2024_v44 = vadd.f32 %v2004_v9, %v1715_v6  ;;  %v362_v22 = vrot.slane %v187_v28, 4 }
  0x99   :  { %v2054_v46 = vadd.f32 %v2034_v41, %v2014_v43  ;;  %v422_v23 = vrot.slane %v197_v25, 4  ;;  %v482_v12 = vrot.slane %v207_v26, 4  ;;  %v542_v50 = vrot.slane %v217_v2, 4 }
  0x9a   :  { %v10890_v30 = vunpack.c.l.s8.bf16 %v8363_v19  ;;  %v10891_v63 = vunpack.c.l.s8.bf16 %v8369_v13  ;;  %v2064_v6 = vadd.f32 %v2044_v7, %v2024_v44  ;;  %v363_v55 = vadd.f32 %v362_v22, %v187_v28 }
  0x9b   :  { %v602_v59 = vrot.slane %v227_v24, 4  ;;  %v662_v18 = vrot.slane %v237_v8, 4  ;;  %v2074_v14 = vmul.f32 0.33333334, %v2054_v46  ;;  %v423_v40 = vadd.f32 %v422_v23, %v197_v25 }
  0x9c   :  { %4074 = vmatpush2.bf16.msra.mxu0 %v10890_v30  ;;  %4117 = vmatpush2.bf16.msra.mxu1 %v10891_v63  ;;  %v483_v19 = vadd.f32 %v482_v12, %v207_v26  ;;  %v543_v13 = vadd.f32 %v542_v50, %v217_v2  ;;  %v2084_v44 = vmul.f32 0.33333334, %v2064_v6  ;;  %v364_v52 = vrot.slane %v363_v55, 2 }
  0x9d   :  { %v603_v28 = vadd.f32 %v602_v59, %v227_v24  ;;  %v663_v32 = vadd.f32 %v662_v18, %v237_v8  ;;  %v2094_v9 = vadd.f32 %v2074_v14, %v1974_v42  ;;  %v424_v43 = vrot.slane %v423_v40, 2 }
  0x9e   :  { %v484_v41 = vrot.slane %v483_v19, 2  ;;  %v544_v7 = vrot.slane %v543_v13, 2  ;;  %v2104_v27 = vadd.f32 %v2084_v44, %v1984_v62  ;;  %v365_v25 = vadd.f32 %v364_v52, %v363_v55 }
  0x9f   :  { %v604_v22 = vrot.slane %v603_v28, 2  ;;  %v664_v56 = vrot.slane %v663_v32, 2  ;;  %v425_v26 = vadd.f32 %v424_v43, %v423_v40  ;;  %v722_v2 = vrot.slane %v247_v39, 4 }
  0xa0   :  { %v485_v46 = vadd.f32 %v484_v41, %v483_v19  ;;  %v545_v36 = vadd.f32 %v544_v7, %v543_v13  ;;  %v8704_v23 = vpack.c.bf16 %v2104_v27, %v2094_v9  ;;  %v366_v31 = vrot.slane %v365_v25, 1 }
  0xa1   :  { %v605_v24 = vadd.f32 %v604_v22, %v603_v28  ;;  %v665_v0 = vadd.f32 %v664_v56, %v663_v32  ;;  %v426_v8 = vrot.slane %v425_v26, 1  ;;  %v723_v62 = vadd.f32 %v722_v2, %v247_v39 }
  0xa2   :  { %10892 = vst [vmem:[#allocation26_spill] sm:$0xff] %v8704_v23  ;;  %v486_v42 = vrot.slane %v485_v46, 1  ;;  %v546_v12 = vrot.slane %v545_v36, 1  ;;  %4075 = vmatprep.mubr.bf16.mxu0 %v8704_v23  ;;  %v367_v50 = vadd.f32 %v366_v31, %v365_v25  ;;  %v782_v6 = vrot.slane %v257_v29, 4 }
  0xa3   :  { %v606_v30 = vrot.slane %v605_v24, 1  ;;  %v666_v63 = vrot.slane %v665_v0, 1  ;;  %v427_v55 = vadd.f32 %v426_v8, %v425_v26  ;;  %v724_v14 = vrot.slane %v723_v62, 2 }
  0xa4   :  { %v487_v59 = vadd.f32 %v486_v42, %v485_v46  ;;  %v547_v18 = vadd.f32 %v546_v12, %v545_v36  ;;  %v783_v13 = vadd.f32 %v782_v6, %v257_v29  ;;  %v842_v48 = vrot.slane %v267_v58, 4 }
  0xa5   :  { %v607_v40 = vadd.f32 %v606_v30, %v605_v24  ;;  %v667_v19 = vadd.f32 %v666_v63, %v665_v0  ;;  %v725_v39 = vadd.f32 %v724_v14, %v723_v62  ;;  %v902_v44 = vrot.slane %v277_v5, 4 }
  0xa6   :  { %v962_v52 = vrot.slane %v287_v16, 4  ;;  %v1022_v28 = vrot.slane %v297_v37, 4  ;;  %v784_v32 = vrot.slane %v783_v13, 2  ;;  %v843_v9 = vadd.f32 %v842_v48, %v267_v58 }
  0xa7   :  { %v1082_v10 = vrot.slane %v307_v61, 4  ;;  %v1142_v29 = vrot.slane %v317_v15, 4  ;;  %v726_v43 = vrot.slane %v725_v39, 1  ;;  %v903_v41 = vadd.f32 %v902_v44, %v277_v5 }
  0xa8   :  { %v963_v7 = vadd.f32 %v962_v52, %v287_v16  ;;  %v1023_v27 = vadd.f32 %v1022_v28, %v297_v37  ;;  %v785_v25 = vadd.f32 %v784_v32, %v783_v13  ;;  %v844_v22 = vrot.slane %v843_v9, 2 }
  0xa9   :  { %v1083_v58 = vadd.f32 %v1082_v10, %v307_v61  ;;  %v1143_v56 = vadd.f32 %v1142_v29, %v317_v15  ;;  %v727_v26 = vadd.f32 %v726_v43, %v725_v39  ;;  %v904_v46 = vrot.slane %v903_v41, 2 }
  0xaa   :  { %v964_v36 = vrot.slane %v963_v7, 2  ;;  %v1024_v2 = vrot.slane %v1023_v27, 2  ;;  %v786_v31 = vrot.slane %v785_v25, 1  ;;  %v845_v5 = vadd.f32 %v844_v22, %v843_v9 }
  0xab   :  { %v1084_v24 = vrot.slane %v1083_v58, 2  ;;  %v1144_v4 = vrot.slane %v1143_v56, 2  ;;  %v905_v16 = vadd.f32 %v904_v46, %v903_v41  ;;  %v1202_v37 = vrot.slane %v327_v11, 4 }
  0xac   :  { %v965_v0 = vadd.f32 %v964_v36, %v963_v7  ;;  %v1025_v21 = vadd.f32 %v1024_v2, %v1023_v27  ;;  %v787_v8 = vadd.f32 %v786_v31, %v785_v25  ;;  %v846_v42 = vrot.slane %v845_v5, 1 }
  0xad   :  { %v1085_v61 = vadd.f32 %v1084_v24, %v1083_v58  ;;  %v1145_v12 = vadd.f32 %v1144_v4, %v1143_v56  ;;  %v906_v62 = vrot.slane %v905_v16, 1  ;;  %v1203_v63 = vadd.f32 %v1202_v37, %v327_v11  ;;  %v8754_v37 = vld [vmem:[#allocation2 + $0x50] sm:$0xff] }
  0xae   :  { %v966_v15 = vrot.slane %v965_v0, 1  ;;  %v1026_v30 = vrot.slane %v1025_v21, 1  ;;  %v847_v6 = vadd.f32 %v846_v42, %v845_v5  ;;  %v1262_v48 = vrot.slane %v337_v38, 4 }
  0xaf   :  { %v1086_v14 = vrot.slane %v1085_v61, 1  ;;  %v1146_v13 = vrot.slane %v1145_v12, 1  ;;  %v907_v39 = vadd.f32 %v906_v62, %v905_v16  ;;  %v1204_v28 = vrot.slane %v1203_v63, 2  ;;  %v8759_v62 = vld [vmem:[#allocation2 + $0x78] sm:$0xff] }
  0xb0   :  { %v967_v44 = vadd.f32 %v966_v15, %v965_v0  ;;  %v1027_v52 = vadd.f32 %v1026_v30, %v1025_v21  ;;  %v1263_v10 = vadd.f32 %v1262_v48, %v337_v38  ;;  %v1308_v29 = vmul.f32 0.125, %v367_v50 }
  0xb1   :  { %v1087_v32 = vadd.f32 %v1086_v14, %v1085_v61  ;;  %v1147_v9 = vadd.f32 %v1146_v13, %v1145_v12  ;;  %v1205_v43 = vadd.f32 %v1204_v28, %v1203_v63  ;;  %v1318_v41 = vmul.f32 0.125, %v427_v55  ;;  %v8767_v13 = vld [vmem:[#allocation2 + $0xc8] sm:$0xff]  ;;  %v8772_v28 = vld [vmem:[#allocation2 + $0xf0] sm:$0xff] }
  0xb2   :  { %v1328_v7 = vmul.f32 0.125, %v487_v59  ;;  %v1338_v11 = vmul.f32 0.125, %v547_v18  ;;  %v1264_v27 = vrot.slane %v1263_v10, 2  ;;  %v1348_v25 = vmul.f32 0.125, %v607_v40  ;;  %v8749_v40 = vld [vmem:[#allocation2 + $0x28] sm:$0xff] }
  0xb3   :  { %v1358_v22 = vmul.f32 0.125, %v667_v19  ;;  %v1368_v58 = vmul.f32 0.125, %v727_v26  ;;  %v1206_v56 = vrot.slane %v1205_v43, 1  ;;  %v1378_v46 = vmul.f32 0.125, %v787_v8 }
  0xb4   :  { %v1388_v36 = vmul.f32 0.125, %v847_v6  ;;  %v1398_v2 = vmul.f32 0.125, %v907_v39  ;;  %v1265_v31 = vadd.f32 %v1264_v27, %v1263_v10  ;;  %v1408_v5 = vmul.f32 0.125, %v967_v44  ;;  %v8764_v6 = vld [vmem:[#allocation2 + $0xa0] sm:$0xff]  ;;  %v8776_v10 = vld [vmem:[#allocation2 + $0x118] sm:$0xff] }
  0xb5   :  { %v1418_v24 = vmul.f32 0.125, %v1027_v52  ;;  %v1428_v4 = vmul.f32 0.125, %v1087_v32  ;;  %v1207_v16 = vadd.f32 %v1206_v56, %v1205_v43  ;;  %v1438_v33 = vmul.f32 0.125, %v1147_v9  ;;  %v8779_v43 = vld [vmem:[#allocation2 + $0x140] sm:$0xff] }
  0xb6   :  { %v1653_v38 = vsel %vm1625_vm0, %v1318_v41, %v1308_v29  ;;  %v1723_v50 = vsel %vm1625_vm0, %v1398_v2, %v1388_v36  ;;  %v1266_v55 = vrot.slane %v1265_v31, 1  ;;  %v194_v19 = vunpack.c.l.bf16 %v8749_v40  ;;  %v8789_v2 = vld [vmem:[#allocation2 + $0x1b8] sm:$0xff] }
  0xb7   :  { %v1654_v59 = vsel %vm1627_vm1, %v1328_v7, %v1653_v38  ;;  %v1724_v18 = vsel %vm1627_vm1, %v1408_v5, %v1723_v50  ;;  %v1448_v26 = vmul.f32 0.125, %v1207_v16  ;;  %v204_v8 = vunpack.c.l.bf16 %v8754_v37  ;;  %v8782_v7 = vld [vmem:[#allocation2 + $0x168] sm:$0xff]  ;;  %v8792_v5 = vld [vmem:[#allocation2 + $0x1e0] sm:$0xff] }
  0xb8   :  { %v1655_v0 = vsel %vm1629_vm2, %v1338_v11, %v1654_v59  ;;  %v1725_v21 = vsel %vm1629_vm2, %v1418_v24, %v1724_v18  ;;  %v1267_v42 = vadd.f32 %v1266_v55, %v1265_v31  ;;  %v214_v15 = vunpack.c.l.bf16 %v8759_v62 }
  0xb9   :  { %v1656_v61 = vsel %vm1631_vm3, %v1348_v25, %v1655_v0  ;;  %v1726_v12 = vsel %vm1631_vm3, %v1428_v4, %v1725_v21  ;;  %v224_v14 = vunpack.c.l.bf16 %v8764_v6  ;;  %v234_v48 = vunpack.c.l.bf16 %v8767_v13  ;;  %v8795_v4 = vld [vmem:[#allocation2 + $0x208] sm:$0xff] }
  0xba   :  { %v1657_v30 = vsel %vm1633_vm4, %v1358_v22, %v1656_v61  ;;  %v1727_v63 = vsel %vm1633_vm4, %v1438_v33, %v1726_v12  ;;  %v1458_v39 = vmul.f32 0.125, %v1267_v42  ;;  %v244_v32 = vunpack.c.l.bf16 %v8772_v28 }
  0xbb   :  { %v1658_v44 = vsel %vm1635_vm5, %v1368_v58, %v1657_v30  ;;  %v1728_v52 = vsel %vm1635_vm5, %v1448_v26, %v1727_v63  ;;  %v254_v29 = vunpack.c.l.bf16 %v8776_v10  ;;  %v264_v41 = vunpack.c.l.bf16 %v8779_v43  ;;  %v8786_v58 = vld [vmem:[#allocation2 + $0x190] sm:$0xff] }
  0xbc   :  { %v1659_v9 = vsel %vm1637_vm6, %v1378_v46, %v1658_v44  ;;  %v274_v11 = vunpack.c.l.bf16 %v8782_v7  ;;  %v1729_v27 = vsel %vm1637_vm6, %v1458_v39, %v1728_v52  ;;  %v284_v56 = vunpack.c.l.bf16 %v8786_v58 }
  0xbd   :  { %v1795_v25 = vrot.slane %v1659_v9, 7  ;;  %v1838_v22 = vrot.slane %v1659_v9, 1  ;;  %v1805_v46 = vrot.slane %v1729_v27, 7  ;;  %v1848_v36 = vrot.slane %v1729_v27, 1 }
  0xbe   :  { %v294_v31 = vunpack.c.l.bf16 %v8789_v2  ;;  %v304_v24 = vunpack.c.l.bf16 %v8792_v5  ;;  %v314_v16 = vunpack.c.l.bf16 %v8795_v4  ;;  %v324_v33 = vunpack.c.l.bf16 %v8435_v45 }
  0xbf   :  { %v334_v38 = vunpack.c.l.bf16 %v8441_v47  ;;  %v10893_v50 = vunpack.c.l.bf16 %v8371_v20  ;;  %v1818_v59 = vsel %vm1814_vm7, %v1795_v25, %v1805_v46  ;;  %v1828_v18 = vsel %vm1814_vm7, %v1805_v46, %v1795_v25 }
  0xc0   :  { %v1859_v26 = vsel %vm1855_vm8, %v1838_v22, %v1848_v36  ;;  %v1869_v0 = vsel %vm1855_vm8, %v1848_v36, %v1838_v22  ;;  %v1912_v21 = vsel %vm8559_vm9, -1e+30, %v1828_v18  ;;  %v1922_v42 = vsel %vm8571_vm10, -1e+30, %v1818_v59 }
  0xc1   :  { %v344_v55 = vrot.slane %v10893_v50, 4  ;;  %v1956_v61 = vsel %vm8577_vm11, -1e+30, %v1859_v26  ;;  %v10894_v12 = vmov %v10893_v50  ;;  %v1932_v63 = vmax.f32 %v1912_v21, %v1659_v9 }
  0xc2   :  { %v1942_v39 = vmax.f32 %v1922_v42, %v1729_v27  ;;  %v1966_v44 = vsel %vm8583_vm12, -1e+30, %v1869_v0  ;;  %v1996_v52 = vsel %vm8559_vm9, 0.0, %v1828_v18  ;;  %v2006_v25 = vsel %vm8571_vm10, 0.0, %v1818_v59 }
  0xc3   :  { %v345_v30 = vadd.f32 %v344_v55, %v10894_v12  ;;  %v2016_v22 = vadd.f32 %v1996_v52, %v1659_v9  ;;  %v2036_v46 = vsel %vm8577_vm11, 0.0, %v1859_v26  ;;  %v2046_v36 = vsel %vm8583_vm12, 0.0, %v1869_v0 }
  0xc4   :  { %v1976_v20 = vmax.f32 %v1932_v63, %v1956_v61  ;;  %v1986_v50 = vmax.f32 %v1942_v39, %v1966_v44  ;;  %v2026_v55 = vadd.f32 %v2006_v25, %v1729_v27  ;;  %v404_v12 = vrot.slane %v194_v19, 4 }
  0xc5   :  { %v346_v21 = vrot.slane %v345_v30, 2  ;;  %v2056_v42 = vadd.f32 %v2036_v46, %v2016_v22  ;;  %v464_v18 = vrot.slane %v204_v8, 4  ;;  %v524_v9 = vrot.slane %v214_v15, 4 }
  0xc6   :  { %v2066_v59 = vadd.f32 %v2046_v36, %v2026_v55  ;;  %v584_v26 = vrot.slane %v224_v14, 4  ;;  %v644_v0 = vrot.slane %v234_v48, 4  ;;  %v405_v61 = vadd.f32 %v404_v12, %v194_v19 }
  0xc7   :  { %v347_v52 = vadd.f32 %v346_v21, %v345_v30  ;;  %v2076_v27 = vmul.f32 0.33333334, %v2056_v42  ;;  %v465_v63 = vadd.f32 %v464_v18, %v204_v8  ;;  %v525_v39 = vadd.f32 %v524_v9, %v214_v15 }
  0xc8   :  { %v2086_v44 = vmul.f32 0.33333334, %v2066_v59  ;;  %v585_v30 = vadd.f32 %v584_v26, %v224_v14  ;;  %v645_v22 = vadd.f32 %v644_v0, %v234_v48  ;;  %v406_v36 = vrot.slane %v405_v61, 2 }
  0xc9   :  { %v348_v25 = vrot.slane %v347_v52, 1  ;;  %v2096_v46 = vadd.f32 %v2076_v27, %v1976_v20  ;;  %v466_v55 = vrot.slane %v465_v63, 2  ;;  %v526_v21 = vrot.slane %v525_v39, 2 }
  0xca   :  { %v2106_v40 = vadd.f32 %v2086_v44, %v1986_v50  ;;  %v586_v37 = vrot.slane %v585_v30, 2  ;;  %v646_v8 = vrot.slane %v645_v22, 2  ;;  %v407_v42 = vadd.f32 %v406_v36, %v405_v61 }
  0xcb   :  { %v8848_v19 = vadd.f32 %v348_v25, %v347_v52  ;;  %v467_v62 = vadd.f32 %v466_v55, %v465_v63  ;;  %v527_v15 = vadd.f32 %v526_v21, %v525_v39  ;;  %v704_v12 = vrot.slane %v244_v32, 4 }
  0xcc   :  { %v8852_v6 = vpack.c.bf16 %v2106_v40, %v2096_v46  ;;  %v587_v14 = vadd.f32 %v586_v37, %v585_v30  ;;  %v647_v13 = vadd.f32 %v646_v8, %v645_v22  ;;  %v764_v48 = vrot.slane %v254_v29, 4 }
  0xcd   :  { %v408_v20 = vrot.slane %v407_v42, 1  ;;  %v468_v18 = vrot.slane %v467_v62, 1  ;;  %v528_v50 = vrot.slane %v527_v15, 1  ;;  %v705_v9 = vadd.f32 %v704_v12, %v244_v32 }
  0xce   :  { %10895 = vst [vmem:[#allocation27_spill] sm:$0xff] %v8852_v6  ;;  %4118 = vmatprep.mubr.bf16.mxu1 %v8852_v6  ;;  %v588_v59 = vrot.slane %v587_v14, 1  ;;  %v648_v52 = vrot.slane %v647_v13, 1  ;;  %v765_v26 = vadd.f32 %v764_v48, %v254_v29  ;;  %v824_v0 = vrot.slane %v264_v41, 4 }
  0xcf   :  { %v409_v27 = vadd.f32 %v408_v20, %v407_v42  ;;  %v469_v61 = vadd.f32 %v468_v18, %v467_v62  ;;  %v529_v63 = vadd.f32 %v528_v50, %v527_v15  ;;  %v706_v39 = vrot.slane %v705_v9, 2 }
  0xd0   :  { %v589_v44 = vadd.f32 %v588_v59, %v587_v14  ;;  %v649_v25 = vadd.f32 %v648_v52, %v647_v13  ;;  %v766_v30 = vrot.slane %v765_v26, 2  ;;  %v825_v28 = vadd.f32 %v824_v0, %v264_v41 }
  0xd1   :  { %v707_v32 = vadd.f32 %v706_v39, %v705_v9  ;;  %v884_v22 = vrot.slane %v274_v11, 4  ;;  %v944_v10 = vrot.slane %v284_v56, 4  ;;  %v1004_v29 = vrot.slane %v294_v31, 4 }
  0xd2   :  { %v767_v46 = vadd.f32 %v766_v30, %v765_v26  ;;  %v826_v36 = vrot.slane %v825_v28, 2  ;;  %v1064_v55 = vrot.slane %v304_v24, 4  ;;  %v1124_v21 = vrot.slane %v314_v16, 4 }
  0xd3   :  { %v708_v43 = vrot.slane %v707_v32, 1  ;;  %v885_v41 = vadd.f32 %v884_v22, %v274_v11  ;;  %v945_v40 = vadd.f32 %v944_v10, %v284_v56  ;;  %v1005_v37 = vadd.f32 %v1004_v29, %v294_v31 }
  0xd4   :  { %v768_v8 = vrot.slane %v767_v46, 1  ;;  %v827_v42 = vadd.f32 %v826_v36, %v825_v28  ;;  %v1065_v62 = vadd.f32 %v1064_v55, %v304_v24  ;;  %v1125_v15 = vadd.f32 %v1124_v21, %v314_v16 }
  0xd5   :  { %v709_v12 = vadd.f32 %v708_v43, %v707_v32  ;;  %v886_v14 = vrot.slane %v885_v41, 2  ;;  %v946_v13 = vrot.slane %v945_v40, 2  ;;  %v1006_v48 = vrot.slane %v1005_v37, 2 }
  0xd6   :  { %v769_v7 = vadd.f32 %v768_v8, %v767_v46  ;;  %v828_v11 = vrot.slane %v827_v42, 1  ;;  %v1066_v20 = vrot.slane %v1065_v62, 2  ;;  %v1126_v58 = vrot.slane %v1125_v15, 2 }
  0xd7   :  { %v887_v56 = vadd.f32 %v886_v14, %v885_v41  ;;  %v947_v18 = vadd.f32 %v946_v13, %v945_v40  ;;  %v1007_v2 = vadd.f32 %v1006_v48, %v1005_v37  ;;  %v1184_v31 = vrot.slane %v324_v33, 4 }
  0xd8   :  { %v829_v50 = vadd.f32 %v828_v11, %v827_v42  ;;  %v1067_v5 = vadd.f32 %v1066_v20, %v1065_v62  ;;  %v1127_v24 = vadd.f32 %v1126_v58, %v1125_v15  ;;  %v1244_v4 = vrot.slane %v334_v38, 4 }
  0xd9   :  { %v888_v16 = vrot.slane %v887_v56, 1  ;;  %v948_v9 = vrot.slane %v947_v18, 1  ;;  %v1008_v59 = vrot.slane %v1007_v2, 1  ;;  %v1185_v52 = vadd.f32 %v1184_v31, %v324_v33 }
  0xda   :  { %v1068_v26 = vrot.slane %v1067_v5, 1  ;;  %v1128_v0 = vrot.slane %v1127_v24, 1  ;;  %v1245_v39 = vadd.f32 %v1244_v4, %v334_v38  ;;  %v1305_v30 = vmul.f32 0.125, %v8848_v19 }
  0xdb   :  { %v889_v28 = vadd.f32 %v888_v16, %v887_v56  ;;  %v949_v32 = vadd.f32 %v948_v9, %v947_v18  ;;  %v1009_v22 = vadd.f32 %v1008_v59, %v1007_v2  ;;  %v1186_v10 = vrot.slane %v1185_v52, 2  ;;  %v8904_v18 = vld [vmem:[#allocation2 + $0x58] sm:$0xff]  ;;  %v8008_v59 = vld [vmem:[#allocation2 + $0xa8] sm:$0xff] }
  0xdc   :  { %v1069_v29 = vadd.f32 %v1068_v26, %v1067_v5  ;;  %v1129_v46 = vadd.f32 %v1128_v0, %v1127_v24  ;;  %v1246_v36 = vrot.slane %v1245_v39, 2  ;;  %v1315_v55 = vmul.f32 0.125, %v409_v27  ;;  %v8909_v24 = vld [vmem:[#allocation2 + $0x80] sm:$0xff]  ;;  %v8009_v26 = vld [vmem:[#allocation2 + $0xd0] sm:$0xff] }
  0xdd   :  { %v1187_v21 = vadd.f32 %v1186_v10, %v1185_v52  ;;  %v1325_v43 = vmul.f32 0.125, %v469_v61  ;;  %v1335_v41 = vmul.f32 0.125, %v529_v63  ;;  %v1345_v45 = vmul.f32 0.125, %v589_v44 }
  0xde   :  { %v1247_v33 = vadd.f32 %v1246_v36, %v1245_v39  ;;  %v1355_v40 = vmul.f32 0.125, %v649_v25  ;;  %v1365_v37 = vmul.f32 0.125, %v709_v12  ;;  %v1375_v8 = vmul.f32 0.125, %v769_v7  ;;  %v8899_v12 = vld [vmem:[#allocation2 + $0x30] sm:$0xff] }
  0xdf   :  { %v1188_v47 = vrot.slane %v1187_v21, 1  ;;  %v1385_v38 = vmul.f32 0.125, %v829_v50  ;;  %v1395_v42 = vmul.f32 0.125, %v889_v28  ;;  %v1405_v19 = vmul.f32 0.125, %v949_v32  ;;  %v8916_v28 = vld [vmem:[#allocation2 + $0xf8] sm:$0xff] }
  0xe0   :  { %v1248_v62 = vrot.slane %v1247_v33, 1  ;;  %v1415_v15 = vmul.f32 0.125, %v1009_v22  ;;  %v1425_v14 = vmul.f32 0.125, %v1069_v29  ;;  %v1435_v13 = vmul.f32 0.125, %v1129_v46  ;;  %v8919_v22 = vld [vmem:[#allocation2 + $0x120] sm:$0xff] }
  0xe1   :  { %v1189_v48 = vadd.f32 %v1188_v47, %v1187_v21  ;;  %v1626_v11 = vsel %vm1625_vm0, %v1315_v55, %v1305_v30  ;;  %v1702_v27 = vsel %vm1625_vm0, %v1395_v42, %v1385_v38  ;;  %v186_v61 = vunpack.c.l.bf16 %v8526_v60 }
  0xe2   :  { %v1249_v63 = vadd.f32 %v1248_v62, %v1247_v33  ;;  %v1628_v44 = vsel %vm1627_vm1, %v1325_v43, %v1626_v11  ;;  %v1703_v25 = vsel %vm1627_vm1, %v1405_v19, %v1702_v27  ;;  %v196_v7 = vunpack.c.l.bf16 %v8899_v12  ;;  %v8926_v33 = vld [vmem:[#allocation2 + $0x198] sm:$0xff] }
  0xe3   :  { %v1445_v20 = vmul.f32 0.125, %v1189_v48  ;;  %v1630_v58 = vsel %vm1629_vm2, %v1335_v41, %v1628_v44  ;;  %v1704_v56 = vsel %vm1629_vm2, %v1415_v15, %v1703_v25  ;;  %v206_v2 = vunpack.c.l.bf16 %v8904_v18 }
  0xe4   :  { %v1455_v31 = vmul.f32 0.125, %v1249_v63  ;;  %v1632_v50 = vsel %vm1631_vm3, %v1345_v45, %v1630_v58  ;;  %v1705_v5 = vsel %vm1631_vm3, %v1425_v14, %v1704_v56  ;;  %v216_v4 = vunpack.c.l.bf16 %v8909_v24 }
  0xe5   :  { %v1634_v16 = vsel %vm1633_vm4, %v1355_v40, %v1632_v50  ;;  %v1706_v9 = vsel %vm1633_vm4, %v1435_v13, %v1705_v5  ;;  %v226_v52 = vunpack.c.l.bf16 %v8008_v59  ;;  %v236_v0 = vunpack.c.l.bf16 %v8009_v26 }
  0xe6   :  { %v1636_v39 = vsel %vm1635_vm5, %v1365_v37, %v1634_v16  ;;  %v1707_v30 = vsel %vm1635_vm5, %v1445_v20, %v1706_v9  ;;  %v246_v32 = vunpack.c.l.bf16 %v8916_v28  ;;  %v256_v10 = vunpack.c.l.bf16 %v8919_v22  ;;  %v8929_v37 = vld [vmem:[#allocation2 + $0x1c0] sm:$0xff] }
  0xe7   :  { %v1638_v29 = vsel %vm1637_vm6, %v1375_v8, %v1636_v39  ;;  %v1708_v46 = vsel %vm1637_vm6, %v1455_v31, %v1707_v30  ;;  %v266_v36 = vunpack.c.l.bf16 %v8563_v49  ;;  %v276_v55 = vunpack.c.l.bf16 %v8565_v54  ;;  %v8959_v16 = vld [vmem:[#allocation2 + $0x260] sm:$0xff] }
  0xe8   :  { %v1792_v21 = vrot.slane %v1638_v29, 7  ;;  %v1802_v43 = vrot.slane %v1708_v46, 7  ;;  %v1835_v41 = vrot.slane %v1638_v29, 1  ;;  %v1845_v45 = vrot.slane %v1708_v46, 1 }
  0xe9   :  { %v286_v40 = vunpack.c.l.bf16 %v8926_v33  ;;  %v296_v47 = vunpack.c.l.bf16 %v8929_v37  ;;  %v306_v8 = vunpack.c.l.bf16 %v8603_v35  ;;  %v316_v38 = vunpack.c.l.bf16 %v8605_v17 }
  0xea   :  { %v1815_v42 = vsel %vm1814_vm7, %v1792_v21, %v1802_v43  ;;  %v1825_v19 = vsel %vm1814_vm7, %v1802_v43, %v1792_v21  ;;  %v1856_v62 = vsel %vm1855_vm8, %v1835_v41, %v1845_v45  ;;  %v1866_v15 = vsel %vm1855_vm8, %v1845_v45, %v1835_v41 }
  0xeb   :  { %v1909_v14 = vsel %vm8559_vm9, -1e+30, %v1825_v19  ;;  %v1919_v13 = vsel %vm8571_vm10, -1e+30, %v1815_v42  ;;  %v1953_v48 = vsel %vm8577_vm11, -1e+30, %v1856_v62  ;;  %v326_v11 = vunpack.c.l.bf16 %v8607_v34 }
  0xec   :  { %v1929_v27 = vmax.f32 %v1909_v14, %v1638_v29  ;;  %v1939_v63 = vmax.f32 %v1919_v13, %v1708_v46  ;;  %v1963_v44 = vsel %vm8583_vm12, -1e+30, %v1866_v15  ;;  %v1993_v25 = vsel %vm8559_vm9, 0.0, %v1825_v19 }
  0xed   :  { %v2003_v20 = vsel %vm8571_vm10, 0.0, %v1815_v42  ;;  %v2013_v58 = vadd.f32 %v1993_v25, %v1638_v29  ;;  %v2033_v56 = vsel %vm8577_vm11, 0.0, %v1856_v62  ;;  %v2043_v31 = vsel %vm8583_vm12, 0.0, %v1866_v15 }
  0xee   :  { %v1973_v50 = vmax.f32 %v1929_v27, %v1953_v48  ;;  %v1983_v5 = vmax.f32 %v1939_v63, %v1963_v44  ;;  %v2023_v24 = vadd.f32 %v2003_v20, %v1708_v46  ;;  %v336_v9 = vunpack.c.l.bf16 %v8959_v16 }
  0xef   :  { %v2053_v59 = vadd.f32 %v2033_v56, %v2013_v58  ;;  %v356_v26 = vrot.slane %v186_v61, 4  ;;  %v416_v39 = vrot.slane %v196_v7, 4  ;;  %v476_v30 = vrot.slane %v206_v2, 4 }
  0xf0   :  { %v2063_v29 = vadd.f32 %v2043_v31, %v2023_v24  ;;  %v536_v21 = vrot.slane %v216_v4, 4  ;;  %v596_v43 = vrot.slane %v226_v52, 4  ;;  %v656_v41 = vrot.slane %v236_v0, 4 }
  0xf1   :  { %v2073_v45 = vmul.f32 0.33333334, %v2053_v59  ;;  %v357_v46 = vadd.f32 %v356_v26, %v186_v61  ;;  %v417_v42 = vadd.f32 %v416_v39, %v196_v7  ;;  %v477_v19 = vadd.f32 %v476_v30, %v206_v2 }
  0xf2   :  { %v2083_v62 = vmul.f32 0.33333334, %v2063_v29  ;;  %v537_v15 = vadd.f32 %v536_v21, %v216_v4  ;;  %v597_v14 = vadd.f32 %v596_v43, %v226_v52  ;;  %v657_v13 = vadd.f32 %v656_v41, %v236_v0 }
  0xf3   :  { %v2093_v48 = vadd.f32 %v2073_v45, %v1973_v50  ;;  %v358_v27 = vrot.slane %v357_v46, 2  ;;  %v418_v63 = vrot.slane %v417_v42, 2  ;;  %v478_v44 = vrot.slane %v477_v19, 2 }
  0xf4   :  { %v2103_v25 = vadd.f32 %v2083_v62, %v1983_v5  ;;  %v538_v20 = vrot.slane %v537_v15, 2  ;;  %v598_v58 = vrot.slane %v597_v14, 2  ;;  %v658_v56 = vrot.slane %v657_v13, 2 }
  0xf5   :  { %v359_v60 = vadd.f32 %v358_v27, %v357_v46  ;;  %v419_v61 = vadd.f32 %v418_v63, %v417_v42  ;;  %v479_v31 = vadd.f32 %v478_v44, %v477_v19  ;;  %v716_v12 = vrot.slane %v246_v32, 4 }
  0xf6   :  { %v8976_v7 = vpack.c.bf16 %v2103_v25, %v2093_v48  ;;  %v539_v18 = vadd.f32 %v538_v20, %v537_v15  ;;  %v599_v2 = vadd.f32 %v598_v58, %v597_v14  ;;  %v659_v4 = vadd.f32 %v658_v56, %v657_v13 }
  0xf7   :  { %v360_v52 = vrot.slane %v359_v60, 1  ;;  %v420_v0 = vrot.slane %v419_v61, 1  ;;  %v480_v50 = vrot.slane %v479_v31, 1  ;;  %v717_v5 = vadd.f32 %v716_v12, %v246_v32 }
  0xf8   :  { %10896 = vst [vmem:[#allocation28_spill] sm:$0xff] %v8976_v7  ;;  %4076 = vmatmul.mubr.bf16.vlgmr.msra.gmra.mxu0 %v8976_v7  ;;  %v540_v24 = vrot.slane %v539_v18, 1  ;;  %v600_v59 = vrot.slane %v599_v2, 1  ;;  %v660_v26 = vrot.slane %v659_v4, 1  ;;  %v776_v39 = vrot.slane %v256_v10, 4 }
  0xf9   :  { %v361_v30 = vadd.f32 %v360_v52, %v359_v60  ;;  %v421_v29 = vadd.f32 %v420_v0, %v419_v61  ;;  %v481_v21 = vadd.f32 %v480_v50, %v479_v31  ;;  %v718_v43 = vrot.slane %v717_v5, 2 }
  0xfa   :  { %v541_v41 = vadd.f32 %v540_v24, %v539_v18  ;;  %v601_v45 = vadd.f32 %v600_v59, %v599_v2  ;;  %v661_v46 = vadd.f32 %v660_v26, %v659_v4  ;;  %v777_v42 = vadd.f32 %v776_v39, %v256_v10 }
  0xfb   :  { %v719_v28 = vadd.f32 %v718_v43, %v717_v5  ;;  %v836_v32 = vrot.slane %v266_v36, 4  ;;  %v896_v19 = vrot.slane %v276_v55, 4  ;;  %v956_v62 = vrot.slane %v286_v40, 4 }
  0xfc   :  { %v778_v15 = vrot.slane %v777_v42, 2  ;;  %v1016_v14 = vrot.slane %v296_v47, 4  ;;  %v1076_v13 = vrot.slane %v306_v8, 4  ;;  %v1136_v22 = vrot.slane %v316_v38, 4 }
  0xfd   :  { %v720_v10 = vrot.slane %v719_v28, 1  ;;  %v837_v48 = vadd.f32 %v836_v32, %v266_v36  ;;  %v897_v27 = vadd.f32 %v896_v19, %v276_v55  ;;  %v957_v63 = vadd.f32 %v956_v62, %v286_v40 }
  0xfe   :  { %v779_v44 = vadd.f32 %v778_v15, %v777_v42  ;;  %v1017_v25 = vadd.f32 %v1016_v14, %v296_v47  ;;  %v1077_v20 = vadd.f32 %v1076_v13, %v306_v8  ;;  %v1137_v58 = vadd.f32 %v1136_v22, %v316_v38  ;;  %v2418_v15 = vld [vmem:[#allocation5 + $0x988] sm:$0xff] }
  0xff   :  { %v721_v56 = vadd.f32 %v720_v10, %v719_v28  ;;  %v838_v60 = vrot.slane %v837_v48, 2  ;;  %v898_v49 = vrot.slane %v897_v27, 2  ;;  %v958_v36 = vrot.slane %v957_v63, 2 }
 0x100   :  { %v780_v61 = vrot.slane %v779_v44, 1  ;;  %v1018_v54 = vrot.slane %v1017_v25, 2  ;;  %v1078_v55 = vrot.slane %v1077_v20, 2  ;;  %v1138_v31 = vrot.slane %v1137_v58, 2 }
 0x101   :  { %v839_v33 = vadd.f32 %v838_v60, %v837_v48  ;;  %v899_v40 = vadd.f32 %v898_v49, %v897_v27  ;;  %v959_v12 = vadd.f32 %v958_v36, %v957_v63  ;;  %v1196_v37 = vrot.slane %v326_v11, 4  ;;  %v9017_v48 = vld [vmem:[#allocation5 + $0xd88] sm:$0xff] }
 0x102   :  { %v781_v47 = vadd.f32 %v780_v61, %v779_v44  ;;  %v1019_v35 = vadd.f32 %v1018_v54, %v1017_v25  ;;  %v1079_v8 = vadd.f32 %v1078_v55, %v1077_v20  ;;  %v1139_v18 = vadd.f32 %v1138_v31, %v1137_v58  ;;  %v9022_v61 = vld [vmem:[#allocation5 + $0xd80] sm:$0xff] }
 0x103   :  { %v840_v17 = vrot.slane %v839_v33, 1  ;;  %v900_v38 = vrot.slane %v899_v40, 1  ;;  %v960_v2 = vrot.slane %v959_v12, 1  ;;  %v1197_v4 = vadd.f32 %v1196_v37, %v326_v11 }
 0x104   :  { %v1020_v52 = vrot.slane %v1019_v35, 1  ;;  %v1080_v0 = vrot.slane %v1079_v8, 1  ;;  %v1140_v50 = vrot.slane %v1139_v18, 1  ;;  %v1256_v5 = vrot.slane %v336_v9, 4 }
 0x105   :  { %v841_v24 = vadd.f32 %v840_v17, %v839_v33  ;;  %v901_v59 = vadd.f32 %v900_v38, %v899_v40  ;;  %v961_v26 = vadd.f32 %v960_v2, %v959_v12  ;;  %v1198_v39 = vrot.slane %v1197_v4, 2  ;;  %v9027_v33 = vld [vmem:[#allocation5 + $0x908] sm:$0xff] }
 0x106   :  { %v1021_v43 = vadd.f32 %v1020_v52, %v1019_v35  ;;  %v1081_v42 = vadd.f32 %v1080_v0, %v1079_v8  ;;  %v1141_v28 = vadd.f32 %v1140_v50, %v1139_v18  ;;  %v1257_v32 = vadd.f32 %v1256_v5, %v336_v9  ;;  %v2417_v9 = vld [vmem:[#allocation5 + $0x980] sm:$0xff]  ;;  %v9031_v35 = vld [vmem:[#allocation5 + $0xd08] sm:$0xff] }
 0x107   :  { %v1199_v19 = vadd.f32 %v1198_v39, %v1197_v4  ;;  %v1307_v62 = vmul.f32 0.125, %v361_v30  ;;  %v1317_v34 = vmul.f32 0.125, %v421_v29  ;;  %v1327_v11 = vmul.f32 0.125, %v481_v21  ;;  %v9033_v8 = vld [vmem:[#allocation5 + $0x900] sm:$0xff] }
 0x108   :  { %v1258_v14 = vrot.slane %v1257_v32, 2  ;;  %v1337_v13 = vmul.f32 0.125, %v541_v41  ;;  %v1347_v22 = vmul.f32 0.125, %v601_v45  ;;  %v1357_v10 = vmul.f32 0.125, %v661_v46  ;;  %v9041_v5 = vld [vmem:[#allocation5 + $0xd00] sm:$0xff] }
 0x109   :  { %v1200_v27 = vrot.slane %v1199_v19, 1  ;;  %v1367_v63 = vmul.f32 0.125, %v721_v56  ;;  %v1377_v44 = vmul.f32 0.125, %v781_v47  ;;  %v1387_v25 = vmul.f32 0.125, %v841_v24 }
 0x10a   :  { %v1259_v20 = vadd.f32 %v1258_v14, %v1257_v32  ;;  %v1397_v58 = vmul.f32 0.125, %v901_v59  ;;  %v1407_v60 = vmul.f32 0.125, %v961_v26  ;;  %v1417_v16 = vmul.f32 0.125, %v1021_v43 }
 0x10b   :  { %v1201_v49 = vadd.f32 %v1200_v27, %v1199_v19  ;;  %v1427_v30 = vmul.f32 0.125, %v1081_v42  ;;  %v1437_v29 = vmul.f32 0.125, %v1141_v28  ;;  %v1646_v21 = vsel %vm1625_vm0, %v1317_v34, %v1307_v62 }
 0x10c   :  { %v1260_v36 = vrot.slane %v1259_v20, 1  ;;  %v1647_v41 = vsel %vm1627_vm1, %v1327_v11, %v1646_v21  ;;  %v1716_v45 = vsel %vm1625_vm0, %v1397_v58, %v1387_v25  ;;  %v3378_v46 = vunpack.c.h.s8.bf16 %v2418_v15  ;;  %v9066_v58 = vld [vmem:[#allocation5 + $0x880] sm:$0xff] }
 0x10d   :  { %v1447_v56 = vmul.f32 0.125, %v1201_v49  ;;  %v1648_v54 = vsel %vm1629_vm2, %v1337_v13, %v1647_v41  ;;  %v1717_v55 = vsel %vm1627_vm1, %v1407_v60, %v1716_v45  ;;  %v3634_v31 = vunpack.c.h.s8.bf16 %v9017_v48  ;;  %v9068_v60 = vld [vmem:[#allocation5 + $0xc80] sm:$0xff]  ;;  %v9081_v45 = vld [vmem:[#allocation5 + $0x808] sm:$0xff] }
 0x10e   :  { %v1261_v40 = vadd.f32 %v1260_v36, %v1259_v20  ;;  %v1649_v12 = vsel %vm1631_vm3, %v1347_v22, %v1648_v54  ;;  %v1718_v37 = vsel %vm1629_vm2, %v1417_v16, %v1717_v55  ;;  %4129 = vmatprep.subr.bf16.mxu0 %v3378_v46  ;;  %v3377_v47 = vunpack.c.h.s8.bf16 %v2417_v9  ;;  %v9064_v20 = vld [vmem:[#allocation5 + $0xc88] sm:$0xff] }
 0x10f   :  { %v1650_v18 = vsel %vm1633_vm4, %v1357_v10, %v1649_v12  ;;  %v1719_v17 = vsel %vm1631_vm3, %v1427_v30, %v1718_v37  ;;  %4172 = vmatprep.subr.bf16.mxu1 %v3634_v31  ;;  %v3633_v38 = vunpack.c.h.s8.bf16 %v9022_v61  ;;  %v3362_v2 = vunpack.c.l.s8.bf16 %v2418_v15  ;;  %v9054_v10 = vld [vmem:[#allocation5 + $0x888] sm:$0xff] }
 0x110   :  { %v1457_v4 = vmul.f32 0.125, %v1261_v40  ;;  %v1651_v52 = vsel %vm1635_vm5, %v1367_v63, %v1650_v18  ;;  %v1720_v0 = vsel %vm1633_vm4, %v1437_v29, %v1719_v17  ;;  %4130 = vmatpush1.bf16.msra.mxu0 %v3377_v47  ;;  %v3618_v50 = vunpack.c.l.s8.bf16 %v9017_v48  ;;  %v9089_v31 = vld [vmem:[#allocation5 + $0xc08] sm:$0xff] }
 0x111   :  { %v1652_v24 = vsel %vm1637_vm6, %v1377_v44, %v1651_v52  ;;  %v1721_v59 = vsel %vm1635_vm5, %v1447_v56, %v1720_v0  ;;  %4131 = vmatprep.subr.bf16.mxu0 %v3362_v2  ;;  %v3361_v26 = vunpack.c.l.s8.bf16 %v2417_v9  ;;  %v3617_v39 = vunpack.c.l.s8.bf16 %v9022_v61  ;;  %v9095_v2 = vld [vmem:[#allocation5 + $0x800] sm:$0xff]  ;;  %v9204_v17 = vld [vmem:[#allocation2 + $0x1c8] sm:$0xff] }
 0x112   :  { %v1722_v43 = vsel %vm1637_vm6, %v1457_v4, %v1721_v59  ;;  %v1794_v42 = vrot.slane %v1652_v24, 7  ;;  %v1837_v28 = vrot.slane %v1652_v24, 1  ;;  %v3346_v32 = vunpack.c.h.s8.bf16 %v9027_v33  ;;  %v9097_v4 = vld [vmem:[#allocation5 + $0xc00] sm:$0xff] }
 0x113   :  { %v1804_v19 = vrot.slane %v1722_v43, 7  ;;  %v1847_v62 = vrot.slane %v1722_v43, 1  ;;  %v3602_v34 = vunpack.c.h.s8.bf16 %v9031_v35  ;;  %v3345_v11 = vunpack.c.h.s8.bf16 %v9033_v8 }
 0x114   :  { %4132 = vmatpush1.bf16.msra.mxu0 %v3361_v26  ;;  %v3330_v14 = vunpack.c.l.s8.bf16 %v9027_v33  ;;  %v3329_v22 = vunpack.c.l.s8.bf16 %v9033_v8  ;;  %v3314_v37 = vunpack.c.h.s8.bf16 %v9054_v10  ;;  %v3313_v18 = vunpack.c.h.s8.bf16 %v9066_v58 }
 0x115   :  { %v1817_v27 = vsel %vm1814_vm7, %v1794_v42, %v1804_v19  ;;  %v1827_v63 = vsel %vm1814_vm7, %v1804_v19, %v1794_v42  ;;  %v1858_v44 = vsel %vm1855_vm8, %v1837_v28, %v1847_v62  ;;  %v1868_v25 = vsel %vm1855_vm8, %v1847_v62, %v1837_v28  ;;  %4133 = vmatprep.subr.bf16.mxu0 %v3346_v32  ;;  %v9105_v32 = vld [vmem:[#allocation5 + $0xb88] sm:$0xff]  ;;  %v9109_v62 = vld [vmem:[#allocation5 + $0xb80] sm:$0xff] }
 0x116   :  { %v1911_v16 = vsel %vm8559_vm9, -1e+30, %v1827_v63  ;;  %v1921_v9 = vsel %vm8571_vm10, -1e+30, %v1817_v27  ;;  %v1955_v49 = vsel %vm8577_vm11, -1e+30, %v1858_v44  ;;  %v3298_v0 = vunpack.c.l.s8.bf16 %v9054_v10 }
 0x117   :  { %v1931_v29 = vmax.f32 %v1911_v16, %v1652_v24  ;;  %v1941_v21 = vmax.f32 %v1921_v9, %v1722_v43  ;;  %v1965_v36 = vsel %vm8583_vm12, -1e+30, %v1868_v25  ;;  %v1995_v41 = vsel %vm8559_vm9, 0.0, %v1827_v63  ;;  %v9107_v19 = vld [vmem:[#allocation5 + $0xf88] sm:$0xff]  ;;  %v9162_v10 = vld [vmem:[#allocation5 + $0xa00] sm:$0xff] }
 0x118   :  { %v2005_v46 = vsel %vm8571_vm10, 0.0, %v1817_v27  ;;  %v2015_v56 = vadd.f32 %v1995_v41, %v1652_v24  ;;  %v2035_v54 = vsel %vm8577_vm11, 0.0, %v1858_v44  ;;  %v2045_v55 = vsel %vm8583_vm12, 0.0, %v1868_v25  ;;  %4134 = vmatpush1.bf16.msra.mxu0 %v3345_v11  ;;  %v9114_v27 = vld [vmem:[#allocation5 + $0xf80] sm:$0xff]  ;;  %v9119_v16 = vld [vmem:[#allocation5 + $0xb08] sm:$0xff]  ;;  %v9188_v44 = vld [vmem:[#allocation2 + $0xb0] sm:$0xff] }
 0x119   :  { %v1975_v33 = vmax.f32 %v1931_v29, %v1955_v49  ;;  %v1985_v40 = vmax.f32 %v1941_v21, %v1965_v36  ;;  %v2025_v12 = vadd.f32 %v2005_v46, %v1722_v43  ;;  %4135 = vmatprep.subr.bf16.mxu0 %v3330_v14  ;;  %v3297_v59 = vunpack.c.l.s8.bf16 %v9066_v58  ;;  %v9121_v9 = vld [vmem:[#allocation5 + $0xf08] sm:$0xff]  ;;  %v9126_v41 = vld [vmem:[#allocation5 + $0xb00] sm:$0xff]  ;;  %v9178_v43 = vld [vmem:[#allocation2 + $0x178] sm:$0xff]  ;;  %10902 = vst [vmem:[#allocation34_spill] sm:$0xff] %v9188_v44 }
 0x11a   :  { %v2055_v47 = vadd.f32 %v2035_v54, %v2015_v56  ;;  %v3282_v42 = vunpack.c.h.s8.bf16 %v9081_v45  ;;  %v3281_v14 = vunpack.c.h.s8.bf16 %v9095_v2  ;;  %v9128_v46 = vld [vmem:[#allocation5 + $0xf00] sm:$0xff]  ;;  %v9176_v56 = vld [vmem:[#allocation2 + $0x150] sm:$0xff]  ;;  %v9186_v28 = vld [vmem:[#allocation2 + $0x88] sm:$0xff]  ;;  %v229_v36 = vunpack.c.h.bf16 %v9188_v44 }
 0x11b   :  { %v2065_v52 = vadd.f32 %v2045_v55, %v2025_v12  ;;  %v9136_v12 = vld [vmem:[#allocation5 + $0xe88] sm:$0xff]  ;;  %v9164_v21 = vld [vmem:[#allocation5 + $0xe00] sm:$0xff]  ;;  %10901 = vst [vmem:[#allocation33_spill] sm:$0xff] %v9186_v28  ;;  %v9206_v54 = vld [vmem:[#allocation2 + $0x1f0] sm:$0xff]  ;;  %v219_v8 = vunpack.c.h.bf16 %v9186_v28  ;;  %v10906_v7 = vunpack.c.h.s8.bf16 %v9041_v5  ;;  %v10908_v15 = vunpack.c.l.s8.bf16 %v9031_v35 }
 0x11c   :  { %v2075_v26 = vmul.f32 0.33333334, %v2055_v47  ;;  %4136 = vmatpush1.bf16.msra.mxu0 %v3329_v22  ;;  %v3266_v22 = vunpack.c.l.s8.bf16 %v9081_v45  ;;  %v9155_v47 = vld [vmem:[#allocation2 + $0x10] sm:$0xff]  ;;  %10898 = vst [vmem:[#allocation30_spill] sm:$0xff] %v9164_v21  ;;  %v9174_v55 = vld [vmem:[#allocation2 + $0x60] sm:$0xff]  ;;  %v9208_v24 = vld [vmem:[#allocation2 + $0x218] sm:$0xff]  ;;  %v10910_v21 = vunpack.c.l.s8.bf16 %v9041_v5  ;;  %v10911_v35 = vunpack.c.h.s8.bf16 %v9109_v62 }
 0x11d   :  { %v2085_v11 = vmul.f32 0.33333334, %v2065_v52  ;;  %4137 = vmatprep.subr.bf16.mxu0 %v3314_v37  ;;  %10900 = vst [vmem:[#allocation32_spill] sm:$0xff] %v9174_v55  ;;  %v9190_v52 = vld [vmem:[#allocation2 + $0xd8] sm:$0xff]  ;;  %v189_v48 = vunpack.c.h.bf16 %v9155_v47  ;;  %v9218_v58 = vld [vmem:[#allocation2 + $0x268] sm:$0xff]  ;;  %v554_v13 = vrot.slane %v219_v8, 4 }
 0x11e   :  { %v2095_v63 = vadd.f32 %v2075_v26, %v1975_v33  ;;  %v9143_v26 = vld [vmem:[#allocation5 + $0xa80] sm:$0xff]  ;;  %10903 = vst [vmem:[#allocation35_spill] sm:$0xff] %v9190_v52  ;;  %v209_v33 = vunpack.c.h.bf16 %v9174_v55  ;;  %v239_v30 = vunpack.c.h.bf16 %v9190_v52  ;;  %v614_v23 = vrot.slane %v229_v36, 4 }
 0x11f   :  { %v2105_v49 = vadd.f32 %v2085_v11, %v1985_v40  ;;  %v9134_v40 = vld [vmem:[#allocation5 + $0xa88] sm:$0xff]  ;;  %v9145_v11 = vld [vmem:[#allocation5 + $0xe80] sm:$0xff]  ;;  %v555_v44 = vadd.f32 %v554_v13, %v219_v8 }
 0x120   :  { %4138 = vmatpush1.bf16.msra.mxu0 %v3313_v18  ;;  %v9200_v18 = vld [vmem:[#allocation2 + $0x1a0] sm:$0xff]  ;;  %v494_v29 = vrot.slane %v209_v33, 4  ;;  %v674_v25 = vrot.slane %v239_v30, 4 }
 0x121   :  { %v9138_v37 = vpack.c.bf16 %v2105_v49, %v2095_v63  ;;  %4139 = vmatprep.subr.bf16.mxu0 %v3298_v0  ;;  %v9151_v49 = vld [vmem:[#allocation5 + $0xa08] sm:$0xff]  ;;  %v9166_v63 = vld [vmem:[#allocation2 + $0x38] sm:$0xff] }
 0x122   :  { %v9153_v0 = vld [vmem:[#allocation5 + $0xe08] sm:$0xff]  ;;  %10899 = vst [vmem:[#allocation31_spill] sm:$0xff] %v9166_v63  ;;  %v495_v52 = vadd.f32 %v494_v29, %v209_v33  ;;  %v675_v28 = vadd.f32 %v674_v25, %v239_v30 }
 0x123   :  { %10897 = vst [vmem:[#allocation29_spill] sm:$0xff] %v9138_v37  ;;  %4119 = vmatmul.mubr.bf16.vlgmr.msra.gmra.mxu1 %v9138_v37  ;;  %v10909_v37 = vunpack.c.h.s8.bf16 %v9105_v32 }
 0x124   :  { %4173 = vmatpush1.bf16.msra.mxu1 %v3633_v38  ;;  %4140 = vmatpush1.bf16.msra.mxu0 %v3297_v59  ;;  %v9196_v38 = vld [vmem:[#allocation2 + $0x100] sm:$0xff]  ;;  %v9198_v59 = vld [vmem:[#allocation2 + $0x128] sm:$0xff] }
 0x125   :  { %4174 = vmatprep.subr.bf16.mxu1 %v3618_v50  ;;  %4141 = vmatprep.subr.bf16.mxu0 %v3282_v42  ;;  %10904 = vst [vmem:[#allocation36_spill] sm:$0xff] %v9196_v38  ;;  %10905 = vst [vmem:[#allocation37_spill] sm:$0xff] %v9198_v59  ;;  %v199_v42 = vunpack.c.h.bf16 %v9166_v63  ;;  %v9216_v50 = vld [vmem:[#allocation2 + $0x240] sm:$0xff]  ;;  %v249_v61 = vunpack.c.h.bf16 %v9196_v38 }
 0x127   :  { %v434_v6 = vrot.slane %v199_v42, 4 }
 0x128   :  { %4175 = vmatpush1.bf16.msra.mxu1 %v3617_v39  ;;  %4142 = vmatpush1.bf16.msra.mxu0 %v3281_v14  ;;  %v259_v39 = vunpack.c.h.bf16 %v9198_v59  ;;  %v10907_v14 = vunpack.c.l.s8.bf16 %v9095_v2  ;;  %v734_v59 = vrot.slane %v249_v61, 4 }
 0x129   :  { %4176 = vmatprep.subr.bf16.mxu1 %v3602_v34  ;;  %4143 = vmatprep.subr.bf16.mxu0 %v3266_v22  ;;  %v374_v22 = vrot.slane %v189_v48, 4  ;;  %v435_v45 = vadd.f32 %v434_v6, %v199_v42  ;;  %v676_v6 = vrot.slane %v675_v28, 2  ;;  %v10912_v42 = vunpack.c.h.s8.bf16 %v9064_v20 }
 0x12a   :  { %v794_v38 = vrot.slane %v259_v39, 4  ;;  %v735_v55 = vadd.f32 %v734_v59, %v249_v61 }
 0x12b   :  { %v375_v34 = vadd.f32 %v374_v22, %v189_v48  ;;  %v10915_v22 = vunpack.c.l.s8.bf16 %v9109_v62 }
 0x12c   :  { %4177 = vmatpush1.bf16.msra.mxu1 %v10906_v7  ;;  %4144 = vmatpush1.bf16.msra.mxu0 %v10907_v14  ;;  %v615_v7 = vadd.f32 %v614_v23, %v229_v36  ;;  %v436_v14 = vrot.slane %v435_v45, 2  ;;  %v795_v63 = vadd.f32 %v794_v38, %v259_v39  ;;  %v10913_v23 = vunpack.c.l.s8.bf16 %v9105_v32 }
 0x12d   :  { %4178 = vmatprep.subr.bf16.mxu1 %v10908_v15  ;;  %4145 = vmatprep.subr.bf16.mxu0 %v10909_v37  ;;  %v376_v2 = vrot.slane %v375_v34, 2  ;;  %v496_v15 = vrot.slane %v495_v52, 2  ;;  %v556_v37 = vrot.slane %v555_v44, 2  ;;  %v736_v8 = vrot.slane %v735_v55, 2 }
 0x12e   :  { %v616_v48 = vrot.slane %v615_v7, 2  ;;  %v437_v30 = vadd.f32 %v436_v14, %v435_v45  ;;  %v796_v25 = vrot.slane %v795_v63, 2  ;;  %v677_v36 = vadd.f32 %v676_v6, %v675_v28 }
 0x12f   :  { %v377_v13 = vadd.f32 %v376_v2, %v375_v34  ;;  %v497_v29 = vadd.f32 %v496_v15, %v495_v52  ;;  %v557_v5 = vadd.f32 %v556_v37, %v555_v44  ;;  %v737_v59 = vadd.f32 %v736_v8, %v735_v55 }
 0x130   :  { %4179 = vmatpush1.bf16.msra.mxu1 %v10910_v21  ;;  %4146 = vmatpush2.bf16.msra.mxu0 %v10911_v35  ;;  %v617_v21 = vadd.f32 %v616_v48, %v615_v7  ;;  %v438_v38 = vrot.slane %v437_v30, 1  ;;  %v797_v61 = vadd.f32 %v796_v25, %v795_v63  ;;  %v10914_v39 = vunpack.c.h.s8.bf16 %v9068_v60 }
 0x131   :  { %4180 = vmatprep.subr.bf16.mxu1 %v10912_v42  ;;  %4147 = vmatprep.subr.bf16.mxu0 %v10913_v23  ;;  %v378_v33 = vrot.slane %v377_v13, 1  ;;  %v498_v32 = vrot.slane %v497_v29, 1  ;;  %v558_v35 = vrot.slane %v557_v5, 1  ;;  %v678_v45 = vrot.slane %v677_v36, 1 }
 0x132   :  { %v618_v34 = vrot.slane %v617_v21, 1  ;;  %v10916_v2 = vunpack.c.l.s8.bf16 %v9064_v20  ;;  %v10917_v44 = vunpack.c.h.s8.bf16 %v9119_v16  ;;  %v9264_v55 = vadd.f32 %v438_v38, %v437_v30 }
 0x133   :  { %v9262_v28 = vadd.f32 %v378_v33, %v377_v13  ;;  %v738_v52 = vrot.slane %v737_v59, 1  ;;  %v798_v63 = vrot.slane %v797_v61, 1  ;;  %v9266_v7 = vadd.f32 %v498_v32, %v497_v29 }
 0x134   :  { %4181 = vmatpush1.bf16.msra.mxu1 %v10914_v39  ;;  %4148 = vmatpush2.bf16.msra.mxu0 %v10915_v22  ;;  %v9268_v62 = vadd.f32 %v558_v35, %v557_v5  ;;  %v9270_v14 = vadd.f32 %v618_v34, %v617_v21  ;;  %v9272_v15 = vadd.f32 %v678_v45, %v677_v36  ;;  %v10918_v48 = vunpack.c.h.bf16 %v9176_v56 }
 0x135   :  { %4182 = vmatprep.subr.bf16.mxu1 %v10916_v2  ;;  %4149 = vmatprep.subr.bf16.mxu0 %v10917_v44  ;;  %v9274_v37 = vadd.f32 %v738_v52, %v737_v59  ;;  %v9276_v20 = vadd.f32 %v798_v63, %v797_v61  ;;  %v10919_v42 = vunpack.c.h.bf16 %v9178_v43  ;;  %v10920_v13 = vunpack.c.l.s8.bf16 %v9068_v60 }
 0x136   :  { %v854_v6 = vrot.slane %v10918_v48, 4  ;;  %v10921_v30 = vunpack.c.h.s8.bf16 %v9126_v41  ;;  %v10922_v8 = vunpack.c.h.bf16 %v9200_v18  ;;  %v10923_v29 = vunpack.c.h.bf16 %v9204_v17 }
 0x137   :  { %v914_v23 = vrot.slane %v10919_v42, 4  ;;  %v10924_v21 = vunpack.c.h.bf16 %v9206_v54  ;;  %v10925_v33 = vunpack.c.h.bf16 %v9208_v24  ;;  %v10926_v59 = vunpack.c.h.s8.bf16 %v9089_v31 }
 0x138   :  { %4183 = vmatpush1.bf16.msra.mxu1 %v10920_v13  ;;  %4150 = vmatpush2.bf16.msra.mxu0 %v10921_v30  ;;  %v974_v25 = vrot.slane %v10922_v8, 4  ;;  %v1034_v5 = vrot.slane %v10923_v29, 4  ;;  %v10927_v60 = vunpack.c.l.s8.bf16 %v9119_v16  ;;  %v10928_v61 = vmov %v10918_v48 }
 0x139   :  { %v1094_v36 = vrot.slane %v10924_v21, 4  ;;  %v1154_v38 = vrot.slane %v10925_v33, 4  ;;  %4184 = vmatprep.subr.bf16.mxu1 %v10926_v59  ;;  %v855_v39 = vadd.f32 %v854_v6, %v10928_v61  ;;  %v10929_v22 = vmov %v10919_v42 }
 0x13a   :  { %4151 = vmatprep.subr.bf16.mxu0 %v10927_v60  ;;  %v915_v32 = vadd.f32 %v914_v23, %v10929_v22  ;;  %v10930_v35 = vunpack.c.h.bf16 %v9216_v50  ;;  %v10931_v45 = vunpack.c.h.bf16 %v9218_v58  ;;  %v10932_v44 = vmov %v10922_v8 }
 0x13b   :  { %v975_v52 = vadd.f32 %v974_v25, %v10932_v44  ;;  %v10933_v63 = vmov %v10923_v29  ;;  %v10934_v16 = vmov %v10924_v21  ;;  %v10935_v6 = vmov %v10925_v33 }
 0x13c   :  { %v1214_v34 = vrot.slane %v10930_v35, 4  ;;  %v1274_v2 = vrot.slane %v10931_v45, 4  ;;  %v1035_v48 = vadd.f32 %v1034_v5, %v10933_v63  ;;  %v1095_v42 = vadd.f32 %v1094_v36, %v10934_v16 }
 0x13d   :  { %v1155_v13 = vadd.f32 %v1154_v38, %v10935_v6  ;;  %v856_v30 = vrot.slane %v855_v39, 2  ;;  %v916_v23 = vrot.slane %v915_v32, 2  ;;  %v10936_v8 = vmov %v10930_v35 }
 0x13e   :  { %v1215_v29 = vadd.f32 %v1214_v34, %v10936_v8  ;;  %v10937_v21 = vmov %v10931_v45  ;;  %v10938_v59 = vunpack.c.h.s8.bf16 %v9097_v4  ;;  %v10939_v25 = vunpack.c.l.s8.bf16 %v9126_v41 }
 0x13f   :  { %v1275_v33 = vadd.f32 %v1274_v2, %v10937_v21  ;;  %v976_v5 = vrot.slane %v975_v52, 2  ;;  %v1036_v60 = vrot.slane %v1035_v48, 2  ;;  %v1096_v36 = vrot.slane %v1095_v42, 2 }
 0x140   :  { %4185 = vmatpush1.bf16.msra.mxu1 %v10938_v59  ;;  %4152 = vmatpush2.bf16.msra.mxu0 %v10939_v25  ;;  %v1156_v61 = vrot.slane %v1155_v13, 2  ;;  %v10940_v38 = vunpack.c.l.s8.bf16 %v9089_v31  ;;  %v10941_v22 = vunpack.c.h.s8.bf16 %v9134_v40  ;;  %v857_v35 = vadd.f32 %v856_v30, %v855_v39 }
 0x141   :  { %v917_v34 = vadd.f32 %v916_v23, %v915_v32  ;;  %v1216_v45 = vrot.slane %v1215_v29, 2  ;;  %v1276_v2 = vrot.slane %v1275_v33, 2  ;;  %v977_v44 = vadd.f32 %v976_v5, %v975_v52 }
 0x142   :  { %4186 = vmatprep.subr.bf16.mxu1 %v10940_v38  ;;  %4153 = vmatprep.subr.bf16.mxu0 %v10941_v22  ;;  %v1037_v63 = vadd.f32 %v1036_v60, %v1035_v48  ;;  %v1097_v16 = vadd.f32 %v1096_v36, %v1095_v42  ;;  %v1157_v6 = vadd.f32 %v1156_v61, %v1155_v13  ;;  %v858_v41 = vrot.slane %v857_v35, 1 }
 0x143   :  { %v918_v8 = vrot.slane %v917_v34, 1  ;;  %v1217_v21 = vadd.f32 %v1216_v45, %v1215_v29  ;;  %v1277_v59 = vadd.f32 %v1276_v2, %v1275_v33  ;;  %v10942_v25 = vunpack.c.l.s8.bf16 %v9097_v4 }
 0x144   :  { %v10943_v31 = vunpack.c.h.s8.bf16 %v9143_v26  ;;  %v978_v38 = vrot.slane %v977_v44, 1  ;;  %v1038_v22 = vrot.slane %v1037_v63, 1  ;;  %v1098_v39 = vrot.slane %v1097_v16, 1 }
 0x145   :  { %4187 = vmatpush1.bf16.msra.mxu1 %v10942_v25  ;;  %v1158_v32 = vrot.slane %v1157_v6, 1  ;;  %v10944_v30 = vunpack.c.h.s8.bf16 %v9107_v19  ;;  %v10945_v52 = vunpack.c.l.s8.bf16 %v9134_v40  ;;  %v859_v48 = vadd.f32 %v858_v41, %v857_v35 }
 0x146   :  { %4154 = vmatpush2.bf16.msra.mxu0 %v10943_v31  ;;  %v919_v42 = vadd.f32 %v918_v8, %v917_v34  ;;  %v1218_v13 = vrot.slane %v1217_v21, 1  ;;  %v1278_v23 = vrot.slane %v1277_v59, 1  ;;  %v979_v29 = vadd.f32 %v978_v38, %v977_v44  ;;  %v9350_v8 = vld [vmem:[#allocation2 + $0x18] sm:$0xff] }
 0x147   :  { %4188 = vmatprep.subr.bf16.mxu1 %v10944_v30  ;;  %4155 = vmatprep.subr.bf16.mxu0 %v10945_v52  ;;  %v1039_v4 = vadd.f32 %v1038_v22, %v1037_v63  ;;  %v1099_v33 = vadd.f32 %v1098_v39, %v1097_v16  ;;  %v1159_v5 = vadd.f32 %v1158_v32, %v1157_v6  ;;  %v1310_v61 = vmul.f32 0.125, %v9262_v28  ;;  %v9360_v38 = vld [vmem:[#allocation2 + $0xb8] sm:$0xff]  ;;  %v9362_v22 = vld [vmem:[#allocation2 + $0xe0] sm:$0xff] }
 0x148   :  { %v1219_v60 = vadd.f32 %v1218_v13, %v1217_v21  ;;  %v1279_v36 = vadd.f32 %v1278_v23, %v1277_v59  ;;  %v1320_v45 = vmul.f32 0.125, %v9264_v55  ;;  %v10946_v2 = vunpack.c.h.s8.bf16 %v9114_v27  ;;  %v9354_v59 = vld [vmem:[#allocation2 + $0x68] sm:$0xff] }
 0x149   :  { %v10947_v40 = vunpack.c.l.s8.bf16 %v9143_v26  ;;  %v1330_v35 = vmul.f32 0.125, %v9266_v7  ;;  %v1340_v34 = vmul.f32 0.125, %v9268_v62  ;;  %v1350_v44 = vmul.f32 0.125, %v9270_v14  ;;  %v9352_v7 = vld [vmem:[#allocation2 + $0x40] sm:$0xff] }
 0x14a   :  { %4189 = vmatpush2.bf16.msra.mxu1 %v10946_v2  ;;  %v1360_v63 = vmul.f32 0.125, %v9272_v15  ;;  %v10948_v16 = vunpack.c.l.s8.bf16 %v9107_v19  ;;  %v10949_v28 = vunpack.c.h.s8.bf16 %v9151_v49  ;;  %v1370_v55 = vmul.f32 0.125, %v9274_v37  ;;  %v9356_v19 = vld [vmem:[#allocation2 + $0x90] sm:$0xff] }
 0x14b   :  { %4156 = vmatpush2.bf16.msra.mxu0 %v10947_v40  ;;  %v1380_v6 = vmul.f32 0.125, %v9276_v20  ;;  %v1390_v26 = vmul.f32 0.125, %v859_v48  ;;  %v1400_v41 = vmul.f32 0.125, %v919_v42  ;;  %v1410_v62 = vmul.f32 0.125, %v979_v29  ;;  %v9370_v48 = vld [vmem:[#allocation2 + $0x108] sm:$0xff]  ;;  %v9372_v42 = vld [vmem:[#allocation2 + $0x130] sm:$0xff] }
 0x14c   :  { %4190 = vmatprep.subr.bf16.mxu1 %v10948_v16  ;;  %4157 = vmatprep.subr.bf16.mxu0 %v10949_v28  ;;  %v1420_v14 = vmul.f32 0.125, %v1039_v4  ;;  %v1430_v21 = vmul.f32 0.125, %v1099_v33  ;;  %v1440_v15 = vmul.f32 0.125, %v1159_v5  ;;  %v1450_v25 = vmul.f32 0.125, %v1219_v60  ;;  %v9382_v5 = vld [vmem:[#allocation2 + $0x158] sm:$0xff]  ;;  %v9384_v60 = vld [vmem:[#allocation2 + $0x180] sm:$0xff] }
 0x14d   :  { %v1460_v31 = vmul.f32 0.125, %v1279_v36  ;;  %v1667_v37 = vsel %vm1625_vm0, %v1320_v45, %v1310_v61  ;;  %v1737_v20 = vsel %vm1625_vm0, %v1400_v41, %v1390_v26  ;;  %v10950_v39 = vunpack.c.l.s8.bf16 %v9114_v27  ;;  %10954 = vst [vmem:[#allocation38_spill] sm:$0xff] %v9384_v60  ;;  %v9390_v40 = vld [vmem:[#allocation2 + $0x1a8] sm:$0xff]  ;;  %v9398_v26 = vld [vmem:[#allocation2 + $0x1f8] sm:$0xff] }
 0x14e   :  { %v10951_v32 = vunpack.c.h.s8.bf16 %v9162_v10  ;;  %v1668_v30 = vsel %vm1627_vm1, %v1330_v35, %v1667_v37  ;;  %v1738_v52 = vsel %vm1627_vm1, %v1410_v62, %v1737_v20  ;;  %v191_v13 = vunpack.c.h.bf16 %v9350_v8  ;;  %10955 = vst [vmem:[#allocation39_spill] sm:$0xff] %v9390_v40  ;;  %10957 = vst [vmem:[#allocation41_spill] sm:$0xff] %v9398_v26  ;;  %v9408_v20 = vld [vmem:[#allocation2 + $0x220] sm:$0xff] }
 0x14f   :  { %4191 = vmatpush2.bf16.msra.mxu1 %v10950_v39  ;;  %v201_v23 = vunpack.c.h.bf16 %v9352_v7  ;;  %v10952_v29 = vunpack.c.h.s8.bf16 %v9121_v9  ;;  %v10953_v27 = vunpack.c.l.s8.bf16 %v9151_v49  ;;  %v1669_v4 = vsel %vm1629_vm2, %v1340_v34, %v1668_v30  ;;  %v9392_v49 = vld [vmem:[#allocation2 + $0x1d0] sm:$0xff]  ;;  %10960 = vst [vmem:[#allocation42_spill] sm:$0xff] %v9408_v20 }
 0x150   :  { %4158 = vmatpush2.bf16.msra.mxu0 %v10951_v32  ;;  %v1739_v33 = vsel %vm1629_vm2, %v1420_v14, %v1738_v52  ;;  %v211_v36 = vunpack.c.h.bf16 %v9354_v59  ;;  %v221_v61 = vunpack.c.h.bf16 %v9356_v19  ;;  %v1670_v45 = vsel %vm1631_vm3, %v1350_v44, %v1669_v4  ;;  %10956 = vst [vmem:[#allocation40_spill] sm:$0xff] %v9392_v49 }
 0x151   :  { %4192 = vmatprep.subr.bf16.mxu1 %v10952_v29  ;;  %4159 = vmatprep.subr.bf16.mxu0 %v10953_v27  ;;  %v1740_v2 = vsel %vm1631_vm3, %v1430_v21, %v1739_v33  ;;  %v231_v35 = vunpack.c.h.bf16 %v9360_v38  ;;  %v241_v34 = vunpack.c.h.bf16 %v9362_v22  ;;  %v1671_v16 = vsel %vm1633_vm4, %v1360_v63, %v1670_v45  ;;  %v9410_v63 = vld [vmem:[#allocation2 + $0x248] sm:$0xff] }
 0x152   :  { %v1741_v28 = vsel %vm1633_vm4, %v1440_v15, %v1740_v2  ;;  %v251_v41 = vunpack.c.h.bf16 %v9370_v48  ;;  %v261_v44 = vunpack.c.h.bf16 %v9372_v42  ;;  %v10958_v62 = vunpack.c.h.s8.bf16 %v9128_v46  ;;  %10961 = vst [vmem:[#allocation43_spill] sm:$0xff] %v9410_v63  ;;  %v9412_v15 = vld [vmem:[#allocation2 + $0x270] sm:$0xff] }
 0x153   :  { %v10959_v14 = vunpack.c.l.s8.bf16 %v9162_v10  ;;  %v1672_v21 = vsel %vm1635_vm5, %v1370_v55, %v1671_v16  ;;  %v1742_v37 = vsel %vm1635_vm5, %v1450_v25, %v1741_v28  ;;  %v271_v39 = vunpack.c.h.bf16 %v9382_v5 }
 0x154   :  { %4193 = vmatpush2.bf16.msra.mxu1 %v10958_v62  ;;  %v281_v32 = vunpack.c.h.bf16 %v9384_v60  ;;  %v10962_v30 = vunpack.c.l.s8.bf16 %v9121_v9  ;;  %v1673_v10 = vsel %vm1637_vm6, %v1380_v6, %v1672_v21  ;;  %v1743_v52 = vsel %vm1637_vm6, %v1460_v31, %v1742_v37 }
 0x155   :  { %4160 = vmatpush2.bf16.msra.mxu0 %v10959_v14  ;;  %v291_v55 = vunpack.c.h.bf16 %v9390_v40  ;;  %v1797_v29 = vrot.slane %v1673_v10, 7  ;;  %v1807_v27 = vrot.slane %v1743_v52, 7  ;;  %v1840_v4 = vrot.slane %v1673_v10, 1 }
 0x156   :  { %4194 = vmatprep.subr.bf16.mxu1 %v10962_v30  ;;  %v1850_v33 = vrot.slane %v1743_v52, 1  ;;  %v10963_v6 = vunpack.c.l.s8.bf16 %v9128_v46  ;;  %v10964_v21 = vunpack.c.h.s8.bf16 %v9136_v12  ;;  %v386_v25 = vrot.slane %v191_v13, 4 }
 0x157   :  { %v1820_v31 = vsel %vm1814_vm7, %v1797_v29, %v1807_v27  ;;  %v1830_v28 = vsel %vm1814_vm7, %v1807_v27, %v1797_v29  ;;  %v10965_v29 = vunpack.c.h.s8.bf16 %v9145_v11 }
 0x158   :  { %4195 = vmatpush2.bf16.msra.mxu1 %v10963_v6  ;;  %v1861_v62 = vsel %vm1855_vm8, %v1840_v4, %v1850_v33  ;;  %v1871_v14 = vsel %vm1855_vm8, %v1850_v33, %v1840_v4  ;;  %v1914_v37 = vsel %vm8559_vm9, -1e+30, %v1830_v28  ;;  %v1924_v46 = vsel %vm8571_vm10, -1e+30, %v1820_v31 }
 0x159   :  { %4196 = vmatprep.subr.bf16.mxu1 %v10964_v21  ;;  %v1958_v30 = vsel %vm8577_vm11, -1e+30, %v1861_v62  ;;  %v1934_v27 = vmax.f32 %v1914_v37, %v1673_v10  ;;  %v1944_v6 = vmax.f32 %v1924_v46, %v1743_v52  ;;  %v1968_v9 = vsel %vm8583_vm12, -1e+30, %v1871_v14 }
 0x15a   :  { %v1998_v4 = vsel %vm8559_vm9, 0.0, %v1830_v28  ;;  %v2008_v33 = vsel %vm8571_vm10, 0.0, %v1820_v31  ;;  %v2038_v16 = vsel %vm8577_vm11, 0.0, %v1861_v62  ;;  %v2048_v2 = vsel %vm8583_vm12, 0.0, %v1871_v14 }
 0x15b   :  { %v2018_v21 = vadd.f32 %v1998_v4, %v1673_v10  ;;  %v1978_v37 = vmax.f32 %v1934_v27, %v1958_v30  ;;  %v1988_v46 = vmax.f32 %v1944_v6, %v1968_v9  ;;  %v2028_v45 = vadd.f32 %v2008_v33, %v1743_v52 }
 0x15c   :  { %4197 = vmatpush2.bf16.msra.mxu1 %v10965_v29  ;;  %v10966_v28 = vunpack.c.l.s8.bf16 %v9136_v12  ;;  %v446_v10 = vrot.slane %v201_v23, 4  ;;  %v506_v62 = vrot.slane %v211_v36, 4  ;;  %v566_v14 = vrot.slane %v221_v61, 4 }
 0x15d   :  { %v2058_v31 = vadd.f32 %v2038_v16, %v2018_v21  ;;  %v2068_v29 = vadd.f32 %v2048_v2, %v2028_v45  ;;  %v387_v52 = vadd.f32 %v386_v25, %v191_v13  ;;  %v626_v9 = vrot.slane %v231_v35, 4 }
 0x15e   :  { %4198 = vmatprep.subr.bf16.mxu1 %v10966_v28  ;;  %v686_v12 = vrot.slane %v241_v34, 4  ;;  %v447_v30 = vadd.f32 %v446_v10, %v201_v23  ;;  %v507_v27 = vadd.f32 %v506_v62, %v211_v36  ;;  %v567_v6 = vadd.f32 %v566_v14, %v221_v61 }
 0x15f   :  { %v2078_v16 = vmul.f32 0.33333334, %v2058_v31  ;;  %v10967_v45 = vunpack.c.l.s8.bf16 %v9145_v11  ;;  %v2088_v13 = vmul.f32 0.33333334, %v2068_v29  ;;  %v388_v25 = vrot.slane %v387_v52, 2 }
 0x160   :  { %v627_v2 = vadd.f32 %v626_v9, %v231_v35  ;;  %v687_v4 = vadd.f32 %v686_v12, %v241_v34  ;;  %v10968_v33 = vunpack.c.h.s8.bf16 %v9153_v0  ;;  %v448_v21 = vrot.slane %v447_v30, 2  ;;  %v10969_v9 = vld [vmem:[#allocation30_spill] sm:$0xff] }
 0x161   :  { %4199 = vmatpush2.bf16.msra.mxu1 %v10967_v45  ;;  %v2098_v23 = vadd.f32 %v2078_v16, %v1978_v37  ;;  %v508_v36 = vrot.slane %v507_v27, 2  ;;  %v568_v28 = vrot.slane %v567_v6, 2  ;;  %v2108_v31 = vadd.f32 %v2088_v13, %v1988_v46 }
 0x162   :  { %4200 = vmatprep.subr.bf16.mxu1 %v10968_v33  ;;  %v389_v61 = vadd.f32 %v388_v25, %v387_v52  ;;  %v628_v10 = vrot.slane %v627_v2, 2  ;;  %v688_v11 = vrot.slane %v687_v4, 2  ;;  %v449_v62 = vadd.f32 %v448_v21, %v447_v30 }
 0x163   :  { %v509_v14 = vadd.f32 %v508_v36, %v507_v27  ;;  %v569_v29 = vadd.f32 %v568_v28, %v567_v6  ;;  %v746_v35 = vrot.slane %v251_v41, 4  ;;  %v10970_v45 = vunpack.c.h.s8.bf16 %v10969_v9 }
 0x164   :  { %v9491_v34 = vpack.c.bf16 %v2108_v31, %v2098_v23  ;;  %v390_v12 = vrot.slane %v389_v61, 1  ;;  %v629_v37 = vadd.f32 %v628_v10, %v627_v2  ;;  %v689_v16 = vadd.f32 %v688_v11, %v687_v4 }
 0x165   :  { %4201 = vmatpush2.bf16.msra.mxu1 %v10970_v45  ;;  %v10972_v33 = vunpack.c.l.s8.bf16 %v9153_v0  ;;  %v450_v46 = vrot.slane %v449_v62, 1  ;;  %v510_v52 = vrot.slane %v509_v14, 1  ;;  %v570_v13 = vrot.slane %v569_v29, 1 }
 0x166   :  { %10971 = vst [vmem:[#allocation30_spill] sm:$0xff] %v9491_v34  ;;  %v747_v30 = vadd.f32 %v746_v35, %v251_v41  ;;  %4161 = vmatprep.mubr.bf16.mxu0 %v9491_v34  ;;  %v391_v27 = vadd.f32 %v390_v12, %v389_v61  ;;  %v630_v6 = vrot.slane %v629_v37, 1  ;;  %v690_v25 = vrot.slane %v689_v16, 1 }
 0x167   :  { %4202 = vmatprep.subr.bf16.mxu1 %v10972_v33  ;;  %v806_v23 = vrot.slane %v261_v44, 4  ;;  %v451_v21 = vadd.f32 %v450_v46, %v449_v62  ;;  %v511_v2 = vadd.f32 %v510_v52, %v509_v14  ;;  %v571_v4 = vadd.f32 %v570_v13, %v569_v29 }
 0x168   :  { %v748_v36 = vrot.slane %v747_v30, 2  ;;  %v10973_v0 = vunpack.c.l.s8.bf16 %v10969_v9  ;;  %v631_v28 = vadd.f32 %v630_v6, %v629_v37  ;;  %v691_v31 = vadd.f32 %v690_v25, %v689_v16 }
 0x169   :  { %v807_v41 = vadd.f32 %v806_v23, %v261_v44  ;;  %v866_v61 = vrot.slane %v271_v39, 4  ;;  %v926_v11 = vrot.slane %v281_v32, 4  ;;  %v986_v62 = vrot.slane %v291_v55, 4 }
 0x16a   :  { %4203 = vmatpush2.bf16.msra.mxu1 %v10973_v0  ;;  %v749_v10 = vadd.f32 %v748_v36, %v747_v30  ;;  %v10974_v14 = vunpack.c.h.bf16 %v9392_v49  ;;  %v10975_v45 = vunpack.c.h.bf16 %v9398_v26  ;;  %v10976_v12 = vunpack.c.h.bf16 %v9408_v20 }
 0x16b   :  { %v808_v35 = vrot.slane %v807_v41, 2  ;;  %v867_v9 = vadd.f32 %v866_v61, %v271_v39  ;;  %v927_v33 = vadd.f32 %v926_v11, %v281_v32  ;;  %v987_v46 = vadd.f32 %v986_v62, %v291_v55 }
 0x16c   :  { %v1046_v29 = vrot.slane %v10974_v14, 4  ;;  %v1106_v44 = vrot.slane %v10975_v45, 4  ;;  %v1166_v37 = vrot.slane %v10976_v12, 4  ;;  %v750_v16 = vrot.slane %v749_v10, 1 }
 0x16d   :  { %v10977_v52 = vmov %v10974_v14  ;;  %v809_v30 = vadd.f32 %v808_v35, %v807_v41  ;;  %v868_v6 = vrot.slane %v867_v9, 2  ;;  %v10978_v39 = vmov %v10975_v45 }
 0x16e   :  { %v1047_v13 = vadd.f32 %v1046_v29, %v10977_v52  ;;  %v1107_v25 = vadd.f32 %v1106_v44, %v10978_v39  ;;  %v10979_v23 = vmov %v10976_v12  ;;  %v751_v0 = vadd.f32 %v750_v16, %v749_v10 }
 0x16f   :  { %v1167_v36 = vadd.f32 %v1166_v37, %v10979_v23  ;;  %v928_v61 = vrot.slane %v927_v33, 2  ;;  %v988_v14 = vrot.slane %v987_v46, 2  ;;  %v810_v12 = vrot.slane %v809_v30, 1 }
 0x170   :  { %v1048_v45 = vrot.slane %v1047_v13, 2  ;;  %v869_v32 = vadd.f32 %v868_v6, %v867_v9  ;;  %v1108_v11 = vrot.slane %v1107_v25, 2  ;;  %v10980_v41 = vunpack.c.h.bf16 %v9410_v63 }
 0x171   :  { %v1168_v34 = vrot.slane %v1167_v36, 2  ;;  %v929_v55 = vadd.f32 %v928_v61, %v927_v33  ;;  %v989_v62 = vadd.f32 %v988_v14, %v987_v46  ;;  %v811_v35 = vadd.f32 %v810_v12, %v809_v30 }
 0x172   :  { %v1049_v49 = vadd.f32 %v1048_v45, %v1047_v13  ;;  %v1226_v29 = vrot.slane %v10980_v41, 4  ;;  %v870_v52 = vrot.slane %v869_v32, 1  ;;  %v1109_v44 = vadd.f32 %v1108_v11, %v1107_v25 }
 0x173   :  { %v1169_v39 = vadd.f32 %v1168_v34, %v1167_v36  ;;  %v930_v20 = vrot.slane %v929_v55, 1  ;;  %v990_v37 = vrot.slane %v989_v62, 1  ;;  %v10981_v16 = vmov %v10980_v41 }
 0x174   :  { %v1050_v10 = vrot.slane %v1049_v49, 1  ;;  %v1227_v23 = vadd.f32 %v1226_v29, %v10981_v16  ;;  %v871_v26 = vadd.f32 %v870_v52, %v869_v32  ;;  %v1110_v9 = vrot.slane %v1109_v44, 1 }
 0x175   :  { %v1170_v6 = vrot.slane %v1169_v39, 1  ;;  %v10982_v33 = vunpack.c.h.bf16 %v9412_v15  ;;  %v931_v13 = vadd.f32 %v930_v20, %v929_v55  ;;  %v991_v61 = vadd.f32 %v990_v37, %v989_v62 }
 0x176   :  { %v1051_v14 = vadd.f32 %v1050_v10, %v1049_v49  ;;  %v1228_v45 = vrot.slane %v1227_v23, 2  ;;  %v1111_v30 = vadd.f32 %v1110_v9, %v1109_v44  ;;  %v1312_v36 = vmul.f32 0.125, %v391_v27  ;;  %v10985_v9 = vld [vmem:[#allocation32_spill] sm:$0xff] }
 0x177   :  { %v1286_v46 = vrot.slane %v10982_v33, 4  ;;  %v1171_v12 = vadd.f32 %v1170_v6, %v1169_v39  ;;  %v10983_v34 = vmov %v10982_v33  ;;  %v1322_v41 = vmul.f32 0.125, %v451_v21 }
 0x178   :  { %v1229_v11 = vadd.f32 %v1228_v45, %v1227_v23  ;;  %v1332_v63 = vmul.f32 0.125, %v511_v2  ;;  %v1342_v29 = vmul.f32 0.125, %v571_v4  ;;  %v1352_v52 = vmul.f32 0.125, %v631_v28 }
 0x179   :  { %v1287_v25 = vadd.f32 %v1286_v46, %v10983_v34  ;;  %v1362_v16 = vmul.f32 0.125, %v691_v31  ;;  %v1372_v40 = vmul.f32 0.125, %v751_v0  ;;  %v1382_v33 = vmul.f32 0.125, %v811_v35  ;;  %v10984_v31 = vld [vmem:[#allocation31_spill] sm:$0xff] }
 0x17a   :  { %v1230_v60 = vrot.slane %v1229_v11, 1  ;;  %v1392_v20 = vmul.f32 0.125, %v871_v26  ;;  %v1402_v55 = vmul.f32 0.125, %v931_v13  ;;  %v1412_v62 = vmul.f32 0.125, %v991_v61  ;;  %v10986_v61 = vld [vmem:[#allocation33_spill] sm:$0xff]  ;;  %v10988_v34 = vld [vmem:[#allocation35_spill] sm:$0xff] }
 0x17b   :  { %v1288_v32 = vrot.slane %v1287_v25, 2  ;;  %v1422_v44 = vmul.f32 0.125, %v1051_v14  ;;  %v1432_v39 = vmul.f32 0.125, %v1111_v30  ;;  %v1442_v10 = vmul.f32 0.125, %v1171_v12  ;;  %v10987_v30 = vld [vmem:[#allocation34_spill] sm:$0xff] }
 0x17c   :  { %v1231_v37 = vadd.f32 %v1230_v60, %v1229_v11  ;;  %v1681_v27 = vsel %vm1625_vm0, %v1322_v41, %v1312_v36  ;;  %v1751_v21 = vsel %vm1625_vm0, %v1402_v55, %v1392_v20  ;;  %v198_v0 = vunpack.c.l.bf16 %v10984_v31  ;;  %v10990_v20 = vld [vmem:[#allocation37_spill] sm:$0xff] }
 0x17d   :  { %v1289_v49 = vadd.f32 %v1288_v32, %v1287_v25  ;;  %v1682_v4 = vsel %vm1627_vm1, %v1332_v63, %v1681_v27  ;;  %v1752_v28 = vsel %vm1627_vm1, %v1412_v62, %v1751_v21  ;;  %v208_v6 = vunpack.c.l.bf16 %v10985_v9 }
 0x17e   :  { %v1452_v35 = vmul.f32 0.125, %v1231_v37  ;;  %v1683_v26 = vsel %vm1629_vm2, %v1342_v29, %v1682_v4  ;;  %v1753_v23 = vsel %vm1629_vm2, %v1422_v44, %v1752_v28  ;;  %v218_v14 = vunpack.c.l.bf16 %v10986_v61  ;;  %v10989_v29 = vld [vmem:[#allocation36_spill] sm:$0xff] }
 0x17f   :  { %v1290_v2 = vrot.slane %v1289_v49, 1  ;;  %v1684_v46 = vsel %vm1631_vm3, %v1352_v52, %v1683_v26  ;;  %v1754_v13 = vsel %vm1631_vm3, %v1432_v39, %v1753_v23  ;;  %v228_v12 = vunpack.c.l.bf16 %v10987_v30 }
 0x180   :  { %v1685_v63 = vsel %vm1633_vm4, %v1362_v16, %v1684_v46  ;;  %v1755_v45 = vsel %vm1633_vm4, %v1442_v10, %v1754_v13  ;;  %v238_v25 = vunpack.c.l.bf16 %v10988_v34  ;;  %v248_v32 = vunpack.c.l.bf16 %v10989_v29 }
 0x181   :  { %v1291_v60 = vadd.f32 %v1290_v2, %v1289_v49  ;;  %v1686_v11 = vsel %vm1635_vm5, %v1372_v40, %v1685_v63  ;;  %v1756_v41 = vsel %vm1635_vm5, %v1452_v35, %v1755_v45  ;;  %v258_v55 = vunpack.c.l.bf16 %v10990_v20 }
 0x182   :  { %v1687_v52 = vsel %vm1637_vm6, %v1382_v33, %v1686_v11  ;;  %v268_v49 = vunpack.c.l.bf16 %v9176_v56  ;;  %v278_v16 = vunpack.c.l.bf16 %v9178_v43  ;;  %v10991_v28 = vunpack.c.l.bf16 %v9155_v47 }
 0x183   :  { %v1462_v36 = vmul.f32 0.125, %v1291_v60  ;;  %v1799_v44 = vrot.slane %v1687_v52, 7  ;;  %v1842_v39 = vrot.slane %v1687_v52, 1  ;;  %v608_v2 = vrot.slane %v228_v12, 4 }
 0x184   :  { %v368_v31 = vrot.slane %v10991_v28, 4  ;;  %v10992_v61 = vmov %v10991_v28  ;;  %v668_v33 = vrot.slane %v238_v25, 4  ;;  %v10994_v20 = vunpack.c.l.bf16 %v9200_v18 }
 0x185   :  { %v1757_v62 = vsel %vm1637_vm6, %v1462_v36, %v1756_v41  ;;  %v609_v37 = vadd.f32 %v608_v2, %v228_v12 }
 0x186   :  { %v1809_v10 = vrot.slane %v1757_v62, 7  ;;  %v1852_v40 = vrot.slane %v1757_v62, 1  ;;  %v369_v63 = vadd.f32 %v368_v31, %v10992_v61  ;;  %v548_v61 = vrot.slane %v218_v14, 4 }
 0x188   :  { %v1822_v35 = vsel %vm1814_vm7, %v1799_v44, %v1809_v10  ;;  %v1832_v26 = vsel %vm1814_vm7, %v1809_v10, %v1799_v44  ;;  %v1863_v23 = vsel %vm1855_vm8, %v1842_v39, %v1852_v40  ;;  %v1873_v9 = vsel %vm1855_vm8, %v1852_v40, %v1842_v39 }
 0x189   :  { %v1916_v60 = vsel %vm8559_vm9, -1e+30, %v1832_v26  ;;  %v1926_v46 = vsel %vm8571_vm10, -1e+30, %v1822_v35  ;;  %v1960_v13 = vsel %vm8577_vm11, -1e+30, %v1863_v23  ;;  %v549_v21 = vadd.f32 %v548_v61, %v218_v14 }
 0x18a   :  { %v1936_v45 = vmax.f32 %v1916_v60, %v1687_v52  ;;  %v1946_v30 = vmax.f32 %v1926_v46, %v1757_v62  ;;  %v1970_v34 = vsel %vm8583_vm12, -1e+30, %v1873_v9  ;;  %v2000_v36 = vsel %vm8559_vm9, 0.0, %v1832_v26 }
 0x18b   :  { %v2010_v11 = vsel %vm8571_vm10, 0.0, %v1822_v35  ;;  %v2020_v41 = vadd.f32 %v2000_v36, %v1687_v52  ;;  %v2040_v44 = vsel %vm8577_vm11, 0.0, %v1863_v23  ;;  %v2050_v39 = vsel %vm8583_vm12, 0.0, %v1873_v9 }
 0x18c   :  { %v1980_v47 = vmax.f32 %v1936_v45, %v1960_v13  ;;  %v1990_v10 = vmax.f32 %v1946_v30, %v1970_v34  ;;  %v2030_v40 = vadd.f32 %v2010_v11, %v1757_v62  ;;  %v370_v28 = vrot.slane %v369_v63, 2 }
 0x18d   :  { %v2060_v31 = vadd.f32 %v2040_v44, %v2020_v41  ;;  %v428_v60 = vrot.slane %v198_v0, 4  ;;  %v488_v46 = vrot.slane %v208_v6, 4  ;;  %v669_v9 = vadd.f32 %v668_v33, %v238_v25 }
 0x18e   :  { %v2070_v4 = vadd.f32 %v2050_v39, %v2030_v40  ;;  %v371_v26 = vadd.f32 %v370_v28, %v369_v63  ;;  %v550_v30 = vrot.slane %v549_v21, 2  ;;  %v610_v41 = vrot.slane %v609_v37, 2 }
 0x18f   :  { %v2080_v35 = vmul.f32 0.33333334, %v2060_v31  ;;  %v429_v52 = vadd.f32 %v428_v60, %v198_v0  ;;  %v489_v36 = vadd.f32 %v488_v46, %v208_v6  ;;  %v670_v44 = vrot.slane %v669_v9, 2 }
 0x190   :  { %v2090_v23 = vmul.f32 0.33333334, %v2070_v4  ;;  %v372_v27 = vrot.slane %v371_v26, 1  ;;  %v551_v40 = vadd.f32 %v550_v30, %v549_v21  ;;  %v728_v0 = vrot.slane %v248_v32, 4 }
 0x191   :  { %v2100_v13 = vadd.f32 %v2080_v35, %v1980_v47  ;;  %v430_v45 = vrot.slane %v429_v52, 2  ;;  %v490_v62 = vrot.slane %v489_v36, 2  ;;  %v611_v14 = vadd.f32 %v610_v41, %v609_v37 }
 0x192   :  { %v2110_v34 = vadd.f32 %v2090_v23, %v1990_v10  ;;  %v9593_v11 = vadd.f32 %v372_v27, %v371_v26  ;;  %v671_v12 = vadd.f32 %v670_v44, %v669_v9  ;;  %v788_v25 = vrot.slane %v258_v55, 4 }
 0x193   :  { %v431_v63 = vadd.f32 %v430_v45, %v429_v52  ;;  %v491_v39 = vadd.f32 %v490_v62, %v489_v36  ;;  %v552_v4 = vrot.slane %v551_v40, 1  ;;  %v729_v27 = vadd.f32 %v728_v0, %v248_v32 }
 0x194   :  { %v9597_v6 = vpack.c.bf16 %v2110_v34, %v2100_v13  ;;  %v612_v47 = vrot.slane %v611_v14, 1  ;;  %v672_v21 = vrot.slane %v671_v12, 1  ;;  %v789_v10 = vadd.f32 %v788_v25, %v258_v55 }
 0x195   :  { %v432_v33 = vrot.slane %v431_v63, 1  ;;  %v492_v2 = vrot.slane %v491_v39, 1  ;;  %v848_v37 = vrot.slane %v268_v49, 4  ;;  %v553_v60 = vadd.f32 %v552_v4, %v551_v40 }
 0x196   :  { %10993 = vst [vmem:[#allocation31_spill] sm:$0xff] %v9597_v6  ;;  %4204 = vmatprep.mubr.bf16.mxu1 %v9597_v6  ;;  %v730_v46 = vrot.slane %v729_v27, 2  ;;  %v613_v61 = vadd.f32 %v612_v47, %v611_v14  ;;  %v673_v26 = vadd.f32 %v672_v21, %v671_v12  ;;  %v790_v35 = vrot.slane %v789_v10, 2 }
 0x197   :  { %v433_v28 = vadd.f32 %v432_v33, %v431_v63  ;;  %v493_v31 = vadd.f32 %v492_v2, %v491_v39  ;;  %v849_v29 = vadd.f32 %v848_v37, %v268_v49  ;;  %v908_v52 = vrot.slane %v278_v16, 4 }
 0x198   :  { %v731_v32 = vadd.f32 %v730_v46, %v729_v27  ;;  %v968_v55 = vrot.slane %v10994_v20, 4  ;;  %v10995_v36 = vunpack.c.l.bf16 %v9204_v17  ;;  %v791_v9 = vadd.f32 %v790_v35, %v789_v10 }
 0x199   :  { %v850_v13 = vrot.slane %v849_v29, 2  ;;  %v10996_v45 = vunpack.c.l.bf16 %v9206_v54  ;;  %v10997_v30 = vunpack.c.l.bf16 %v9208_v24  ;;  %v909_v49 = vadd.f32 %v908_v52, %v278_v16 }
 0x19a   :  { %v1028_v23 = vrot.slane %v10995_v36, 4  ;;  %v732_v56 = vrot.slane %v731_v32, 1  ;;  %v10998_v41 = vmov %v10994_v20  ;;  %v10999_v63 = vmov %v10995_v36 }
 0x19b   :  { %v1088_v62 = vrot.slane %v10996_v45, 4  ;;  %v1148_v34 = vrot.slane %v10997_v30, 4  ;;  %v969_v44 = vadd.f32 %v968_v55, %v10998_v41  ;;  %v792_v40 = vrot.slane %v791_v9, 1 }
 0x19c   :  { %v1029_v39 = vadd.f32 %v1028_v23, %v10999_v63  ;;  %v851_v0 = vadd.f32 %v850_v13, %v849_v29  ;;  %v11000_v14 = vmov %v10996_v45  ;;  %v11001_v25 = vmov %v10997_v30 }
 0x19d   :  { %v1089_v12 = vadd.f32 %v1088_v62, %v11000_v14  ;;  %v1149_v33 = vadd.f32 %v1148_v34, %v11001_v25  ;;  %v733_v2 = vadd.f32 %v732_v56, %v731_v32  ;;  %v910_v4 = vrot.slane %v909_v49, 2 }
 0x19e   :  { %v970_v27 = vrot.slane %v969_v44, 2  ;;  %v1030_v47 = vrot.slane %v1029_v39, 2  ;;  %v793_v43 = vadd.f32 %v792_v40, %v791_v9  ;;  %v852_v16 = vrot.slane %v851_v0, 1 }
 0x19f   :  { %v1090_v21 = vrot.slane %v1089_v12, 2  ;;  %v1150_v18 = vrot.slane %v1149_v33, 2  ;;  %v911_v10 = vadd.f32 %v910_v4, %v909_v49  ;;  %v11002_v46 = vunpack.c.l.bf16 %v9216_v50 }
 0x1a0   :  { %v971_v37 = vadd.f32 %v970_v27, %v969_v44  ;;  %v1031_v17 = vadd.f32 %v1030_v47, %v1029_v39  ;;  %v853_v29 = vadd.f32 %v852_v16, %v851_v0  ;;  %v11003_v24 = vunpack.c.l.bf16 %v9218_v58 }
 0x1a1   :  { %v1208_v35 = vrot.slane %v11002_v46, 4  ;;  %v1091_v54 = vadd.f32 %v1090_v21, %v1089_v12  ;;  %v1151_v52 = vadd.f32 %v1150_v18, %v1149_v33  ;;  %v912_v32 = vrot.slane %v911_v10, 1 }
 0x1a2   :  { %v1268_v20 = vrot.slane %v11003_v24, 4  ;;  %v972_v55 = vrot.slane %v971_v37, 1  ;;  %v1032_v36 = vrot.slane %v1031_v17, 1  ;;  %v11004_v23 = vmov %v11002_v46 }
 0x1a3   :  { %v1209_v9 = vadd.f32 %v1208_v35, %v11004_v23  ;;  %v1092_v13 = vrot.slane %v1091_v54, 1  ;;  %v1152_v45 = vrot.slane %v1151_v52, 1  ;;  %v11005_v62 = vmov %v11003_v24 }
 0x1a4   :  { %v1269_v30 = vadd.f32 %v1268_v20, %v11005_v62  ;;  %v1309_v34 = vmul.f32 0.125, %v9593_v11  ;;  %v913_v56 = vadd.f32 %v912_v32, %v911_v10  ;;  %v973_v49 = vadd.f32 %v972_v55, %v971_v37 }
 0x1a5   :  { %v1033_v41 = vadd.f32 %v1032_v36, %v1031_v17  ;;  %v1210_v44 = vrot.slane %v1209_v9, 2  ;;  %v1093_v63 = vadd.f32 %v1092_v13, %v1091_v54  ;;  %v1153_v39 = vadd.f32 %v1152_v45, %v1151_v52 }
 0x1a6   :  { %v1270_v40 = vrot.slane %v1269_v30, 2  ;;  %v1319_v0 = vmul.f32 0.125, %v433_v28  ;;  %v1329_v12 = vmul.f32 0.125, %v493_v31  ;;  %v1339_v25 = vmul.f32 0.125, %v553_v60 }
 0x1a7   :  { %v1211_v14 = vadd.f32 %v1210_v44, %v1209_v9  ;;  %v1349_v50 = vmul.f32 0.125, %v613_v61  ;;  %v1359_v4 = vmul.f32 0.125, %v673_v26  ;;  %v1369_v27 = vmul.f32 0.125, %v733_v2  ;;  %v11007_v44 = vld [vmem:[#allocation39_spill] sm:$0xff] }
 0x1a8   :  { %v1271_v33 = vadd.f32 %v1270_v40, %v1269_v30  ;;  %v1379_v47 = vmul.f32 0.125, %v793_v43  ;;  %v1389_v16 = vmul.f32 0.125, %v853_v29  ;;  %v1399_v21 = vmul.f32 0.125, %v913_v56 }
 0x1a9   :  { %v1212_v58 = vrot.slane %v1211_v14, 1  ;;  %v1409_v11 = vmul.f32 0.125, %v973_v49  ;;  %v1419_v10 = vmul.f32 0.125, %v1033_v41  ;;  %v1429_v37 = vmul.f32 0.125, %v1093_v63 }
 0x1aa   :  { %v1272_v18 = vrot.slane %v1271_v33, 1  ;;  %v1439_v17 = vmul.f32 0.125, %v1153_v39  ;;  %v1660_v35 = vsel %vm1625_vm0, %v1319_v0, %v1309_v34  ;;  %v1730_v28 = vsel %vm1625_vm0, %v1399_v21, %v1389_v16  ;;  %v11006_v34 = vld [vmem:[#allocation38_spill] sm:$0xff]  ;;  %v11008_v39 = vld [vmem:[#allocation40_spill] sm:$0xff]  ;;  %v11009_v0 = vld [vmem:[#allocation41_spill] sm:$0xff] }
 0x1ab   :  { %v1213_v46 = vadd.f32 %v1212_v58, %v1211_v14  ;;  %v190_v31 = vunpack.c.l.bf16 %v9350_v8  ;;  %v1661_v61 = vsel %vm1627_vm1, %v1329_v12, %v1660_v35  ;;  %v1731_v26 = vsel %vm1627_vm1, %v1409_v11, %v1730_v28  ;;  %v11010_v12 = vld [vmem:[#allocation42_spill] sm:$0xff]  ;;  %v11011_v21 = vld [vmem:[#allocation43_spill] sm:$0xff] }
 0x1ac   :  { %v1273_v60 = vadd.f32 %v1272_v18, %v1271_v33  ;;  %v200_v2 = vunpack.c.l.bf16 %v9352_v7  ;;  %v1662_v29 = vsel %vm1629_vm2, %v1339_v25, %v1661_v61  ;;  %v1732_v54 = vsel %vm1629_vm2, %v1419_v10, %v1731_v26 }
 0x1ad   :  { %v1449_v43 = vmul.f32 0.125, %v1213_v46  ;;  %v210_v52 = vunpack.c.l.bf16 %v9354_v59  ;;  %v1663_v20 = vsel %vm1631_vm3, %v1349_v50, %v1662_v29  ;;  %v1733_v32 = vsel %vm1631_vm3, %v1429_v37, %v1732_v54 }
 0x1ae   :  { %v1459_v24 = vmul.f32 0.125, %v1273_v60  ;;  %v220_v8 = vunpack.c.l.bf16 %v9356_v19  ;;  %v1664_v55 = vsel %vm1633_vm4, %v1359_v4, %v1663_v20  ;;  %v1734_v36 = vsel %vm1633_vm4, %v1439_v17, %v1733_v32 }
 0x1af   :  { %v230_v7 = vunpack.c.l.bf16 %v9360_v38  ;;  %v240_v23 = vunpack.c.l.bf16 %v9362_v22  ;;  %v1665_v9 = vsel %vm1635_vm5, %v1369_v27, %v1664_v55  ;;  %v1735_v13 = vsel %vm1635_vm5, %v1449_v43, %v1734_v36 }
 0x1b0   :  { %v250_v59 = vunpack.c.l.bf16 %v9370_v48  ;;  %v260_v45 = vunpack.c.l.bf16 %v9372_v42  ;;  %v1666_v62 = vsel %vm1637_vm6, %v1379_v47, %v1665_v9  ;;  %v1736_v19 = vsel %vm1637_vm6, %v1459_v24, %v1735_v13 }
 0x1b1   :  { %v270_v30 = vunpack.c.l.bf16 %v9382_v5  ;;  %v280_v56 = vunpack.c.l.bf16 %v11006_v34  ;;  %v1796_v49 = vrot.slane %v1666_v62, 7  ;;  %v1806_v38 = vrot.slane %v1736_v19, 7 }
 0x1b2   :  { %v1839_v41 = vrot.slane %v1666_v62, 1  ;;  %v1849_v22 = vrot.slane %v1736_v19, 1  ;;  %v290_v63 = vunpack.c.l.bf16 %v11007_v44  ;;  %v300_v40 = vunpack.c.l.bf16 %v11008_v39 }
 0x1b3   :  { %v310_v14 = vunpack.c.l.bf16 %v11009_v0  ;;  %v320_v25 = vunpack.c.l.bf16 %v11010_v12  ;;  %v1819_v50 = vsel %vm1814_vm7, %v1796_v49, %v1806_v38  ;;  %v1829_v33 = vsel %vm1814_vm7, %v1806_v38, %v1796_v49 }
 0x1b4   :  { %v1860_v4 = vsel %vm1855_vm8, %v1839_v41, %v1849_v22  ;;  %v1870_v27 = vsel %vm1855_vm8, %v1849_v22, %v1839_v41  ;;  %v1913_v47 = vsel %vm8559_vm9, -1e+30, %v1829_v33  ;;  %v1923_v58 = vsel %vm8571_vm10, -1e+30, %v1819_v50 }
 0x1b5   :  { %v1957_v16 = vsel %vm8577_vm11, -1e+30, %v1860_v4  ;;  %v330_v11 = vunpack.c.l.bf16 %v11011_v21  ;;  %v1933_v18 = vmax.f32 %v1913_v47, %v1666_v62  ;;  %v1943_v10 = vmax.f32 %v1923_v58, %v1736_v19 }
 0x1b6   :  { %v1967_v37 = vsel %vm8583_vm12, -1e+30, %v1870_v27  ;;  %v1997_v17 = vsel %vm8559_vm9, 0.0, %v1829_v33  ;;  %v2007_v46 = vsel %vm8571_vm10, 0.0, %v1819_v50  ;;  %v2037_v28 = vsel %vm8577_vm11, 0.0, %v1860_v4 }
 0x1b7   :  { %v2017_v35 = vadd.f32 %v1997_v17, %v1666_v62  ;;  %v2047_v60 = vsel %vm8583_vm12, 0.0, %v1870_v27  ;;  %v1977_v61 = vmax.f32 %v1933_v18, %v1957_v16  ;;  %v1987_v26 = vmax.f32 %v1943_v10, %v1967_v37 }
 0x1b8   :  { %v2027_v43 = vadd.f32 %v2007_v46, %v1736_v19  ;;  %v340_v29 = vunpack.c.l.bf16 %v9412_v15  ;;  %v380_v24 = vrot.slane %v190_v31, 4  ;;  %v440_v20 = vrot.slane %v200_v2, 4 }
 0x1b9   :  { %v2057_v54 = vadd.f32 %v2037_v28, %v2017_v35  ;;  %v500_v32 = vrot.slane %v210_v52, 4  ;;  %v560_v36 = vrot.slane %v220_v8, 4  ;;  %v620_v9 = vrot.slane %v230_v7, 4 }
 0x1ba   :  { %v2067_v55 = vadd.f32 %v2047_v60, %v2027_v43  ;;  %v680_v13 = vrot.slane %v240_v23, 4  ;;  %v381_v49 = vadd.f32 %v380_v24, %v190_v31  ;;  %v441_v38 = vadd.f32 %v440_v20, %v200_v2 }
 0x1bb   :  { %v2077_v62 = vmul.f32 0.33333334, %v2057_v54  ;;  %v501_v41 = vadd.f32 %v500_v32, %v210_v52  ;;  %v561_v50 = vadd.f32 %v560_v36, %v220_v8  ;;  %v621_v33 = vadd.f32 %v620_v9, %v230_v7 }
 0x1bc   :  { %v2087_v22 = vmul.f32 0.33333334, %v2067_v55  ;;  %v681_v4 = vadd.f32 %v680_v13, %v240_v23  ;;  %v382_v19 = vrot.slane %v381_v49, 2  ;;  %v442_v47 = vrot.slane %v441_v38, 2 }
 0x1bd   :  { %v2097_v27 = vadd.f32 %v2077_v62, %v1977_v61  ;;  %v502_v58 = vrot.slane %v501_v41, 2  ;;  %v562_v18 = vrot.slane %v561_v50, 2  ;;  %v622_v10 = vrot.slane %v621_v33, 2 }
 0x1be   :  { %v2107_v16 = vadd.f32 %v2087_v22, %v1987_v26  ;;  %v682_v37 = vrot.slane %v681_v4, 2  ;;  %v383_v17 = vadd.f32 %v382_v19, %v381_v49  ;;  %v443_v46 = vadd.f32 %v442_v47, %v441_v38 }
 0x1bf   :  { %v503_v35 = vadd.f32 %v502_v58, %v501_v41  ;;  %v740_v31 = vrot.slane %v250_v59, 4  ;;  %v563_v52 = vadd.f32 %v562_v18, %v561_v50  ;;  %v623_v8 = vadd.f32 %v622_v10, %v621_v33 }
 0x1c0   :  { %v9695_v2 = vpack.c.bf16 %v2107_v16, %v2097_v27  ;;  %v683_v7 = vadd.f32 %v682_v37, %v681_v4  ;;  %v384_v23 = vrot.slane %v383_v17, 1  ;;  %v444_v28 = vrot.slane %v443_v46, 1 }
 0x1c1   :  { %v504_v60 = vrot.slane %v503_v35, 1  ;;  %v741_v61 = vadd.f32 %v740_v31, %v250_v59  ;;  %v564_v26 = vrot.slane %v563_v52, 1  ;;  %v624_v43 = vrot.slane %v623_v8, 1 }
 0x1c2   :  { %11012 = vst [vmem:[#allocation32_spill] sm:$0xff] %v9695_v2  ;;  %4162 = vmatmul.mubr.bf16.vlgmr.msra.gmra.mxu0 %v9695_v2  ;;  %v684_v54 = vrot.slane %v683_v7, 1  ;;  %v800_v24 = vrot.slane %v260_v45, 4  ;;  %v385_v20 = vadd.f32 %v384_v23, %v383_v17  ;;  %v445_v32 = vadd.f32 %v444_v28, %v443_v46 }
 0x1c3   :  { %v505_v55 = vadd.f32 %v504_v60, %v503_v35  ;;  %v742_v36 = vrot.slane %v741_v61, 2  ;;  %v565_v9 = vadd.f32 %v564_v26, %v563_v52  ;;  %v625_v13 = vadd.f32 %v624_v43, %v623_v8 }
 0x1c4   :  { %v685_v62 = vadd.f32 %v684_v54, %v683_v7  ;;  %v801_v49 = vadd.f32 %v800_v24, %v260_v45  ;;  %v860_v59 = vrot.slane %v270_v30, 4  ;;  %v920_v38 = vrot.slane %v280_v56, 4 }
 0x1c5   :  { %v743_v48 = vadd.f32 %v742_v36, %v741_v61  ;;  %v980_v41 = vrot.slane %v290_v63, 4  ;;  %v1040_v50 = vrot.slane %v300_v40, 4  ;;  %v1100_v33 = vrot.slane %v310_v14, 4 }
 0x1c6   :  { %v802_v22 = vrot.slane %v801_v49, 2  ;;  %v1160_v42 = vrot.slane %v320_v25, 4  ;;  %v861_v4 = vadd.f32 %v860_v59, %v270_v30  ;;  %v921_v27 = vadd.f32 %v920_v38, %v280_v56 }
 0x1c7   :  { %v744_v45 = vrot.slane %v743_v48, 1  ;;  %v981_v19 = vadd.f32 %v980_v41, %v290_v63  ;;  %v1041_v58 = vadd.f32 %v1040_v50, %v300_v40  ;;  %v1101_v16 = vadd.f32 %v1100_v33, %v310_v14 }
 0x1c8   :  { %v803_v47 = vadd.f32 %v802_v22, %v801_v49  ;;  %v1161_v18 = vadd.f32 %v1160_v42, %v320_v25  ;;  %v862_v37 = vrot.slane %v861_v4, 2  ;;  %v922_v5 = vrot.slane %v921_v27, 2 }
 0x1c9   :  { %v745_v10 = vadd.f32 %v744_v45, %v743_v48  ;;  %v982_v30 = vrot.slane %v981_v19, 2  ;;  %v1042_v34 = vrot.slane %v1041_v58, 2  ;;  %v1102_v56 = vrot.slane %v1101_v16, 2 }
 0x1ca   :  { %v804_v17 = vrot.slane %v803_v47, 1  ;;  %v1162_v46 = vrot.slane %v1161_v18, 2  ;;  %v863_v44 = vadd.f32 %v862_v37, %v861_v4  ;;  %v923_v63 = vadd.f32 %v922_v5, %v921_v27  ;;  %v9736_v37 = vld [vmem:[#allocation5 + $0x198] sm:$0xff] }
 0x1cb   :  { %v983_v35 = vadd.f32 %v982_v30, %v981_v19  ;;  %v1220_v39 = vrot.slane %v330_v11, 4  ;;  %v1043_v0 = vadd.f32 %v1042_v34, %v1041_v58  ;;  %v1103_v14 = vadd.f32 %v1102_v56, %v1101_v16  ;;  %v2674_v19 = vld [vmem:[#allocation5 + $0x1188] sm:$0xff]  ;;  %v9744_v56 = vld [vmem:[#allocation5 + $0x190] sm:$0xff] }
 0x1cc   :  { %v805_v40 = vadd.f32 %v804_v17, %v803_v47  ;;  %v1163_v31 = vadd.f32 %v1162_v46, %v1161_v18  ;;  %v864_v12 = vrot.slane %v863_v44, 1  ;;  %v924_v25 = vrot.slane %v923_v63, 1 }
 0x1cd   :  { %v984_v52 = vrot.slane %v983_v35, 1  ;;  %v1221_v8 = vadd.f32 %v1220_v39, %v330_v11  ;;  %v1044_v7 = vrot.slane %v1043_v0, 1  ;;  %v1104_v23 = vrot.slane %v1103_v14, 1 }
 0x1ce   :  { %v1164_v28 = vrot.slane %v1163_v31, 1  ;;  %v1280_v60 = vrot.slane %v340_v29, 4  ;;  %v865_v61 = vadd.f32 %v864_v12, %v863_v44  ;;  %v925_v26 = vadd.f32 %v924_v25, %v923_v63 }
 0x1cf   :  { %v985_v43 = vadd.f32 %v984_v52, %v983_v35  ;;  %v1222_v54 = vrot.slane %v1221_v8, 2  ;;  %v1045_v24 = vadd.f32 %v1044_v7, %v1043_v0  ;;  %v1105_v36 = vadd.f32 %v1104_v23, %v1103_v14  ;;  %v2658_v14 = vld [vmem:[#allocation5 + $0x1108] sm:$0xff] }
 0x1d0   :  { %v1165_v49 = vadd.f32 %v1164_v28, %v1163_v31  ;;  %v1281_v48 = vadd.f32 %v1280_v60, %v340_v29  ;;  %v1311_v38 = vmul.f32 0.125, %v385_v20  ;;  %v1321_v21 = vmul.f32 0.125, %v445_v32 }
 0x1d1   :  { %v1223_v59 = vadd.f32 %v1222_v54, %v1221_v8  ;;  %v1331_v11 = vmul.f32 0.125, %v505_v55  ;;  %v1341_v22 = vmul.f32 0.125, %v565_v9  ;;  %v1351_v50 = vmul.f32 0.125, %v625_v13  ;;  %v2673_v55 = vld [vmem:[#allocation5 + $0x1180] sm:$0xff]  ;;  %v9753_v8 = vld [vmem:[#allocation5 + $0x118] sm:$0xff] }
 0x1d2   :  { %v1282_v41 = vrot.slane %v1281_v48, 2  ;;  %v1361_v33 = vmul.f32 0.125, %v685_v62  ;;  %v1371_v45 = vmul.f32 0.125, %v745_v10  ;;  %v1381_v4 = vmul.f32 0.125, %v805_v40 }
 0x1d3   :  { %v1224_v42 = vrot.slane %v1223_v59, 1  ;;  %v1391_v27 = vmul.f32 0.125, %v865_v61  ;;  %v1401_v58 = vmul.f32 0.125, %v925_v26  ;;  %v1411_v16 = vmul.f32 0.125, %v985_v43  ;;  %v2657_v61 = vld [vmem:[#allocation5 + $0x1100] sm:$0xff]  ;;  %v9758_v26 = vld [vmem:[#allocation5 + $0x110] sm:$0xff] }
 0x1d4   :  { %v1283_v47 = vadd.f32 %v1282_v41, %v1281_v48  ;;  %v1421_v18 = vmul.f32 0.125, %v1045_v24  ;;  %v1431_v29 = vmul.f32 0.125, %v1105_v36  ;;  %v1441_v20 = vmul.f32 0.125, %v1165_v49 }
 0x1d5   :  { %v1225_v15 = vadd.f32 %v1224_v42, %v1223_v59  ;;  %v1674_v32 = vsel %vm1625_vm0, %v1321_v21, %v1311_v38  ;;  %v1744_v62 = vsel %vm1625_vm0, %v1401_v58, %v1391_v27  ;;  %v3890_v10 = vunpack.c.h.s8.bf16 %v2674_v19 }
 0x1d6   :  { %v1284_v9 = vrot.slane %v1283_v47, 1  ;;  %v1675_v13 = vsel %vm1627_vm1, %v1331_v11, %v1674_v32  ;;  %v1745_v17 = vsel %vm1627_vm1, %v1411_v16, %v1744_v62  ;;  %v2868_v34 = vunpack.c.h.s8.bf16 %v9736_v37  ;;  %v9787_v32 = vld [vmem:[#allocation5 + $0x1080] sm:$0xff] }
 0x1d7   :  { %v1451_v5 = vmul.f32 0.125, %v1225_v15  ;;  %v1676_v30 = vsel %vm1629_vm2, %v1341_v22, %v1675_v13  ;;  %v1746_v63 = vsel %vm1629_vm2, %v1421_v18, %v1745_v17  ;;  %4215 = vmatprep.subr.bf16.mxu0 %v3890_v10  ;;  %v3889_v35 = vunpack.c.h.s8.bf16 %v2673_v55  ;;  %v9795_v10 = vld [vmem:[#allocation5 + $0x90] sm:$0xff] }
 0x1d8   :  { %v1285_v46 = vadd.f32 %v1284_v9, %v1283_v47  ;;  %v1677_v44 = vsel %vm1631_vm3, %v1351_v50, %v1676_v30  ;;  %v1747_v40 = vsel %vm1631_vm3, %v1431_v29, %v1746_v63  ;;  %4258 = vmatprep.subr.bf16.mxu1 %v2868_v34  ;;  %v3874_v0 = vunpack.c.l.s8.bf16 %v2674_v19 }
 0x1d9   :  { %v1678_v39 = vsel %vm1633_vm4, %v1361_v33, %v1677_v44  ;;  %v1748_v25 = vsel %vm1633_vm4, %v1441_v20, %v1747_v40  ;;  %4216 = vmatpush1.bf16.msra.mxu0 %v3889_v35  ;;  %v2867_v52 = vunpack.c.h.s8.bf16 %v9744_v56  ;;  %v2852_v28 = vunpack.c.l.s8.bf16 %v9736_v37  ;;  %v9785_v20 = vld [vmem:[#allocation5 + $0x98] sm:$0xff]  ;;  %v9917_v37 = vld [vmem:[#allocation2 + $0x200] sm:$0xff] }
 0x1da   :  { %v1461_v31 = vmul.f32 0.125, %v1285_v46  ;;  %v1679_v12 = vsel %vm1635_vm5, %v1371_v45, %v1678_v39  ;;  %v1749_v23 = vsel %vm1635_vm5, %v1451_v5, %v1748_v25  ;;  %4217 = vmatprep.subr.bf16.mxu0 %v3874_v0  ;;  %v3873_v60 = vunpack.c.l.s8.bf16 %v2673_v55  ;;  %v9799_v46 = vld [vmem:[#allocation5 + $0x1008] sm:$0xff]  ;;  %v9803_v40 = vld [vmem:[#allocation5 + $0x18] sm:$0xff]  ;;  %v9805_v0 = vld [vmem:[#allocation5 + $0x1000] sm:$0xff] }
 0x1db   :  { %v1680_v7 = vsel %vm1637_vm6, %v1381_v4, %v1679_v12  ;;  %v3858_v36 = vunpack.c.h.s8.bf16 %v2658_v14  ;;  %v2851_v59 = vunpack.c.l.s8.bf16 %v9744_v56  ;;  %v2836_v38 = vunpack.c.h.s8.bf16 %v9753_v8  ;;  %v9773_v4 = vld [vmem:[#allocation5 + $0x1088] sm:$0xff] }
 0x1dc   :  { %v1750_v43 = vsel %vm1637_vm6, %v1461_v31, %v1749_v23  ;;  %v1798_v54 = vrot.slane %v1680_v7, 7  ;;  %v1841_v24 = vrot.slane %v1680_v7, 1  ;;  %v3857_v21 = vunpack.c.h.s8.bf16 %v2657_v61  ;;  %v9925_v12 = vld [vmem:[#allocation2 + $0x228] sm:$0xff] }
 0x1dd   :  { %v1808_v49 = vrot.slane %v1750_v43, 7  ;;  %v1851_v48 = vrot.slane %v1750_v43, 1  ;;  %4218 = vmatpush1.bf16.msra.mxu0 %v3873_v60  ;;  %v3842_v41 = vunpack.c.l.s8.bf16 %v2658_v14  ;;  %v3841_v58 = vunpack.c.l.s8.bf16 %v2657_v61  ;;  %v9807_v14 = vld [vmem:[#allocation5 + $0x10] sm:$0xff]  ;;  %v9915_v61 = vld [vmem:[#allocation2 + $0x1d8] sm:$0xff] }
 0x1de   :  { %4219 = vmatprep.subr.bf16.mxu0 %v3858_v36  ;;  %v3826_v34 = vunpack.c.h.s8.bf16 %v9773_v4  ;;  %v3825_v39 = vunpack.c.h.s8.bf16 %v9787_v32  ;;  %v3810_v25 = vunpack.c.l.s8.bf16 %v9773_v4  ;;  %v3809_v60 = vunpack.c.l.s8.bf16 %v9787_v32 }
 0x1df   :  { %v1821_v50 = vsel %vm1814_vm7, %v1798_v54, %v1808_v49  ;;  %v1831_v33 = vsel %vm1814_vm7, %v1808_v49, %v1798_v54  ;;  %v1862_v42 = vsel %vm1855_vm8, %v1841_v24, %v1851_v48  ;;  %v1872_v45 = vsel %vm1855_vm8, %v1851_v48, %v1841_v24  ;;  %v9815_v54 = vld [vmem:[#allocation5 + $0x1388] sm:$0xff]  ;;  %v9817_v24 = vld [vmem:[#allocation5 + $0x398] sm:$0xff]  ;;  %v9886_v49 = vld [vmem:[#allocation2 + $0x160] sm:$0xff] }
 0x1e0   :  { %v1915_v27 = vsel %vm8559_vm9, -1e+30, %v1831_v33  ;;  %v1925_v19 = vsel %vm8571_vm10, -1e+30, %v1821_v50  ;;  %v1959_v47 = vsel %vm8577_vm11, -1e+30, %v1862_v42  ;;  %v3793_v48 = vunpack.c.h.s8.bf16 %v9805_v0 }
 0x1e1   :  { %v1935_v16 = vmax.f32 %v1915_v27, %v1680_v7  ;;  %v1945_v18 = vmax.f32 %v1925_v19, %v1750_v43  ;;  %v1969_v15 = vsel %vm8583_vm12, -1e+30, %v1872_v45  ;;  %v1999_v29 = vsel %vm8559_vm9, 0.0, %v1831_v33  ;;  %4220 = vmatpush1.bf16.msra.mxu0 %v3857_v21  ;;  %v9829_v27 = vld [vmem:[#allocation5 + $0x1308] sm:$0xff] }
 0x1e2   :  { %v2009_v55 = vsel %vm8571_vm10, 0.0, %v1821_v50  ;;  %v2019_v9 = vadd.f32 %v1999_v29, %v1680_v7  ;;  %v2039_v13 = vsel %vm8577_vm11, 0.0, %v1862_v42  ;;  %v2049_v62 = vsel %vm8583_vm12, 0.0, %v1872_v45  ;;  %4221 = vmatprep.subr.bf16.mxu0 %v3842_v41  ;;  %v9822_v41 = vld [vmem:[#allocation5 + $0x1380] sm:$0xff]  ;;  %v9824_v50 = vld [vmem:[#allocation5 + $0x390] sm:$0xff]  ;;  %v9908_v21 = vld [vmem:[#allocation2 + $0x188] sm:$0xff] }
 0x1e3   :  { %v1979_v5 = vmax.f32 %v1935_v16, %v1959_v47  ;;  %v2029_v30 = vadd.f32 %v2009_v55, %v1750_v43  ;;  %v1989_v44 = vmax.f32 %v1945_v18, %v1969_v15  ;;  %v3794_v43 = vunpack.c.h.s8.bf16 %v9799_v46  ;;  %v9834_v18 = vld [vmem:[#allocation5 + $0x318] sm:$0xff]  ;;  %v9836_v15 = vld [vmem:[#allocation5 + $0x1300] sm:$0xff]  ;;  %v9838_v29 = vld [vmem:[#allocation5 + $0x310] sm:$0xff] }
 0x1e4   :  { %v2059_v63 = vadd.f32 %v2039_v13, %v2019_v9  ;;  %v3778_v42 = vunpack.c.l.s8.bf16 %v9799_v46  ;;  %v9863_v13 = vld [vmem:[#allocation2 + $0x20] sm:$0xff]  ;;  %v9870_v47 = vld [vmem:[#allocation5 + $0x218] sm:$0xff]  ;;  %v11021_v4 = vunpack.c.l.s8.bf16 %v9753_v8  ;;  %v11022_v11 = vunpack.c.h.s8.bf16 %v9815_v54 }
 0x1e5   :  { %v2069_v31 = vadd.f32 %v2049_v62, %v2029_v30  ;;  %4222 = vmatpush1.bf16.msra.mxu0 %v3841_v58  ;;  %v9844_v62 = vld [vmem:[#allocation5 + $0x1288] sm:$0xff]  ;;  %11016 = vst [vmem:[#allocation36_spill] sm:$0xff] %v9870_v47  ;;  %v9872_v45 = vld [vmem:[#allocation5 + $0x1200] sm:$0xff]  ;;  %v9913_v30 = vld [vmem:[#allocation2 + $0x1b0] sm:$0xff]  ;;  %v11023_v57 = vunpack.c.l.s8.bf16 %v9758_v26  ;;  %v11024_v8 = vunpack.c.h.s8.bf16 %v9822_v41 }
 0x1e6   :  { %v2079_v23 = vmul.f32 0.33333334, %v2059_v63  ;;  %4223 = vmatprep.subr.bf16.mxu0 %v3826_v34  ;;  %v9851_v63 = vld [vmem:[#allocation5 + $0x298] sm:$0xff]  ;;  %v9896_v16 = vld [vmem:[#allocation2 + $0xc0] sm:$0xff] }
 0x1e7   :  { %v2089_v36 = vmul.f32 0.33333334, %v2069_v31  ;;  %11014 = vst [vmem:[#allocation34_spill] sm:$0xff] %v9851_v63  ;;  %v9855_v31 = vld [vmem:[#allocation5 + $0x290] sm:$0xff]  ;;  %v9894_v34 = vld [vmem:[#allocation2 + $0x98] sm:$0xff]  ;;  %v11018_v55 = vld [vmem:[#allocation26_spill] sm:$0xff]  ;;  %v233_v35 = vunpack.c.h.bf16 %v9896_v16  ;;  %v11054_v63 = vunpack.c.l.s8.bf16 %v9807_v14 }
 0x1e8   :  { %v2099_v33 = vadd.f32 %v2079_v23, %v1979_v5  ;;  %11015 = vst [vmem:[#allocation35_spill] sm:$0xff] %v9855_v31  ;;  %v9884_v23 = vld [vmem:[#allocation2 + $0x70] sm:$0xff]  ;;  %v223_v9 = vunpack.c.h.bf16 %v9894_v34 }
 0x1e9   :  { %v2109_v19 = vadd.f32 %v2089_v36, %v1989_v44  ;;  %4224 = vmatpush1.bf16.msra.mxu0 %v3825_v39  ;;  %v9853_v39 = vld [vmem:[#allocation5 + $0x1280] sm:$0xff]  ;;  %v9898_v36 = vld [vmem:[#allocation2 + $0xe8] sm:$0xff]  ;;  %v9927_v44 = vld [vmem:[#allocation2 + $0x250] sm:$0xff]  ;;  %v213_v7 = vunpack.c.h.bf16 %v9884_v23  ;;  %v638_v6 = vrot.slane %v233_v35, 4 }
 0x1ea   :  { %4225 = vmatprep.subr.bf16.mxu0 %v3810_v25  ;;  %v9882_v25 = vld [vmem:[#allocation2 + $0x48] sm:$0xff]  ;;  %v243_v32 = vunpack.c.h.bf16 %v9898_v36  ;;  %v578_v58 = vrot.slane %v223_v9, 4 }
 0x1eb   :  { %v9846_v5 = vpack.c.bf16 %v2109_v19, %v2099_v33  ;;  %v9861_v19 = vld [vmem:[#allocation5 + $0x1208] sm:$0xff]  ;;  %v9874_v33 = vld [vmem:[#allocation5 + $0x210] sm:$0xff]  ;;  %v518_v17 = vrot.slane %v213_v7, 4 }
 0x1ec   :  { %11017 = vst [vmem:[#allocation37_spill] sm:$0xff] %v9874_v33  ;;  %v698_v22 = vrot.slane %v243_v32, 4  ;;  %v579_v31 = vadd.f32 %v578_v58, %v223_v9 }
 0x1ed   :  { %11013 = vst [vmem:[#allocation33_spill] sm:$0xff] %v9846_v5  ;;  %4205 = vmatmul.mubr.bf16.vlgmr.msra.gmra.mxu1 %v9846_v5  ;;  %4226 = vmatpush1.bf16.msra.mxu0 %v3809_v60  ;;  %v9906_v60 = vld [vmem:[#allocation2 + $0x138] sm:$0xff]  ;;  %v11020_v5 = vunpack.c.l.s8.bf16 %v9805_v0  ;;  %v519_v47 = vadd.f32 %v518_v17, %v213_v7 }
 0x1ee   :  { %4259 = vmatpush1.bf16.msra.mxu1 %v2867_v52  ;;  %4227 = vmatprep.subr.bf16.mxu0 %v3794_v43  ;;  %v9904_v52 = vld [vmem:[#allocation2 + $0x110] sm:$0xff]  ;;  %v203_v43 = vunpack.c.h.bf16 %v9882_v25  ;;  %v699_v53 = vadd.f32 %v698_v22, %v243_v32  ;;  %v9963_v7 = vld [vmem:[#allocation2 + $0x278] sm:$0xff] }
 0x1ef   :  { %4260 = vmatprep.subr.bf16.mxu1 %v2852_v28  ;;  %4290 = vmatprep.mubr.bf16.mxu1 %v11018_v55  ;;  %v193_v28 = vunpack.c.h.bf16 %v9863_v13  ;;  %v11019_v55 = vunpack.c.h.s8.bf16 %v9758_v26  ;;  %11027 = vst [vmem:[#allocation38_spill] sm:$0xff] %v9963_v7 }
 0x1f0   :  { %v458_v56 = vrot.slane %v203_v43, 4 }
 0x1f1   :  { %4228 = vmatpush1.bf16.msra.mxu0 %v3793_v48  ;;  %v263_v48 = vunpack.c.h.bf16 %v9906_v60 }
 0x1f2   :  { %4261 = vmatpush1.bf16.msra.mxu1 %v2851_v59  ;;  %4229 = vmatprep.subr.bf16.mxu0 %v3778_v42  ;;  %v253_v59 = vunpack.c.h.bf16 %v9904_v52  ;;  %v398_v42 = vrot.slane %v193_v28, 4  ;;  %v459_v46 = vadd.f32 %v458_v56, %v203_v43  ;;  %v700_v43 = vrot.slane %v699_v53, 2 }
 0x1f3   :  { %4262 = vmatprep.subr.bf16.mxu1 %v2836_v38  ;;  %v818_v33 = vrot.slane %v263_v48, 4  ;;  %v11025_v56 = vunpack.c.h.s8.bf16 %v9785_v20 }
 0x1f4   :  { %v399_v38 = vadd.f32 %v398_v42, %v193_v28  ;;  %v758_v2 = vrot.slane %v253_v59, 4  ;;  %v701_v32 = vadd.f32 %v700_v43, %v699_v53  ;;  %v11028_v42 = vunpack.c.h.s8.bf16 %v9795_v10 }
 0x1f5   :  { %4230 = vmatpush1.bf16.msra.mxu0 %v11020_v5  ;;  %v460_v5 = vrot.slane %v459_v46, 2  ;;  %v819_v51 = vadd.f32 %v818_v33, %v263_v48  ;;  %v11031_v53 = vunpack.c.h.s8.bf16 %v9829_v27  ;;  %v11032_v43 = vunpack.c.h.bf16 %v9886_v49 }
 0x1f6   :  { %4263 = vmatpush1.bf16.msra.mxu1 %v11019_v55  ;;  %4231 = vmatprep.subr.bf16.mxu0 %v11022_v11  ;;  %v639_v55 = vadd.f32 %v638_v6, %v233_v35  ;;  %v400_v0 = vrot.slane %v399_v38, 2  ;;  %v759_v3 = vadd.f32 %v758_v2, %v253_v59  ;;  %v580_v11 = vrot.slane %v579_v31, 2 }
 0x1f7   :  { %4264 = vmatprep.subr.bf16.mxu1 %v11021_v4  ;;  %v520_v4 = vrot.slane %v519_v47, 2  ;;  %v11026_v6 = vunpack.c.l.s8.bf16 %v9815_v54  ;;  %v461_v17 = vadd.f32 %v460_v5, %v459_v46  ;;  %v820_v35 = vrot.slane %v819_v51, 2 }
 0x1f8   :  { %v640_v28 = vrot.slane %v639_v55, 2  ;;  %v401_v22 = vadd.f32 %v400_v0, %v399_v38  ;;  %v760_v2 = vrot.slane %v759_v3, 2  ;;  %v581_v26 = vadd.f32 %v580_v11, %v579_v31 }
 0x1f9   :  { %4232 = vmatpush2.bf16.msra.mxu0 %v11024_v8  ;;  %v462_v33 = vrot.slane %v461_v17, 1  ;;  %v9965_v48 = vadd.f32 %v820_v35, %v819_v51  ;;  %v11029_v54 = vunpack.c.l.s8.bf16 %v9822_v41  ;;  %v702_v5 = vrot.slane %v701_v32, 1 }
 0x1fa   :  { %4265 = vmatpush1.bf16.msra.mxu1 %v11023_v57  ;;  %4233 = vmatprep.subr.bf16.mxu0 %v11026_v6  ;;  %v521_v57 = vadd.f32 %v520_v4, %v519_v47  ;;  %v641_v58 = vadd.f32 %v640_v28, %v639_v55  ;;  %v402_v9 = vrot.slane %v401_v22, 1  ;;  %v761_v59 = vadd.f32 %v760_v2, %v759_v3 }
 0x1fb   :  { %4266 = vmatprep.subr.bf16.mxu1 %v11025_v56  ;;  %v582_v46 = vrot.slane %v581_v26, 1  ;;  %v11030_v47 = vunpack.c.l.s8.bf16 %v9785_v20  ;;  %v343_v3 = vunpack.c.h.bf16 %v9963_v7  ;;  %v9978_v31 = vadd.f32 %v462_v33, %v461_v17 }
 0x1fc   :  { %v522_v38 = vrot.slane %v521_v57, 1  ;;  %v642_v0 = vrot.slane %v641_v58, 1  ;;  %v9976_v51 = vadd.f32 %v402_v9, %v401_v22  ;;  %v762_v55 = vrot.slane %v761_v59, 1 }
 0x1fd   :  { %4234 = vmatpush2.bf16.msra.mxu0 %v11029_v54  ;;  %v9982_v41 = vadd.f32 %v582_v46, %v581_v26  ;;  %v822_v11 = vrot.slane %v9965_v48, 1  ;;  %v9987_v20 = vadd.f32 %v702_v5, %v701_v32  ;;  %v878_v56 = vrot.slane %v11032_v43, 4 }
 0x1fe   :  { %4267 = vmatpush1.bf16.msra.mxu1 %v11028_v42  ;;  %4235 = vmatprep.subr.bf16.mxu0 %v11031_v53  ;;  %v9980_v8 = vadd.f32 %v522_v38, %v521_v57  ;;  %v9984_v4 = vadd.f32 %v642_v0, %v641_v58  ;;  %v9989_v28 = vadd.f32 %v762_v55, %v761_v59  ;;  %v11033_v6 = vunpack.c.h.bf16 %v9908_v21 }
 0x1ff   :  { %4268 = vmatprep.subr.bf16.mxu1 %v11030_v47  ;;  %v11034_v17 = vunpack.c.l.s8.bf16 %v9795_v10  ;;  %v11035_v2 = vunpack.c.h.s8.bf16 %v9836_v15  ;;  %v11036_v35 = vunpack.c.h.bf16 %v9913_v30  ;;  %v11037_v26 = vunpack.c.h.bf16 %v9915_v61 }
 0x200   :  { %v938_v22 = vrot.slane %v11033_v6, 4  ;;  %v11038_v32 = vunpack.c.h.bf16 %v9917_v37  ;;  %v11039_v33 = vunpack.c.h.bf16 %v9925_v12  ;;  %v11040_v42 = vunpack.c.h.s8.bf16 %v9803_v40 }
 0x201   :  { %4236 = vmatpush2.bf16.msra.mxu0 %v11035_v2  ;;  %v998_v57 = vrot.slane %v11036_v35, 4  ;;  %v1058_v58 = vrot.slane %v11037_v26, 4  ;;  %v11041_v10 = vunpack.c.l.s8.bf16 %v9829_v27  ;;  %v11042_v54 = vmov %v11032_v43 }
 0x202   :  { %4269 = vmatpush1.bf16.msra.mxu1 %v11034_v17  ;;  %v1118_v9 = vrot.slane %v11038_v32, 4  ;;  %v1178_v59 = vrot.slane %v11039_v33, 4  ;;  %v879_v38 = vadd.f32 %v878_v56, %v11042_v54  ;;  %v11043_v46 = vmov %v11033_v6 }
 0x203   :  { %4270 = vmatprep.subr.bf16.mxu1 %v11040_v42  ;;  %4237 = vmatprep.subr.bf16.mxu0 %v11041_v10  ;;  %v939_v0 = vadd.f32 %v938_v22, %v11043_v46  ;;  %v11044_v5 = vunpack.c.h.bf16 %v9927_v44  ;;  %v1298_v53 = vrot.slane %v343_v3, 4  ;;  %v11045_v55 = vmov %v11036_v35 }
 0x204   :  { %v999_v43 = vadd.f32 %v998_v57, %v11045_v55  ;;  %v11046_v6 = vmov %v11037_v26  ;;  %v11047_v2 = vmov %v11038_v32  ;;  %v11048_v35 = vmov %v11039_v33 }
 0x205   :  { %v1238_v47 = vrot.slane %v11044_v5, 4  ;;  %v1059_v17 = vadd.f32 %v1058_v58, %v11046_v6  ;;  %v1119_v27 = vadd.f32 %v1118_v9, %v11047_v2  ;;  %v1179_v26 = vadd.f32 %v1178_v59, %v11048_v35 }
 0x206   :  { %v880_v56 = vrot.slane %v879_v38, 2  ;;  %v940_v32 = vrot.slane %v939_v0, 2  ;;  %v11049_v22 = vmov %v11044_v5  ;;  %v1299_v42 = vadd.f32 %v1298_v53, %v343_v3 }
 0x207   :  { %v1239_v33 = vadd.f32 %v1238_v47, %v11049_v22  ;;  %v11050_v10 = vunpack.c.h.s8.bf16 %v9807_v14  ;;  %v11051_v57 = vunpack.c.l.s8.bf16 %v9836_v15  ;;  %v1000_v54 = vrot.slane %v999_v43, 2 }
 0x208   :  { %v1060_v58 = vrot.slane %v1059_v17, 2  ;;  %v1120_v46 = vrot.slane %v1119_v27, 2  ;;  %v1180_v5 = vrot.slane %v1179_v26, 2  ;;  %v11052_v9 = vunpack.c.l.s8.bf16 %v9803_v40 }
 0x209   :  { %4271 = vmatpush1.bf16.msra.mxu1 %v11050_v10  ;;  %4238 = vmatpush2.bf16.msra.mxu0 %v11051_v57  ;;  %v11053_v59 = vunpack.c.h.s8.bf16 %v9844_v62  ;;  %v881_v55 = vadd.f32 %v880_v56, %v879_v38  ;;  %v941_v6 = vadd.f32 %v940_v32, %v939_v0  ;;  %v1240_v47 = vrot.slane %v1239_v33, 2 }
 0x20a   :  { %4272 = vmatprep.subr.bf16.mxu1 %v11052_v9  ;;  %v1300_v3 = vrot.slane %v1299_v42, 2  ;;  %v1001_v53 = vadd.f32 %v1000_v54, %v999_v43  ;;  %v1061_v2 = vadd.f32 %v1060_v58, %v1059_v17  ;;  %v1121_v35 = vadd.f32 %v1120_v46, %v1119_v27 }
 0x20b   :  { %4239 = vmatprep.subr.bf16.mxu0 %v11053_v59  ;;  %v1181_v22 = vadd.f32 %v1180_v5, %v1179_v26  ;;  %v882_v15 = vrot.slane %v881_v55, 1  ;;  %v942_v10 = vrot.slane %v941_v6, 1  ;;  %v1241_v57 = vadd.f32 %v1240_v47, %v1239_v33 }
 0x20c   :  { %v1301_v7 = vadd.f32 %v1300_v3, %v1299_v42  ;;  %v11055_v40 = vunpack.c.h.s8.bf16 %v9853_v39  ;;  %v1002_v9 = vrot.slane %v1001_v53, 1  ;;  %v1062_v59 = vrot.slane %v1061_v2, 1 }
 0x20d   :  { %4273 = vmatpush1.bf16.msra.mxu1 %v11054_v63  ;;  %v1122_v38 = vrot.slane %v1121_v35, 1  ;;  %v1182_v0 = vrot.slane %v1181_v22, 1  ;;  %v11056_v56 = vunpack.c.h.s8.bf16 %v9817_v24  ;;  %v11057_v43 = vunpack.c.l.s8.bf16 %v9844_v62 }
 0x20e   :  { %4240 = vmatpush2.bf16.msra.mxu0 %v11055_v40  ;;  %v883_v17 = vadd.f32 %v882_v15, %v881_v55  ;;  %v943_v27 = vadd.f32 %v942_v10, %v941_v6  ;;  %v1242_v26 = vrot.slane %v1241_v57, 1  ;;  %v1302_v32 = vrot.slane %v1301_v7, 1 }
 0x20f   :  { %4274 = vmatprep.subr.bf16.mxu1 %v11056_v56  ;;  %4241 = vmatprep.subr.bf16.mxu0 %v11057_v43  ;;  %v823_v14 = vadd.f32 %v822_v11, %v9965_v48  ;;  %v1003_v63 = vadd.f32 %v1002_v9, %v1001_v53  ;;  %v1063_v33 = vadd.f32 %v1062_v59, %v1061_v2  ;;  %v1314_v46 = vmul.f32 0.125, %v9976_v51 }
 0x210   :  { %v1123_v42 = vadd.f32 %v1122_v38, %v1121_v35  ;;  %v1183_v54 = vadd.f32 %v1182_v0, %v1181_v22  ;;  %v1243_v58 = vadd.f32 %v1242_v26, %v1241_v57  ;;  %v1324_v5 = vmul.f32 0.125, %v9978_v31 }
 0x211   :  { %v11058_v47 = vunpack.c.h.s8.bf16 %v9824_v50  ;;  %v11059_v62 = vunpack.c.l.s8.bf16 %v9853_v39  ;;  %v1303_v55 = vadd.f32 %v1302_v32, %v1301_v7  ;;  %v1334_v6 = vmul.f32 0.125, %v9980_v8 }
 0x212   :  { %v1344_v48 = vmul.f32 0.125, %v9982_v41  ;;  %v1354_v11 = vmul.f32 0.125, %v9984_v4  ;;  %v11060_v3 = vunpack.c.l.s8.bf16 %v9817_v24  ;;  %v11061_v51 = vunpack.c.h.s8.bf16 %v9861_v19 }
 0x213   :  { %4275 = vmatpush2.bf16.msra.mxu1 %v11058_v47  ;;  %4242 = vmatpush2.bf16.msra.mxu0 %v11059_v62  ;;  %v1364_v31 = vmul.f32 0.125, %v9987_v20  ;;  %v1374_v53 = vmul.f32 0.125, %v9989_v28  ;;  %v1394_v2 = vmul.f32 0.125, %v883_v17  ;;  %v1404_v39 = vmul.f32 0.125, %v943_v27 }
 0x214   :  { %4276 = vmatprep.subr.bf16.mxu1 %v11060_v3  ;;  %4243 = vmatprep.subr.bf16.mxu0 %v11061_v51  ;;  %v1384_v35 = vmul.f32 0.125, %v823_v14  ;;  %v1414_v7 = vmul.f32 0.125, %v1003_v63  ;;  %v1424_v22 = vmul.f32 0.125, %v1063_v33  ;;  %v1434_v8 = vmul.f32 0.125, %v1123_v42 }
 0x215   :  { %v1444_v15 = vmul.f32 0.125, %v1183_v54  ;;  %v1454_v41 = vmul.f32 0.125, %v1243_v58  ;;  %v1695_v4 = vsel %vm1625_vm0, %v1324_v5, %v1314_v46  ;;  %v1765_v24 = vsel %vm1625_vm0, %v1404_v39, %v1394_v2 }
 0x216   :  { %v11062_v10 = vunpack.c.l.s8.bf16 %v9824_v50  ;;  %v11063_v57 = vunpack.c.h.s8.bf16 %v9872_v45  ;;  %v1464_v20 = vmul.f32 0.125, %v1303_v55  ;;  %v1696_v28 = vsel %vm1627_vm1, %v1334_v6, %v1695_v4 }
 0x217   :  { %v1766_v40 = vsel %vm1627_vm1, %v1414_v7, %v1765_v24  ;;  %v192_v9 = vunpack.c.l.bf16 %v9863_v13  ;;  %v11064_v59 = vunpack.c.h.s8.bf16 %v9834_v18  ;;  %v11065_v38 = vunpack.c.l.s8.bf16 %v9861_v19 }
 0x218   :  { %4277 = vmatpush2.bf16.msra.mxu1 %v11062_v10  ;;  %4244 = vmatpush2.bf16.msra.mxu0 %v11063_v57  ;;  %v1697_v0 = vsel %vm1629_vm2, %v1344_v48, %v1696_v28  ;;  %v1767_v50 = vsel %vm1629_vm2, %v1424_v22, %v1766_v40  ;;  %v202_v56 = vunpack.c.l.bf16 %v9882_v25  ;;  %v212_v43 = vunpack.c.l.bf16 %v9884_v23 }
 0x219   :  { %4278 = vmatprep.subr.bf16.mxu1 %v11064_v59  ;;  %4245 = vmatprep.subr.bf16.mxu0 %v11065_v38  ;;  %v1698_v17 = vsel %vm1631_vm3, %v1354_v11, %v1697_v0  ;;  %v1768_v27 = vsel %vm1631_vm3, %v1434_v8, %v1767_v50  ;;  %v222_v26 = vunpack.c.l.bf16 %v9894_v34  ;;  %v232_v32 = vunpack.c.l.bf16 %v9896_v16  ;;  %v10252_v0 = vpop.f32.mrf.mxu1 }
 0x21a   :  { %v1699_v14 = vsel %vm1633_vm4, %v1364_v31, %v1698_v17  ;;  %v1769_v19 = vsel %vm1633_vm4, %v1444_v15, %v1768_v27  ;;  %v242_v63 = vunpack.c.l.bf16 %v9898_v36  ;;  %v252_v33 = vunpack.c.l.bf16 %v9904_v52  ;;  %v10098_v31 = vld [vmem:[#allocation5 + $0x598] sm:$0xff] }
 0x21b   :  { %v11066_v42 = vunpack.c.h.s8.bf16 %v9838_v29  ;;  %v11067_v54 = vunpack.c.l.s8.bf16 %v9872_v45  ;;  %v1700_v58 = vsel %vm1635_vm5, %v1374_v53, %v1699_v14  ;;  %v1770_v34 = vsel %vm1635_vm5, %v1454_v41, %v1769_v19  ;;  %v11070_v41 = vld [vmem:[#allocation34_spill] sm:$0xff] }
 0x21c   :  { %v262_v46 = vunpack.c.l.bf16 %v9906_v60  ;;  %v272_v5 = vunpack.c.l.bf16 %v9886_v49  ;;  %v11068_v47 = vunpack.c.l.s8.bf16 %v9834_v18  ;;  %v1701_v62 = vsel %vm1637_vm6, %v1384_v35, %v1700_v58 }
 0x21d   :  { %4279 = vmatpush2.bf16.msra.mxu1 %v11066_v42  ;;  %4246 = vmatpush2.bf16.msra.mxu0 %v11067_v54  ;;  %v1771_v55 = vsel %vm1637_vm6, %v1464_v20, %v1770_v34  ;;  %v282_v6 = vunpack.c.l.bf16 %v9908_v21  ;;  %v292_v45 = vunpack.c.l.bf16 %v9913_v30  ;;  %v1801_v48 = vrot.slane %v1701_v62, 7  ;;  %v11076_v54 = vld [vmem:[#allocation35_spill] sm:$0xff] }
 0x21e   :  { %4280 = vmatprep.subr.bf16.mxu1 %v11068_v47  ;;  %v1811_v11 = vrot.slane %v1771_v55, 7  ;;  %v1844_v3 = vrot.slane %v1701_v62, 1  ;;  %v1854_v51 = vrot.slane %v1771_v55, 1  ;;  %v302_v53 = vunpack.c.l.bf16 %v9915_v61 }
 0x21f   :  { %v312_v2 = vunpack.c.l.bf16 %v9917_v37  ;;  %v322_v18 = vunpack.c.l.bf16 %v9925_v12  ;;  %v332_v39 = vunpack.c.l.bf16 %v9927_v44  ;;  %v11069_v35 = vunpack.c.l.s8.bf16 %v9838_v29 }
 0x220   :  { %v1824_v7 = vsel %vm1814_vm7, %v1801_v48, %v1811_v11  ;;  %v1834_v22 = vsel %vm1814_vm7, %v1811_v11, %v1801_v48  ;;  %v1865_v8 = vsel %vm1855_vm8, %v1844_v3, %v1854_v51  ;;  %v1875_v15 = vsel %vm1855_vm8, %v1854_v51, %v1844_v3 }
 0x221   :  { %4281 = vmatpush2.bf16.msra.mxu1 %v11069_v35  ;;  %v11071_v4 = vunpack.c.h.s8.bf16 %v11070_v41  ;;  %v1918_v10 = vsel %vm8559_vm9, -1e+30, %v1834_v22  ;;  %v1928_v57 = vsel %vm8571_vm10, -1e+30, %v1824_v7  ;;  %v1962_v28 = vsel %vm8577_vm11, -1e+30, %v1865_v8 }
 0x222   :  { %v3124_v40 = vunpack.c.h.s8.bf16 %v10098_v31  ;;  %v1938_v59 = vmax.f32 %v1918_v10, %v1701_v62  ;;  %v1948_v38 = vmax.f32 %v1928_v57, %v1771_v55  ;;  %v1972_v50 = vsel %vm8583_vm12, -1e+30, %v1875_v15 }
 0x223   :  { %4282 = vmatprep.subr.bf16.mxu1 %v11071_v4  ;;  %v2002_v17 = vsel %vm8559_vm9, 0.0, %v1834_v22  ;;  %v2012_v27 = vsel %vm8571_vm10, 0.0, %v1824_v7  ;;  %v2042_v19 = vsel %vm8577_vm11, 0.0, %v1865_v8  ;;  %v2052_v42 = vsel %vm8583_vm12, 0.0, %v1875_v15 }
 0x224   :  { %v2022_v14 = vadd.f32 %v2002_v17, %v1701_v62  ;;  %4301 = vmatprep.subr.bf16.mxu0 %v3124_v40  ;;  %v11077_v58 = vunpack.c.h.s8.bf16 %v11076_v54  ;;  %v1982_v34 = vmax.f32 %v1938_v59, %v1962_v28  ;;  %v1992_v47 = vmax.f32 %v1948_v38, %v1972_v50  ;;  %v11080_v38 = vld [vmem:[#allocation36_spill] sm:$0xff] }
 0x225   :  { %v2032_v48 = vadd.f32 %v2012_v27, %v1771_v55  ;;  %v392_v11 = vrot.slane %v192_v9, 4  ;;  %v11078_v3 = vunpack.c.l.s8.bf16 %v11070_v41  ;;  %v452_v51 = vrot.slane %v202_v56, 4 }
 0x226   :  { %4283 = vmatpush2.bf16.msra.mxu1 %v11077_v58  ;;  %v2062_v62 = vadd.f32 %v2042_v19, %v2022_v14  ;;  %v512_v35 = vrot.slane %v212_v43, 4  ;;  %v572_v7 = vrot.slane %v222_v26, 4  ;;  %v632_v55 = vrot.slane %v232_v32, 4 }
 0x227   :  { %4284 = vmatprep.subr.bf16.mxu1 %v11078_v3  ;;  %v2072_v22 = vadd.f32 %v2052_v42, %v2032_v48  ;;  %v393_v8 = vadd.f32 %v392_v11, %v192_v9  ;;  %v692_v15 = vrot.slane %v242_v63, 4  ;;  %v453_v4 = vadd.f32 %v452_v51, %v202_v56 }
 0x228   :  { %v2082_v41 = vmul.f32 0.33333334, %v2062_v62  ;;  %v513_v10 = vadd.f32 %v512_v35, %v212_v43  ;;  %v573_v57 = vadd.f32 %v572_v7, %v222_v26  ;;  %v11079_v28 = vunpack.c.l.s8.bf16 %v11076_v54  ;;  %v11085_v35 = vld [vmem:[#allocation38_spill] sm:$0xff] }
 0x229   :  { %v2092_v40 = vmul.f32 0.33333334, %v2072_v22  ;;  %v394_v13 = vrot.slane %v393_v8, 2  ;;  %v633_v9 = vadd.f32 %v632_v55, %v232_v32  ;;  %v693_v59 = vadd.f32 %v692_v15, %v242_v63  ;;  %v11082_v32 = vld [vmem:[#allocation37_spill] sm:$0xff] }
 0x22a   :  { %4285 = vmatpush2.bf16.msra.mxu1 %v11079_v28  ;;  %v11081_v50 = vunpack.c.h.s8.bf16 %v11080_v38  ;;  %v2102_v25 = vadd.f32 %v2082_v41, %v1982_v34  ;;  %v454_v56 = vrot.slane %v453_v4, 2  ;;  %v514_v17 = vrot.slane %v513_v10, 2 }
 0x22b   :  { %v574_v23 = vrot.slane %v573_v57, 2  ;;  %v2112_v43 = vadd.f32 %v2092_v40, %v1992_v47  ;;  %v395_v26 = vadd.f32 %v394_v13, %v393_v8  ;;  %v634_v27 = vrot.slane %v633_v9, 2 }
 0x22c   :  { %4286 = vmatprep.subr.bf16.mxu1 %v11081_v50  ;;  %v694_v14 = vrot.slane %v693_v59, 2  ;;  %v455_v19 = vadd.f32 %v454_v56, %v453_v4  ;;  %v515_v42 = vadd.f32 %v514_v17, %v513_v10  ;;  %v752_v16 = vrot.slane %v252_v33, 4 }
 0x22d   :  { %v575_v54 = vadd.f32 %v574_v23, %v573_v57  ;;  %v11083_v36 = vunpack.c.h.s8.bf16 %v11082_v32  ;;  %v10165_v63 = vpack.c.bf16 %v2112_v43, %v2102_v25  ;;  %v396_v58 = vrot.slane %v395_v26, 1 }
 0x22e   :  { %v635_v34 = vadd.f32 %v634_v27, %v633_v9  ;;  %v695_v48 = vadd.f32 %v694_v14, %v693_v59  ;;  %v11084_v11 = vunpack.c.l.s8.bf16 %v11080_v38  ;;  %v456_v47 = vrot.slane %v455_v19, 1 }
 0x22f   :  { %4287 = vmatpush2.bf16.msra.mxu1 %v11083_v36  ;;  %v516_v3 = vrot.slane %v515_v42, 1  ;;  %v576_v62 = vrot.slane %v575_v54, 1  ;;  %v753_v51 = vadd.f32 %v752_v16, %v252_v33  ;;  %4247 = vmatprep.mubr.bf16.mxu0 %v10165_v63  ;;  %v342_v7 = vunpack.c.l.bf16 %v11085_v35 }
 0x230   :  { %4288 = vmatprep.subr.bf16.mxu1 %v11084_v11  ;;  %v10173_v22 = vadd.f32 %v396_v58, %v395_v26  ;;  %v636_v8 = vrot.slane %v635_v34, 1  ;;  %v812_v55 = vrot.slane %v262_v46, 4  ;;  %v457_v15 = vadd.f32 %v456_v47, %v455_v19  ;;  %v11087_v26 = vld [vmem:[#allocation28_spill] sm:$0xff]  ;;  %v11088_v19 = vld [vmem:[#allocation30_spill] sm:$0xff] }
 0x231   :  { %v517_v41 = vadd.f32 %v516_v3, %v515_v42  ;;  %v696_v4 = vrot.slane %v695_v48, 1  ;;  %v754_v10 = vrot.slane %v753_v51, 2  ;;  %v11086_v57 = vunpack.c.l.s8.bf16 %v11082_v32 }
 0x232   :  { %v577_v28 = vadd.f32 %v576_v62, %v575_v54  ;;  %v637_v52 = vadd.f32 %v636_v8, %v635_v34  ;;  %v813_v33 = vadd.f32 %v812_v55, %v262_v46  ;;  %v872_v40 = vrot.slane %v272_v5, 4 }
 0x233   :  { %4289 = vmatpush2.bf16.msra.mxu1 %v11086_v57  ;;  %v755_v13 = vadd.f32 %v754_v10, %v753_v51  ;;  %v932_v9 = vrot.slane %v282_v6, 4  ;;  %v992_v59 = vrot.slane %v292_v45, 4  ;;  %v1052_v38 = vrot.slane %v302_v53, 4 }
 0x234   :  { %v814_v50 = vrot.slane %v813_v33, 2  ;;  %v873_v25 = vadd.f32 %v872_v40, %v272_v5  ;;  %v1112_v60 = vrot.slane %v312_v2, 4  ;;  %v1172_v46 = vrot.slane %v322_v18, 4 }
 0x235   :  { %v756_v56 = vrot.slane %v755_v13, 1  ;;  %v933_v17 = vadd.f32 %v932_v9, %v282_v6  ;;  %v993_v23 = vadd.f32 %v992_v59, %v292_v45  ;;  %v1053_v43 = vadd.f32 %v1052_v38, %v302_v53 }
 0x236   :  { %4291 = vmatmul.mubr.bf16.vlgmr.msra.gmra.mxu1 %v11087_v26  ;;  %v815_v49 = vadd.f32 %v814_v50, %v813_v33  ;;  %v874_v5 = vrot.slane %v873_v25, 2  ;;  %v1113_v27 = vadd.f32 %v1112_v60, %v312_v2  ;;  %v1173_v14 = vadd.f32 %v1172_v46, %v322_v18 }
 0x237   :  { %4376 = vmatprep.mubr.bf16.mxu1 %v11088_v19  ;;  %v697_v21 = vadd.f32 %v696_v4, %v695_v48  ;;  %v934_v6 = vrot.slane %v933_v17, 2  ;;  %v994_v42 = vrot.slane %v993_v23, 2  ;;  %v1054_v30 = vrot.slane %v1053_v43, 2 }
 0x238   :  { %v816_v45 = vrot.slane %v815_v49, 1  ;;  %v875_v54 = vadd.f32 %v874_v5, %v873_v25  ;;  %v1114_v61 = vrot.slane %v1113_v27, 2  ;;  %v1174_v53 = vrot.slane %v1173_v14, 2 }
 0x239   :  { %v935_v16 = vadd.f32 %v934_v6, %v933_v17  ;;  %v995_v32 = vadd.f32 %v994_v42, %v993_v23  ;;  %v1055_v36 = vadd.f32 %v1054_v30, %v1053_v43  ;;  %v1232_v37 = vrot.slane %v332_v39, 4  ;;  %v2420_v43 = vld [vmem:[#allocation5 + $0x998] sm:$0xff] }
 0x23a   :  { %v757_v2 = vadd.f32 %v756_v56, %v755_v13  ;;  %v876_v58 = vrot.slane %v875_v54, 1  ;;  %v1115_v12 = vadd.f32 %v1114_v61, %v1113_v27  ;;  %v1175_v18 = vadd.f32 %v1174_v53, %v1173_v14 }
 0x23b   :  { %v936_v34 = vrot.slane %v935_v16, 1  ;;  %v996_v11 = vrot.slane %v995_v32, 1  ;;  %v1056_v48 = vrot.slane %v1055_v36, 1  ;;  %v1233_v47 = vadd.f32 %v1232_v37, %v332_v39  ;;  %v2404_v37 = vld [vmem:[#allocation5 + $0x918] sm:$0xff] }
 0x23c   :  { %v817_v3 = vadd.f32 %v816_v45, %v815_v49  ;;  %v1116_v62 = vrot.slane %v1115_v12, 1  ;;  %v1176_v51 = vrot.slane %v1175_v18, 1  ;;  %v1292_v35 = vrot.slane %v342_v7, 4 }
 0x23d   :  { %v877_v8 = vadd.f32 %v876_v58, %v875_v54  ;;  %v937_v55 = vadd.f32 %v936_v34, %v935_v16  ;;  %v997_v4 = vadd.f32 %v996_v11, %v995_v32  ;;  %v1234_v10 = vrot.slane %v1233_v47, 2 }
 0x23e   :  { %v1057_v57 = vadd.f32 %v1056_v48, %v1055_v36  ;;  %v1117_v33 = vadd.f32 %v1116_v62, %v1115_v12  ;;  %v1177_v40 = vadd.f32 %v1176_v51, %v1175_v18  ;;  %v1293_v13 = vadd.f32 %v1292_v35, %v342_v7  ;;  %v2403_v62 = vld [vmem:[#allocation5 + $0x910] sm:$0xff] }
 0x23f   :  { %v1235_v9 = vadd.f32 %v1234_v10, %v1233_v47  ;;  %v1313_v59 = vmul.f32 0.125, %v10173_v22  ;;  %v1323_v38 = vmul.f32 0.125, %v457_v15  ;;  %v1333_v50 = vmul.f32 0.125, %v517_v41  ;;  %v2419_v15 = vld [vmem:[#allocation5 + $0x990] sm:$0xff] }
 0x240   :  { %v1294_v25 = vrot.slane %v1293_v13, 2  ;;  %v1343_v44 = vmul.f32 0.125, %v577_v28  ;;  %v1353_v39 = vmul.f32 0.125, %v637_v52  ;;  %v1363_v60 = vmul.f32 0.125, %v697_v21 }
 0x241   :  { %v1236_v46 = vrot.slane %v1235_v9, 1  ;;  %v1373_v56 = vmul.f32 0.125, %v757_v2  ;;  %v1393_v17 = vmul.f32 0.125, %v877_v8  ;;  %v1403_v23 = vmul.f32 0.125, %v937_v55 }
 0x242   :  { %v1295_v49 = vadd.f32 %v1294_v25, %v1293_v13  ;;  %v1413_v5 = vmul.f32 0.125, %v997_v4  ;;  %v1423_v27 = vmul.f32 0.125, %v1057_v57  ;;  %v1433_v14 = vmul.f32 0.125, %v1117_v33 }
 0x243   :  { %v1237_v6 = vadd.f32 %v1236_v46, %v1235_v9  ;;  %v1443_v7 = vmul.f32 0.125, %v1177_v40  ;;  %v1688_v42 = vsel %vm1625_vm0, %v1323_v38, %v1313_v59  ;;  %v1758_v22 = vsel %vm1625_vm0, %v1403_v23, %v1393_v17  ;;  %v2388_v59 = vld [vmem:[#allocation5 + $0x898] sm:$0xff] }
 0x244   :  { %v1296_v41 = vrot.slane %v1295_v49, 1  ;;  %v1689_v28 = vsel %vm1627_vm1, %v1333_v50, %v1688_v42  ;;  %v1759_v52 = vsel %vm1627_vm1, %v1413_v5, %v1758_v22  ;;  %v3380_v21 = vunpack.c.h.s8.bf16 %v2420_v43 }
 0x245   :  { %v1383_v30 = vmul.f32 0.125, %v817_v3  ;;  %v1453_v45 = vmul.f32 0.125, %v1237_v6  ;;  %v1690_v54 = vsel %vm1629_vm2, %v1343_v44, %v1689_v28  ;;  %v1760_v61 = vsel %vm1629_vm2, %v1423_v27, %v1759_v52  ;;  %v10250_v28 = vpop.f32.mrf.mxu0 }
 0x246   :  { %v1297_v53 = vadd.f32 %v1296_v41, %v1295_v49  ;;  %v1691_v16 = vsel %vm1631_vm3, %v1353_v39, %v1690_v54  ;;  %v1761_v32 = vsel %vm1631_vm3, %v1433_v14, %v1760_v61  ;;  %4344 = vmatprep.subr.bf16.mxu1 %v3380_v21  ;;  %v3379_v36 = vunpack.c.h.s8.bf16 %v2419_v15  ;;  %v2387_v14 = vld [vmem:[#allocation5 + $0x890] sm:$0xff]  ;;  %v2372_v21 = vld [vmem:[#allocation5 + $0x818] sm:$0xff] }
 0x247   :  { %v1692_v2 = vsel %vm1633_vm4, %v1363_v60, %v1691_v16  ;;  %v1762_v58 = vsel %vm1633_vm4, %v1443_v7, %v1761_v32  ;;  %v3364_v12 = vunpack.c.l.s8.bf16 %v2420_v43  ;;  %v3363_v47 = vunpack.c.l.s8.bf16 %v2419_v15  ;;  %v2291_v41 = vld [vmem:[#allocation5 + $0x590] sm:$0xff] }
 0x248   :  { %v1463_v18 = vmul.f32 0.125, %v1297_v53  ;;  %v1693_v34 = vsel %vm1635_vm5, %v1373_v56, %v1692_v2  ;;  %v1763_v11 = vsel %vm1635_vm5, %v1453_v45, %v1762_v58  ;;  %4345 = vmatpush1.bf16.msra.mxu1 %v3379_v36  ;;  %v3348_v3 = vunpack.c.h.s8.bf16 %v2404_v37  ;;  %v2371_v32 = vld [vmem:[#allocation5 + $0x810] sm:$0xff]  ;;  %v10257_v36 = vpop.f32.mrf.mxu0  ;;  %v2276_v2 = vld [vmem:[#allocation5 + $0x518] sm:$0xff] }
 0x249   :  { %v1694_v48 = vsel %vm1637_vm6, %v1383_v30, %v1693_v34  ;;  %4346 = vmatprep.subr.bf16.mxu1 %v3364_v12  ;;  %v3347_v10 = vunpack.c.h.s8.bf16 %v2403_v62  ;;  %v3332_v57 = vunpack.c.l.s8.bf16 %v2404_v37  ;;  %v3331_v44 = vunpack.c.l.s8.bf16 %v2403_v62  ;;  %v10259_v37 = vpop.f32.mrf.mxu1  ;;  %v2275_v34 = vld [vmem:[#allocation5 + $0x510] sm:$0xff] }
 0x24a   :  { %v1764_v51 = vsel %vm1637_vm6, %v1463_v18, %v1763_v11  ;;  %v1800_v35 = vrot.slane %v1694_v48, 7  ;;  %v1843_v8 = vrot.slane %v1694_v48, 1  ;;  %v3316_v27 = vunpack.c.h.s8.bf16 %v2388_v59 }
 0x24b   :  { %v1810_v55 = vrot.slane %v1764_v51, 7  ;;  %v1853_v4 = vrot.slane %v1764_v51, 1  ;;  %v3315_v29 = vunpack.c.h.s8.bf16 %v2387_v14  ;;  %v3300_v20 = vunpack.c.l.s8.bf16 %v2388_v59  ;;  %v2468_v59 = vld [vmem:[#allocation5 + $0xb18] sm:$0xff] }
 0x24c   :  { %4347 = vmatpush1.bf16.msra.mxu1 %v3363_v47  ;;  %v3123_v45 = vunpack.c.h.s8.bf16 %v2291_v41  ;;  %v3299_v54 = vunpack.c.l.s8.bf16 %v2387_v14  ;;  %v3108_v53 = vunpack.c.l.s8.bf16 %v10098_v31  ;;  %v3284_v16 = vunpack.c.h.s8.bf16 %v2372_v21  ;;  %v4081_v31 = vpop.f32.mrf.mxu0  ;;  %v2484_v47 = vld [vmem:[#allocation5 + $0xb98] sm:$0xff] }
 0x24d   :  { %v1823_v33 = vsel %vm1814_vm7, %v1800_v35, %v1810_v55  ;;  %v1833_v40 = vsel %vm1814_vm7, %v1810_v55, %v1800_v35  ;;  %v1864_v13 = vsel %vm1855_vm8, %v1843_v8, %v1853_v4  ;;  %v1874_v9 = vsel %vm1855_vm8, %v1853_v4, %v1843_v8  ;;  %4348 = vmatprep.subr.bf16.mxu1 %v3348_v3  ;;  %v11089_v3 = vld [vmem:[#allocation27_spill] sm:$0xff] }
 0x24e   :  { %v1917_v38 = vsel %vm8559_vm9, -1e+30, %v1833_v40  ;;  %v1927_v50 = vsel %vm8571_vm10, -1e+30, %v1823_v33  ;;  %v1961_v25 = vsel %vm8577_vm11, -1e+30, %v1864_v13  ;;  %v3107_v58 = vunpack.c.l.s8.bf16 %v2291_v41 }
 0x24f   :  { %v1937_v39 = vmax.f32 %v1917_v38, %v1694_v48  ;;  %v1947_v60 = vmax.f32 %v1927_v50, %v1764_v51  ;;  %v1971_v46 = vsel %vm8583_vm12, -1e+30, %v1874_v9  ;;  %v2001_v56 = vsel %vm8559_vm9, 0.0, %v1833_v40  ;;  %v2483_v4 = vld [vmem:[#allocation5 + $0xb90] sm:$0xff] }
 0x250   :  { %v2011_v17 = vsel %vm8571_vm10, 0.0, %v1823_v33  ;;  %v2021_v23 = vadd.f32 %v2001_v56, %v1694_v48  ;;  %v2041_v43 = vsel %vm8577_vm11, 0.0, %v1864_v13  ;;  %v2051_v49 = vsel %vm8583_vm12, 0.0, %v1874_v9  ;;  %4349 = vmatpush1.bf16.msra.mxu1 %v3347_v10  ;;  %v4124_v48 = vpop.f32.mrf.mxu1  ;;  %v2260_v10 = vld [vmem:[#allocation5 + $0x498] sm:$0xff]  ;;  %v2259_v13 = vld [vmem:[#allocation5 + $0x490] sm:$0xff] }
 0x251   :  { %v2031_v5 = vadd.f32 %v2011_v17, %v1764_v51  ;;  %4350 = vmatprep.subr.bf16.mxu1 %v3332_v57  ;;  %v1981_v6 = vmax.f32 %v1937_v39, %v1961_v25  ;;  %v1991_v42 = vmax.f32 %v1947_v60, %v1971_v46  ;;  %v3283_v12 = vunpack.c.h.s8.bf16 %v2371_v32  ;;  %v2467_v39 = vld [vmem:[#allocation5 + $0xb10] sm:$0xff]  ;;  %v2244_v60 = vld [vmem:[#allocation5 + $0x418] sm:$0xff] }
 0x252   :  { %v2061_v7 = vadd.f32 %v2041_v43, %v2021_v23  ;;  %v3092_v18 = vunpack.c.h.s8.bf16 %v2276_v2  ;;  %v3268_v11 = vunpack.c.l.s8.bf16 %v2372_v21  ;;  %v3091_v62 = vunpack.c.h.s8.bf16 %v2275_v34  ;;  %v2243_v23 = vld [vmem:[#allocation5 + $0x410] sm:$0xff] }
 0x253   :  { %v2071_v24 = vadd.f32 %v2051_v49, %v2031_v5  ;;  %v3267_v51 = vunpack.c.l.s8.bf16 %v2371_v32  ;;  %v10263_v35 = vadd.f32 %v4124_v48, %v4081_v31  ;;  %v3076_v8 = vunpack.c.l.s8.bf16 %v2276_v2  ;;  %v2452_v49 = vld [vmem:[#allocation5 + $0xa98] sm:$0xff] }
 0x254   :  { %v2081_v22 = vmul.f32 0.33333334, %v2061_v7  ;;  %4351 = vmatpush1.bf16.msra.mxu1 %v3331_v44  ;;  %v3508_v55 = vunpack.c.h.s8.bf16 %v2484_v47  ;;  %v3075_v57 = vunpack.c.l.s8.bf16 %v2275_v34  ;;  %v3507_v33 = vunpack.c.h.s8.bf16 %v2483_v4  ;;  %v2451_v7 = vld [vmem:[#allocation5 + $0xa90] sm:$0xff] }
 0x255   :  { %v2091_v15 = vmul.f32 0.33333334, %v2071_v24  ;;  %4352 = vmatprep.subr.bf16.mxu1 %v3316_v27  ;;  %v3060_v40 = vunpack.c.h.s8.bf16 %v2260_v10  ;;  %v3492_v9 = vunpack.c.l.s8.bf16 %v2484_v47  ;;  %v3059_v38 = vunpack.c.h.s8.bf16 %v2259_v13  ;;  %v2675_v47 = vld [vmem:[#allocation5 + $0x1190] sm:$0xff] }
 0x256   :  { %v2101_v52 = vadd.f32 %v2081_v22, %v1981_v6  ;;  %v3491_v50 = vunpack.c.l.s8.bf16 %v2483_v4  ;;  %v3044_v25 = vunpack.c.l.s8.bf16 %v2260_v10  ;;  %v3476_v44 = vunpack.c.h.s8.bf16 %v2468_v59  ;;  %v2323_v4 = vld [vmem:[#allocation5 + $0x690] sm:$0xff] }
 0x257   :  { %v2111_v30 = vadd.f32 %v2091_v15, %v1991_v42  ;;  %v3043_v46 = vunpack.c.l.s8.bf16 %v2259_v13  ;;  %v3475_v56 = vunpack.c.h.s8.bf16 %v2467_v39  ;;  %v3028_v17 = vunpack.c.h.s8.bf16 %v2244_v60  ;;  %v2356_v42 = vld [vmem:[#allocation5 + $0x798] sm:$0xff]  ;;  %v2355_v15 = vld [vmem:[#allocation5 + $0x790] sm:$0xff] }
 0x258   :  { %4353 = vmatpush1.bf16.msra.mxu1 %v3315_v29  ;;  %v3460_v43 = vunpack.c.l.s8.bf16 %v2468_v59  ;;  %v3027_v5 = vunpack.c.h.s8.bf16 %v2243_v23  ;;  %v3459_v27 = vunpack.c.l.s8.bf16 %v2467_v39  ;;  %v3012_v14 = vunpack.c.l.s8.bf16 %v2244_v60 }
 0x259   :  { %v10254_v61 = vpack.c.bf16 %v2111_v30, %v2101_v52  ;;  %4354 = vmatprep.subr.bf16.mxu1 %v3300_v20  ;;  %v3444_v6 = vunpack.c.h.s8.bf16 %v2452_v49  ;;  %v3011_v24 = vunpack.c.l.s8.bf16 %v2243_v23  ;;  %v3443_v22 = vunpack.c.h.s8.bf16 %v2451_v7  ;;  %v2436_v20 = vld [vmem:[#allocation5 + $0xa18] sm:$0xff] }
 0x25a   :  { %v3252_v29 = vunpack.c.h.s8.bf16 %v2356_v42  ;;  %v3428_v41 = vunpack.c.l.s8.bf16 %v2452_v49  ;;  %v3251_v52 = vunpack.c.h.s8.bf16 %v2355_v15  ;;  %v3427_v21 = vunpack.c.l.s8.bf16 %v2451_v7 }
 0x25b   :  { %4248 = vmatmul.mubr.bf16.vlgmr.msra.gmra.mxu0 %v10254_v61  ;;  %v3236_v30 = vunpack.c.l.s8.bf16 %v2356_v42  ;;  %v3875_v13 = vunpack.c.l.s8.bf16 %v2675_v47  ;;  %v3171_v39 = vunpack.c.l.s8.bf16 %v2323_v4  ;;  %v2643_v42 = vld [vmem:[#allocation5 + $0x1090] sm:$0xff] }
 0x25c   :  { %4302 = vmatpush1.bf16.msra.mxu0 %v3123_v45  ;;  %4355 = vmatpush1.bf16.msra.mxu1 %v3299_v54  ;;  %v3412_v45 = vunpack.c.h.s8.bf16 %v2436_v20  ;;  %v2435_v54 = vld [vmem:[#allocation5 + $0xa10] sm:$0xff] }
 0x25d   :  { %4303 = vmatprep.subr.bf16.mxu0 %v3108_v53  ;;  %4356 = vmatprep.subr.bf16.mxu1 %v3284_v16  ;;  %v2340_v53 = vld [vmem:[#allocation5 + $0x718] sm:$0xff]  ;;  %v3235_v16 = vunpack.c.l.s8.bf16 %v2355_v15  ;;  %v3411_v32 = vunpack.c.h.s8.bf16 %v2435_v54 }
 0x25e   :  { %4333 = vmatprep.mubr.bf16.mxu0 %v11089_v3  ;;  %v3220_v2 = vunpack.c.h.s8.bf16 %v2340_v53  ;;  %v3204_v31 = vunpack.c.l.s8.bf16 %v2340_v53  ;;  %v2532_v53 = vld [vmem:[#allocation5 + $0xd18] sm:$0xff] }
 0x260   :  { %4304 = vmatpush1.bf16.msra.mxu0 %v3107_v58  ;;  %4357 = vmatpush1.bf16.msra.mxu1 %v3283_v12  ;;  %v2339_v58 = vld [vmem:[#allocation5 + $0x710] sm:$0xff]  ;;  %v3396_v12 = vunpack.c.l.s8.bf16 %v2436_v20  ;;  %v2628_v20 = vld [vmem:[#allocation5 + $0x1018] sm:$0xff] }
 0x261   :  { %4305 = vmatprep.subr.bf16.mxu0 %v3092_v18  ;;  %4358 = vmatprep.subr.bf16.mxu1 %v3268_v11  ;;  %v2676_v18 = vld [vmem:[#allocation5 + $0x1198] sm:$0xff]  ;;  %v3219_v34 = vunpack.c.h.s8.bf16 %v2339_v58  ;;  %v3395_v11 = vunpack.c.l.s8.bf16 %v2435_v54  ;;  %v2627_v54 = vld [vmem:[#allocation5 + $0x1010] sm:$0xff] }
 0x262   :  { %v3892_v48 = vunpack.c.h.s8.bf16 %v2676_v18  ;;  %v3876_v10 = vunpack.c.l.s8.bf16 %v2676_v18  ;;  %v3780_v18 = vunpack.c.l.s8.bf16 %v2628_v20 }
 0x264   :  { %4306 = vmatpush1.bf16.msra.mxu0 %v3091_v62  ;;  %4359 = vmatpush1.bf16.msra.mxu1 %v3267_v51  ;;  %v2324_v62 = vld [vmem:[#allocation5 + $0x698] sm:$0xff]  ;;  %v3203_v51 = vunpack.c.l.s8.bf16 %v2339_v58  ;;  %v3604_v58 = vunpack.c.h.s8.bf16 %v2532_v53 }
 0x265   :  { %4307 = vmatprep.subr.bf16.mxu0 %v3076_v8  ;;  %4360 = vmatprep.subr.bf16.mxu1 %v3508_v55  ;;  %v3891_v8 = vunpack.c.h.s8.bf16 %v2675_v47  ;;  %v3188_v55 = vunpack.c.h.s8.bf16 %v2324_v62  ;;  %v3172_v59 = vunpack.c.l.s8.bf16 %v2324_v62  ;;  %v3588_v47 = vunpack.c.l.s8.bf16 %v2532_v53 }
 0x268   :  { %4308 = vmatpush1.bf16.msra.mxu0 %v3075_v57  ;;  %4361 = vmatpush2.bf16.msra.mxu1 %v3507_v33  ;;  %v2660_v57 = vld [vmem:[#allocation5 + $0x1118] sm:$0xff] }
 0x269   :  { %4309 = vmatprep.subr.bf16.mxu0 %v3060_v40  ;;  %4362 = vmatprep.subr.bf16.mxu1 %v3492_v9  ;;  %v11090_v33 = vld [vmem:[#allocation32_spill] sm:$0xff]  ;;  %v3187_v40 = vunpack.c.h.s8.bf16 %v2323_v4  ;;  %v10266_v9 = vpop.f32.mrf.mxu0  ;;  %v3844_v23 = vunpack.c.l.s8.bf16 %v2660_v57 }
 0x26c   :  { %4310 = vmatpush1.bf16.msra.mxu0 %v3059_v38  ;;  %4363 = vmatpush2.bf16.msra.mxu1 %v3491_v50  ;;  %v3860_v38 = vunpack.c.h.s8.bf16 %v2660_v57  ;;  %v2659_v50 = vld [vmem:[#allocation5 + $0x1110] sm:$0xff] }
 0x26d   :  { %4311 = vmatprep.subr.bf16.mxu0 %v3044_v25  ;;  %4364 = vmatprep.subr.bf16.mxu1 %v3476_v44  ;;  %v2308_v25 = vld [vmem:[#allocation5 + $0x618] sm:$0xff]  ;;  %v3859_v60 = vunpack.c.h.s8.bf16 %v2659_v50  ;;  %v2515_v57 = vld [vmem:[#allocation5 + $0xc90] sm:$0xff] }
 0x270   :  { %4312 = vmatpush1.bf16.msra.mxu0 %v3043_v46  ;;  %4365 = vmatpush2.bf16.msra.mxu1 %v3475_v56  ;;  %v3156_v56 = vunpack.c.h.s8.bf16 %v2308_v25 }
 0x271   :  { %4313 = vmatprep.subr.bf16.mxu0 %v3028_v17  ;;  %4366 = vmatprep.subr.bf16.mxu1 %v3460_v43  ;;  %v2307_v17 = vld [vmem:[#allocation5 + $0x610] sm:$0xff]  ;;  %v2644_v43 = vld [vmem:[#allocation5 + $0x1098] sm:$0xff] }
 0x272   :  { %v3828_v7 = vunpack.c.h.s8.bf16 %v2644_v43 }
 0x274   :  { %4314 = vmatpush1.bf16.msra.mxu0 %v3027_v5  ;;  %4367 = vmatpush2.bf16.msra.mxu1 %v3459_v27  ;;  %v3155_v27 = vunpack.c.h.s8.bf16 %v2307_v17 }
 0x275   :  { %4315 = vmatprep.subr.bf16.mxu0 %v3012_v14  ;;  %4368 = vmatprep.subr.bf16.mxu1 %v3444_v6  ;;  %v3843_v14 = vunpack.c.l.s8.bf16 %v2659_v50  ;;  %v3140_v6 = vunpack.c.l.s8.bf16 %v2308_v25 }
 0x278   :  { %4316 = vmatpush1.bf16.msra.mxu0 %v3011_v24  ;;  %4369 = vmatpush2.bf16.msra.mxu1 %v3443_v22  ;;  %v2548_v24 = vld [vmem:[#allocation5 + $0xd98] sm:$0xff]  ;;  %v3139_v22 = vunpack.c.l.s8.bf16 %v2307_v17 }
 0x279   :  { %4317 = vmatprep.subr.bf16.mxu0 %v3252_v29  ;;  %4370 = vmatprep.subr.bf16.mxu1 %v3428_v41  ;;  %v3827_v29 = vunpack.c.h.s8.bf16 %v2643_v42  ;;  %v3636_v15 = vunpack.c.h.s8.bf16 %v2548_v24  ;;  %v2547_v41 = vld [vmem:[#allocation5 + $0xd90] sm:$0xff] }
 0x27c   :  { %4318 = vmatpush2.bf16.msra.mxu0 %v3251_v52  ;;  %4371 = vmatpush2.bf16.msra.mxu1 %v3427_v21  ;;  %v3635_v52 = vunpack.c.h.s8.bf16 %v2547_v41  ;;  %v3811_v21 = vunpack.c.l.s8.bf16 %v2643_v42 }
 0x27d   :  { %4319 = vmatprep.subr.bf16.mxu0 %v3236_v30  ;;  %4372 = vmatprep.subr.bf16.mxu1 %v3412_v45  ;;  %v3620_v30 = vunpack.c.l.s8.bf16 %v2548_v24  ;;  %v3796_v45 = vunpack.c.h.s8.bf16 %v2628_v20 }
 0x280   :  { %4320 = vmatpush2.bf16.msra.mxu0 %v3235_v16  ;;  %4373 = vmatpush2.bf16.msra.mxu1 %v3411_v32  ;;  %v11091_v16 = vld [vmem:[#allocation29_spill] sm:$0xff]  ;;  %v3619_v32 = vunpack.c.l.s8.bf16 %v2547_v41  ;;  %v10281_v41 = vpop.f32.mrf.mxu1 }
 0x281   :  { %4321 = vmatprep.subr.bf16.mxu0 %v3220_v2  ;;  %4374 = vmatprep.subr.bf16.mxu1 %v3396_v12  ;;  %v3795_v2 = vunpack.c.h.s8.bf16 %v2627_v54  ;;  %v2531_v12 = vld [vmem:[#allocation5 + $0xd10] sm:$0xff] }
 0x282   :  { %v10269_v44 = vpop.f32.mrf.mxu0 }
 0x284   :  { %4322 = vmatpush2.bf16.msra.mxu0 %v3219_v34  ;;  %4375 = vmatpush2.bf16.msra.mxu1 %v3395_v11  ;;  %v10271_v46 = vpop.f32.mrf.mxu0  ;;  %v2740_v34 = vld [vmem:[#allocation5 + $0x1398] sm:$0xff]  ;;  %v11092_v11 = vld [vmem:[#allocation31_spill] sm:$0xff] }
 0x285   :  { %4323 = vmatprep.subr.bf16.mxu0 %v3204_v31  ;;  %4430 = vmatprep.subr.bf16.mxu1 %v3892_v48  ;;  %v3603_v31 = vunpack.c.h.s8.bf16 %v2531_v12  ;;  %v3779_v48 = vunpack.c.l.s8.bf16 %v2627_v54  ;;  %v4020_v62 = vunpack.c.h.s8.bf16 %v2740_v34 }
 0x286   :  { %v4167_v49 = vpop.f32.mrf.mxu0 }
 0x287   :  { %4377 = vmatmul.mubr.bf16.vlgmr.msra.gmra.mxu1 %v11090_v33  ;;  %v10274_v5 = vadd.f32 %v4167_v49, %v10263_v35  ;;  %v3812_v35 = vunpack.c.l.s8.bf16 %v2644_v43  ;;  %v2499_v43 = vld [vmem:[#allocation5 + $0xc10] sm:$0xff] }
 0x288   :  { %4324 = vmatpush2.bf16.msra.mxu0 %v3203_v51  ;;  %4431 = vmatpush1.bf16.msra.mxu1 %v3891_v8  ;;  %v2739_v51 = vld [vmem:[#allocation5 + $0x1390] sm:$0xff]  ;;  %v2516_v8 = vld [vmem:[#allocation5 + $0xc98] sm:$0xff] }
 0x289   :  { %4325 = vmatprep.subr.bf16.mxu0 %v3188_v55  ;;  %4432 = vmatprep.subr.bf16.mxu1 %v3876_v10  ;;  %v3587_v55 = vunpack.c.l.s8.bf16 %v2531_v12  ;;  %v4019_v4 = vunpack.c.h.s8.bf16 %v2739_v51  ;;  %v3572_v10 = vunpack.c.h.s8.bf16 %v2516_v8  ;;  %v3556_v50 = vunpack.c.l.s8.bf16 %v2516_v8  ;;  %v2294_v8 = vld [vmem:[#allocation5 + $0x5a8] sm:$0xff] }
 0x28a   :  { %4462 = vmatprep.mubr.bf16.mxu1 %v10165_v63 }
 0x28c   :  { %4326 = vmatpush2.bf16.msra.mxu0 %v3187_v40  ;;  %4433 = vmatpush1.bf16.msra.mxu1 %v3875_v13  ;;  %v4004_v40 = vunpack.c.l.s8.bf16 %v2740_v34  ;;  %v2724_v13 = vld [vmem:[#allocation5 + $0x1318] sm:$0xff] }
 0x28d   :  { %4327 = vmatprep.subr.bf16.mxu0 %v3172_v59  ;;  %4434 = vmatprep.subr.bf16.mxu1 %v3860_v38  ;;  %v3571_v59 = vunpack.c.h.s8.bf16 %v2515_v57  ;;  %v4003_v38 = vunpack.c.l.s8.bf16 %v2739_v51  ;;  %v3988_v25 = vunpack.c.h.s8.bf16 %v2724_v13  ;;  %v3972_v49 = vunpack.c.l.s8.bf16 %v2724_v13 }
 0x290   :  { %4328 = vmatpush2.bf16.msra.mxu0 %v3171_v39  ;;  %4435 = vmatpush1.bf16.msra.mxu1 %v3859_v60  ;;  %v2723_v39 = vld [vmem:[#allocation5 + $0x1310] sm:$0xff]  ;;  %v2500_v60 = vld [vmem:[#allocation5 + $0xc18] sm:$0xff] }
 0x291   :  { %4329 = vmatprep.subr.bf16.mxu0 %v3156_v56  ;;  %4436 = vmatprep.subr.bf16.mxu1 %v3844_v23  ;;  %v3555_v56 = vunpack.c.l.s8.bf16 %v2515_v57  ;;  %v3987_v17 = vunpack.c.h.s8.bf16 %v2723_v39  ;;  %v3540_v23 = vunpack.c.h.s8.bf16 %v2500_v60  ;;  %v3524_v42 = vunpack.c.l.s8.bf16 %v2500_v60 }
 0x292   :  { %v3126_v57 = vunpack.c.h.s8.bf16 %v2294_v8 }
 0x294   :  { %4330 = vmatpush2.bf16.msra.mxu0 %v3155_v27  ;;  %4437 = vmatpush1.bf16.msra.mxu1 %v3843_v14  ;;  %v2708_v27 = vld [vmem:[#allocation5 + $0x1298] sm:$0xff]  ;;  %v4121_v14 = vadd.f32 %v10252_v0, %v10250_v28  ;;  %v2611_v0 = vld [vmem:[#allocation5 + $0xf90] sm:$0xff] }
 0x295   :  { %4331 = vmatprep.subr.bf16.mxu0 %v3140_v6  ;;  %4438 = vmatprep.subr.bf16.mxu1 %v3828_v7  ;;  %v3539_v6 = vunpack.c.h.s8.bf16 %v2499_v43  ;;  %v3971_v7 = vunpack.c.l.s8.bf16 %v2723_v39  ;;  %v3956_v24 = vunpack.c.h.s8.bf16 %v2708_v27  ;;  %v3763_v53 = vunpack.c.h.s8.bf16 %v2611_v0  ;;  %v2278_v39 = vld [vmem:[#allocation5 + $0x528] sm:$0xff] }
 0x298   :  { %4332 = vmatpush2.bf16.msra.mxu0 %v3139_v22  ;;  %4439 = vmatpush1.bf16.msra.mxu1 %v3827_v29  ;;  %v2707_v22 = vld [vmem:[#allocation5 + $0x1290] sm:$0xff]  ;;  %v2612_v29 = vld [vmem:[#allocation5 + $0xf98] sm:$0xff] }
 0x299   :  { %4387 = vmatprep.subr.bf16.mxu0 %v3636_v15  ;;  %4440 = vmatprep.subr.bf16.mxu1 %v3812_v35  ;;  %v4164_v15 = vadd.f32 %v10269_v44, %v4121_v14  ;;  %v3523_v35 = vunpack.c.l.s8.bf16 %v2499_v43  ;;  %v3955_v20 = vunpack.c.h.s8.bf16 %v2707_v22  ;;  %v3764_v28 = vunpack.c.h.s8.bf16 %v2612_v29  ;;  %v2277_v43 = vld [vmem:[#allocation5 + $0x520] sm:$0xff] }
 0x29a   :  { %v3939_v44 = vunpack.c.l.s8.bf16 %v2707_v22  ;;  %v3093_v14 = vunpack.c.h.s8.bf16 %v2277_v43 }
 0x29b   :  { %4334 = vmatmul.mubr.bf16.vlgmr.msra.gmra.mxu0 %v11091_v16 }
 0x29c   :  { %4388 = vmatpush1.bf16.msra.mxu0 %v3635_v52  ;;  %4441 = vmatpush1.bf16.msra.mxu1 %v3811_v21  ;;  %v3940_v52 = vunpack.c.l.s8.bf16 %v2708_v27 }
 0x29d   :  { %4389 = vmatprep.subr.bf16.mxu0 %v3620_v30  ;;  %4442 = vmatprep.subr.bf16.mxu1 %v3796_v45  ;;  %v2692_v30 = vld [vmem:[#allocation5 + $0x1218] sm:$0xff] }
 0x29e   :  { %4419 = vmatprep.mubr.bf16.mxu0 %v11092_v11  ;;  %v3908_v51 = vunpack.c.l.s8.bf16 %v2692_v30 }
 0x2a0   :  { %4390 = vmatpush1.bf16.msra.mxu0 %v3619_v32  ;;  %4443 = vmatpush1.bf16.msra.mxu1 %v3795_v2  ;;  %v3748_v32 = vunpack.c.l.s8.bf16 %v2612_v29  ;;  %v3924_v2 = vunpack.c.h.s8.bf16 %v2692_v30  ;;  %v3077_v29 = vunpack.c.l.s8.bf16 %v2277_v43  ;;  %v2165_v30 = vld [vmem:[#allocation5 + $0x1a0] sm:$0xff] }
 0x2a1   :  { %4391 = vmatprep.subr.bf16.mxu0 %v3604_v58  ;;  %4444 = vmatprep.subr.bf16.mxu1 %v3780_v18  ;;  %v2691_v58 = vld [vmem:[#allocation5 + $0x1210] sm:$0xff]  ;;  %v2596_v18 = vld [vmem:[#allocation5 + $0xf18] sm:$0xff] }
 0x2a4   :  { %4392 = vmatpush1.bf16.msra.mxu0 %v3603_v31  ;;  %4445 = vmatpush1.bf16.msra.mxu1 %v3779_v48  ;;  %v3747_v31 = vunpack.c.l.s8.bf16 %v2611_v0  ;;  %v3923_v48 = vunpack.c.h.s8.bf16 %v2691_v58 }
 0x2a5   :  { %4393 = vmatprep.subr.bf16.mxu0 %v3588_v47  ;;  %4446 = vmatprep.subr.bf16.mxu1 %v4020_v62  ;;  %v3732_v47 = vunpack.c.h.s8.bf16 %v2596_v18  ;;  %v2595_v62 = vld [vmem:[#allocation5 + $0xf10] sm:$0xff] }
 0x2a6   :  { %v3715_v13 = vunpack.c.l.s8.bf16 %v2595_v62 }
 0x2a8   :  { %4394 = vmatpush1.bf16.msra.mxu0 %v3587_v55  ;;  %4447 = vmatpush2.bf16.msra.mxu1 %v4019_v4  ;;  %v3731_v55 = vunpack.c.h.s8.bf16 %v2595_v62  ;;  %v3907_v4 = vunpack.c.l.s8.bf16 %v2691_v58 }
 0x2a9   :  { %4395 = vmatprep.subr.bf16.mxu0 %v3572_v10  ;;  %4448 = vmatprep.subr.bf16.mxu1 %v4004_v40  ;;  %v3716_v10 = vunpack.c.l.s8.bf16 %v2596_v18  ;;  %v2580_v40 = vld [vmem:[#allocation5 + $0xe98] sm:$0xff]  ;;  %v2245_v18 = vld [vmem:[#allocation5 + $0x420] sm:$0xff] }
 0x2aa   :  { %v3029_v62 = vunpack.c.h.s8.bf16 %v2245_v18 }
 0x2ac   :  { %4396 = vmatpush1.bf16.msra.mxu0 %v3571_v59  ;;  %4449 = vmatpush2.bf16.msra.mxu1 %v4003_v38  ;;  %v3700_v38 = vunpack.c.h.s8.bf16 %v2580_v40 }
 0x2ad   :  { %4397 = vmatprep.subr.bf16.mxu0 %v3556_v50  ;;  %4450 = vmatprep.subr.bf16.mxu1 %v3988_v25  ;;  %v4206_v21 = vpop.f32.mrf.mxu1  ;;  %v2579_v50 = vld [vmem:[#allocation5 + $0xe90] sm:$0xff]  ;;  %v3110_v25 = vunpack.c.l.s8.bf16 %v2294_v8  ;;  %v2149_v8 = vld [vmem:[#allocation5 + $0x120] sm:$0xff] }
 0x2ae   :  { %v10283_v45 = vadd.f32 %v4206_v21, %v4164_v15  ;;  %v3699_v60 = vunpack.c.h.s8.bf16 %v2579_v50  ;;  %v3683_v27 = vunpack.c.l.s8.bf16 %v2579_v50  ;;  %v2821_v50 = vunpack.c.l.s8.bf16 %v2149_v8 }
 0x2af   :  { %v10285_v54 = vpop.f32.mrf.mxu1 }
 0x2b0   :  { %4398 = vmatpush1.bf16.msra.mxu0 %v3555_v56  ;;  %4451 = vmatpush2.bf16.msra.mxu1 %v3987_v17  ;;  %v3684_v17 = vunpack.c.l.s8.bf16 %v2580_v40 }
 0x2b1   :  { %4399 = vmatprep.subr.bf16.mxu0 %v3540_v23  ;;  %4452 = vmatprep.subr.bf16.mxu1 %v3972_v49  ;;  %v4210_v12 = vpop.f32.mrf.mxu1  ;;  %v3094_v23 = vunpack.c.h.s8.bf16 %v2278_v39  ;;  %v2564_v49 = vld [vmem:[#allocation5 + $0xe18] sm:$0xff] }
 0x2b2   :  { %v10288_v34 = vadd.f32 %v4210_v12, %v10274_v5  ;;  %v2293_v5 = vld [vmem:[#allocation5 + $0x5a0] sm:$0xff]  ;;  %v3652_v15 = vunpack.c.l.s8.bf16 %v2564_v49 }
 0x2b3   :  { %v3125_v59 = vunpack.c.h.s8.bf16 %v2293_v5  ;;  %v3109_v56 = vunpack.c.l.s8.bf16 %v2293_v5  ;;  %v3013_v5 = vunpack.c.l.s8.bf16 %v2245_v18 }
 0x2b4   :  { %4400 = vmatpush1.bf16.msra.mxu0 %v3539_v6  ;;  %4453 = vmatpush2.bf16.msra.mxu1 %v3971_v7  ;;  %v3668_v6 = vunpack.c.h.s8.bf16 %v2564_v49  ;;  %v2563_v7 = vld [vmem:[#allocation5 + $0xe10] sm:$0xff] }
 0x2b5   :  { %4401 = vmatprep.subr.bf16.mxu0 %v3524_v42  ;;  %4454 = vmatprep.subr.bf16.mxu1 %v3956_v24  ;;  %v3078_v42 = vunpack.c.l.s8.bf16 %v2278_v39  ;;  %v2262_v24 = vld [vmem:[#allocation5 + $0x4a8] sm:$0xff]  ;;  %v3667_v22 = vunpack.c.h.s8.bf16 %v2563_v7  ;;  %v3651_v0 = vunpack.c.l.s8.bf16 %v2563_v7 }
 0x2b8   :  { %4402 = vmatpush1.bf16.msra.mxu0 %v3523_v35  ;;  %4455 = vmatpush2.bf16.msra.mxu1 %v3955_v20  ;;  %v3062_v35 = vunpack.c.h.s8.bf16 %v2262_v24  ;;  %v2261_v20 = vld [vmem:[#allocation5 + $0x4a0] sm:$0xff] }
 0x2b9   :  { %4403 = vmatprep.subr.bf16.mxu0 %v3764_v28  ;;  %4456 = vmatprep.subr.bf16.mxu1 %v3940_v52  ;;  %v2166_v28 = vld [vmem:[#allocation5 + $0x1a8] sm:$0xff]  ;;  %v3061_v52 = vunpack.c.h.s8.bf16 %v2261_v20 }
 0x2ba   :  { %v2870_v21 = vunpack.c.h.s8.bf16 %v2166_v28  ;;  %v2854_v58 = vunpack.c.l.s8.bf16 %v2166_v28 }
 0x2bc   :  { %4404 = vmatpush2.bf16.msra.mxu0 %v3763_v53  ;;  %4457 = vmatpush2.bf16.msra.mxu1 %v3939_v44  ;;  %v3046_v53 = vunpack.c.l.s8.bf16 %v2262_v24  ;;  %v2246_v44 = vld [vmem:[#allocation5 + $0x428] sm:$0xff] }
 0x2bd   :  { %4405 = vmatprep.subr.bf16.mxu0 %v3748_v32  ;;  %4458 = vmatprep.subr.bf16.mxu1 %v3924_v2  ;;  %v2869_v32 = vunpack.c.h.s8.bf16 %v2165_v30  ;;  %v3045_v2 = vunpack.c.l.s8.bf16 %v2261_v20  ;;  %v3030_v12 = vunpack.c.h.s8.bf16 %v2246_v44 }
 0x2c0   :  { %4406 = vmatpush2.bf16.msra.mxu0 %v3747_v31  ;;  %4459 = vmatpush2.bf16.msra.mxu1 %v3923_v48  ;;  %v2150_v31 = vld [vmem:[#allocation5 + $0x128] sm:$0xff]  ;;  %v11093_v48 = vld [vmem:[#allocation33_spill] sm:$0xff] }
 0x2c1   :  { %4407 = vmatprep.subr.bf16.mxu0 %v3732_v47  ;;  %4460 = vmatprep.subr.bf16.mxu1 %v3908_v51  ;;  %v2853_v47 = vunpack.c.l.s8.bf16 %v2165_v30  ;;  %v2838_v51 = vunpack.c.h.s8.bf16 %v2150_v31  ;;  %v2822_v40 = vunpack.c.l.s8.bf16 %v2150_v31 }
 0x2c4   :  { %4408 = vmatpush2.bf16.msra.mxu0 %v3731_v55  ;;  %4461 = vmatpush2.bf16.msra.mxu1 %v3907_v4  ;;  %v3014_v55 = vunpack.c.l.s8.bf16 %v2246_v44  ;;  %v2358_v4 = vld [vmem:[#allocation5 + $0x7a8] sm:$0xff] }
 0x2c5   :  { %4409 = vmatprep.subr.bf16.mxu0 %v3716_v10  ;;  %4516 = vmatprep.subr.bf16.mxu1 %v3126_v57  ;;  %v11094_v10 = vld [vmem:[#allocation26_spill] sm:$0xff]  ;;  %v2837_v57 = vunpack.c.h.s8.bf16 %v2149_v8 }
 0x2c7   :  { %4463 = vmatmul.mubr.bf16.vlgmr.msra.gmra.mxu1 %v10254_v61 }
 0x2c8   :  { %4410 = vmatpush2.bf16.msra.mxu0 %v3715_v13  ;;  %4517 = vmatpush1.bf16.msra.mxu1 %v3125_v59  ;;  %v3254_v13 = vunpack.c.h.s8.bf16 %v2358_v4  ;;  %v2357_v59 = vld [vmem:[#allocation5 + $0x7a0] sm:$0xff] }
 0x2c9   :  { %4411 = vmatprep.subr.bf16.mxu0 %v3700_v38  ;;  %4518 = vmatprep.subr.bf16.mxu1 %v3110_v25  ;;  %v2134_v38 = vld [vmem:[#allocation5 + $0xa8] sm:$0xff]  ;;  %v3253_v25 = vunpack.c.h.s8.bf16 %v2357_v59  ;;  %v3237_v43 = vunpack.c.l.s8.bf16 %v2357_v59 }
 0x2ca   :  { %4548 = vmatprep.mubr.bf16.mxu1 %v11089_v3  ;;  %v2806_v39 = vunpack.c.h.s8.bf16 %v2134_v38  ;;  %v2790_v49 = vunpack.c.l.s8.bf16 %v2134_v38 }
 0x2cc   :  { %4412 = vmatpush2.bf16.msra.mxu0 %v3699_v60  ;;  %4519 = vmatpush1.bf16.msra.mxu1 %v3109_v56  ;;  %v2133_v60 = vld [vmem:[#allocation5 + $0xa0] sm:$0xff]  ;;  %v3238_v56 = vunpack.c.l.s8.bf16 %v2358_v4 }
 0x2cd   :  { %4413 = vmatprep.subr.bf16.mxu0 %v3684_v17  ;;  %4520 = vmatprep.subr.bf16.mxu1 %v3094_v23  ;;  %v2342_v17 = vld [vmem:[#allocation5 + $0x728] sm:$0xff]  ;;  %v2805_v23 = vunpack.c.h.s8.bf16 %v2133_v60  ;;  %v2789_v7 = vunpack.c.l.s8.bf16 %v2133_v60 }
 0x2d0   :  { %4414 = vmatpush2.bf16.msra.mxu0 %v3683_v27  ;;  %4521 = vmatpush1.bf16.msra.mxu1 %v3093_v14  ;;  %v3222_v27 = vunpack.c.h.s8.bf16 %v2342_v17  ;;  %v2341_v14 = vld [vmem:[#allocation5 + $0x720] sm:$0xff] }
 0x2d1   :  { %4415 = vmatprep.subr.bf16.mxu0 %v3668_v6  ;;  %4522 = vmatprep.subr.bf16.mxu1 %v3078_v42  ;;  %v2118_v6 = vld [vmem:[#allocation5 + $0x28] sm:$0xff]  ;;  %v3221_v42 = vunpack.c.h.s8.bf16 %v2341_v14  ;;  %v3205_v20 = vunpack.c.l.s8.bf16 %v2341_v14 }
 0x2d2   :  { %v2774_v24 = vunpack.c.h.s8.bf16 %v2118_v6  ;;  %v2758_v28 = vunpack.c.l.s8.bf16 %v2118_v6 }
 0x2d4   :  { %4416 = vmatpush2.bf16.msra.mxu0 %v3667_v22  ;;  %4523 = vmatpush1.bf16.msra.mxu1 %v3077_v29  ;;  %v2117_v22 = vld [vmem:[#allocation5 + $0x20] sm:$0xff]  ;;  %v3206_v29 = vunpack.c.l.s8.bf16 %v2342_v17 }
 0x2d5   :  { %4417 = vmatprep.subr.bf16.mxu0 %v3652_v15  ;;  %4524 = vmatprep.subr.bf16.mxu1 %v3062_v35  ;;  %v2326_v15 = vld [vmem:[#allocation5 + $0x6a8] sm:$0xff]  ;;  %v2773_v35 = vunpack.c.h.s8.bf16 %v2117_v22  ;;  %v2757_v30 = vunpack.c.l.s8.bf16 %v2117_v22 }
 0x2d8   :  { %4418 = vmatpush2.bf16.msra.mxu0 %v3651_v0  ;;  %4525 = vmatpush1.bf16.msra.mxu1 %v3061_v52  ;;  %v3190_v0 = vunpack.c.h.s8.bf16 %v2326_v15  ;;  %v2325_v52 = vld [vmem:[#allocation5 + $0x6a0] sm:$0xff] }
 0x2d9   :  { %4473 = vmatprep.subr.bf16.mxu0 %v2870_v21  ;;  %4526 = vmatprep.subr.bf16.mxu1 %v3046_v53  ;;  %v2230_v21 = vld [vmem:[#allocation5 + $0x3a8] sm:$0xff]  ;;  %v3189_v53 = vunpack.c.h.s8.bf16 %v2325_v52  ;;  %v3173_v18 = vunpack.c.l.s8.bf16 %v2325_v52 }
 0x2da   :  { %v2998_v44 = vunpack.c.h.s8.bf16 %v2230_v21  ;;  %v2982_v31 = vunpack.c.l.s8.bf16 %v2230_v21 }
 0x2db   :  { %4420 = vmatmul.mubr.bf16.vlgmr.msra.gmra.mxu0 %v11093_v48 }
 0x2dc   :  { %4474 = vmatpush1.bf16.msra.mxu0 %v2869_v32  ;;  %4527 = vmatpush1.bf16.msra.mxu1 %v3045_v2  ;;  %v2229_v32 = vld [vmem:[#allocation5 + $0x3a0] sm:$0xff]  ;;  %v3174_v2 = vunpack.c.l.s8.bf16 %v2326_v15 }
 0x2dd   :  { %4475 = vmatprep.subr.bf16.mxu0 %v2854_v58  ;;  %4528 = vmatprep.subr.bf16.mxu1 %v3030_v12  ;;  %v2310_v58 = vld [vmem:[#allocation5 + $0x628] sm:$0xff]  ;;  %v2997_v12 = vunpack.c.h.s8.bf16 %v2229_v32  ;;  %v2981_v8 = vunpack.c.l.s8.bf16 %v2229_v32 }
 0x2de   :  { %4505 = vmatprep.mubr.bf16.mxu0 %v11094_v10 }
 0x2e0   :  { %4476 = vmatpush1.bf16.msra.mxu0 %v2853_v47  ;;  %4529 = vmatpush1.bf16.msra.mxu1 %v3029_v62  ;;  %v3158_v47 = vunpack.c.h.s8.bf16 %v2310_v58  ;;  %v2309_v62 = vld [vmem:[#allocation5 + $0x620] sm:$0xff] }
 0x2e1   :  { %4477 = vmatprep.subr.bf16.mxu0 %v2838_v51  ;;  %4530 = vmatprep.subr.bf16.mxu1 %v3014_v55  ;;  %v2214_v51 = vld [vmem:[#allocation5 + $0x328] sm:$0xff]  ;;  %v3157_v55 = vunpack.c.h.s8.bf16 %v2309_v62  ;;  %v3141_v59 = vunpack.c.l.s8.bf16 %v2309_v62  ;;  %v5763_v62 = vld [vmem:[#allocation7] sm:$0xff] }
 0x2e2   :  { %v2966_v4 = vunpack.c.h.s8.bf16 %v2214_v51  ;;  %v2950_v38 = vunpack.c.l.s8.bf16 %v2214_v51 }
 0x2e4   :  { %4478 = vmatpush1.bf16.msra.mxu0 %v2837_v57  ;;  %4531 = vmatpush1.bf16.msra.mxu1 %v3013_v5  ;;  %v2213_v57 = vld [vmem:[#allocation5 + $0x320] sm:$0xff]  ;;  %v3142_v5 = vunpack.c.l.s8.bf16 %v2310_v58 }
 0x2e5   :  { %4479 = vmatprep.subr.bf16.mxu0 %v2822_v40  ;;  %4532 = vmatprep.subr.bf16.mxu1 %v3254_v13  ;;  %v2550_v40 = vld [vmem:[#allocation5 + $0xda8] sm:$0xff]  ;;  %v2965_v13 = vunpack.c.h.s8.bf16 %v2213_v57  ;;  %v2949_v60 = vunpack.c.l.s8.bf16 %v2213_v57 }
 0x2e8   :  { %4480 = vmatpush1.bf16.msra.mxu0 %v2821_v50  ;;  %4533 = vmatpush2.bf16.msra.mxu1 %v3253_v25  ;;  %v3638_v50 = vunpack.c.h.s8.bf16 %v2550_v40  ;;  %v2549_v25 = vld [vmem:[#allocation5 + $0xda0] sm:$0xff] }
 0x2e9   :  { %4481 = vmatprep.subr.bf16.mxu0 %v2806_v39  ;;  %4534 = vmatprep.subr.bf16.mxu1 %v3238_v56  ;;  %v2198_v39 = vld [vmem:[#allocation5 + $0x2a8] sm:$0xff]  ;;  %v3637_v56 = vunpack.c.h.s8.bf16 %v2549_v25  ;;  %v3621_v14 = vunpack.c.l.s8.bf16 %v2549_v25 }
 0x2ea   :  { %v2934_v17 = vunpack.c.h.s8.bf16 %v2198_v39  ;;  %v2918_v6 = vunpack.c.l.s8.bf16 %v2198_v39 }
 0x2ec   :  { %4482 = vmatpush1.bf16.msra.mxu0 %v2805_v23  ;;  %4535 = vmatpush2.bf16.msra.mxu1 %v3237_v43  ;;  %v2197_v23 = vld [vmem:[#allocation5 + $0x2a0] sm:$0xff]  ;;  %v3622_v43 = vunpack.c.l.s8.bf16 %v2550_v40 }
 0x2ed   :  { %4483 = vmatprep.subr.bf16.mxu0 %v2790_v49  ;;  %4536 = vmatprep.subr.bf16.mxu1 %v3222_v27  ;;  %v2534_v49 = vld [vmem:[#allocation5 + $0xd28] sm:$0xff]  ;;  %v2933_v27 = vunpack.c.h.s8.bf16 %v2197_v23  ;;  %v2917_v22 = vunpack.c.l.s8.bf16 %v2197_v23 }
 0x2f0   :  { %4484 = vmatpush1.bf16.msra.mxu0 %v2789_v7  ;;  %4537 = vmatpush2.bf16.msra.mxu1 %v3221_v42  ;;  %v3606_v7 = vunpack.c.h.s8.bf16 %v2534_v49  ;;  %v2533_v42 = vld [vmem:[#allocation5 + $0xd20] sm:$0xff] }
 0x2f1   :  { %4485 = vmatprep.subr.bf16.mxu0 %v2774_v24  ;;  %4538 = vmatprep.subr.bf16.mxu1 %v3206_v29  ;;  %v2182_v24 = vld [vmem:[#allocation5 + $0x228] sm:$0xff]  ;;  %v3605_v29 = vunpack.c.h.s8.bf16 %v2533_v42  ;;  %v3589_v52 = vunpack.c.l.s8.bf16 %v2533_v42 }
 0x2f2   :  { %v2902_v15 = vunpack.c.h.s8.bf16 %v2182_v24  ;;  %v2886_v21 = vunpack.c.l.s8.bf16 %v2182_v24 }
 0x2f4   :  { %4486 = vmatpush1.bf16.msra.mxu0 %v2773_v35  ;;  %4539 = vmatpush2.bf16.msra.mxu1 %v3205_v20  ;;  %v2181_v35 = vld [vmem:[#allocation5 + $0x220] sm:$0xff]  ;;  %v3590_v20 = vunpack.c.l.s8.bf16 %v2534_v49 }
 0x2f5   :  { %4487 = vmatprep.subr.bf16.mxu0 %v2758_v28  ;;  %4540 = vmatprep.subr.bf16.mxu1 %v3190_v0  ;;  %v2518_v28 = vld [vmem:[#allocation5 + $0xca8] sm:$0xff]  ;;  %v2901_v0 = vunpack.c.h.s8.bf16 %v2181_v35  ;;  %v2885_v32 = vunpack.c.l.s8.bf16 %v2181_v35 }
 0x2f6   :  { %v2390_v35 = vld [vmem:[#allocation5 + $0x8a8] sm:$0xff] }
 0x2f8   :  { %4488 = vmatpush1.bf16.msra.mxu0 %v2757_v30  ;;  %4541 = vmatpush2.bf16.msra.mxu1 %v3189_v53  ;;  %v3574_v30 = vunpack.c.h.s8.bf16 %v2518_v28  ;;  %v2517_v53 = vld [vmem:[#allocation5 + $0xca0] sm:$0xff] }
 0x2f9   :  { %4489 = vmatprep.subr.bf16.mxu0 %v2998_v44  ;;  %4542 = vmatprep.subr.bf16.mxu1 %v3174_v2  ;;  %v2422_v44 = vld [vmem:[#allocation5 + $0x9a8] sm:$0xff]  ;;  %v3573_v2 = vunpack.c.h.s8.bf16 %v2517_v53 }
 0x2fa   :  { %v3382_v58 = vunpack.c.h.s8.bf16 %v2422_v44 }
 0x2fc   :  { %4490 = vmatpush2.bf16.msra.mxu0 %v2997_v12  ;;  %4543 = vmatpush2.bf16.msra.mxu1 %v3173_v18  ;;  %v2421_v12 = vld [vmem:[#allocation5 + $0x9a0] sm:$0xff]  ;;  %v3558_v18 = vunpack.c.l.s8.bf16 %v2518_v28 }
 0x2fd   :  { %4491 = vmatprep.subr.bf16.mxu0 %v2982_v31  ;;  %4544 = vmatprep.subr.bf16.mxu1 %v3158_v47  ;;  %v10297_v31 = vsub.s32 0, %v8266_v1  ;;  %v2502_v47 = vld [vmem:[#allocation5 + $0xc28] sm:$0xff]  ;;  %v3381_v51 = vunpack.c.h.s8.bf16 %v2421_v12  ;;  %v3365_v25 = vunpack.c.l.s8.bf16 %v2421_v12  ;;  %v3302_v12 = vunpack.c.l.s8.bf16 %v2390_v35 }
 0x2fe   :  { %v3542_v57 = vunpack.c.h.s8.bf16 %v2502_v47  ;;  %v3526_v23 = vunpack.c.l.s8.bf16 %v2502_v47  ;;  %v2597_v47 = vld [vmem:[#allocation5 + $0xf20] sm:$0xff] }
 0x2ff   :  { %v5770_v40 = vrot.slane %v5763_v62, %v10297_v31  ;;  %v2374_v62 = vld [vmem:[#allocation5 + $0x828] sm:$0xff] }
 0x300   :  { %4492 = vmatpush2.bf16.msra.mxu0 %v2981_v8  ;;  %4545 = vmatpush2.bf16.msra.mxu1 %v3157_v55  ;;  %v3557_v8 = vunpack.c.l.s8.bf16 %v2517_v53  ;;  %v10299_v55 = vpop.f32.mrf.mxu0 }
 0x301   :  { %4493 = vmatprep.subr.bf16.mxu0 %v2966_v4  ;;  %4546 = vmatprep.subr.bf16.mxu1 %v3142_v5  ;;  %v3366_v4 = vunpack.c.l.s8.bf16 %v2422_v44  ;;  %v2501_v5 = vld [vmem:[#allocation5 + $0xc20] sm:$0xff]  ;;  %v2598_v44 = vld [vmem:[#allocation5 + $0xf28] sm:$0xff] }
 0x302   :  { %v3541_v39 = vunpack.c.h.s8.bf16 %v2501_v5 }
 0x304   :  { %4494 = vmatpush2.bf16.msra.mxu0 %v2965_v13  ;;  %4547 = vmatpush2.bf16.msra.mxu1 %v3141_v59  ;;  %v2406_v13 = vld [vmem:[#allocation5 + $0x928] sm:$0xff] }
 0x305   :  { %4495 = vmatprep.subr.bf16.mxu0 %v2950_v38  ;;  %4602 = vmatprep.subr.bf16.mxu1 %v3638_v50  ;;  %v5879_v38 = vld [vmem:[#allocation8] sm:$0xff]  ;;  %v3334_v42 = vunpack.c.l.s8.bf16 %v2406_v13 }
 0x306   :  { %v5886_v49 = vrot.slane %v5879_v38, %v10297_v31  ;;  %v3270_v38 = vunpack.c.l.s8.bf16 %v2374_v62 }
 0x307   :  { %4549 = vmatmul.mubr.bf16.vlgmr.msra.gmra.mxu1 %v11091_v16 }
 0x308   :  { %4496 = vmatpush2.bf16.msra.mxu0 %v2949_v60  ;;  %4603 = vmatpush1.bf16.msra.mxu1 %v3637_v56  ;;  %v3350_v56 = vunpack.c.h.s8.bf16 %v2406_v13 }
 0x309   :  { %4497 = vmatprep.subr.bf16.mxu0 %v2934_v17  ;;  %4604 = vmatprep.subr.bf16.mxu1 %v3622_v43  ;;  %v2405_v17 = vld [vmem:[#allocation5 + $0x920] sm:$0xff] }
 0x30a   :  { %4634 = vmatprep.mubr.bf16.mxu1 %v11092_v11  ;;  %v3333_v28 = vunpack.c.l.s8.bf16 %v2405_v17 }
 0x30c   :  { %4498 = vmatpush2.bf16.msra.mxu0 %v2933_v27  ;;  %4605 = vmatpush1.bf16.msra.mxu1 %v3621_v14  ;;  %v2614_v27 = vld [vmem:[#allocation5 + $0xfa8] sm:$0xff] }
 0x30d   :  { %4499 = vmatprep.subr.bf16.mxu0 %v2918_v6  ;;  %4606 = vmatprep.subr.bf16.mxu1 %v3606_v7  ;;  %v3349_v6 = vunpack.c.h.s8.bf16 %v2405_v17  ;;  %v3525_v7 = vunpack.c.l.s8.bf16 %v2501_v5  ;;  %v3766_v24 = vunpack.c.h.s8.bf16 %v2614_v27  ;;  %v3718_v5 = vunpack.c.l.s8.bf16 %v2598_v44 }
 0x310   :  { %4500 = vmatpush2.bf16.msra.mxu0 %v2917_v22  ;;  %4607 = vmatpush1.bf16.msra.mxu1 %v3605_v29  ;;  %v2613_v22 = vld [vmem:[#allocation5 + $0xfa0] sm:$0xff] }
 0x311   :  { %4501 = vmatprep.subr.bf16.mxu0 %v2902_v15  ;;  %4608 = vmatprep.subr.bf16.mxu1 %v3590_v20 }
 0x314   :  { %4502 = vmatpush2.bf16.msra.mxu0 %v2901_v0  ;;  %4609 = vmatpush1.bf16.msra.mxu1 %v3589_v52  ;;  %v3765_v0 = vunpack.c.h.s8.bf16 %v2613_v22  ;;  %v3318_v52 = vunpack.c.h.s8.bf16 %v2390_v35  ;;  %v2469_v35 = vld [vmem:[#allocation5 + $0xb20] sm:$0xff] }
 0x315   :  { %4503 = vmatprep.subr.bf16.mxu0 %v2886_v21  ;;  %4610 = vmatprep.subr.bf16.mxu1 %v3574_v30  ;;  %v3750_v21 = vunpack.c.l.s8.bf16 %v2614_v27  ;;  %v2566_v27 = vld [vmem:[#allocation5 + $0xe28] sm:$0xff] }
 0x318   :  { %4504 = vmatpush2.bf16.msra.mxu0 %v2885_v32  ;;  %4611 = vmatpush1.bf16.msra.mxu1 %v3573_v2 }
 0x319   :  { %4559 = vmatprep.subr.bf16.mxu0 %v3382_v58  ;;  %4612 = vmatprep.subr.bf16.mxu1 %v3558_v18  ;;  %v3749_v58 = vunpack.c.l.s8.bf16 %v2613_v22  ;;  %v3734_v18 = vunpack.c.h.s8.bf16 %v2598_v44  ;;  %v3461_v44 = vunpack.c.l.s8.bf16 %v2469_v35 }
 0x31b   :  { %v4249_v59 = vpop.f32.mrf.mxu0  ;;  %4506 = vmatmul.mubr.bf16.vlgmr.msra.gmra.mxu0 %v11087_v26 }
 0x31c   :  { %v4250_v50 = vadd.f32 %v4249_v59, %v10283_v45  ;;  %4560 = vmatpush1.bf16.msra.mxu0 %v3381_v51  ;;  %4613 = vmatpush1.bf16.msra.mxu1 %v3557_v8  ;;  %v3733_v8 = vunpack.c.h.s8.bf16 %v2597_v47  ;;  %v3717_v59 = vunpack.c.l.s8.bf16 %v2597_v47  ;;  %v2152_v47 = vld [vmem:[#allocation5 + $0x138] sm:$0xff] }
 0x31d   :  { %v10304_v60 = vpop.f32.mrf.mxu0  ;;  %4561 = vmatprep.subr.bf16.mxu0 %v3366_v4  ;;  %4614 = vmatprep.subr.bf16.mxu1 %v3542_v57  ;;  %v3286_v4 = vunpack.c.h.s8.bf16 %v2374_v62  ;;  %v2373_v57 = vld [vmem:[#allocation5 + $0x820] sm:$0xff] }
 0x31e   :  { %v5847_v43 = vmul.f32 %v5770_v40, %v4250_v50  ;;  %4591 = vmatprep.mubr.bf16.mxu0 %v11088_v19  ;;  %v3285_v13 = vunpack.c.h.s8.bf16 %v2373_v57 }
 0x31f   :  { %v4253_v14 = vpop.f32.mrf.mxu0 }
 0x320   :  { %v4254_v45 = vadd.f32 %v4253_v14, %v10288_v34  ;;  %4562 = vmatpush1.bf16.msra.mxu0 %v3365_v25  ;;  %4615 = vmatpush1.bf16.msra.mxu1 %v3541_v39  ;;  %v5963_v29 = vadd.f32 %v5886_v49, %v5847_v43  ;;  %v2389_v34 = vld [vmem:[#allocation5 + $0x8a0] sm:$0xff]  ;;  %v2486_v39 = vld [vmem:[#allocation5 + $0xba8] sm:$0xff] }
 0x321   :  { %4563 = vmatprep.subr.bf16.mxu0 %v3350_v56  ;;  %4616 = vmatprep.subr.bf16.mxu1 %v3526_v23  ;;  %v3317_v2 = vunpack.c.h.s8.bf16 %v2389_v34  ;;  %v3301_v51 = vunpack.c.l.s8.bf16 %v2389_v34  ;;  %v2581_v25 = vld [vmem:[#allocation5 + $0xea0] sm:$0xff]  ;;  %v3269_v56 = vunpack.c.l.s8.bf16 %v2373_v57  ;;  %v3510_v23 = vunpack.c.h.s8.bf16 %v2486_v39  ;;  %v2151_v57 = vld [vmem:[#allocation5 + $0x130] sm:$0xff] }
 0x322   :  { %v5863_v15 = vmul.f32 %v5770_v40, %v4254_v45  ;;  %v5995_v30 = vmax.f32 %v5963_v29, 0.0  ;;  %v2582_v40 = vld [vmem:[#allocation5 + $0xea8] sm:$0xff]  ;;  %v3701_v17 = vunpack.c.h.s8.bf16 %v2581_v25  ;;  %v2485_v43 = vld [vmem:[#allocation5 + $0xba0] sm:$0xff]  ;;  %v3685_v45 = vunpack.c.l.s8.bf16 %v2581_v25  ;;  %v2136_v25 = vld [vmem:[#allocation5 + $0xb8] sm:$0xff] }
 0x323   :  { %v3702_v50 = vunpack.c.h.s8.bf16 %v2582_v40  ;;  %v3509_v14 = vunpack.c.h.s8.bf16 %v2485_v43  ;;  %v3493_v22 = vunpack.c.l.s8.bf16 %v2485_v43  ;;  %v2135_v43 = vld [vmem:[#allocation5 + $0xb0] sm:$0xff] }
 0x324   :  { %v5979_v20 = vadd.f32 %v5886_v49, %v5863_v15  ;;  %4564 = vmatpush1.bf16.msra.mxu0 %v3349_v6  ;;  %4617 = vmatpush1.bf16.msra.mxu1 %v3525_v7  ;;  %v3686_v49 = vunpack.c.l.s8.bf16 %v2582_v40  ;;  %v3494_v6 = vunpack.c.l.s8.bf16 %v2486_v39  ;;  %v3670_v7 = vunpack.c.h.s8.bf16 %v2566_v27 }
 0x325   :  { %4565 = vmatprep.subr.bf16.mxu0 %v3334_v42  ;;  %4618 = vmatprep.subr.bf16.mxu1 %v3766_v24  ;;  %v2565_v42 = vld [vmem:[#allocation5 + $0xe20] sm:$0xff]  ;;  %v2470_v24 = vld [vmem:[#allocation5 + $0xb28] sm:$0xff] }
 0x326   :  { %v6011_v53 = vmax.f32 %v5979_v20, 0.0  ;;  %v3669_v29 = vunpack.c.h.s8.bf16 %v2565_v42  ;;  %v3478_v15 = vunpack.c.h.s8.bf16 %v2470_v24  ;;  %v3654_v20 = vunpack.c.l.s8.bf16 %v2566_v27 }
 0x327   :  { %v3462_v34 = vunpack.c.l.s8.bf16 %v2470_v24 }
 0x328   :  { %v10309_v32 = vpack.c.bf16 %v6011_v53, %v5995_v30  ;;  %4566 = vmatpush1.bf16.msra.mxu0 %v3333_v28  ;;  %4619 = vmatpush2.bf16.msra.mxu1 %v3765_v0  ;;  %v2168_v28 = vld [vmem:[#allocation5 + $0x1b8] sm:$0xff]  ;;  %v3477_v0 = vunpack.c.h.s8.bf16 %v2469_v35  ;;  %v2167_v30 = vld [vmem:[#allocation5 + $0x1b0] sm:$0xff]  ;;  %v2454_v53 = vld [vmem:[#allocation5 + $0xaa8] sm:$0xff] }
 0x329   :  { %4567 = vmatprep.subr.bf16.mxu0 %v3318_v52  ;;  %4620 = vmatprep.subr.bf16.mxu1 %v3750_v21  ;;  %v3653_v52 = vunpack.c.l.s8.bf16 %v2565_v42  ;;  %v2872_v21 = vunpack.c.h.s8.bf16 %v2168_v28  ;;  %v2120_v42 = vld [vmem:[#allocation5 + $0x38] sm:$0xff]  ;;  %v2119_v35 = vld [vmem:[#allocation5 + $0x30] sm:$0xff] }
 0x32a   :  { %11095 = vst [vmem:[#allocation39_spill] sm:$0xff] %v10309_v32 }
 0x32c   :  { %4568 = vmatpush1.bf16.msra.mxu0 %v3317_v2  ;;  %4621 = vmatpush2.bf16.msra.mxu1 %v3749_v58  ;;  %v2871_v2 = vunpack.c.h.s8.bf16 %v2167_v30  ;;  %v3446_v58 = vunpack.c.h.s8.bf16 %v2454_v53 }
 0x32d   :  { %4569 = vmatprep.subr.bf16.mxu0 %v3302_v12  ;;  %4622 = vmatprep.subr.bf16.mxu1 %v3734_v18  ;;  %v2453_v12 = vld [vmem:[#allocation5 + $0xaa0] sm:$0xff]  ;;  %v2856_v18 = vunpack.c.l.s8.bf16 %v2168_v28 }
 0x32e   :  { %v3445_v62 = vunpack.c.h.s8.bf16 %v2453_v12  ;;  %v3429_v40 = vunpack.c.l.s8.bf16 %v2453_v12  ;;  %v2231_v12 = vld [vmem:[#allocation5 + $0x3b0] sm:$0xff] }
 0x330   :  { %4570 = vmatpush1.bf16.msra.mxu0 %v3301_v51  ;;  %4623 = vmatpush2.bf16.msra.mxu1 %v3733_v8  ;;  %v2855_v51 = vunpack.c.l.s8.bf16 %v2167_v30  ;;  %v3430_v8 = vunpack.c.l.s8.bf16 %v2454_v53  ;;  %v2232_v30 = vld [vmem:[#allocation5 + $0x3b8] sm:$0xff] }
 0x331   :  { %4571 = vmatprep.subr.bf16.mxu0 %v3286_v4  ;;  %4624 = vmatprep.subr.bf16.mxu1 %v3718_v5  ;;  %v2840_v4 = vunpack.c.h.s8.bf16 %v2152_v47  ;;  %v2438_v5 = vld [vmem:[#allocation5 + $0xa28] sm:$0xff] }
 0x334   :  { %4572 = vmatpush1.bf16.msra.mxu0 %v3285_v13  ;;  %4625 = vmatpush2.bf16.msra.mxu1 %v3717_v59  ;;  %v2839_v13 = vunpack.c.h.s8.bf16 %v2151_v57  ;;  %v3414_v59 = vunpack.c.h.s8.bf16 %v2438_v5 }
 0x335   :  { %4573 = vmatprep.subr.bf16.mxu0 %v3270_v38  ;;  %4626 = vmatprep.subr.bf16.mxu1 %v3702_v50  ;;  %v2437_v38 = vld [vmem:[#allocation5 + $0xa20] sm:$0xff]  ;;  %v2824_v50 = vunpack.c.l.s8.bf16 %v2152_v47 }
 0x336   :  { %v3413_v39 = vunpack.c.h.s8.bf16 %v2437_v38  ;;  %v3397_v27 = vunpack.c.l.s8.bf16 %v2437_v38  ;;  %v2215_v38 = vld [vmem:[#allocation5 + $0x330] sm:$0xff] }
 0x338   :  { %4574 = vmatpush1.bf16.msra.mxu0 %v3269_v56  ;;  %4627 = vmatpush2.bf16.msra.mxu1 %v3701_v17  ;;  %v2823_v56 = vunpack.c.l.s8.bf16 %v2151_v57  ;;  %v3398_v17 = vunpack.c.l.s8.bf16 %v2438_v5  ;;  %v2216_v57 = vld [vmem:[#allocation5 + $0x338] sm:$0xff] }
 0x339   :  { %4575 = vmatprep.subr.bf16.mxu0 %v3510_v23  ;;  %4628 = vmatprep.subr.bf16.mxu1 %v3686_v49  ;;  %v2808_v23 = vunpack.c.h.s8.bf16 %v2136_v25  ;;  %v2678_v49 = vld [vmem:[#allocation5 + $0x11a8] sm:$0xff] }
 0x33c   :  { %4576 = vmatpush2.bf16.msra.mxu0 %v3509_v14  ;;  %4629 = vmatpush2.bf16.msra.mxu1 %v3685_v45  ;;  %v2807_v14 = vunpack.c.h.s8.bf16 %v2135_v43  ;;  %v3894_v45 = vunpack.c.h.s8.bf16 %v2678_v49 }
 0x33d   :  { %4577 = vmatprep.subr.bf16.mxu0 %v3494_v6  ;;  %4630 = vmatprep.subr.bf16.mxu1 %v3670_v7  ;;  %v2677_v6 = vld [vmem:[#allocation5 + $0x11a0] sm:$0xff]  ;;  %v2792_v7 = vunpack.c.l.s8.bf16 %v2136_v25 }
 0x33e   :  { %v3893_v24 = vunpack.c.h.s8.bf16 %v2677_v6  ;;  %v3877_v28 = vunpack.c.l.s8.bf16 %v2677_v6  ;;  %v2199_v6 = vld [vmem:[#allocation5 + $0x2b0] sm:$0xff] }
 0x340   :  { %4578 = vmatpush2.bf16.msra.mxu0 %v3493_v22  ;;  %4631 = vmatpush2.bf16.msra.mxu1 %v3669_v29  ;;  %v2791_v22 = vunpack.c.l.s8.bf16 %v2135_v43  ;;  %v3878_v29 = vunpack.c.l.s8.bf16 %v2678_v49  ;;  %v2200_v43 = vld [vmem:[#allocation5 + $0x2b8] sm:$0xff] }
 0x341   :  { %4579 = vmatprep.subr.bf16.mxu0 %v3478_v15  ;;  %4632 = vmatprep.subr.bf16.mxu1 %v3654_v20  ;;  %v2776_v15 = vunpack.c.h.s8.bf16 %v2120_v42  ;;  %v2662_v20 = vld [vmem:[#allocation5 + $0x1128] sm:$0xff] }
 0x344   :  { %4580 = vmatpush2.bf16.msra.mxu0 %v3477_v0  ;;  %4633 = vmatpush2.bf16.msra.mxu1 %v3653_v52  ;;  %v2775_v0 = vunpack.c.h.s8.bf16 %v2119_v35  ;;  %v3862_v52 = vunpack.c.h.s8.bf16 %v2662_v20 }
 0x345   :  { %4581 = vmatprep.subr.bf16.mxu0 %v3462_v34  ;;  %4688 = vmatprep.subr.bf16.mxu1 %v2872_v21  ;;  %v2661_v34 = vld [vmem:[#allocation5 + $0x1120] sm:$0xff]  ;;  %v2760_v21 = vunpack.c.l.s8.bf16 %v2120_v42 }
 0x346   :  { %v3861_v53 = vunpack.c.h.s8.bf16 %v2661_v34  ;;  %v3845_v47 = vunpack.c.l.s8.bf16 %v2661_v34  ;;  %v2183_v34 = vld [vmem:[#allocation5 + $0x230] sm:$0xff] }
 0x347   :  { %4635 = vmatmul.mubr.bf16.vlgmr.msra.gmra.mxu1 %v11093_v48 }
 0x348   :  { %4582 = vmatpush2.bf16.msra.mxu0 %v3461_v44  ;;  %4689 = vmatpush1.bf16.msra.mxu1 %v2871_v2  ;;  %v2759_v44 = vunpack.c.l.s8.bf16 %v2119_v35  ;;  %v3846_v2 = vunpack.c.l.s8.bf16 %v2662_v20  ;;  %v2184_v35 = vld [vmem:[#allocation5 + $0x238] sm:$0xff] }
 0x349   :  { %4583 = vmatprep.subr.bf16.mxu0 %v3446_v58  ;;  %4690 = vmatprep.subr.bf16.mxu1 %v2856_v18  ;;  %v3000_v58 = vunpack.c.h.s8.bf16 %v2232_v30  ;;  %v2646_v18 = vld [vmem:[#allocation5 + $0x10a8] sm:$0xff] }
 0x34a   :  { %4720 = vmatprep.mubr.bf16.mxu1 %v11094_v10 }
 0x34c   :  { %4584 = vmatpush2.bf16.msra.mxu0 %v3445_v62  ;;  %4691 = vmatpush1.bf16.msra.mxu1 %v2855_v51  ;;  %v2999_v62 = vunpack.c.h.s8.bf16 %v2231_v12  ;;  %v3830_v51 = vunpack.c.h.s8.bf16 %v2646_v18 }
 0x34d   :  { %4585 = vmatprep.subr.bf16.mxu0 %v3430_v8  ;;  %4692 = vmatprep.subr.bf16.mxu1 %v2840_v4  ;;  %v2645_v8 = vld [vmem:[#allocation5 + $0x10a0] sm:$0xff]  ;;  %v2984_v4 = vunpack.c.l.s8.bf16 %v2232_v30 }
 0x34e   :  { %v3829_v5 = vunpack.c.h.s8.bf16 %v2645_v8  ;;  %v3813_v25 = vunpack.c.l.s8.bf16 %v2645_v8  ;;  %v2423_v8 = vld [vmem:[#allocation5 + $0x9b0] sm:$0xff] }
 0x350   :  { %4586 = vmatpush2.bf16.msra.mxu0 %v3429_v40  ;;  %4693 = vmatpush1.bf16.msra.mxu1 %v2839_v13  ;;  %v2983_v40 = vunpack.c.l.s8.bf16 %v2231_v12  ;;  %v3814_v13 = vunpack.c.l.s8.bf16 %v2646_v18  ;;  %v2424_v12 = vld [vmem:[#allocation5 + $0x9b8] sm:$0xff] }
 0x351   :  { %4587 = vmatprep.subr.bf16.mxu0 %v3414_v59  ;;  %4694 = vmatprep.subr.bf16.mxu1 %v2824_v50  ;;  %v2968_v59 = vunpack.c.h.s8.bf16 %v2216_v57  ;;  %v2630_v50 = vld [vmem:[#allocation5 + $0x1028] sm:$0xff] }
 0x354   :  { %4588 = vmatpush2.bf16.msra.mxu0 %v3413_v39  ;;  %4695 = vmatpush1.bf16.msra.mxu1 %v2823_v56  ;;  %v2967_v39 = vunpack.c.h.s8.bf16 %v2215_v38  ;;  %v3798_v56 = vunpack.c.h.s8.bf16 %v2630_v50 }
 0x355   :  { %4589 = vmatprep.subr.bf16.mxu0 %v3398_v17  ;;  %4696 = vmatprep.subr.bf16.mxu1 %v2808_v23  ;;  %v2629_v17 = vld [vmem:[#allocation5 + $0x1020] sm:$0xff]  ;;  %v2952_v23 = vunpack.c.l.s8.bf16 %v2216_v57 }
 0x356   :  { %v3797_v49 = vunpack.c.h.s8.bf16 %v2629_v17  ;;  %v3781_v42 = vunpack.c.l.s8.bf16 %v2629_v17  ;;  %v2407_v17 = vld [vmem:[#allocation5 + $0x930] sm:$0xff] }
 0x358   :  { %4590 = vmatpush2.bf16.msra.mxu0 %v3397_v27  ;;  %4697 = vmatpush1.bf16.msra.mxu1 %v2807_v14  ;;  %v2951_v27 = vunpack.c.l.s8.bf16 %v2215_v38  ;;  %v3782_v14 = vunpack.c.l.s8.bf16 %v2630_v50  ;;  %v2408_v38 = vld [vmem:[#allocation5 + $0x938] sm:$0xff] }
 0x359   :  { %4645 = vmatprep.subr.bf16.mxu0 %v3894_v45  ;;  %4698 = vmatprep.subr.bf16.mxu1 %v2792_v7  ;;  %v2936_v45 = vunpack.c.h.s8.bf16 %v2200_v43  ;;  %v2742_v7 = vld [vmem:[#allocation5 + $0x13a8] sm:$0xff] }
 0x35b   :  { %4592 = vmatmul.mubr.bf16.vlgmr.msra.gmra.mxu0 %v11090_v33 }
 0x35c   :  { %4646 = vmatpush1.bf16.msra.mxu0 %v3893_v24  ;;  %4699 = vmatpush1.bf16.msra.mxu1 %v2791_v22  ;;  %v2935_v24 = vunpack.c.h.s8.bf16 %v2199_v6  ;;  %v4022_v22 = vunpack.c.h.s8.bf16 %v2742_v7 }
 0x35d   :  { %4647 = vmatprep.subr.bf16.mxu0 %v3878_v29  ;;  %4700 = vmatprep.subr.bf16.mxu1 %v2776_v15  ;;  %v2741_v29 = vld [vmem:[#allocation5 + $0x13a0] sm:$0xff]  ;;  %v2920_v15 = vunpack.c.l.s8.bf16 %v2200_v43 }
 0x35e   :  { %4677 = vmatprep.mubr.bf16.mxu0 %v10165_v63  ;;  %v4021_v20 = vunpack.c.h.s8.bf16 %v2741_v29  ;;  %v4005_v30 = vunpack.c.l.s8.bf16 %v2741_v29  ;;  %v2391_v29 = vld [vmem:[#allocation5 + $0x8b0] sm:$0xff] }
 0x360   :  { %4648 = vmatpush1.bf16.msra.mxu0 %v3877_v28  ;;  %4701 = vmatpush1.bf16.msra.mxu1 %v2775_v0  ;;  %v2919_v28 = vunpack.c.l.s8.bf16 %v2199_v6  ;;  %v4006_v0 = vunpack.c.l.s8.bf16 %v2742_v7  ;;  %v2392_v6 = vld [vmem:[#allocation5 + $0x8b8] sm:$0xff] }
 0x361   :  { %4649 = vmatprep.subr.bf16.mxu0 %v3862_v52  ;;  %4702 = vmatprep.subr.bf16.mxu1 %v2760_v21  ;;  %v2904_v52 = vunpack.c.h.s8.bf16 %v2184_v35  ;;  %v2726_v21 = vld [vmem:[#allocation5 + $0x1328] sm:$0xff] }
 0x364   :  { %4650 = vmatpush1.bf16.msra.mxu0 %v3861_v53  ;;  %4703 = vmatpush1.bf16.msra.mxu1 %v2759_v44  ;;  %v2903_v53 = vunpack.c.h.s8.bf16 %v2183_v34  ;;  %v3990_v44 = vunpack.c.h.s8.bf16 %v2726_v21 }
 0x365   :  { %4651 = vmatprep.subr.bf16.mxu0 %v3846_v2  ;;  %4704 = vmatprep.subr.bf16.mxu1 %v3000_v58  ;;  %v2725_v2 = vld [vmem:[#allocation5 + $0x1320] sm:$0xff]  ;;  %v2888_v58 = vunpack.c.l.s8.bf16 %v2184_v35 }
 0x366   :  { %v3989_v18 = vunpack.c.h.s8.bf16 %v2725_v2  ;;  %v3973_v57 = vunpack.c.l.s8.bf16 %v2725_v2  ;;  %v2375_v2 = vld [vmem:[#allocation5 + $0x830] sm:$0xff] }
 0x368   :  { %4652 = vmatpush1.bf16.msra.mxu0 %v3845_v47  ;;  %4705 = vmatpush2.bf16.msra.mxu1 %v2999_v62  ;;  %v2887_v47 = vunpack.c.l.s8.bf16 %v2183_v34  ;;  %v3974_v62 = vunpack.c.l.s8.bf16 %v2726_v21  ;;  %v2376_v34 = vld [vmem:[#allocation5 + $0x838] sm:$0xff] }
 0x369   :  { %4653 = vmatprep.subr.bf16.mxu0 %v3830_v51  ;;  %4706 = vmatprep.subr.bf16.mxu1 %v2984_v4  ;;  %v3384_v51 = vunpack.c.h.s8.bf16 %v2424_v12  ;;  %v2710_v4 = vld [vmem:[#allocation5 + $0x12a8] sm:$0xff] }
 0x36c   :  { %4654 = vmatpush1.bf16.msra.mxu0 %v3829_v5  ;;  %4707 = vmatpush2.bf16.msra.mxu1 %v2983_v40  ;;  %v3383_v5 = vunpack.c.h.s8.bf16 %v2423_v8  ;;  %v3958_v40 = vunpack.c.h.s8.bf16 %v2710_v4 }
 0x36d   :  { %4655 = vmatprep.subr.bf16.mxu0 %v3814_v13  ;;  %4708 = vmatprep.subr.bf16.mxu1 %v2968_v59  ;;  %v2709_v13 = vld [vmem:[#allocation5 + $0x12a0] sm:$0xff]  ;;  %v3368_v59 = vunpack.c.l.s8.bf16 %v2424_v12 }
 0x36e   :  { %v3957_v50 = vunpack.c.h.s8.bf16 %v2709_v13  ;;  %v3941_v43 = vunpack.c.l.s8.bf16 %v2709_v13  ;;  %v2487_v13 = vld [vmem:[#allocation5 + $0xbb0] sm:$0xff] }
 0x370   :  { %4656 = vmatpush1.bf16.msra.mxu0 %v3813_v25  ;;  %4709 = vmatpush2.bf16.msra.mxu1 %v2967_v39  ;;  %v3367_v25 = vunpack.c.l.s8.bf16 %v2423_v8  ;;  %v3942_v39 = vunpack.c.l.s8.bf16 %v2710_v4  ;;  %v2488_v8 = vld [vmem:[#allocation5 + $0xbb8] sm:$0xff] }
 0x371   :  { %4657 = vmatprep.subr.bf16.mxu0 %v3798_v56  ;;  %4710 = vmatprep.subr.bf16.mxu1 %v2952_v23  ;;  %v3352_v56 = vunpack.c.h.s8.bf16 %v2408_v38  ;;  %v2694_v23 = vld [vmem:[#allocation5 + $0x1228] sm:$0xff] }
 0x374   :  { %4658 = vmatpush1.bf16.msra.mxu0 %v3797_v49  ;;  %4711 = vmatpush2.bf16.msra.mxu1 %v2951_v27  ;;  %v3351_v49 = vunpack.c.h.s8.bf16 %v2407_v17  ;;  %v3926_v27 = vunpack.c.h.s8.bf16 %v2694_v23 }
 0x375   :  { %4659 = vmatprep.subr.bf16.mxu0 %v3782_v14  ;;  %4712 = vmatprep.subr.bf16.mxu1 %v2936_v45  ;;  %v2693_v14 = vld [vmem:[#allocation5 + $0x1220] sm:$0xff]  ;;  %v3336_v45 = vunpack.c.l.s8.bf16 %v2408_v38 }
 0x376   :  { %v3925_v7 = vunpack.c.h.s8.bf16 %v2693_v14  ;;  %v3909_v35 = vunpack.c.l.s8.bf16 %v2693_v14 }
 0x378   :  { %4660 = vmatpush1.bf16.msra.mxu0 %v3781_v42  ;;  %4713 = vmatpush2.bf16.msra.mxu1 %v2935_v24  ;;  %v3335_v42 = vunpack.c.l.s8.bf16 %v2407_v17  ;;  %v3910_v24 = vunpack.c.l.s8.bf16 %v2694_v23  ;;  %v2472_v17 = vld [vmem:[#allocation5 + $0xb38] sm:$0xff] }
 0x379   :  { %4661 = vmatprep.subr.bf16.mxu0 %v4022_v22  ;;  %4714 = vmatprep.subr.bf16.mxu1 %v2920_v15  ;;  %v3320_v22 = vunpack.c.h.s8.bf16 %v2392_v6  ;;  %v2296_v15 = vld [vmem:[#allocation5 + $0x5b8] sm:$0xff]  ;;  %v3480_v14 = vunpack.c.h.s8.bf16 %v2472_v17 }
 0x37c   :  { %4662 = vmatpush2.bf16.msra.mxu0 %v4021_v20  ;;  %4715 = vmatpush2.bf16.msra.mxu1 %v2919_v28  ;;  %v3319_v20 = vunpack.c.h.s8.bf16 %v2391_v29  ;;  %v3128_v28 = vunpack.c.h.s8.bf16 %v2296_v15 }
 0x37d   :  { %4663 = vmatprep.subr.bf16.mxu0 %v4006_v0  ;;  %4716 = vmatprep.subr.bf16.mxu1 %v2904_v52  ;;  %v2295_v0 = vld [vmem:[#allocation5 + $0x5b0] sm:$0xff]  ;;  %v3304_v52 = vunpack.c.l.s8.bf16 %v2392_v6  ;;  %v2248_v6 = vld [vmem:[#allocation5 + $0x438] sm:$0xff] }
 0x37e   :  { %v3127_v21 = vunpack.c.h.s8.bf16 %v2295_v0  ;;  %v3111_v12 = vunpack.c.l.s8.bf16 %v2295_v0 }
 0x380   :  { %4664 = vmatpush2.bf16.msra.mxu0 %v4005_v30  ;;  %4717 = vmatpush2.bf16.msra.mxu1 %v2903_v53  ;;  %v3303_v30 = vunpack.c.l.s8.bf16 %v2391_v29  ;;  %v3112_v53 = vunpack.c.l.s8.bf16 %v2296_v15  ;;  %v2247_v29 = vld [vmem:[#allocation5 + $0x430] sm:$0xff]  ;;  %v3464_v15 = vunpack.c.l.s8.bf16 %v2472_v17 }
 0x381   :  { %4665 = vmatprep.subr.bf16.mxu0 %v3990_v44  ;;  %4718 = vmatprep.subr.bf16.mxu1 %v2888_v58  ;;  %v3288_v44 = vunpack.c.h.s8.bf16 %v2376_v34  ;;  %v2280_v58 = vld [vmem:[#allocation5 + $0x538] sm:$0xff] }
 0x384   :  { %4666 = vmatpush2.bf16.msra.mxu0 %v3989_v18  ;;  %4719 = vmatpush2.bf16.msra.mxu1 %v2887_v47  ;;  %v3287_v18 = vunpack.c.h.s8.bf16 %v2375_v2  ;;  %v3096_v47 = vunpack.c.h.s8.bf16 %v2280_v58 }
 0x385   :  { %4667 = vmatprep.subr.bf16.mxu0 %v3974_v62  ;;  %4774 = vmatprep.subr.bf16.mxu1 %v3384_v51  ;;  %v2279_v62 = vld [vmem:[#allocation5 + $0x530] sm:$0xff]  ;;  %v3272_v51 = vunpack.c.l.s8.bf16 %v2376_v34 }
 0x386   :  { %v3095_v4 = vunpack.c.h.s8.bf16 %v2279_v62  ;;  %v3079_v38 = vunpack.c.l.s8.bf16 %v2279_v62 }
 0x387   :  { %4721 = vmatmul.mubr.bf16.vlgmr.msra.gmra.mxu1 %v11087_v26 }
 0x388   :  { %4668 = vmatpush2.bf16.msra.mxu0 %v3973_v57  ;;  %4775 = vmatpush1.bf16.msra.mxu1 %v3383_v5  ;;  %v3271_v57 = vunpack.c.l.s8.bf16 %v2375_v2  ;;  %v3080_v5 = vunpack.c.l.s8.bf16 %v2280_v58 }
 0x389   :  { %4669 = vmatprep.subr.bf16.mxu0 %v3958_v40  ;;  %4776 = vmatprep.subr.bf16.mxu1 %v3368_v59  ;;  %v3512_v40 = vunpack.c.h.s8.bf16 %v2488_v8  ;;  %v2264_v59 = vld [vmem:[#allocation5 + $0x4b8] sm:$0xff] }
 0x38a   :  { %4806 = vmatprep.mubr.bf16.mxu1 %v11088_v19 }
 0x38c   :  { %4670 = vmatpush2.bf16.msra.mxu0 %v3957_v50  ;;  %4777 = vmatpush1.bf16.msra.mxu1 %v3367_v25  ;;  %v3511_v50 = vunpack.c.h.s8.bf16 %v2487_v13  ;;  %v3064_v25 = vunpack.c.h.s8.bf16 %v2264_v59 }
 0x38d   :  { %4671 = vmatprep.subr.bf16.mxu0 %v3942_v39  ;;  %4778 = vmatprep.subr.bf16.mxu1 %v3352_v56  ;;  %v2263_v39 = vld [vmem:[#allocation5 + $0x4b0] sm:$0xff]  ;;  %v3496_v56 = vunpack.c.l.s8.bf16 %v2488_v8 }
 0x38e   :  { %v3063_v23 = vunpack.c.h.s8.bf16 %v2263_v39 }
 0x390   :  { %4672 = vmatpush2.bf16.msra.mxu0 %v3941_v43  ;;  %4779 = vmatpush1.bf16.msra.mxu1 %v3351_v49  ;;  %v3495_v43 = vunpack.c.l.s8.bf16 %v2487_v13  ;;  %v10319_v49 = vpop.f32.mrf.mxu1  ;;  %v2344_v13 = vld [vmem:[#allocation5 + $0x738] sm:$0xff] }
 0x391   :  { %4673 = vmatprep.subr.bf16.mxu0 %v3926_v27  ;;  %4780 = vmatprep.subr.bf16.mxu1 %v3336_v45  ;;  %v3048_v27 = vunpack.c.l.s8.bf16 %v2264_v59  ;;  %v2471_v45 = vld [vmem:[#allocation5 + $0xb30] sm:$0xff] }
 0x392   :  { %v3463_v0 = vunpack.c.l.s8.bf16 %v2471_v45 }
 0x394   :  { %4674 = vmatpush2.bf16.msra.mxu0 %v3925_v7  ;;  %4781 = vmatpush1.bf16.msra.mxu1 %v3335_v42  ;;  %v10321_v7 = vpop.f32.mrf.mxu1  ;;  %v3047_v42 = vunpack.c.l.s8.bf16 %v2263_v39  ;;  %v3224_v39 = vunpack.c.h.s8.bf16 %v2344_v13 }
 0x395   :  { %4675 = vmatprep.subr.bf16.mxu0 %v3910_v24  ;;  %4782 = vmatprep.subr.bf16.mxu1 %v3320_v22  ;;  %v3479_v24 = vunpack.c.h.s8.bf16 %v2471_v45  ;;  %v3032_v22 = vunpack.c.h.s8.bf16 %v2248_v6 }
 0x398   :  { %4676 = vmatpush2.bf16.msra.mxu0 %v3909_v35  ;;  %4783 = vmatpush1.bf16.msra.mxu1 %v3319_v20  ;;  %v2456_v35 = vld [vmem:[#allocation5 + $0xab8] sm:$0xff]  ;;  %v10323_v20 = vpop.f32.mrf.mxu1 }
 0x399   :  { %4731 = vmatprep.subr.bf16.mxu0 %v3128_v28  ;;  %4784 = vmatprep.subr.bf16.mxu1 %v3304_v52  ;;  %v3031_v28 = vunpack.c.h.s8.bf16 %v2247_v29  ;;  %v3016_v52 = vunpack.c.l.s8.bf16 %v2248_v6  ;;  %v3448_v34 = vunpack.c.h.s8.bf16 %v2456_v35  ;;  %v3208_v6 = vunpack.c.l.s8.bf16 %v2344_v13 }
 0x39b   :  { %4678 = vmatmul.mubr.bf16.vlgmr.msra.gmra.mxu0 %v10254_v61 }
 0x39c   :  { %4732 = vmatpush1.bf16.msra.mxu0 %v3127_v21  ;;  %4785 = vmatpush1.bf16.msra.mxu1 %v3303_v30  ;;  %v2455_v21 = vld [vmem:[#allocation5 + $0xab0] sm:$0xff]  ;;  %v2360_v30 = vld [vmem:[#allocation5 + $0x7b8] sm:$0xff] }
 0x39d   :  { %4733 = vmatprep.subr.bf16.mxu0 %v3112_v53  ;;  %4786 = vmatprep.subr.bf16.mxu1 %v3288_v44  ;;  %v10325_v53 = vpop.f32.mrf.mxu1  ;;  %v3015_v44 = vunpack.c.l.s8.bf16 %v2247_v29  ;;  %v3447_v2 = vunpack.c.h.s8.bf16 %v2455_v21  ;;  %v3256_v58 = vunpack.c.h.s8.bf16 %v2360_v30  ;;  %v3431_v8 = vunpack.c.l.s8.bf16 %v2455_v21  ;;  %v2664_v21 = vld [vmem:[#allocation5 + $0x1138] sm:$0xff] }
 0x39e   :  { %4763 = vmatprep.mubr.bf16.mxu0 %v11089_v3 }
 0x39f   :  { %v10327_v62 = vpop.f32.mrf.mxu1 }
 0x3a0   :  { %4734 = vmatpush1.bf16.msra.mxu0 %v3111_v12  ;;  %4787 = vmatpush1.bf16.msra.mxu1 %v3287_v18  ;;  %v2359_v12 = vld [vmem:[#allocation5 + $0x7b0] sm:$0xff]  ;;  %v3432_v18 = vunpack.c.l.s8.bf16 %v2456_v35 }
 0x3a1   :  { %4735 = vmatprep.subr.bf16.mxu0 %v3096_v47  ;;  %4788 = vmatprep.subr.bf16.mxu1 %v3272_v51  ;;  %v2440_v47 = vld [vmem:[#allocation5 + $0xa38] sm:$0xff]  ;;  %v3255_v51 = vunpack.c.h.s8.bf16 %v2359_v12  ;;  %v3239_v59 = vunpack.c.l.s8.bf16 %v2359_v12 }
 0x3a2   :  { %v3400_v17 = vunpack.c.l.s8.bf16 %v2440_v47 }
 0x3a4   :  { %4736 = vmatpush1.bf16.msra.mxu0 %v3095_v4  ;;  %4789 = vmatpush1.bf16.msra.mxu1 %v3271_v57  ;;  %v10329_v4 = vpop.f32.mrf.mxu1  ;;  %v3240_v57 = vunpack.c.l.s8.bf16 %v2360_v30 }
 0x3a5   :  { %4737 = vmatprep.subr.bf16.mxu0 %v3080_v5  ;;  %4790 = vmatprep.subr.bf16.mxu1 %v3512_v40  ;;  %11096 = vst [vmem:[#allocation40_spill] sm:$0xff] %v10329_v4  ;;  %v3416_v5 = vunpack.c.h.s8.bf16 %v2440_v47  ;;  %v2439_v40 = vld [vmem:[#allocation5 + $0xa30] sm:$0xff] }
 0x3a6   :  { %v2663_v47 = vld [vmem:[#allocation5 + $0x1130] sm:$0xff] }
 0x3a8   :  { %4738 = vmatpush1.bf16.msra.mxu0 %v3079_v38  ;;  %4791 = vmatpush2.bf16.msra.mxu1 %v3511_v50  ;;  %v3415_v38 = vunpack.c.h.s8.bf16 %v2439_v40  ;;  %v10331_v50 = vpop.f32.mrf.mxu0 }
 0x3a9   :  { %4739 = vmatprep.subr.bf16.mxu0 %v3064_v25  ;;  %4792 = vmatprep.subr.bf16.mxu1 %v3496_v56  ;;  %v10333_v25 = vpop.f32.mrf.mxu1  ;;  %v2343_v56 = vld [vmem:[#allocation5 + $0x730] sm:$0xff] }
 0x3ab   :  { %v10337_v45 = vpop.f32.mrf.mxu1 }
 0x3ac   :  { %4740 = vmatpush1.bf16.msra.mxu0 %v3063_v23  ;;  %4793 = vmatpush2.bf16.msra.mxu1 %v3495_v43  ;;  %v2680_v23 = vld [vmem:[#allocation5 + $0x11b8] sm:$0xff]  ;;  %v10335_v43 = vpop.f32.mrf.mxu0 }
 0x3ad   :  { %4741 = vmatprep.subr.bf16.mxu0 %v3048_v27  ;;  %4794 = vmatprep.subr.bf16.mxu1 %v3480_v14  ;;  %v3223_v27 = vunpack.c.h.s8.bf16 %v2343_v56  ;;  %v3399_v14 = vunpack.c.l.s8.bf16 %v2439_v40  ;;  %v3863_v40 = vunpack.c.h.s8.bf16 %v2663_v47 }
 0x3ae   :  { %v10339_v29 = vpop.f32.mrf.mxu0 }
 0x3b0   :  { %4742 = vmatpush1.bf16.msra.mxu0 %v3047_v42  ;;  %4795 = vmatpush2.bf16.msra.mxu1 %v3479_v24  ;;  %v3896_v42 = vunpack.c.h.s8.bf16 %v2680_v23  ;;  %v2679_v24 = vld [vmem:[#allocation5 + $0x11b0] sm:$0xff]  ;;  %v10343_v30 = vpop.f32.mrf.mxu0 }
 0x3b1   :  { %4743 = vmatprep.subr.bf16.mxu0 %v3032_v22  ;;  %4796 = vmatprep.subr.bf16.mxu1 %v3464_v15  ;;  %v2328_v22 = vld [vmem:[#allocation5 + $0x6b8] sm:$0xff]  ;;  %v3207_v15 = vunpack.c.l.s8.bf16 %v2343_v56  ;;  %v3895_v35 = vunpack.c.h.s8.bf16 %v2679_v24 }
 0x3b2   :  { %v3176_v12 = vunpack.c.l.s8.bf16 %v2328_v22  ;;  %v2648_v56 = vld [vmem:[#allocation5 + $0x10b8] sm:$0xff] }
 0x3b4   :  { %4744 = vmatpush1.bf16.msra.mxu0 %v3031_v28  ;;  %4797 = vmatpush2.bf16.msra.mxu1 %v3463_v0  ;;  %v10341_v28 = vpop.f32.mrf.mxu1  ;;  %v3192_v0 = vunpack.c.h.s8.bf16 %v2328_v22  ;;  %v2552_v22 = vld [vmem:[#allocation5 + $0xdb8] sm:$0xff] }
 0x3b5   :  { %4745 = vmatprep.subr.bf16.mxu0 %v3016_v52  ;;  %4798 = vmatprep.subr.bf16.mxu1 %v3448_v34  ;;  %v2327_v52 = vld [vmem:[#allocation5 + $0x6b0] sm:$0xff]  ;;  %v3880_v34 = vunpack.c.l.s8.bf16 %v2680_v23 }
 0x3b8   :  { %4746 = vmatpush1.bf16.msra.mxu0 %v3015_v44  ;;  %4799 = vmatpush2.bf16.msra.mxu1 %v3447_v2  ;;  %v10345_v44 = vpop.f32.mrf.mxu1  ;;  %v3191_v2 = vunpack.c.h.s8.bf16 %v2327_v52 }
 0x3b9   :  { %4747 = vmatprep.subr.bf16.mxu0 %v3256_v58  ;;  %4800 = vmatprep.subr.bf16.mxu1 %v3432_v18  ;;  %11097 = vst [vmem:[#allocation41_spill] sm:$0xff] %v10345_v44  ;;  %v3879_v58 = vunpack.c.l.s8.bf16 %v2679_v24  ;;  %v3864_v18 = vunpack.c.h.s8.bf16 %v2664_v21  ;;  %v2647_v24 = vld [vmem:[#allocation5 + $0x10b0] sm:$0xff] }
 0x3bc   :  { %4748 = vmatpush2.bf16.msra.mxu0 %v3255_v51  ;;  %4801 = vmatpush2.bf16.msra.mxu1 %v3431_v8  ;;  %v2312_v51 = vld [vmem:[#allocation5 + $0x638] sm:$0xff]  ;;  %v10349_v8 = vpop.f32.mrf.mxu0 }
 0x3bd   :  { %4749 = vmatprep.subr.bf16.mxu0 %v3240_v57  ;;  %4802 = vmatprep.subr.bf16.mxu1 %v3416_v5  ;;  %v10351_v57 = vpop.f32.mrf.mxu1  ;;  %v3175_v5 = vunpack.c.l.s8.bf16 %v2327_v52 }
 0x3be   :  { %v10353_v13 = vpop.f32.mrf.mxu0 }
 0x3bf   :  { %11098 = vst [vmem:[#allocation42_spill] sm:$0xff] %v10353_v13 }
 0x3c0   :  { %4750 = vmatpush2.bf16.msra.mxu0 %v3239_v59  ;;  %4803 = vmatpush2.bf16.msra.mxu1 %v3415_v38  ;;  %v3160_v59 = vunpack.c.h.s8.bf16 %v2312_v51  ;;  %v2311_v38 = vld [vmem:[#allocation5 + $0x630] sm:$0xff] }
 0x3c1   :  { %4751 = vmatprep.subr.bf16.mxu0 %v3224_v39  ;;  %4804 = vmatprep.subr.bf16.mxu1 %v3400_v17  ;;  %v3848_v39 = vunpack.c.l.s8.bf16 %v2664_v21  ;;  %v10355_v17 = vpop.f32.mrf.mxu1  ;;  %v3159_v23 = vunpack.c.h.s8.bf16 %v2311_v38  ;;  %v3640_v21 = vunpack.c.h.s8.bf16 %v2552_v22 }
 0x3c2   :  { %11099 = vst [vmem:[#allocation43_spill] sm:$0xff] %v10355_v17  ;;  %v2618_v17 = vld [vmem:[#allocation5 + $0xfc8] sm:$0xff] }
 0x3c4   :  { %4752 = vmatpush2.bf16.msra.mxu0 %v3223_v27  ;;  %4805 = vmatpush2.bf16.msra.mxu1 %v3399_v14  ;;  %v3847_v27 = vunpack.c.l.s8.bf16 %v2663_v47  ;;  %v10357_v14 = vpop.f32.mrf.mxu0  ;;  %v3815_v47 = vunpack.c.l.s8.bf16 %v2647_v24 }
 0x3c5   :  { %4753 = vmatprep.subr.bf16.mxu0 %v3208_v6  ;;  %4860 = vmatprep.subr.bf16.mxu1 %v3896_v42  ;;  %v3144_v6 = vunpack.c.l.s8.bf16 %v2312_v51  ;;  %v3832_v42 = vunpack.c.h.s8.bf16 %v2648_v56 }
 0x3c6   :  { %v10361_v52 = vpop.f32.mrf.mxu0 }
 0x3c7   :  { %4807 = vmatmul.mubr.bf16.vlgmr.msra.gmra.mxu1 %v11090_v33  ;;  %11100 = vst [vmem:[#allocation34_spill] sm:$0xff] %v10361_v52 }
 0x3c8   :  { %4754 = vmatpush2.bf16.msra.mxu0 %v3207_v15  ;;  %4861 = vmatpush1.bf16.msra.mxu1 %v3895_v35  ;;  %v10359_v15 = vpop.f32.mrf.mxu1  ;;  %v3143_v35 = vunpack.c.l.s8.bf16 %v2311_v38  ;;  %v10363_v51 = vpop.f32.mrf.mxu0  ;;  %v2631_v38 = vld [vmem:[#allocation5 + $0x1030] sm:$0xff] }
 0x3c9   :  { %4755 = vmatprep.subr.bf16.mxu0 %v3192_v0  ;;  %4862 = vmatprep.subr.bf16.mxu1 %v3880_v34  ;;  %v3831_v0 = vunpack.c.h.s8.bf16 %v2647_v24 }
 0x3ca   :  { %4892 = vmatprep.mubr.bf16.mxu1 %v10165_v63  ;;  %v4550_v34 = vpop.f32.mrf.mxu1 }
 0x3cc   :  { %4756 = vmatpush2.bf16.msra.mxu0 %v3191_v2  ;;  %4863 = vmatpush1.bf16.msra.mxu1 %v3879_v58  ;;  %v2551_v2 = vld [vmem:[#allocation5 + $0xdb0] sm:$0xff]  ;;  %v3816_v58 = vunpack.c.l.s8.bf16 %v2648_v56 }
 0x3cd   :  { %4757 = vmatprep.subr.bf16.mxu0 %v3176_v12  ;;  %4864 = vmatprep.subr.bf16.mxu1 %v3864_v18  ;;  %v2632_v12 = vld [vmem:[#allocation5 + $0x1038] sm:$0xff]  ;;  %v3639_v18 = vunpack.c.h.s8.bf16 %v2551_v2  ;;  %v3623_v56 = vunpack.c.l.s8.bf16 %v2551_v2  ;;  %v3783_v2 = vunpack.c.l.s8.bf16 %v2631_v38 }
 0x3d0   :  { %4758 = vmatpush2.bf16.msra.mxu0 %v3175_v5  ;;  %4865 = vmatpush1.bf16.msra.mxu1 %v3863_v40  ;;  %v10365_v5 = vpop.f32.mrf.mxu1  ;;  %v3624_v40 = vunpack.c.l.s8.bf16 %v2552_v22  ;;  %v3784_v22 = vunpack.c.l.s8.bf16 %v2632_v12 }
 0x3d1   :  { %4759 = vmatprep.subr.bf16.mxu0 %v3160_v59  ;;  %4866 = vmatprep.subr.bf16.mxu1 %v3848_v39  ;;  %11101 = vst [vmem:[#allocation22_spill] sm:$0xff] %v10365_v5  ;;  %v3800_v59 = vunpack.c.h.s8.bf16 %v2632_v12  ;;  %v2536_v39 = vld [vmem:[#allocation5 + $0xd38] sm:$0xff] }
 0x3d2   :  { %v4554_v24 = vpop.f32.mrf.mxu1 }
 0x3d4   :  { %4760 = vmatpush2.bf16.msra.mxu0 %v3159_v23  ;;  %4867 = vmatpush1.bf16.msra.mxu1 %v3847_v27 }
 0x3d5   :  { %4761 = vmatprep.subr.bf16.mxu0 %v3144_v6  ;;  %4868 = vmatprep.subr.bf16.mxu1 %v3832_v42  ;;  %v3799_v6 = vunpack.c.h.s8.bf16 %v2631_v38 }
 0x3d8   :  { %4762 = vmatpush2.bf16.msra.mxu0 %v3143_v35  ;;  %4869 = vmatpush1.bf16.msra.mxu1 %v3831_v0  ;;  %v3608_v35 = vunpack.c.h.s8.bf16 %v2536_v39  ;;  %v2535_v0 = vld [vmem:[#allocation5 + $0xd30] sm:$0xff] }
 0x3d9   :  { %4817 = vmatprep.subr.bf16.mxu0 %v3640_v21  ;;  %4870 = vmatprep.subr.bf16.mxu1 %v3816_v58  ;;  %v2744_v21 = vld [vmem:[#allocation5 + $0x13b8] sm:$0xff]  ;;  %v3591_v5 = vunpack.c.l.s8.bf16 %v2535_v0 }
 0x3db   :  { %v4507_v23 = vpop.f32.mrf.mxu0  ;;  %4764 = vmatmul.mubr.bf16.vlgmr.msra.gmra.mxu0 %v11091_v16 }
 0x3dc   :  { %v10368_v27 = vadd.f32 %v4550_v34, %v4507_v23  ;;  %4818 = vmatpush1.bf16.msra.mxu0 %v3639_v18  ;;  %4871 = vmatpush1.bf16.msra.mxu1 %v3815_v47  ;;  %v3607_v34 = vunpack.c.h.s8.bf16 %v2535_v0  ;;  %v3592_v18 = vunpack.c.l.s8.bf16 %v2536_v39  ;;  %v4024_v47 = vunpack.c.h.s8.bf16 %v2744_v21  ;;  %v2743_v23 = vld [vmem:[#allocation5 + $0x13b0] sm:$0xff] }
 0x3dd   :  { %v10370_v42 = vpop.f32.mrf.mxu0  ;;  %4819 = vmatprep.subr.bf16.mxu0 %v3624_v40  ;;  %4872 = vmatprep.subr.bf16.mxu1 %v3800_v59  ;;  %v2520_v40 = vld [vmem:[#allocation5 + $0xcb8] sm:$0xff]  ;;  %v4023_v12 = vunpack.c.h.s8.bf16 %v2743_v23  ;;  %v4007_v38 = vunpack.c.l.s8.bf16 %v2743_v23 }
 0x3de   :  { %11102 = vst [vmem:[#allocation23_spill] sm:$0xff] %v10370_v42  ;;  %4849 = vmatprep.mubr.bf16.mxu0 %v11092_v11  ;;  %v3576_v59 = vunpack.c.h.s8.bf16 %v2520_v40  ;;  %v2519_v42 = vld [vmem:[#allocation5 + $0xcb0] sm:$0xff]  ;;  %v3560_v39 = vunpack.c.l.s8.bf16 %v2520_v40 }
 0x3df   :  { %v4511_v58 = vpop.f32.mrf.mxu0  ;;  %v3559_v0 = vunpack.c.l.s8.bf16 %v2519_v42 }
 0x3e0   :  { %v10373_v32 = vadd.f32 %v4554_v24, %v4511_v58  ;;  %4820 = vmatpush1.bf16.msra.mxu0 %v3623_v56  ;;  %4873 = vmatpush1.bf16.msra.mxu1 %v3799_v6  ;;  %v4008_v24 = vunpack.c.l.s8.bf16 %v2744_v21  ;;  %v2728_v58 = vld [vmem:[#allocation5 + $0x1338] sm:$0xff]  ;;  %v3575_v56 = vunpack.c.h.s8.bf16 %v2519_v42 }
 0x3e1   :  { %4821 = vmatprep.subr.bf16.mxu0 %v3608_v35  ;;  %4874 = vmatprep.subr.bf16.mxu1 %v3784_v22  ;;  %v3992_v6 = vunpack.c.h.s8.bf16 %v2728_v58  ;;  %v2727_v35 = vld [vmem:[#allocation5 + $0x1330] sm:$0xff]  ;;  %v2504_v22 = vld [vmem:[#allocation5 + $0xc38] sm:$0xff]  ;;  %v3976_v21 = vunpack.c.l.s8.bf16 %v2728_v58 }
 0x3e2   :  { %v3975_v23 = vunpack.c.l.s8.bf16 %v2727_v35  ;;  %v3528_v40 = vunpack.c.l.s8.bf16 %v2504_v22 }
 0x3e4   :  { %4822 = vmatpush1.bf16.msra.mxu0 %v3607_v34  ;;  %4875 = vmatpush1.bf16.msra.mxu1 %v3783_v2  ;;  %v3991_v34 = vunpack.c.h.s8.bf16 %v2727_v35  ;;  %v3544_v2 = vunpack.c.h.s8.bf16 %v2504_v22 }
 0x3e5   :  { %4823 = vmatprep.subr.bf16.mxu0 %v3592_v18  ;;  %4876 = vmatprep.subr.bf16.mxu1 %v4024_v47  ;;  %v2503_v18 = vld [vmem:[#allocation5 + $0xc30] sm:$0xff]  ;;  %v2712_v47 = vld [vmem:[#allocation5 + $0x12b8] sm:$0xff] }
 0x3e6   :  { %v3527_v42 = vunpack.c.l.s8.bf16 %v2503_v18  ;;  %v3944_v58 = vunpack.c.l.s8.bf16 %v2712_v47 }
 0x3e8   :  { %4824 = vmatpush1.bf16.msra.mxu0 %v3591_v5  ;;  %4877 = vmatpush2.bf16.msra.mxu1 %v4023_v12  ;;  %v3543_v5 = vunpack.c.h.s8.bf16 %v2503_v18  ;;  %v3960_v12 = vunpack.c.h.s8.bf16 %v2712_v47 }
 0x3e9   :  { %4825 = vmatprep.subr.bf16.mxu0 %v3576_v59  ;;  %4878 = vmatprep.subr.bf16.mxu1 %v4008_v24  ;;  %v2711_v59 = vld [vmem:[#allocation5 + $0x12b0] sm:$0xff]  ;;  %v2616_v24 = vld [vmem:[#allocation5 + $0xfb8] sm:$0xff] }
 0x3ea   :  { %v3943_v35 = vunpack.c.l.s8.bf16 %v2711_v59  ;;  %v3752_v22 = vunpack.c.l.s8.bf16 %v2616_v24 }
 0x3ec   :  { %4826 = vmatpush1.bf16.msra.mxu0 %v3575_v56  ;;  %4879 = vmatpush2.bf16.msra.mxu1 %v4007_v38  ;;  %v3959_v56 = vunpack.c.h.s8.bf16 %v2711_v59  ;;  %v3768_v38 = vunpack.c.h.s8.bf16 %v2616_v24 }
 0x3ed   :  { %4827 = vmatprep.subr.bf16.mxu0 %v3560_v39  ;;  %4880 = vmatprep.subr.bf16.mxu1 %v3992_v6  ;;  %v2615_v39 = vld [vmem:[#allocation5 + $0xfb0] sm:$0xff]  ;;  %v2696_v6 = vld [vmem:[#allocation5 + $0x1238] sm:$0xff] }
 0x3ee   :  { %v3751_v18 = vunpack.c.l.s8.bf16 %v2615_v39  ;;  %v3912_v47 = vunpack.c.l.s8.bf16 %v2696_v6 }
 0x3f0   :  { %4828 = vmatpush1.bf16.msra.mxu0 %v3559_v0  ;;  %4881 = vmatpush2.bf16.msra.mxu1 %v3991_v34  ;;  %v3767_v0 = vunpack.c.h.s8.bf16 %v2615_v39  ;;  %v3928_v34 = vunpack.c.h.s8.bf16 %v2696_v6 }
 0x3f1   :  { %4829 = vmatprep.subr.bf16.mxu0 %v3544_v2  ;;  %4882 = vmatprep.subr.bf16.mxu1 %v3976_v21  ;;  %v2695_v2 = vld [vmem:[#allocation5 + $0x1230] sm:$0xff]  ;;  %v2600_v21 = vld [vmem:[#allocation5 + $0xf38] sm:$0xff] }
 0x3f2   :  { %v3911_v59 = vunpack.c.l.s8.bf16 %v2695_v2  ;;  %v3720_v24 = vunpack.c.l.s8.bf16 %v2600_v21 }
 0x3f4   :  { %4830 = vmatpush1.bf16.msra.mxu0 %v3543_v5  ;;  %4883 = vmatpush2.bf16.msra.mxu1 %v3975_v23  ;;  %v3927_v5 = vunpack.c.h.s8.bf16 %v2695_v2  ;;  %v3736_v23 = vunpack.c.h.s8.bf16 %v2600_v21 }
 0x3f5   :  { %4831 = vmatprep.subr.bf16.mxu0 %v3528_v40  ;;  %4884 = vmatprep.subr.bf16.mxu1 %v3960_v12  ;;  %v2599_v40 = vld [vmem:[#allocation5 + $0xf30] sm:$0xff]  ;;  %v2298_v12 = vld [vmem:[#allocation5 + $0x5c8] sm:$0xff] }
 0x3f6   :  { %v3719_v39 = vunpack.c.l.s8.bf16 %v2599_v40  ;;  %v3114_v6 = vunpack.c.l.s8.bf16 %v2298_v12 }
 0x3f8   :  { %4832 = vmatpush1.bf16.msra.mxu0 %v3527_v42  ;;  %4885 = vmatpush2.bf16.msra.mxu1 %v3959_v56  ;;  %v3735_v42 = vunpack.c.h.s8.bf16 %v2599_v40  ;;  %v3130_v56 = vunpack.c.h.s8.bf16 %v2298_v12  ;;  %v2568_v40 = vld [vmem:[#allocation5 + $0xe38] sm:$0xff] }
 0x3f9   :  { %4833 = vmatprep.subr.bf16.mxu0 %v3768_v38  ;;  %4886 = vmatprep.subr.bf16.mxu1 %v3944_v58  ;;  %v2297_v38 = vld [vmem:[#allocation5 + $0x5c0] sm:$0xff]  ;;  %v2584_v58 = vld [vmem:[#allocation5 + $0xeb8] sm:$0xff]  ;;  %v3672_v12 = vunpack.c.h.s8.bf16 %v2568_v40 }
 0x3fa   :  { %v3113_v21 = vunpack.c.l.s8.bf16 %v2297_v38 }
 0x3fc   :  { %4834 = vmatpush2.bf16.msra.mxu0 %v3767_v0  ;;  %4887 = vmatpush2.bf16.msra.mxu1 %v3943_v35  ;;  %v3129_v0 = vunpack.c.h.s8.bf16 %v2297_v38  ;;  %v3704_v35 = vunpack.c.h.s8.bf16 %v2584_v58 }
 0x3fd   :  { %4835 = vmatprep.subr.bf16.mxu0 %v3752_v22  ;;  %4888 = vmatprep.subr.bf16.mxu1 %v3928_v34  ;;  %v2583_v22 = vld [vmem:[#allocation5 + $0xeb0] sm:$0xff]  ;;  %v2282_v34 = vld [vmem:[#allocation5 + $0x548] sm:$0xff] }
 0x3fe   :  { %v3703_v2 = vunpack.c.h.s8.bf16 %v2583_v22 }
 0x400   :  { %4836 = vmatpush2.bf16.msra.mxu0 %v3751_v18  ;;  %4889 = vmatpush2.bf16.msra.mxu1 %v3927_v5  ;;  %v3688_v18 = vunpack.c.l.s8.bf16 %v2584_v58  ;;  %v3098_v5 = vunpack.c.h.s8.bf16 %v2282_v34 }
 0x401   :  { %4837 = vmatprep.subr.bf16.mxu0 %v3736_v23  ;;  %4890 = vmatprep.subr.bf16.mxu1 %v3912_v47  ;;  %v2281_v23 = vld [vmem:[#allocation5 + $0x540] sm:$0xff]  ;;  %v3687_v47 = vunpack.c.l.s8.bf16 %v2583_v22 }
 0x402   :  { %v3081_v58 = vunpack.c.l.s8.bf16 %v2281_v23 }
 0x404   :  { %4838 = vmatpush2.bf16.msra.mxu0 %v3735_v42  ;;  %4891 = vmatpush2.bf16.msra.mxu1 %v3911_v59  ;;  %v3097_v42 = vunpack.c.h.s8.bf16 %v2281_v23  ;;  %v2567_v59 = vld [vmem:[#allocation5 + $0xe30] sm:$0xff] }
 0x405   :  { %4839 = vmatprep.subr.bf16.mxu0 %v3720_v24  ;;  %4946 = vmatprep.subr.bf16.mxu1 %v3130_v56  ;;  %v3082_v24 = vunpack.c.l.s8.bf16 %v2282_v34  ;;  %v2266_v56 = vld [vmem:[#allocation5 + $0x4c8] sm:$0xff]  ;;  %v3671_v38 = vunpack.c.h.s8.bf16 %v2567_v59  ;;  %v3655_v22 = vunpack.c.l.s8.bf16 %v2567_v59 }
 0x406   :  { %v3050_v34 = vunpack.c.l.s8.bf16 %v2266_v56 }
 0x407   :  { %4893 = vmatmul.mubr.bf16.vlgmr.msra.gmra.mxu1 %v10254_v61 }
 0x408   :  { %4840 = vmatpush2.bf16.msra.mxu0 %v3719_v39  ;;  %4947 = vmatpush1.bf16.msra.mxu1 %v3129_v0  ;;  %v3656_v39 = vunpack.c.l.s8.bf16 %v2568_v40  ;;  %v3066_v0 = vunpack.c.h.s8.bf16 %v2266_v56 }
 0x409   :  { %4841 = vmatprep.subr.bf16.mxu0 %v3704_v35  ;;  %4948 = vmatprep.subr.bf16.mxu1 %v3114_v6  ;;  %v2265_v35 = vld [vmem:[#allocation5 + $0x4c0] sm:$0xff]  ;;  %v2170_v6 = vld [vmem:[#allocation5 + $0x1c8] sm:$0xff] }
 0x40a   :  { %4978 = vmatprep.mubr.bf16.mxu1 %v11089_v3  ;;  %v3049_v40 = vunpack.c.l.s8.bf16 %v2265_v35 }
 0x40c   :  { %4842 = vmatpush2.bf16.msra.mxu0 %v3703_v2  ;;  %4949 = vmatpush1.bf16.msra.mxu1 %v3113_v21  ;;  %v3065_v2 = vunpack.c.h.s8.bf16 %v2265_v35  ;;  %v2874_v21 = vunpack.c.h.s8.bf16 %v2170_v6 }
 0x40d   :  { %4843 = vmatprep.subr.bf16.mxu0 %v3688_v18  ;;  %4950 = vmatprep.subr.bf16.mxu1 %v3098_v5  ;;  %v2169_v18 = vld [vmem:[#allocation5 + $0x1c0] sm:$0xff]  ;;  %v2250_v5 = vld [vmem:[#allocation5 + $0x448] sm:$0xff] }
 0x40e   :  { %v2873_v23 = vunpack.c.h.s8.bf16 %v2169_v18  ;;  %v3034_v59 = vunpack.c.h.s8.bf16 %v2250_v5 }
 0x410   :  { %4844 = vmatpush2.bf16.msra.mxu0 %v3687_v47  ;;  %4951 = vmatpush1.bf16.msra.mxu1 %v3097_v42  ;;  %v10377_v47 = vpop.f32.mrf.mxu1  ;;  %v10379_v42 = vpop.f32.mrf.mxu0 }
 0x411   :  { %4845 = vmatprep.subr.bf16.mxu0 %v3672_v12  ;;  %4952 = vmatprep.subr.bf16.mxu1 %v3082_v24  ;;  %11103 = vst [vmem:[#allocation24_spill] sm:$0xff] %v10377_v47  ;;  %11104 = vst [vmem:[#allocation25_spill] sm:$0xff] %v10379_v42  ;;  %v2858_v24 = vunpack.c.l.s8.bf16 %v2170_v6  ;;  %v2153_v6 = vld [vmem:[#allocation5 + $0x140] sm:$0xff]  ;;  %v2362_v42 = vld [vmem:[#allocation5 + $0x7c8] sm:$0xff] }
 0x412   :  { %v4636_v12 = vpop.f32.mrf.mxu1 }
 0x414   :  { %4846 = vmatpush2.bf16.msra.mxu0 %v3671_v38  ;;  %4953 = vmatpush1.bf16.msra.mxu1 %v3081_v58  ;;  %v2249_v38 = vld [vmem:[#allocation5 + $0x440] sm:$0xff]  ;;  %v2154_v58 = vld [vmem:[#allocation5 + $0x148] sm:$0xff]  ;;  %v10385_v35 = vpop.f32.mrf.mxu1 }
 0x415   :  { %4847 = vmatprep.subr.bf16.mxu0 %v3656_v39  ;;  %4954 = vmatprep.subr.bf16.mxu1 %v3066_v0  ;;  %v2857_v0 = vunpack.c.l.s8.bf16 %v2169_v18  ;;  %11106 = vst [vmem:[#allocation36_spill] sm:$0xff] %v10385_v35  ;;  %v2841_v18 = vunpack.c.h.s8.bf16 %v2153_v6  ;;  %v2361_v35 = vld [vmem:[#allocation5 + $0x7c0] sm:$0xff] }
 0x418   :  { %4848 = vmatpush2.bf16.msra.mxu0 %v3655_v22  ;;  %4955 = vmatpush1.bf16.msra.mxu1 %v3065_v2  ;;  %v3033_v22 = vunpack.c.h.s8.bf16 %v2249_v38 }
 0x419   :  { %4903 = vmatprep.subr.bf16.mxu0 %v2874_v21  ;;  %4956 = vmatprep.subr.bf16.mxu1 %v3050_v34  ;;  %v2842_v21 = vunpack.c.h.s8.bf16 %v2154_v58  ;;  %v3018_v34 = vunpack.c.l.s8.bf16 %v2250_v5  ;;  %v2138_v5 = vld [vmem:[#allocation5 + $0xc8] sm:$0xff] }
 0x41b   :  { %v4593_v39 = vpop.f32.mrf.mxu0  ;;  %4850 = vmatmul.mubr.bf16.vlgmr.msra.gmra.mxu0 %v11093_v48 }
 0x41c   :  { %v4594_v56 = vadd.f32 %v4593_v39, %v10368_v27  ;;  %4904 = vmatpush1.bf16.msra.mxu0 %v2873_v23  ;;  %4957 = vmatpush1.bf16.msra.mxu1 %v3049_v40  ;;  %v3017_v23 = vunpack.c.l.s8.bf16 %v2249_v38  ;;  %v4640_v40 = vpop.f32.mrf.mxu1  ;;  %v2826_v39 = vunpack.c.l.s8.bf16 %v2154_v58  ;;  %v3241_v58 = vunpack.c.l.s8.bf16 %v2361_v35 }
 0x41d   :  { %v10383_v2 = vpop.f32.mrf.mxu0  ;;  %4905 = vmatprep.subr.bf16.mxu0 %v2858_v24  ;;  %4958 = vmatprep.subr.bf16.mxu1 %v3034_v59  ;;  %v3258_v24 = vunpack.c.h.s8.bf16 %v2362_v42 }
 0x41e   :  { %11105 = vst [vmem:[#allocation35_spill] sm:$0xff] %v10383_v2  ;;  %v10387_v47 = vadd.f32 %v4636_v12, %v4594_v56  ;;  %4935 = vmatprep.mubr.bf16.mxu0 %v11094_v10  ;;  %v2825_v12 = vunpack.c.l.s8.bf16 %v2153_v6  ;;  %v3257_v56 = vunpack.c.h.s8.bf16 %v2361_v35  ;;  %v2810_v2 = vunpack.c.h.s8.bf16 %v2138_v5 }
 0x41f   :  { %v4597_v44 = vpop.f32.mrf.mxu0 }
 0x420   :  { %v4598_v27 = vadd.f32 %v4597_v44, %v10373_v32  ;;  %4906 = vmatpush1.bf16.msra.mxu0 %v2857_v0  ;;  %4959 = vmatpush1.bf16.msra.mxu1 %v3033_v22  ;;  %v2137_v32 = vld [vmem:[#allocation5 + $0xc0] sm:$0xff]  ;;  %v3242_v44 = vunpack.c.l.s8.bf16 %v2362_v42  ;;  %v2346_v0 = vld [vmem:[#allocation5 + $0x748] sm:$0xff]  ;;  %v2794_v22 = vunpack.c.l.s8.bf16 %v2138_v5 }
 0x421   :  { %4907 = vmatprep.subr.bf16.mxu0 %v2842_v21  ;;  %4960 = vmatprep.subr.bf16.mxu1 %v3018_v34  ;;  %v2809_v38 = vunpack.c.h.s8.bf16 %v2137_v32  ;;  %v3226_v21 = vunpack.c.h.s8.bf16 %v2346_v0  ;;  %v2345_v34 = vld [vmem:[#allocation5 + $0x740] sm:$0xff]  ;;  %v2793_v6 = vunpack.c.l.s8.bf16 %v2137_v32  ;;  %v3210_v42 = vunpack.c.l.s8.bf16 %v2346_v0 }
 0x422   :  { %v10391_v59 = vadd.f32 %v4640_v40, %v4598_v27  ;;  %v2122_v27 = vld [vmem:[#allocation5 + $0x48] sm:$0xff]  ;;  %v2121_v40 = vld [vmem:[#allocation5 + $0x40] sm:$0xff]  ;;  %v3209_v35 = vunpack.c.l.s8.bf16 %v2345_v34 }
 0x423   :  { %v2761_v32 = vunpack.c.l.s8.bf16 %v2121_v40 }
 0x424   :  { %4908 = vmatpush1.bf16.msra.mxu0 %v2841_v18  ;;  %4961 = vmatpush1.bf16.msra.mxu1 %v3017_v23  ;;  %v3225_v18 = vunpack.c.h.s8.bf16 %v2345_v34  ;;  %v2778_v23 = vunpack.c.h.s8.bf16 %v2122_v27 }
 0x425   :  { %4909 = vmatprep.subr.bf16.mxu0 %v2826_v39  ;;  %4962 = vmatprep.subr.bf16.mxu1 %v3258_v24  ;;  %v2330_v39 = vld [vmem:[#allocation5 + $0x6c8] sm:$0xff]  ;;  %v2777_v24 = vunpack.c.h.s8.bf16 %v2121_v40 }
 0x426   :  { %v3194_v5 = vunpack.c.h.s8.bf16 %v2330_v39  ;;  %v3178_v0 = vunpack.c.l.s8.bf16 %v2330_v39 }
 0x428   :  { %4910 = vmatpush1.bf16.msra.mxu0 %v2825_v12  ;;  %4963 = vmatpush2.bf16.msra.mxu1 %v3257_v56  ;;  %v2329_v12 = vld [vmem:[#allocation5 + $0x6c0] sm:$0xff]  ;;  %v2234_v56 = vld [vmem:[#allocation5 + $0x3c8] sm:$0xff] }
 0x429   :  { %4911 = vmatprep.subr.bf16.mxu0 %v2810_v2  ;;  %4964 = vmatprep.subr.bf16.mxu1 %v3242_v44  ;;  %v2762_v2 = vunpack.c.l.s8.bf16 %v2122_v27  ;;  %v3193_v44 = vunpack.c.h.s8.bf16 %v2329_v12  ;;  %v3177_v34 = vunpack.c.l.s8.bf16 %v2329_v12  ;;  %v2986_v27 = vunpack.c.l.s8.bf16 %v2234_v56 }
 0x42c   :  { %4912 = vmatpush1.bf16.msra.mxu0 %v2809_v38  ;;  %4965 = vmatpush2.bf16.msra.mxu1 %v3241_v58  ;;  %v3002_v38 = vunpack.c.h.s8.bf16 %v2234_v56  ;;  %v2233_v58 = vld [vmem:[#allocation5 + $0x3c0] sm:$0xff] }
 0x42d   :  { %4913 = vmatprep.subr.bf16.mxu0 %v2794_v22  ;;  %4966 = vmatprep.subr.bf16.mxu1 %v3226_v21  ;;  %v2314_v22 = vld [vmem:[#allocation5 + $0x648] sm:$0xff]  ;;  %v3001_v21 = vunpack.c.h.s8.bf16 %v2233_v58  ;;  %v2985_v40 = vunpack.c.l.s8.bf16 %v2233_v58 }
 0x42e   :  { %v3146_v39 = vunpack.c.l.s8.bf16 %v2314_v22 }
 0x430   :  { %4914 = vmatpush1.bf16.msra.mxu0 %v2793_v6  ;;  %4967 = vmatpush2.bf16.msra.mxu1 %v3225_v18  ;;  %v3162_v6 = vunpack.c.h.s8.bf16 %v2314_v22  ;;  %v2313_v18 = vld [vmem:[#allocation5 + $0x640] sm:$0xff] }
 0x431   :  { %4915 = vmatprep.subr.bf16.mxu0 %v2778_v23  ;;  %4968 = vmatprep.subr.bf16.mxu1 %v3210_v42  ;;  %v2218_v23 = vld [vmem:[#allocation5 + $0x348] sm:$0xff]  ;;  %v3161_v42 = vunpack.c.h.s8.bf16 %v2313_v18  ;;  %v3145_v12 = vunpack.c.l.s8.bf16 %v2313_v18 }
 0x432   :  { %v2954_v56 = vunpack.c.l.s8.bf16 %v2218_v23 }
 0x434   :  { %4916 = vmatpush1.bf16.msra.mxu0 %v2777_v24  ;;  %4969 = vmatpush2.bf16.msra.mxu1 %v3209_v35  ;;  %v2970_v24 = vunpack.c.h.s8.bf16 %v2218_v23  ;;  %v2217_v35 = vld [vmem:[#allocation5 + $0x340] sm:$0xff] }
 0x435   :  { %4917 = vmatprep.subr.bf16.mxu0 %v2762_v2  ;;  %4970 = vmatprep.subr.bf16.mxu1 %v3194_v5  ;;  %v2554_v2 = vld [vmem:[#allocation5 + $0xdc8] sm:$0xff]  ;;  %v2969_v5 = vunpack.c.h.s8.bf16 %v2217_v35  ;;  %v2953_v58 = vunpack.c.l.s8.bf16 %v2217_v35 }
 0x436   :  { %v3626_v22 = vunpack.c.l.s8.bf16 %v2554_v2 }
 0x438   :  { %4918 = vmatpush1.bf16.msra.mxu0 %v2761_v32  ;;  %4971 = vmatpush2.bf16.msra.mxu1 %v3193_v44  ;;  %v3642_v32 = vunpack.c.h.s8.bf16 %v2554_v2  ;;  %v2553_v44 = vld [vmem:[#allocation5 + $0xdc0] sm:$0xff] }
 0x439   :  { %4919 = vmatprep.subr.bf16.mxu0 %v3002_v38  ;;  %4972 = vmatprep.subr.bf16.mxu1 %v3178_v0  ;;  %v2202_v38 = vld [vmem:[#allocation5 + $0x2c8] sm:$0xff]  ;;  %v3641_v0 = vunpack.c.h.s8.bf16 %v2553_v44  ;;  %v3625_v18 = vunpack.c.l.s8.bf16 %v2553_v44 }
 0x43a   :  { %v2922_v23 = vunpack.c.l.s8.bf16 %v2202_v38 }
 0x43c   :  { %4920 = vmatpush2.bf16.msra.mxu0 %v3001_v21  ;;  %4973 = vmatpush2.bf16.msra.mxu1 %v3177_v34  ;;  %v2938_v21 = vunpack.c.h.s8.bf16 %v2202_v38  ;;  %v2201_v34 = vld [vmem:[#allocation5 + $0x2c0] sm:$0xff] }
 0x43d   :  { %4921 = vmatprep.subr.bf16.mxu0 %v2986_v27  ;;  %4974 = vmatprep.subr.bf16.mxu1 %v3162_v6  ;;  %v2538_v27 = vld [vmem:[#allocation5 + $0xd48] sm:$0xff]  ;;  %v2937_v6 = vunpack.c.h.s8.bf16 %v2201_v34  ;;  %v2921_v35 = vunpack.c.l.s8.bf16 %v2201_v34 }
 0x440   :  { %4922 = vmatpush2.bf16.msra.mxu0 %v2985_v40  ;;  %4975 = vmatpush2.bf16.msra.mxu1 %v3161_v42  ;;  %v3610_v40 = vunpack.c.h.s8.bf16 %v2538_v27  ;;  %v2537_v42 = vld [vmem:[#allocation5 + $0xd40] sm:$0xff] }
 0x441   :  { %4923 = vmatprep.subr.bf16.mxu0 %v2970_v24  ;;  %4976 = vmatprep.subr.bf16.mxu1 %v3146_v39  ;;  %v2186_v24 = vld [vmem:[#allocation5 + $0x248] sm:$0xff]  ;;  %v3609_v39 = vunpack.c.h.s8.bf16 %v2537_v42  ;;  %v3593_v44 = vunpack.c.l.s8.bf16 %v2537_v42 }
 0x442   :  { %v2906_v2 = vunpack.c.h.s8.bf16 %v2186_v24  ;;  %v2890_v38 = vunpack.c.l.s8.bf16 %v2186_v24 }
 0x444   :  { %4924 = vmatpush2.bf16.msra.mxu0 %v2969_v5  ;;  %4977 = vmatpush2.bf16.msra.mxu1 %v3145_v12  ;;  %v2185_v5 = vld [vmem:[#allocation5 + $0x240] sm:$0xff]  ;;  %v3594_v12 = vunpack.c.l.s8.bf16 %v2538_v27 }
 0x445   :  { %4925 = vmatprep.subr.bf16.mxu0 %v2954_v56  ;;  %5032 = vmatprep.subr.bf16.mxu1 %v3642_v32  ;;  %v2522_v56 = vld [vmem:[#allocation5 + $0xcc8] sm:$0xff]  ;;  %v2905_v32 = vunpack.c.h.s8.bf16 %v2185_v5  ;;  %v2889_v34 = vunpack.c.l.s8.bf16 %v2185_v5  ;;  %v2505_v5 = vld [vmem:[#allocation5 + $0xc40] sm:$0xff] }
 0x446   :  { %v3562_v27 = vunpack.c.l.s8.bf16 %v2522_v56 }
 0x447   :  { %4979 = vmatmul.mubr.bf16.vlgmr.msra.gmra.mxu1 %v11091_v16 }
 0x448   :  { %4926 = vmatpush2.bf16.msra.mxu0 %v2953_v58  ;;  %5033 = vmatpush1.bf16.msra.mxu1 %v3641_v0  ;;  %v3578_v58 = vunpack.c.h.s8.bf16 %v2522_v56  ;;  %v2521_v0 = vld [vmem:[#allocation5 + $0xcc0] sm:$0xff] }
 0x449   :  { %4927 = vmatprep.subr.bf16.mxu0 %v2938_v21  ;;  %5034 = vmatprep.subr.bf16.mxu1 %v3626_v22  ;;  %v2426_v21 = vld [vmem:[#allocation5 + $0x9c8] sm:$0xff]  ;;  %v3577_v22 = vunpack.c.h.s8.bf16 %v2521_v0  ;;  %v3561_v24 = vunpack.c.l.s8.bf16 %v2521_v0  ;;  %v3545_v0 = vunpack.c.h.s8.bf16 %v2505_v5 }
 0x44a   :  { %5064 = vmatprep.mubr.bf16.mxu1 %v11092_v11 }
 0x44c   :  { %4928 = vmatpush2.bf16.msra.mxu0 %v2937_v6  ;;  %5035 = vmatpush1.bf16.msra.mxu1 %v3625_v18  ;;  %v3386_v6 = vunpack.c.h.s8.bf16 %v2426_v21  ;;  %v2425_v18 = vld [vmem:[#allocation5 + $0x9c0] sm:$0xff] }
 0x44d   :  { %4929 = vmatprep.subr.bf16.mxu0 %v2922_v23  ;;  %5036 = vmatprep.subr.bf16.mxu1 %v3610_v40  ;;  %v10396_v23 = vsub.s32 4, %v8266_v1  ;;  %v2506_v40 = vld [vmem:[#allocation5 + $0xc48] sm:$0xff]  ;;  %v3385_v42 = vunpack.c.h.s8.bf16 %v2425_v18 }
 0x44f   :  { %11107 = vst [vmem:[#allocation37_spill] sm:$0xff] %v10396_v23 }
 0x450   :  { %4930 = vmatpush2.bf16.msra.mxu0 %v2921_v35  ;;  %5037 = vmatpush1.bf16.msra.mxu1 %v3609_v39  ;;  %v10398_v35 = vpop.f32.mrf.mxu0  ;;  %v3370_v39 = vunpack.c.l.s8.bf16 %v2426_v21 }
 0x451   :  { %4931 = vmatprep.subr.bf16.mxu0 %v2906_v2  ;;  %5038 = vmatprep.subr.bf16.mxu1 %v3594_v12  ;;  %11108 = vst [vmem:[#allocation38_spill] sm:$0xff] %v10398_v35  ;;  %v3546_v2 = vunpack.c.h.s8.bf16 %v2506_v40  ;;  %v8015_v12 = vld [vmem:[#allocation7] sm:$0xff]  ;;  %v8016_v35 = vld [vmem:[#allocation8] sm:$0xff] }
 0x454   :  { %4932 = vmatpush2.bf16.msra.mxu0 %v2905_v32  ;;  %5039 = vmatpush1.bf16.msra.mxu1 %v3593_v44  ;;  %v5786_v32 = vrot.slane %v8015_v12, %v10396_v23  ;;  %v2410_v44 = vld [vmem:[#allocation5 + $0x948] sm:$0xff]  ;;  %v5902_v12 = vrot.slane %v8016_v35, %v10396_v23 }
 0x455   :  { %4933 = vmatprep.subr.bf16.mxu0 %v2890_v38  ;;  %5040 = vmatprep.subr.bf16.mxu1 %v3578_v58  ;;  %v3369_v58 = vunpack.c.l.s8.bf16 %v2425_v18  ;;  %v3354_v21 = vunpack.c.h.s8.bf16 %v2410_v44 }
 0x458   :  { %4934 = vmatpush2.bf16.msra.mxu0 %v2889_v34  ;;  %5041 = vmatpush1.bf16.msra.mxu1 %v3577_v22  ;;  %v2409_v22 = vld [vmem:[#allocation5 + $0x940] sm:$0xff] }
 0x459   :  { %4989 = vmatprep.subr.bf16.mxu0 %v3386_v6  ;;  %5042 = vmatprep.subr.bf16.mxu1 %v3562_v27  ;;  %v3530_v6 = vunpack.c.l.s8.bf16 %v2506_v40  ;;  %v3353_v18 = vunpack.c.h.s8.bf16 %v2409_v22  ;;  %v3337_v35 = vunpack.c.l.s8.bf16 %v2409_v22 }
 0x45b   :  { %v4679_v56 = vpop.f32.mrf.mxu0  ;;  %4936 = vmatmul.mubr.bf16.vlgmr.msra.gmra.mxu0 %v11087_v26 }
 0x45c   :  { %v4680_v38 = vadd.f32 %v4679_v56, %v10387_v47  ;;  %4990 = vmatpush1.bf16.msra.mxu0 %v3385_v42  ;;  %5043 = vmatpush1.bf16.msra.mxu1 %v3561_v24  ;;  %v3529_v42 = vunpack.c.l.s8.bf16 %v2505_v5  ;;  %v3338_v24 = vunpack.c.l.s8.bf16 %v2410_v44 }
 0x45d   :  { %v10403_v34 = vpop.f32.mrf.mxu0  ;;  %4991 = vmatprep.subr.bf16.mxu0 %v3370_v39  ;;  %5044 = vmatprep.subr.bf16.mxu1 %v3546_v2  ;;  %v3770_v39 = vunpack.c.h.s8.bf16 %v2618_v17  ;;  %v2617_v2 = vld [vmem:[#allocation5 + $0xfc0] sm:$0xff] }
 0x45e   :  { %11109 = vst [vmem:[#allocation28_spill] sm:$0xff] %v10403_v34  ;;  %v5851_v27 = vmul.f32 %v5786_v32, %v4680_v38  ;;  %5021 = vmatprep.mubr.bf16.mxu0 %v11088_v19  ;;  %v2394_v38 = vld [vmem:[#allocation5 + $0x8c8] sm:$0xff]  ;;  %v3769_v23 = vunpack.c.h.s8.bf16 %v2617_v2 }
 0x45f   :  { %v4683_v13 = vpop.f32.mrf.mxu0  ;;  %v3322_v52 = vunpack.c.h.s8.bf16 %v2394_v38 }
 0x460   :  { %v4684_v47 = vadd.f32 %v4683_v13, %v10391_v59  ;;  %4992 = vmatpush1.bf16.msra.mxu0 %v3369_v58  ;;  %5045 = vmatpush1.bf16.msra.mxu1 %v3545_v0  ;;  %v5967_v40 = vadd.f32 %v5902_v12, %v5851_v27  ;;  %v2393_v13 = vld [vmem:[#allocation5 + $0x8c0] sm:$0xff]  ;;  %v3754_v59 = vunpack.c.l.s8.bf16 %v2618_v17  ;;  %v2602_v0 = vld [vmem:[#allocation5 + $0xf48] sm:$0xff] }
 0x461   :  { %4993 = vmatprep.subr.bf16.mxu0 %v3354_v21  ;;  %5046 = vmatprep.subr.bf16.mxu1 %v3530_v6  ;;  %v3321_v21 = vunpack.c.h.s8.bf16 %v2393_v13  ;;  %v3306_v6 = vunpack.c.l.s8.bf16 %v2394_v38  ;;  %v3738_v22 = vunpack.c.h.s8.bf16 %v2602_v0  ;;  %v2601_v27 = vld [vmem:[#allocation5 + $0xf40] sm:$0xff] }
 0x462   :  { %v5867_v56 = vmul.f32 %v5786_v32, %v4684_v47  ;;  %v5999_v58 = vmax.f32 %v5967_v40, 0.0  ;;  %v3753_v32 = vunpack.c.l.s8.bf16 %v2617_v2  ;;  %v3305_v47 = vunpack.c.l.s8.bf16 %v2393_v13  ;;  %v2585_v40 = vld [vmem:[#allocation5 + $0xec0] sm:$0xff] }
 0x464   :  { %v5983_v34 = vadd.f32 %v5902_v12, %v5867_v56  ;;  %4994 = vmatpush1.bf16.msra.mxu0 %v3353_v18  ;;  %5047 = vmatpush1.bf16.msra.mxu1 %v3529_v42  ;;  %v2378_v12 = vld [vmem:[#allocation5 + $0x848] sm:$0xff]  ;;  %v3737_v18 = vunpack.c.h.s8.bf16 %v2601_v27  ;;  %v3722_v42 = vunpack.c.l.s8.bf16 %v2602_v0 }
 0x465   :  { %4995 = vmatprep.subr.bf16.mxu0 %v3338_v24  ;;  %5048 = vmatprep.subr.bf16.mxu1 %v3770_v39  ;;  %v3290_v17 = vunpack.c.h.s8.bf16 %v2378_v12  ;;  %v2586_v24 = vld [vmem:[#allocation5 + $0xec8] sm:$0xff] }
 0x466   :  { %v6015_v5 = vmax.f32 %v5983_v34, 0.0  ;;  %v2377_v34 = vld [vmem:[#allocation5 + $0x840] sm:$0xff]  ;;  %v3706_v2 = vunpack.c.h.s8.bf16 %v2586_v24  ;;  %v2490_v56 = vld [vmem:[#allocation5 + $0xbc8] sm:$0xff] }
 0x467   :  { %v3289_v39 = vunpack.c.h.s8.bf16 %v2377_v34  ;;  %v3273_v38 = vunpack.c.l.s8.bf16 %v2377_v34  ;;  %v3514_v13 = vunpack.c.h.s8.bf16 %v2490_v56 }
 0x468   :  { %v10408_v44 = vpack.c.bf16 %v6015_v5, %v5999_v58  ;;  %4996 = vmatpush1.bf16.msra.mxu0 %v3337_v35  ;;  %5049 = vmatpush2.bf16.msra.mxu1 %v3769_v23  ;;  %v3721_v23 = vunpack.c.l.s8.bf16 %v2601_v27  ;;  %v3705_v35 = vunpack.c.h.s8.bf16 %v2585_v40  ;;  %v3690_v58 = vunpack.c.l.s8.bf16 %v2586_v24  ;;  %v2570_v5 = vld [vmem:[#allocation5 + $0xe48] sm:$0xff] }
 0x469   :  { %4997 = vmatprep.subr.bf16.mxu0 %v3322_v52  ;;  %5050 = vmatprep.subr.bf16.mxu1 %v3754_v59  ;;  %v3274_v52 = vunpack.c.l.s8.bf16 %v2378_v12  ;;  %v2489_v59 = vld [vmem:[#allocation5 + $0xbc0] sm:$0xff]  ;;  %v2474_v27 = vld [vmem:[#allocation5 + $0xb48] sm:$0xff]  ;;  %v3658_v34 = vunpack.c.l.s8.bf16 %v2570_v5 }
 0x46a   :  { %11110 = vst [vmem:[#allocation30_spill] sm:$0xff] %v10408_v44  ;;  %v3513_v0 = vunpack.c.h.s8.bf16 %v2489_v59  ;;  %v3497_v12 = vunpack.c.l.s8.bf16 %v2489_v59  ;;  %v2683_v44 = vld [vmem:[#allocation5 + $0x11d0] sm:$0xff] }
 0x46c   :  { %4998 = vmatpush1.bf16.msra.mxu0 %v3321_v21  ;;  %5051 = vmatpush2.bf16.msra.mxu1 %v3753_v32  ;;  %v3689_v21 = vunpack.c.l.s8.bf16 %v2585_v40  ;;  %v3498_v32 = vunpack.c.l.s8.bf16 %v2490_v56  ;;  %v2458_v40 = vld [vmem:[#allocation5 + $0xac8] sm:$0xff] }
 0x46d   :  { %4999 = vmatprep.subr.bf16.mxu0 %v3306_v6  ;;  %5052 = vmatprep.subr.bf16.mxu1 %v3738_v22  ;;  %v3674_v6 = vunpack.c.h.s8.bf16 %v2570_v5  ;;  %v2569_v22 = vld [vmem:[#allocation5 + $0xe40] sm:$0xff] }
 0x470   :  { %5000 = vmatpush1.bf16.msra.mxu0 %v3305_v47  ;;  %5053 = vmatpush2.bf16.msra.mxu1 %v3737_v18  ;;  %v3673_v47 = vunpack.c.h.s8.bf16 %v2569_v22  ;;  %v3482_v18 = vunpack.c.h.s8.bf16 %v2474_v27 }
 0x471   :  { %5001 = vmatprep.subr.bf16.mxu0 %v3290_v17  ;;  %5054 = vmatprep.subr.bf16.mxu1 %v3722_v42  ;;  %v2473_v17 = vld [vmem:[#allocation5 + $0xb40] sm:$0xff]  ;;  %v2172_v42 = vld [vmem:[#allocation5 + $0x1d8] sm:$0xff] }
 0x472   :  { %v3481_v24 = vunpack.c.h.s8.bf16 %v2473_v17  ;;  %v3465_v56 = vunpack.c.l.s8.bf16 %v2473_v17  ;;  %v2860_v59 = vunpack.c.l.s8.bf16 %v2172_v42 }
 0x474   :  { %5002 = vmatpush1.bf16.msra.mxu0 %v3289_v39  ;;  %5055 = vmatpush2.bf16.msra.mxu1 %v3721_v23  ;;  %v3657_v39 = vunpack.c.l.s8.bf16 %v2569_v22  ;;  %v3466_v23 = vunpack.c.l.s8.bf16 %v2474_v27  ;;  %v2442_v22 = vld [vmem:[#allocation5 + $0xa48] sm:$0xff] }
 0x475   :  { %5003 = vmatprep.subr.bf16.mxu0 %v3274_v52  ;;  %5056 = vmatprep.subr.bf16.mxu1 %v3706_v2  ;;  %v2876_v52 = vunpack.c.h.s8.bf16 %v2172_v42  ;;  %v2171_v2 = vld [vmem:[#allocation5 + $0x1d0] sm:$0xff] }
 0x478   :  { %5004 = vmatpush1.bf16.msra.mxu0 %v3273_v38  ;;  %5057 = vmatpush2.bf16.msra.mxu1 %v3705_v35  ;;  %v2875_v38 = vunpack.c.h.s8.bf16 %v2171_v2  ;;  %v3450_v35 = vunpack.c.h.s8.bf16 %v2458_v40 }
 0x479   :  { %5005 = vmatprep.subr.bf16.mxu0 %v3514_v13  ;;  %5058 = vmatprep.subr.bf16.mxu1 %v3690_v58  ;;  %v2457_v13 = vld [vmem:[#allocation5 + $0xac0] sm:$0xff]  ;;  %v2156_v58 = vld [vmem:[#allocation5 + $0x158] sm:$0xff] }
 0x47a   :  { %v3449_v5 = vunpack.c.h.s8.bf16 %v2457_v13  ;;  %v3433_v27 = vunpack.c.l.s8.bf16 %v2457_v13  ;;  %v2828_v17 = vunpack.c.l.s8.bf16 %v2156_v58 }
 0x47c   :  { %5006 = vmatpush2.bf16.msra.mxu0 %v3513_v0  ;;  %5059 = vmatpush2.bf16.msra.mxu1 %v3689_v21  ;;  %v2859_v0 = vunpack.c.l.s8.bf16 %v2171_v2  ;;  %v3434_v21 = vunpack.c.l.s8.bf16 %v2458_v40  ;;  %v2682_v2 = vld [vmem:[#allocation5 + $0x11c8] sm:$0xff] }
 0x47d   :  { %5007 = vmatprep.subr.bf16.mxu0 %v3498_v32  ;;  %5060 = vmatprep.subr.bf16.mxu1 %v3674_v6  ;;  %v2844_v32 = vunpack.c.h.s8.bf16 %v2156_v58  ;;  %v2155_v6 = vld [vmem:[#allocation5 + $0x150] sm:$0xff] }
 0x480   :  { %5008 = vmatpush2.bf16.msra.mxu0 %v3497_v12  ;;  %5061 = vmatpush2.bf16.msra.mxu1 %v3673_v47  ;;  %v2843_v12 = vunpack.c.h.s8.bf16 %v2155_v6  ;;  %v3418_v47 = vunpack.c.h.s8.bf16 %v2442_v22 }
 0x481   :  { %5009 = vmatprep.subr.bf16.mxu0 %v3482_v18  ;;  %5062 = vmatprep.subr.bf16.mxu1 %v3658_v34  ;;  %v2441_v18 = vld [vmem:[#allocation5 + $0xa40] sm:$0xff]  ;;  %v2140_v34 = vld [vmem:[#allocation5 + $0xd8] sm:$0xff] }
 0x482   :  { %v3417_v42 = vunpack.c.h.s8.bf16 %v2441_v18  ;;  %v3401_v40 = vunpack.c.l.s8.bf16 %v2441_v18  ;;  %v2796_v13 = vunpack.c.l.s8.bf16 %v2140_v34 }
 0x484   :  { %5010 = vmatpush2.bf16.msra.mxu0 %v3481_v24  ;;  %5063 = vmatpush2.bf16.msra.mxu1 %v3657_v39  ;;  %v2827_v24 = vunpack.c.l.s8.bf16 %v2155_v6  ;;  %v3402_v39 = vunpack.c.l.s8.bf16 %v2442_v22  ;;  %v2666_v6 = vld [vmem:[#allocation5 + $0x1148] sm:$0xff] }
 0x485   :  { %5011 = vmatprep.subr.bf16.mxu0 %v3466_v23  ;;  %5118 = vmatprep.subr.bf16.mxu1 %v2876_v52  ;;  %v2812_v23 = vunpack.c.h.s8.bf16 %v2140_v34  ;;  %v2139_v52 = vld [vmem:[#allocation5 + $0xd0] sm:$0xff] }
 0x487   :  { %5065 = vmatmul.mubr.bf16.vlgmr.msra.gmra.mxu1 %v11093_v48 }
 0x488   :  { %5012 = vmatpush2.bf16.msra.mxu0 %v3465_v56  ;;  %5119 = vmatpush1.bf16.msra.mxu1 %v2875_v38  ;;  %v2811_v56 = vunpack.c.h.s8.bf16 %v2139_v52  ;;  %v3898_v38 = vunpack.c.h.s8.bf16 %v2682_v2 }
 0x489   :  { %5013 = vmatprep.subr.bf16.mxu0 %v3450_v35  ;;  %5120 = vmatprep.subr.bf16.mxu1 %v2860_v59  ;;  %v2681_v35 = vld [vmem:[#allocation5 + $0x11c0] sm:$0xff]  ;;  %v2124_v59 = vld [vmem:[#allocation5 + $0x58] sm:$0xff] }
 0x48a   :  { %5150 = vmatprep.mubr.bf16.mxu1 %v11094_v10  ;;  %v3897_v58 = vunpack.c.h.s8.bf16 %v2681_v35  ;;  %v3881_v22 = vunpack.c.l.s8.bf16 %v2681_v35  ;;  %v2764_v18 = vunpack.c.l.s8.bf16 %v2124_v59 }
 0x48c   :  { %5014 = vmatpush2.bf16.msra.mxu0 %v3449_v5  ;;  %5121 = vmatpush1.bf16.msra.mxu1 %v2859_v0  ;;  %v2795_v5 = vunpack.c.l.s8.bf16 %v2139_v52  ;;  %v3882_v0 = vunpack.c.l.s8.bf16 %v2682_v2  ;;  %v2650_v52 = vld [vmem:[#allocation5 + $0x10c8] sm:$0xff] }
 0x48d   :  { %5015 = vmatprep.subr.bf16.mxu0 %v3434_v21  ;;  %5122 = vmatprep.subr.bf16.mxu1 %v2844_v32  ;;  %v2780_v21 = vunpack.c.h.s8.bf16 %v2124_v59  ;;  %v2123_v32 = vld [vmem:[#allocation5 + $0x50] sm:$0xff] }
 0x490   :  { %5016 = vmatpush2.bf16.msra.mxu0 %v3433_v27  ;;  %5123 = vmatpush1.bf16.msra.mxu1 %v2843_v12  ;;  %v2779_v27 = vunpack.c.h.s8.bf16 %v2123_v32  ;;  %v3866_v12 = vunpack.c.h.s8.bf16 %v2666_v6 }
 0x491   :  { %5017 = vmatprep.subr.bf16.mxu0 %v3418_v47  ;;  %5124 = vmatprep.subr.bf16.mxu1 %v2828_v17  ;;  %v2665_v47 = vld [vmem:[#allocation5 + $0x1140] sm:$0xff]  ;;  %v2236_v17 = vld [vmem:[#allocation5 + $0x3d8] sm:$0xff] }
 0x492   :  { %v3865_v34 = vunpack.c.h.s8.bf16 %v2665_v47  ;;  %v3849_v2 = vunpack.c.l.s8.bf16 %v2665_v47  ;;  %v2988_v35 = vunpack.c.l.s8.bf16 %v2236_v17 }
 0x494   :  { %5018 = vmatpush2.bf16.msra.mxu0 %v3417_v42  ;;  %5125 = vmatpush1.bf16.msra.mxu1 %v2827_v24  ;;  %v2763_v42 = vunpack.c.l.s8.bf16 %v2123_v32  ;;  %v3850_v24 = vunpack.c.l.s8.bf16 %v2666_v6  ;;  %v2634_v32 = vld [vmem:[#allocation5 + $0x1048] sm:$0xff] }
 0x495   :  { %5019 = vmatprep.subr.bf16.mxu0 %v3402_v39  ;;  %5126 = vmatprep.subr.bf16.mxu1 %v2812_v23  ;;  %v3004_v39 = vunpack.c.h.s8.bf16 %v2236_v17  ;;  %v2235_v23 = vld [vmem:[#allocation5 + $0x3d0] sm:$0xff] }
 0x498   :  { %5020 = vmatpush2.bf16.msra.mxu0 %v3401_v40  ;;  %5127 = vmatpush1.bf16.msra.mxu1 %v2811_v56  ;;  %v3003_v40 = vunpack.c.h.s8.bf16 %v2235_v23  ;;  %v3834_v56 = vunpack.c.h.s8.bf16 %v2650_v52 }
 0x499   :  { %5075 = vmatprep.subr.bf16.mxu0 %v3898_v38  ;;  %5128 = vmatprep.subr.bf16.mxu1 %v2796_v13  ;;  %v2649_v38 = vld [vmem:[#allocation5 + $0x10c0] sm:$0xff]  ;;  %v2220_v13 = vld [vmem:[#allocation5 + $0x358] sm:$0xff] }
 0x49a   :  { %v3833_v59 = vunpack.c.h.s8.bf16 %v2649_v38  ;;  %v3817_v6 = vunpack.c.l.s8.bf16 %v2649_v38  ;;  %v2956_v47 = vunpack.c.l.s8.bf16 %v2220_v13 }
 0x49b   :  { %5022 = vmatmul.mubr.bf16.vlgmr.msra.gmra.mxu0 %v11090_v33 }
 0x49c   :  { %5076 = vmatpush1.bf16.msra.mxu0 %v3897_v58  ;;  %5129 = vmatpush1.bf16.msra.mxu1 %v2795_v5  ;;  %v2987_v58 = vunpack.c.l.s8.bf16 %v2235_v23  ;;  %v3818_v5 = vunpack.c.l.s8.bf16 %v2650_v52  ;;  %v2746_v23 = vld [vmem:[#allocation5 + $0x13c8] sm:$0xff] }
 0x49d   :  { %5077 = vmatprep.subr.bf16.mxu0 %v3882_v0  ;;  %5130 = vmatprep.subr.bf16.mxu1 %v2780_v21  ;;  %v2972_v0 = vunpack.c.h.s8.bf16 %v2220_v13  ;;  %v2219_v21 = vld [vmem:[#allocation5 + $0x350] sm:$0xff] }
 0x49e   :  { %5107 = vmatprep.mubr.bf16.mxu0 %v10165_v63 }
 0x4a0   :  { %5078 = vmatpush1.bf16.msra.mxu0 %v3881_v22  ;;  %5131 = vmatpush1.bf16.msra.mxu1 %v2779_v27  ;;  %v2971_v22 = vunpack.c.h.s8.bf16 %v2219_v21  ;;  %v3802_v27 = vunpack.c.h.s8.bf16 %v2634_v32 }
 0x4a1   :  { %5079 = vmatprep.subr.bf16.mxu0 %v3866_v12  ;;  %5132 = vmatprep.subr.bf16.mxu1 %v2764_v18  ;;  %v2633_v12 = vld [vmem:[#allocation5 + $0x1040] sm:$0xff]  ;;  %v2204_v18 = vld [vmem:[#allocation5 + $0x2d8] sm:$0xff] }
 0x4a2   :  { %v3801_v17 = vunpack.c.h.s8.bf16 %v2633_v12  ;;  %v3785_v52 = vunpack.c.l.s8.bf16 %v2633_v12  ;;  %v2924_v38 = vunpack.c.l.s8.bf16 %v2204_v18 }
 0x4a4   :  { %5080 = vmatpush1.bf16.msra.mxu0 %v3865_v34  ;;  %5133 = vmatpush1.bf16.msra.mxu1 %v2763_v42  ;;  %v2955_v34 = vunpack.c.l.s8.bf16 %v2219_v21  ;;  %v3786_v42 = vunpack.c.l.s8.bf16 %v2634_v32  ;;  %v2730_v21 = vld [vmem:[#allocation5 + $0x1348] sm:$0xff] }
 0x4a5   :  { %5081 = vmatprep.subr.bf16.mxu0 %v3850_v24  ;;  %5134 = vmatprep.subr.bf16.mxu1 %v3004_v39  ;;  %v2940_v24 = vunpack.c.h.s8.bf16 %v2204_v18  ;;  %v2203_v39 = vld [vmem:[#allocation5 + $0x2d0] sm:$0xff] }
 0x4a8   :  { %5082 = vmatpush1.bf16.msra.mxu0 %v3849_v2  ;;  %5135 = vmatpush2.bf16.msra.mxu1 %v3003_v40  ;;  %v2939_v2 = vunpack.c.h.s8.bf16 %v2203_v39  ;;  %v4026_v40 = vunpack.c.h.s8.bf16 %v2746_v23 }
 0x4a9   :  { %5083 = vmatprep.subr.bf16.mxu0 %v3834_v56  ;;  %5136 = vmatprep.subr.bf16.mxu1 %v2988_v35  ;;  %v2745_v56 = vld [vmem:[#allocation5 + $0x13c0] sm:$0xff]  ;;  %v2188_v35 = vld [vmem:[#allocation5 + $0x258] sm:$0xff] }
 0x4aa   :  { %v4025_v13 = vunpack.c.h.s8.bf16 %v2745_v56  ;;  %v4009_v32 = vunpack.c.l.s8.bf16 %v2745_v56  ;;  %v2892_v12 = vunpack.c.l.s8.bf16 %v2188_v35 }
 0x4ac   :  { %5084 = vmatpush1.bf16.msra.mxu0 %v3833_v59  ;;  %5137 = vmatpush2.bf16.msra.mxu1 %v2987_v58  ;;  %v2923_v59 = vunpack.c.l.s8.bf16 %v2203_v39  ;;  %v4010_v58 = vunpack.c.l.s8.bf16 %v2746_v23  ;;  %v2714_v39 = vld [vmem:[#allocation5 + $0x12c8] sm:$0xff] }
 0x4ad   :  { %5085 = vmatprep.subr.bf16.mxu0 %v3818_v5  ;;  %5138 = vmatprep.subr.bf16.mxu1 %v2972_v0  ;;  %v2908_v5 = vunpack.c.h.s8.bf16 %v2188_v35  ;;  %v2187_v0 = vld [vmem:[#allocation5 + $0x250] sm:$0xff] }
 0x4b0   :  { %5086 = vmatpush1.bf16.msra.mxu0 %v3817_v6  ;;  %5139 = vmatpush2.bf16.msra.mxu1 %v2971_v22  ;;  %v2907_v6 = vunpack.c.h.s8.bf16 %v2187_v0  ;;  %v3994_v22 = vunpack.c.h.s8.bf16 %v2730_v21 }
 0x4b1   :  { %5087 = vmatprep.subr.bf16.mxu0 %v3802_v27  ;;  %5140 = vmatprep.subr.bf16.mxu1 %v2956_v47  ;;  %v2729_v27 = vld [vmem:[#allocation5 + $0x1340] sm:$0xff]  ;;  %v2428_v47 = vld [vmem:[#allocation5 + $0x9d8] sm:$0xff] }
 0x4b2   :  { %v3993_v18 = vunpack.c.h.s8.bf16 %v2729_v27  ;;  %v3977_v23 = vunpack.c.l.s8.bf16 %v2729_v27  ;;  %v3372_v56 = vunpack.c.l.s8.bf16 %v2428_v47 }
 0x4b4   :  { %5088 = vmatpush1.bf16.msra.mxu0 %v3801_v17  ;;  %5141 = vmatpush2.bf16.msra.mxu1 %v2955_v34  ;;  %v2891_v17 = vunpack.c.l.s8.bf16 %v2187_v0  ;;  %v3978_v34 = vunpack.c.l.s8.bf16 %v2730_v21  ;;  %v2698_v0 = vld [vmem:[#allocation5 + $0x1248] sm:$0xff] }
 0x4b5   :  { %5089 = vmatprep.subr.bf16.mxu0 %v3786_v42  ;;  %5142 = vmatprep.subr.bf16.mxu1 %v2940_v24  ;;  %v3388_v42 = vunpack.c.h.s8.bf16 %v2428_v47  ;;  %v2427_v24 = vld [vmem:[#allocation5 + $0x9d0] sm:$0xff] }
 0x4b8   :  { %5090 = vmatpush1.bf16.msra.mxu0 %v3785_v52  ;;  %5143 = vmatpush2.bf16.msra.mxu1 %v2939_v2  ;;  %v3387_v52 = vunpack.c.h.s8.bf16 %v2427_v24  ;;  %v3962_v2 = vunpack.c.h.s8.bf16 %v2714_v39 }
 0x4b9   :  { %5091 = vmatprep.subr.bf16.mxu0 %v4026_v40  ;;  %5144 = vmatprep.subr.bf16.mxu1 %v2924_v38  ;;  %v2713_v40 = vld [vmem:[#allocation5 + $0x12c0] sm:$0xff]  ;;  %v2412_v38 = vld [vmem:[#allocation5 + $0x958] sm:$0xff] }
 0x4ba   :  { %v3961_v35 = vunpack.c.h.s8.bf16 %v2713_v40  ;;  %v3945_v21 = vunpack.c.l.s8.bf16 %v2713_v40  ;;  %v3340_v27 = vunpack.c.l.s8.bf16 %v2412_v38 }
 0x4bc   :  { %5092 = vmatpush2.bf16.msra.mxu0 %v4025_v13  ;;  %5145 = vmatpush2.bf16.msra.mxu1 %v2923_v59  ;;  %v3371_v13 = vunpack.c.l.s8.bf16 %v2427_v24  ;;  %v3946_v59 = vunpack.c.l.s8.bf16 %v2714_v39  ;;  %v2300_v24 = vld [vmem:[#allocation5 + $0x5d8] sm:$0xff] }
 0x4bd   :  { %5093 = vmatprep.subr.bf16.mxu0 %v4010_v58  ;;  %5146 = vmatprep.subr.bf16.mxu1 %v2908_v5  ;;  %v3356_v58 = vunpack.c.h.s8.bf16 %v2412_v38  ;;  %v2411_v5 = vld [vmem:[#allocation5 + $0x950] sm:$0xff] }
 0x4c0   :  { %5094 = vmatpush2.bf16.msra.mxu0 %v4009_v32  ;;  %5147 = vmatpush2.bf16.msra.mxu1 %v2907_v6  ;;  %v3355_v32 = vunpack.c.h.s8.bf16 %v2411_v5  ;;  %v3930_v6 = vunpack.c.h.s8.bf16 %v2698_v0 }
 0x4c1   :  { %5095 = vmatprep.subr.bf16.mxu0 %v3994_v22  ;;  %5148 = vmatprep.subr.bf16.mxu1 %v2892_v12  ;;  %v2697_v22 = vld [vmem:[#allocation5 + $0x1240] sm:$0xff]  ;;  %v2396_v12 = vld [vmem:[#allocation5 + $0x8d8] sm:$0xff] }
 0x4c2   :  { %v3929_v47 = vunpack.c.h.s8.bf16 %v2697_v22  ;;  %v3913_v39 = vunpack.c.l.s8.bf16 %v2697_v22  ;;  %v3308_v40 = vunpack.c.l.s8.bf16 %v2396_v12 }
 0x4c4   :  { %5096 = vmatpush2.bf16.msra.mxu0 %v3993_v18  ;;  %5149 = vmatpush2.bf16.msra.mxu1 %v2891_v17  ;;  %v3339_v18 = vunpack.c.l.s8.bf16 %v2411_v5  ;;  %v3914_v17 = vunpack.c.l.s8.bf16 %v2698_v0  ;;  %v2284_v5 = vld [vmem:[#allocation5 + $0x558] sm:$0xff] }
 0x4c5   :  { %5097 = vmatprep.subr.bf16.mxu0 %v3978_v34  ;;  %5204 = vmatprep.subr.bf16.mxu1 %v3388_v42  ;;  %v3324_v34 = vunpack.c.h.s8.bf16 %v2396_v12  ;;  %v2395_v42 = vld [vmem:[#allocation5 + $0x8d0] sm:$0xff] }
 0x4c7   :  { %5151 = vmatmul.mubr.bf16.vlgmr.msra.gmra.mxu1 %v11087_v26 }
 0x4c8   :  { %5098 = vmatpush2.bf16.msra.mxu0 %v3977_v23  ;;  %5205 = vmatpush1.bf16.msra.mxu1 %v3387_v52  ;;  %v3323_v23 = vunpack.c.h.s8.bf16 %v2395_v42  ;;  %v3132_v52 = vunpack.c.h.s8.bf16 %v2300_v24 }
 0x4c9   :  { %5099 = vmatprep.subr.bf16.mxu0 %v3962_v2  ;;  %5206 = vmatprep.subr.bf16.mxu1 %v3372_v56  ;;  %v2299_v2 = vld [vmem:[#allocation5 + $0x5d0] sm:$0xff]  ;;  %v2380_v56 = vld [vmem:[#allocation5 + $0x858] sm:$0xff] }
 0x4ca   :  { %5236 = vmatprep.mubr.bf16.mxu1 %v11088_v19  ;;  %v3131_v38 = vunpack.c.h.s8.bf16 %v2299_v2  ;;  %v3115_v0 = vunpack.c.l.s8.bf16 %v2299_v2  ;;  %v3276_v22 = vunpack.c.l.s8.bf16 %v2380_v56 }
 0x4cc   :  { %5100 = vmatpush2.bf16.msra.mxu0 %v3961_v35  ;;  %5207 = vmatpush1.bf16.msra.mxu1 %v3371_v13  ;;  %v3307_v35 = vunpack.c.l.s8.bf16 %v2395_v42  ;;  %v3116_v13 = vunpack.c.l.s8.bf16 %v2300_v24  ;;  %v2268_v42 = vld [vmem:[#allocation5 + $0x4d8] sm:$0xff] }
 0x4cd   :  { %5101 = vmatprep.subr.bf16.mxu0 %v3946_v59  ;;  %5208 = vmatprep.subr.bf16.mxu1 %v3356_v58  ;;  %v3292_v59 = vunpack.c.h.s8.bf16 %v2380_v56  ;;  %v2379_v58 = vld [vmem:[#allocation5 + $0x850] sm:$0xff] }
 0x4d0   :  { %5102 = vmatpush2.bf16.msra.mxu0 %v3945_v21  ;;  %5209 = vmatpush1.bf16.msra.mxu1 %v3355_v32  ;;  %v3291_v21 = vunpack.c.h.s8.bf16 %v2379_v58  ;;  %v3100_v32 = vunpack.c.h.s8.bf16 %v2284_v5 }
 0x4d1   :  { %5103 = vmatprep.subr.bf16.mxu0 %v3930_v6  ;;  %5210 = vmatprep.subr.bf16.mxu1 %v3340_v27  ;;  %v2283_v6 = vld [vmem:[#allocation5 + $0x550] sm:$0xff]  ;;  %v2492_v27 = vld [vmem:[#allocation5 + $0xbd8] sm:$0xff] }
 0x4d2   :  { %v3099_v12 = vunpack.c.h.s8.bf16 %v2283_v6  ;;  %v3083_v24 = vunpack.c.l.s8.bf16 %v2283_v6  ;;  %v3500_v2 = vunpack.c.l.s8.bf16 %v2492_v27 }
 0x4d4   :  { %5104 = vmatpush2.bf16.msra.mxu0 %v3929_v47  ;;  %5211 = vmatpush1.bf16.msra.mxu1 %v3339_v18  ;;  %v3275_v47 = vunpack.c.l.s8.bf16 %v2379_v58  ;;  %v3084_v18 = vunpack.c.l.s8.bf16 %v2284_v5  ;;  %v2475_v58 = vld [vmem:[#allocation5 + $0xb50] sm:$0xff]  ;;  %v2252_v5 = vld [vmem:[#allocation5 + $0x458] sm:$0xff] }
 0x4d5   :  { %5105 = vmatprep.subr.bf16.mxu0 %v3914_v17  ;;  %5212 = vmatprep.subr.bf16.mxu1 %v3324_v34  ;;  %v3516_v17 = vunpack.c.h.s8.bf16 %v2492_v27  ;;  %v2491_v34 = vld [vmem:[#allocation5 + $0xbd0] sm:$0xff]  ;;  %v3036_v6 = vunpack.c.h.s8.bf16 %v2252_v5 }
 0x4d8   :  { %5106 = vmatpush2.bf16.msra.mxu0 %v3913_v39  ;;  %5213 = vmatpush1.bf16.msra.mxu1 %v3323_v23  ;;  %v3515_v39 = vunpack.c.h.s8.bf16 %v2491_v34  ;;  %v3068_v23 = vunpack.c.h.s8.bf16 %v2268_v42 }
 0x4d9   :  { %5161 = vmatprep.subr.bf16.mxu0 %v3132_v52  ;;  %5214 = vmatprep.subr.bf16.mxu1 %v3308_v40  ;;  %v2267_v52 = vld [vmem:[#allocation5 + $0x4d0] sm:$0xff]  ;;  %v2476_v40 = vld [vmem:[#allocation5 + $0xb58] sm:$0xff] }
 0x4da   :  { %v3067_v56 = vunpack.c.h.s8.bf16 %v2267_v52  ;;  %v3468_v27 = vunpack.c.l.s8.bf16 %v2476_v40 }
 0x4db   :  { %5108 = vmatmul.mubr.bf16.vlgmr.msra.gmra.mxu0 %v10254_v61 }
 0x4dc   :  { %5162 = vmatpush1.bf16.msra.mxu0 %v3131_v38  ;;  %5215 = vmatpush1.bf16.msra.mxu1 %v3307_v35  ;;  %v3499_v38 = vunpack.c.l.s8.bf16 %v2491_v34  ;;  %v10418_v35 = vpop.f32.mrf.mxu1  ;;  %v3020_v34 = vunpack.c.l.s8.bf16 %v2252_v5 }
 0x4dd   :  { %5163 = vmatprep.subr.bf16.mxu0 %v3116_v13  ;;  %5216 = vmatprep.subr.bf16.mxu1 %v3292_v59  ;;  %11111 = vst [vmem:[#allocation27_spill] sm:$0xff] %v10418_v35  ;;  %v3052_v13 = vunpack.c.l.s8.bf16 %v2268_v42  ;;  %v3484_v59 = vunpack.c.h.s8.bf16 %v2476_v40 }
 0x4de   :  { %5193 = vmatprep.mubr.bf16.mxu0 %v11089_v3 }
 0x4e0   :  { %5164 = vmatpush1.bf16.msra.mxu0 %v3115_v0  ;;  %5217 = vmatpush1.bf16.msra.mxu1 %v3291_v21  ;;  %v10420_v0 = vpop.f32.mrf.mxu1  ;;  %v3051_v21 = vunpack.c.l.s8.bf16 %v2267_v52 }
 0x4e1   :  { %5165 = vmatprep.subr.bf16.mxu0 %v3100_v32  ;;  %5218 = vmatprep.subr.bf16.mxu1 %v3276_v22  ;;  %11112 = vst [vmem:[#allocation32_spill] sm:$0xff] %v10420_v0  ;;  %v3483_v32 = vunpack.c.h.s8.bf16 %v2475_v58  ;;  %v2251_v22 = vld [vmem:[#allocation5 + $0x450] sm:$0xff] }
 0x4e2   :  { %v3019_v52 = vunpack.c.l.s8.bf16 %v2251_v22 }
 0x4e4   :  { %5166 = vmatpush1.bf16.msra.mxu0 %v3099_v12  ;;  %5219 = vmatpush1.bf16.msra.mxu1 %v3275_v47  ;;  %v2460_v12 = vld [vmem:[#allocation5 + $0xad8] sm:$0xff]  ;;  %v10422_v47 = vpop.f32.mrf.mxu1 }
 0x4e5   :  { %5167 = vmatprep.subr.bf16.mxu0 %v3084_v18  ;;  %5220 = vmatprep.subr.bf16.mxu1 %v3516_v17  ;;  %11113 = vst [vmem:[#allocation29_spill] sm:$0xff] %v10422_v47  ;;  %v3035_v18 = vunpack.c.h.s8.bf16 %v2251_v22  ;;  %v3467_v17 = vunpack.c.l.s8.bf16 %v2475_v58  ;;  %v3452_v42 = vunpack.c.h.s8.bf16 %v2460_v12  ;;  %v2443_v22 = vld [vmem:[#allocation5 + $0xa50] sm:$0xff] }
 0x4e8   :  { %5168 = vmatpush1.bf16.msra.mxu0 %v3083_v24  ;;  %5221 = vmatpush2.bf16.msra.mxu1 %v3515_v39  ;;  %v2459_v24 = vld [vmem:[#allocation5 + $0xad0] sm:$0xff]  ;;  %v2364_v39 = vld [vmem:[#allocation5 + $0x7d8] sm:$0xff] }
 0x4e9   :  { %5169 = vmatprep.subr.bf16.mxu0 %v3068_v23  ;;  %5222 = vmatprep.subr.bf16.mxu1 %v3500_v2  ;;  %v10424_v23 = vpop.f32.mrf.mxu1  ;;  %v3451_v2 = vunpack.c.h.s8.bf16 %v2459_v24  ;;  %v3260_v40 = vunpack.c.h.s8.bf16 %v2364_v39  ;;  %v3435_v5 = vunpack.c.l.s8.bf16 %v2459_v24 }
 0x4ea   :  { %11114 = vst [vmem:[#allocation31_spill] sm:$0xff] %v10424_v23 }
 0x4ec   :  { %5170 = vmatpush1.bf16.msra.mxu0 %v3067_v56  ;;  %5223 = vmatpush2.bf16.msra.mxu1 %v3499_v38  ;;  %v2363_v56 = vld [vmem:[#allocation5 + $0x7d0] sm:$0xff]  ;;  %v3436_v38 = vunpack.c.l.s8.bf16 %v2460_v12  ;;  %v10430_v12 = vpop.f32.mrf.mxu0 }
 0x4ed   :  { %5171 = vmatprep.subr.bf16.mxu0 %v3052_v13  ;;  %5224 = vmatprep.subr.bf16.mxu1 %v3484_v59  ;;  %v2444_v13 = vld [vmem:[#allocation5 + $0xa58] sm:$0xff]  ;;  %v10426_v59 = vpop.f32.mrf.mxu1  ;;  %v3259_v58 = vunpack.c.h.s8.bf16 %v2363_v56  ;;  %11116 = vst [vmem:[#allocation26_spill] sm:$0xff] %v10430_v12 }
 0x4ee   :  { %v3404_v24 = vunpack.c.l.s8.bf16 %v2444_v13 }
 0x4f0   :  { %5172 = vmatpush1.bf16.msra.mxu0 %v3051_v21  ;;  %5225 = vmatpush2.bf16.msra.mxu1 %v3483_v32  ;;  %v10428_v21 = vpop.f32.mrf.mxu1  ;;  %v3244_v32 = vunpack.c.l.s8.bf16 %v2364_v39 }
 0x4f1   :  { %5173 = vmatprep.subr.bf16.mxu0 %v3036_v6  ;;  %5226 = vmatprep.subr.bf16.mxu1 %v3468_v27  ;;  %11115 = vst [vmem:[#allocation33_spill] sm:$0xff] %v10428_v21  ;;  %v3420_v6 = vunpack.c.h.s8.bf16 %v2444_v13  ;;  %v2348_v27 = vld [vmem:[#allocation5 + $0x758] sm:$0xff]  ;;  %v3899_v13 = vunpack.c.h.s8.bf16 %v2683_v44 }
 0x4f2   :  { %v2332_v21 = vld [vmem:[#allocation5 + $0x6d8] sm:$0xff] }
 0x4f4   :  { %5174 = vmatpush1.bf16.msra.mxu0 %v3035_v18  ;;  %5227 = vmatpush2.bf16.msra.mxu1 %v3467_v17  ;;  %v3243_v18 = vunpack.c.l.s8.bf16 %v2363_v56  ;;  %v3419_v17 = vunpack.c.h.s8.bf16 %v2443_v22  ;;  %v3212_v56 = vunpack.c.l.s8.bf16 %v2348_v27 }
 0x4f5   :  { %5175 = vmatprep.subr.bf16.mxu0 %v3020_v34  ;;  %5228 = vmatprep.subr.bf16.mxu1 %v3452_v42  ;;  %v10432_v34 = vpop.f32.mrf.mxu1  ;;  %v3228_v42 = vunpack.c.h.s8.bf16 %v2348_v27 }
 0x4f6   :  { %11117 = vst [vmem:[#allocation44_spill] sm:$0xff] %v10432_v34 }
 0x4f8   :  { %5176 = vmatpush1.bf16.msra.mxu0 %v3019_v52  ;;  %5229 = vmatpush2.bf16.msra.mxu1 %v3451_v2  ;;  %v2347_v52 = vld [vmem:[#allocation5 + $0x750] sm:$0xff]  ;;  %v2684_v2 = vld [vmem:[#allocation5 + $0x11d8] sm:$0xff] }
 0x4f9   :  { %5177 = vmatprep.subr.bf16.mxu0 %v3260_v40  ;;  %5230 = vmatprep.subr.bf16.mxu1 %v3436_v38  ;;  %v10434_v40 = vpop.f32.mrf.mxu0  ;;  %v3227_v39 = vunpack.c.h.s8.bf16 %v2347_v52  ;;  %v3403_v38 = vunpack.c.l.s8.bf16 %v2443_v22  ;;  %v3884_v22 = vunpack.c.l.s8.bf16 %v2684_v2 }
 0x4fa   :  { %11118 = vst [vmem:[#allocation45_spill] sm:$0xff] %v10434_v40  ;;  %v2316_v40 = vld [vmem:[#allocation5 + $0x658] sm:$0xff] }
 0x4fc   :  { %5178 = vmatpush2.bf16.msra.mxu0 %v3259_v58  ;;  %5231 = vmatpush2.bf16.msra.mxu1 %v3435_v5  ;;  %v10436_v58 = vpop.f32.mrf.mxu1  ;;  %v3900_v5 = vunpack.c.h.s8.bf16 %v2684_v2 }
 0x4fd   :  { %5179 = vmatprep.subr.bf16.mxu0 %v3244_v32  ;;  %5232 = vmatprep.subr.bf16.mxu1 %v3420_v6  ;;  %11119 = vst [vmem:[#allocation46_spill] sm:$0xff] %v10436_v58  ;;  %v10438_v32 = vpop.f32.mrf.mxu0  ;;  %v3211_v6 = vunpack.c.l.s8.bf16 %v2347_v52  ;;  %v2668_v58 = vld [vmem:[#allocation5 + $0x1158] sm:$0xff]  ;;  %v3883_v52 = vunpack.c.l.s8.bf16 %v2683_v44  ;;  %v3164_v44 = vunpack.c.h.s8.bf16 %v2316_v40 }
 0x4fe   :  { %11120 = vst [vmem:[#allocation47_spill] sm:$0xff] %v10438_v32  ;;  %v10440_v0 = vpop.f32.mrf.mxu1 }
 0x4ff   :  { %11121 = vst [vmem:[#allocation48_spill] sm:$0xff] %v10440_v0  ;;  %v2523_v0 = vld [vmem:[#allocation5 + $0xcd0] sm:$0xff] }
 0x500   :  { %5180 = vmatpush2.bf16.msra.mxu0 %v3243_v18  ;;  %5233 = vmatpush2.bf16.msra.mxu1 %v3419_v17  ;;  %v3196_v18 = vunpack.c.h.s8.bf16 %v2332_v21  ;;  %v2331_v17 = vld [vmem:[#allocation5 + $0x6d0] sm:$0xff]  ;;  %v10444_v27 = vpop.f32.mrf.mxu1 }
 0x501   :  { %5181 = vmatprep.subr.bf16.mxu0 %v3228_v42  ;;  %5234 = vmatprep.subr.bf16.mxu1 %v3404_v24  ;;  %v10442_v42 = vpop.f32.mrf.mxu0  ;;  %11123 = vst [vmem:[#allocation50_spill] sm:$0xff] %v10444_v27  ;;  %v3195_v24 = vunpack.c.h.s8.bf16 %v2331_v17  ;;  %v3179_v27 = vunpack.c.l.s8.bf16 %v2331_v17  ;;  %v3148_v17 = vunpack.c.l.s8.bf16 %v2316_v40 }
 0x502   :  { %11122 = vst [vmem:[#allocation49_spill] sm:$0xff] %v10442_v42 }
 0x503   :  { %v10448_v2 = vpop.f32.mrf.mxu0 }
 0x504   :  { %5182 = vmatpush2.bf16.msra.mxu0 %v3227_v39  ;;  %5235 = vmatpush2.bf16.msra.mxu1 %v3403_v38  ;;  %v3180_v39 = vunpack.c.l.s8.bf16 %v2332_v21  ;;  %v3868_v38 = vunpack.c.h.s8.bf16 %v2668_v58  ;;  %v3852_v21 = vunpack.c.l.s8.bf16 %v2668_v58 }
 0x505   :  { %5183 = vmatprep.subr.bf16.mxu0 %v3212_v56  ;;  %5290 = vmatprep.subr.bf16.mxu1 %v3900_v5  ;;  %v2667_v56 = vld [vmem:[#allocation5 + $0x1150] sm:$0xff]  ;;  %v10450_v5 = vpop.f32.mrf.mxu1 }
 0x506   :  { %11124 = vst [vmem:[#allocation51_spill] sm:$0xff] %v10450_v5  ;;  %v3867_v42 = vunpack.c.h.s8.bf16 %v2667_v56  ;;  %v3851_v12 = vunpack.c.l.s8.bf16 %v2667_v56  ;;  %v2555_v56 = vld [vmem:[#allocation5 + $0xdd0] sm:$0xff] }
 0x507   :  { %5237 = vmatmul.mubr.bf16.vlgmr.msra.gmra.mxu1 %v11090_v33  ;;  %v3643_v40 = vunpack.c.h.s8.bf16 %v2555_v56 }
 0x508   :  { %5184 = vmatpush2.bf16.msra.mxu0 %v3211_v6  ;;  %5291 = vmatpush1.bf16.msra.mxu1 %v3899_v13  ;;  %v10452_v6 = vpop.f32.mrf.mxu0  ;;  %v2315_v13 = vld [vmem:[#allocation5 + $0x650] sm:$0xff] }
 0x509   :  { %5185 = vmatprep.subr.bf16.mxu0 %v3196_v18  ;;  %5292 = vmatprep.subr.bf16.mxu1 %v3884_v22  ;;  %11125 = vst [vmem:[#allocation52_spill] sm:$0xff] %v10452_v6  ;;  %v2652_v18 = vld [vmem:[#allocation5 + $0x10d8] sm:$0xff]  ;;  %v10454_v22 = vpop.f32.mrf.mxu1  ;;  %v3163_v23 = vunpack.c.h.s8.bf16 %v2315_v13 }
 0x50a   :  { %5322 = vmatprep.mubr.bf16.mxu1 %v10165_v63  ;;  %11126 = vst [vmem:[#allocation53_spill] sm:$0xff] %v10454_v22  ;;  %v10456_v35 = vpop.f32.mrf.mxu0  ;;  %v2556_v6 = vld [vmem:[#allocation5 + $0xdd8] sm:$0xff]  ;;  %v3820_v22 = vunpack.c.l.s8.bf16 %v2652_v18 }
 0x50b   :  { %11127 = vst [vmem:[#allocation54_spill] sm:$0xff] %v10456_v35 }
 0x50c   :  { %5186 = vmatpush2.bf16.msra.mxu0 %v3195_v24  ;;  %5293 = vmatpush1.bf16.msra.mxu1 %v3883_v52  ;;  %v3836_v24 = vunpack.c.h.s8.bf16 %v2652_v18  ;;  %v2651_v52 = vld [vmem:[#allocation5 + $0x10d0] sm:$0xff]  ;;  %v10460_v5 = vpop.f32.mrf.mxu0  ;;  %v3627_v18 = vunpack.c.l.s8.bf16 %v2555_v56 }
 0x50d   :  { %5187 = vmatprep.subr.bf16.mxu0 %v3180_v39  ;;  %5294 = vmatprep.subr.bf16.mxu1 %v3868_v38  ;;  %v10458_v39 = vpop.f32.mrf.mxu1  ;;  %v3147_v38 = vunpack.c.l.s8.bf16 %v2315_v13  ;;  %v3835_v58 = vunpack.c.h.s8.bf16 %v2651_v52  ;;  %11129 = vst [vmem:[#allocation56_spill] sm:$0xff] %v10460_v5  ;;  %v2635_v5 = vld [vmem:[#allocation5 + $0x1050] sm:$0xff] }
 0x50e   :  { %11128 = vst [vmem:[#allocation55_spill] sm:$0xff] %v10458_v39  ;;  %v10462_v35 = vpop.f32.mrf.mxu0 }
 0x50f   :  { %11130 = vst [vmem:[#allocation57_spill] sm:$0xff] %v10462_v35 }
 0x510   :  { %5188 = vmatpush2.bf16.msra.mxu0 %v3179_v27  ;;  %5295 = vmatpush1.bf16.msra.mxu1 %v3867_v42  ;;  %v4980_v27 = vpop.f32.mrf.mxu1  ;;  %v3644_v42 = vunpack.c.h.s8.bf16 %v2556_v6 }
 0x511   :  { %5189 = vmatprep.subr.bf16.mxu0 %v3164_v44  ;;  %5296 = vmatprep.subr.bf16.mxu1 %v3852_v21  ;;  %v2636_v44 = vld [vmem:[#allocation5 + $0x1058] sm:$0xff]  ;;  %v3819_v21 = vunpack.c.l.s8.bf16 %v2651_v52 }
 0x512   :  { %v3804_v13 = vunpack.c.h.s8.bf16 %v2636_v44 }
 0x514   :  { %5190 = vmatpush2.bf16.msra.mxu0 %v3163_v23  ;;  %5297 = vmatpush1.bf16.msra.mxu1 %v3851_v12  ;;  %v10464_v23 = vpop.f32.mrf.mxu1  ;;  %v3628_v12 = vunpack.c.l.s8.bf16 %v2556_v6  ;;  %v3788_v6 = vunpack.c.l.s8.bf16 %v2636_v44 }
 0x515   :  { %5191 = vmatprep.subr.bf16.mxu0 %v3148_v17  ;;  %5298 = vmatprep.subr.bf16.mxu1 %v3836_v24  ;;  %11131 = vst [vmem:[#allocation58_spill] sm:$0xff] %v10464_v23  ;;  %v2540_v17 = vld [vmem:[#allocation5 + $0xd58] sm:$0xff]  ;;  %v2539_v23 = vld [vmem:[#allocation5 + $0xd50] sm:$0xff] }
 0x516   :  { %v3596_v56 = vunpack.c.l.s8.bf16 %v2540_v17 }
 0x518   :  { %5192 = vmatpush2.bf16.msra.mxu0 %v3147_v38  ;;  %5299 = vmatpush1.bf16.msra.mxu1 %v3835_v58  ;;  %v3803_v38 = vunpack.c.h.s8.bf16 %v2635_v5  ;;  %v4984_v58 = vpop.f32.mrf.mxu1 }
 0x519   :  { %5247 = vmatprep.subr.bf16.mxu0 %v3644_v42  ;;  %5300 = vmatprep.subr.bf16.mxu1 %v3820_v22  ;;  %v3612_v42 = vunpack.c.h.s8.bf16 %v2540_v17  ;;  %v2748_v22 = vld [vmem:[#allocation5 + $0x13d8] sm:$0xff] }
 0x51b   :  { %v4937_v39 = vpop.f32.mrf.mxu0  ;;  %5194 = vmatmul.mubr.bf16.vlgmr.msra.gmra.mxu0 %v11091_v16 }
 0x51c   :  { %v10467_v24 = vadd.f32 %v4980_v27, %v4937_v39  ;;  %5248 = vmatpush1.bf16.msra.mxu0 %v3643_v40  ;;  %5301 = vmatpush1.bf16.msra.mxu1 %v3819_v21  ;;  %v3611_v39 = vunpack.c.h.s8.bf16 %v2539_v23  ;;  %v3787_v27 = vunpack.c.l.s8.bf16 %v2635_v5  ;;  %v4028_v40 = vunpack.c.h.s8.bf16 %v2748_v22  ;;  %v2747_v21 = vld [vmem:[#allocation5 + $0x13d0] sm:$0xff] }
 0x51d   :  { %v10469_v52 = vpop.f32.mrf.mxu0  ;;  %5249 = vmatprep.subr.bf16.mxu0 %v3628_v12  ;;  %5302 = vmatprep.subr.bf16.mxu1 %v3804_v13  ;;  %v2524_v12 = vld [vmem:[#allocation5 + $0xcd8] sm:$0xff]  ;;  %v4027_v44 = vunpack.c.h.s8.bf16 %v2747_v21  ;;  %v4011_v5 = vunpack.c.l.s8.bf16 %v2747_v21 }
 0x51e   :  { %11132 = vst [vmem:[#allocation59_spill] sm:$0xff] %v10469_v52  ;;  %5279 = vmatprep.mubr.bf16.mxu0 %v11092_v11  ;;  %v3595_v52 = vunpack.c.l.s8.bf16 %v2539_v23  ;;  %v3580_v13 = vunpack.c.h.s8.bf16 %v2524_v12  ;;  %v3564_v17 = vunpack.c.l.s8.bf16 %v2524_v12  ;;  %v3563_v23 = vunpack.c.l.s8.bf16 %v2523_v0 }
 0x51f   :  { %v4941_v35 = vpop.f32.mrf.mxu0 }
 0x520   :  { %v10472_v34 = vadd.f32 %v4984_v58, %v4941_v35  ;;  %5250 = vmatpush1.bf16.msra.mxu0 %v3627_v18  ;;  %5303 = vmatpush1.bf16.msra.mxu1 %v3803_v38  ;;  %v4012_v35 = vunpack.c.l.s8.bf16 %v2748_v22  ;;  %v2732_v58 = vld [vmem:[#allocation5 + $0x1358] sm:$0xff]  ;;  %v3579_v18 = vunpack.c.h.s8.bf16 %v2523_v0 }
 0x521   :  { %5251 = vmatprep.subr.bf16.mxu0 %v3612_v42  ;;  %5304 = vmatprep.subr.bf16.mxu1 %v3788_v6  ;;  %v3996_v38 = vunpack.c.h.s8.bf16 %v2732_v58  ;;  %v2731_v42 = vld [vmem:[#allocation5 + $0x1350] sm:$0xff]  ;;  %v2508_v6 = vld [vmem:[#allocation5 + $0xc58] sm:$0xff]  ;;  %v3980_v22 = vunpack.c.l.s8.bf16 %v2732_v58 }
 0x522   :  { %v3979_v21 = vunpack.c.l.s8.bf16 %v2731_v42  ;;  %v3532_v12 = vunpack.c.l.s8.bf16 %v2508_v6 }
 0x524   :  { %5252 = vmatpush1.bf16.msra.mxu0 %v3611_v39  ;;  %5305 = vmatpush1.bf16.msra.mxu1 %v3787_v27  ;;  %v3995_v39 = vunpack.c.h.s8.bf16 %v2731_v42  ;;  %v3548_v27 = vunpack.c.h.s8.bf16 %v2508_v6 }
 0x525   :  { %5253 = vmatprep.subr.bf16.mxu0 %v3596_v56  ;;  %5306 = vmatprep.subr.bf16.mxu1 %v4028_v40  ;;  %v2507_v56 = vld [vmem:[#allocation5 + $0xc50] sm:$0xff]  ;;  %v2716_v40 = vld [vmem:[#allocation5 + $0x12d8] sm:$0xff] }
 0x526   :  { %v3531_v0 = vunpack.c.l.s8.bf16 %v2507_v56  ;;  %v3948_v58 = vunpack.c.l.s8.bf16 %v2716_v40 }
 0x528   :  { %5254 = vmatpush1.bf16.msra.mxu0 %v3595_v52  ;;  %5307 = vmatpush2.bf16.msra.mxu1 %v4027_v44  ;;  %v3547_v52 = vunpack.c.h.s8.bf16 %v2507_v56  ;;  %v3964_v44 = vunpack.c.h.s8.bf16 %v2716_v40 }
 0x529   :  { %5255 = vmatprep.subr.bf16.mxu0 %v3580_v13  ;;  %5308 = vmatprep.subr.bf16.mxu1 %v4012_v35  ;;  %v2715_v13 = vld [vmem:[#allocation5 + $0x12d0] sm:$0xff]  ;;  %v2620_v35 = vld [vmem:[#allocation5 + $0xfd8] sm:$0xff] }
 0x52a   :  { %v3947_v42 = vunpack.c.l.s8.bf16 %v2715_v13  ;;  %v3756_v6 = vunpack.c.l.s8.bf16 %v2620_v35 }
 0x52c   :  { %5256 = vmatpush1.bf16.msra.mxu0 %v3579_v18  ;;  %5309 = vmatpush2.bf16.msra.mxu1 %v4011_v5  ;;  %v3963_v18 = vunpack.c.h.s8.bf16 %v2715_v13  ;;  %v3772_v5 = vunpack.c.h.s8.bf16 %v2620_v35 }
 0x52d   :  { %5257 = vmatprep.subr.bf16.mxu0 %v3564_v17  ;;  %5310 = vmatprep.subr.bf16.mxu1 %v3996_v38  ;;  %v2619_v17 = vld [vmem:[#allocation5 + $0xfd0] sm:$0xff]  ;;  %v2700_v38 = vld [vmem:[#allocation5 + $0x1258] sm:$0xff] }
 0x52e   :  { %v3755_v56 = vunpack.c.l.s8.bf16 %v2619_v17  ;;  %v3916_v40 = vunpack.c.l.s8.bf16 %v2700_v38 }
 0x530   :  { %5258 = vmatpush1.bf16.msra.mxu0 %v3563_v23  ;;  %5311 = vmatpush2.bf16.msra.mxu1 %v3995_v39  ;;  %v3771_v23 = vunpack.c.h.s8.bf16 %v2619_v17  ;;  %v3932_v39 = vunpack.c.h.s8.bf16 %v2700_v38 }
 0x531   :  { %5259 = vmatprep.subr.bf16.mxu0 %v3548_v27  ;;  %5312 = vmatprep.subr.bf16.mxu1 %v3980_v22  ;;  %v2699_v27 = vld [vmem:[#allocation5 + $0x1250] sm:$0xff]  ;;  %v2604_v22 = vld [vmem:[#allocation5 + $0xf58] sm:$0xff] }
 0x532   :  { %v3915_v13 = vunpack.c.l.s8.bf16 %v2699_v27  ;;  %v3724_v35 = vunpack.c.l.s8.bf16 %v2604_v22 }
 0x534   :  { %5260 = vmatpush1.bf16.msra.mxu0 %v3547_v52  ;;  %5313 = vmatpush2.bf16.msra.mxu1 %v3979_v21  ;;  %v3931_v52 = vunpack.c.h.s8.bf16 %v2699_v27  ;;  %v3740_v21 = vunpack.c.h.s8.bf16 %v2604_v22 }
 0x535   :  { %5261 = vmatprep.subr.bf16.mxu0 %v3532_v12  ;;  %5314 = vmatprep.subr.bf16.mxu1 %v3964_v44  ;;  %v2603_v12 = vld [vmem:[#allocation5 + $0xf50] sm:$0xff]  ;;  %v2302_v44 = vld [vmem:[#allocation5 + $0x5e8] sm:$0xff] }
 0x536   :  { %v3723_v17 = vunpack.c.l.s8.bf16 %v2603_v12  ;;  %v3118_v38 = vunpack.c.l.s8.bf16 %v2302_v44 }
 0x538   :  { %5262 = vmatpush1.bf16.msra.mxu0 %v3531_v0  ;;  %5315 = vmatpush2.bf16.msra.mxu1 %v3963_v18  ;;  %v3739_v0 = vunpack.c.h.s8.bf16 %v2603_v12  ;;  %v3134_v18 = vunpack.c.h.s8.bf16 %v2302_v44  ;;  %v2572_v12 = vld [vmem:[#allocation5 + $0xe58] sm:$0xff] }
 0x539   :  { %5263 = vmatprep.subr.bf16.mxu0 %v3772_v5  ;;  %5316 = vmatprep.subr.bf16.mxu1 %v3948_v58  ;;  %v2301_v5 = vld [vmem:[#allocation5 + $0x5e0] sm:$0xff]  ;;  %v2588_v58 = vld [vmem:[#allocation5 + $0xed8] sm:$0xff]  ;;  %v3676_v44 = vunpack.c.h.s8.bf16 %v2572_v12 }
 0x53a   :  { %v3117_v22 = vunpack.c.l.s8.bf16 %v2301_v5 }
 0x53c   :  { %5264 = vmatpush2.bf16.msra.mxu0 %v3771_v23  ;;  %5317 = vmatpush2.bf16.msra.mxu1 %v3947_v42  ;;  %v3133_v23 = vunpack.c.h.s8.bf16 %v2301_v5  ;;  %v3708_v42 = vunpack.c.h.s8.bf16 %v2588_v58 }
 0x53d   :  { %5265 = vmatprep.subr.bf16.mxu0 %v3756_v6  ;;  %5318 = vmatprep.subr.bf16.mxu1 %v3932_v39  ;;  %v2587_v6 = vld [vmem:[#allocation5 + $0xed0] sm:$0xff]  ;;  %v2286_v39 = vld [vmem:[#allocation5 + $0x568] sm:$0xff] }
 0x53e   :  { %v3707_v27 = vunpack.c.h.s8.bf16 %v2587_v6 }
 0x540   :  { %5266 = vmatpush2.bf16.msra.mxu0 %v3755_v56  ;;  %5319 = vmatpush2.bf16.msra.mxu1 %v3931_v52  ;;  %v3692_v56 = vunpack.c.l.s8.bf16 %v2588_v58  ;;  %v3102_v52 = vunpack.c.h.s8.bf16 %v2286_v39 }
 0x541   :  { %5267 = vmatprep.subr.bf16.mxu0 %v3740_v21  ;;  %5320 = vmatprep.subr.bf16.mxu1 %v3916_v40  ;;  %v2285_v21 = vld [vmem:[#allocation5 + $0x560] sm:$0xff]  ;;  %v3691_v40 = vunpack.c.l.s8.bf16 %v2587_v6 }
 0x542   :  { %v3085_v58 = vunpack.c.l.s8.bf16 %v2285_v21 }
 0x544   :  { %5268 = vmatpush2.bf16.msra.mxu0 %v3739_v0  ;;  %5321 = vmatpush2.bf16.msra.mxu1 %v3915_v13  ;;  %v3101_v0 = vunpack.c.h.s8.bf16 %v2285_v21  ;;  %v2571_v13 = vld [vmem:[#allocation5 + $0xe50] sm:$0xff] }
 0x545   :  { %5269 = vmatprep.subr.bf16.mxu0 %v3724_v35  ;;  %5376 = vmatprep.subr.bf16.mxu1 %v3134_v18  ;;  %v3086_v35 = vunpack.c.l.s8.bf16 %v2286_v39  ;;  %v2270_v18 = vld [vmem:[#allocation5 + $0x4e8] sm:$0xff]  ;;  %v3675_v5 = vunpack.c.h.s8.bf16 %v2571_v13  ;;  %v3659_v6 = vunpack.c.l.s8.bf16 %v2571_v13 }
 0x546   :  { %v3054_v39 = vunpack.c.l.s8.bf16 %v2270_v18 }
 0x547   :  { %5323 = vmatmul.mubr.bf16.vlgmr.msra.gmra.mxu1 %v10254_v61 }
 0x548   :  { %5270 = vmatpush2.bf16.msra.mxu0 %v3723_v17  ;;  %5377 = vmatpush1.bf16.msra.mxu1 %v3133_v23  ;;  %v3660_v17 = vunpack.c.l.s8.bf16 %v2572_v12  ;;  %v3070_v23 = vunpack.c.h.s8.bf16 %v2270_v18 }
 0x549   :  { %5271 = vmatprep.subr.bf16.mxu0 %v3708_v42  ;;  %5378 = vmatprep.subr.bf16.mxu1 %v3118_v38  ;;  %v2269_v42 = vld [vmem:[#allocation5 + $0x4e0] sm:$0xff]  ;;  %v2174_v38 = vld [vmem:[#allocation5 + $0x1e8] sm:$0xff] }
 0x54a   :  { %5408 = vmatprep.mubr.bf16.mxu1 %v11089_v3  ;;  %v3053_v12 = vunpack.c.l.s8.bf16 %v2269_v42 }
 0x54c   :  { %5272 = vmatpush2.bf16.msra.mxu0 %v3707_v27  ;;  %5379 = vmatpush1.bf16.msra.mxu1 %v3117_v22  ;;  %v3069_v27 = vunpack.c.h.s8.bf16 %v2269_v42  ;;  %v2878_v22 = vunpack.c.h.s8.bf16 %v2174_v38 }
 0x54d   :  { %5273 = vmatprep.subr.bf16.mxu0 %v3692_v56  ;;  %5380 = vmatprep.subr.bf16.mxu1 %v3102_v52  ;;  %v2173_v56 = vld [vmem:[#allocation5 + $0x1e0] sm:$0xff]  ;;  %v2254_v52 = vld [vmem:[#allocation5 + $0x468] sm:$0xff] }
 0x54e   :  { %v2877_v21 = vunpack.c.h.s8.bf16 %v2173_v56  ;;  %v3038_v13 = vunpack.c.h.s8.bf16 %v2254_v52 }
 0x550   :  { %5274 = vmatpush2.bf16.msra.mxu0 %v3691_v40  ;;  %5381 = vmatpush1.bf16.msra.mxu1 %v3101_v0  ;;  %v10476_v40 = vpop.f32.mrf.mxu1  ;;  %v10478_v0 = vpop.f32.mrf.mxu0 }
 0x551   :  { %5275 = vmatprep.subr.bf16.mxu0 %v3676_v44  ;;  %5382 = vmatprep.subr.bf16.mxu1 %v3086_v35  ;;  %11133 = vst [vmem:[#allocation60_spill] sm:$0xff] %v10476_v40  ;;  %11134 = vst [vmem:[#allocation61_spill] sm:$0xff] %v10478_v0  ;;  %v2862_v35 = vunpack.c.l.s8.bf16 %v2174_v38  ;;  %v2157_v38 = vld [vmem:[#allocation5 + $0x160] sm:$0xff]  ;;  %v2366_v0 = vld [vmem:[#allocation5 + $0x7e8] sm:$0xff] }
 0x552   :  { %v5066_v44 = vpop.f32.mrf.mxu1 }
 0x554   :  { %5276 = vmatpush2.bf16.msra.mxu0 %v3675_v5  ;;  %5383 = vmatpush1.bf16.msra.mxu1 %v3085_v58  ;;  %v2253_v5 = vld [vmem:[#allocation5 + $0x460] sm:$0xff]  ;;  %v2158_v58 = vld [vmem:[#allocation5 + $0x168] sm:$0xff]  ;;  %v10484_v42 = vpop.f32.mrf.mxu1 }
 0x555   :  { %5277 = vmatprep.subr.bf16.mxu0 %v3660_v17  ;;  %5384 = vmatprep.subr.bf16.mxu1 %v3070_v23  ;;  %v2861_v23 = vunpack.c.l.s8.bf16 %v2173_v56  ;;  %11136 = vst [vmem:[#allocation63_spill] sm:$0xff] %v10484_v42  ;;  %v2845_v56 = vunpack.c.h.s8.bf16 %v2157_v38  ;;  %v2365_v42 = vld [vmem:[#allocation5 + $0x7e0] sm:$0xff] }
 0x558   :  { %5278 = vmatpush2.bf16.msra.mxu0 %v3659_v6  ;;  %5385 = vmatpush1.bf16.msra.mxu1 %v3069_v27  ;;  %v3037_v6 = vunpack.c.h.s8.bf16 %v2253_v5 }
 0x559   :  { %5333 = vmatprep.subr.bf16.mxu0 %v2878_v22  ;;  %5386 = vmatprep.subr.bf16.mxu1 %v3054_v39  ;;  %v2846_v22 = vunpack.c.h.s8.bf16 %v2158_v58  ;;  %v3022_v39 = vunpack.c.l.s8.bf16 %v2254_v52  ;;  %v2142_v52 = vld [vmem:[#allocation5 + $0xe8] sm:$0xff] }
 0x55b   :  { %v5023_v17 = vpop.f32.mrf.mxu0  ;;  %5280 = vmatmul.mubr.bf16.vlgmr.msra.gmra.mxu0 %v11093_v48 }
 0x55c   :  { %v5024_v18 = vadd.f32 %v5023_v17, %v10467_v24  ;;  %5334 = vmatpush1.bf16.msra.mxu0 %v2877_v21  ;;  %5387 = vmatpush1.bf16.msra.mxu1 %v3053_v12  ;;  %v3021_v21 = vunpack.c.l.s8.bf16 %v2253_v5  ;;  %v5070_v12 = vpop.f32.mrf.mxu1  ;;  %v2830_v17 = vunpack.c.l.s8.bf16 %v2158_v58  ;;  %v3245_v58 = vunpack.c.l.s8.bf16 %v2365_v42 }
 0x55d   :  { %v10482_v27 = vpop.f32.mrf.mxu0  ;;  %5335 = vmatprep.subr.bf16.mxu0 %v2862_v35  ;;  %5388 = vmatprep.subr.bf16.mxu1 %v3038_v13  ;;  %v3262_v35 = vunpack.c.h.s8.bf16 %v2366_v0 }
 0x55e   :  { %11135 = vst [vmem:[#allocation62_spill] sm:$0xff] %v10482_v27  ;;  %v10486_v40 = vadd.f32 %v5066_v44, %v5024_v18  ;;  %5365 = vmatprep.mubr.bf16.mxu0 %v11094_v10  ;;  %v2829_v44 = vunpack.c.l.s8.bf16 %v2157_v38  ;;  %v3261_v18 = vunpack.c.h.s8.bf16 %v2365_v42  ;;  %v2814_v27 = vunpack.c.h.s8.bf16 %v2142_v52 }
 0x55f   :  { %v5027_v4 = vpop.f32.mrf.mxu0 }
 0x560   :  { %v5028_v24 = vadd.f32 %v5027_v4, %v10472_v34  ;;  %5336 = vmatpush1.bf16.msra.mxu0 %v2861_v23  ;;  %5389 = vmatpush1.bf16.msra.mxu1 %v3037_v6  ;;  %v2141_v4 = vld [vmem:[#allocation5 + $0xe0] sm:$0xff]  ;;  %v3246_v34 = vunpack.c.l.s8.bf16 %v2366_v0  ;;  %v2350_v23 = vld [vmem:[#allocation5 + $0x768] sm:$0xff]  ;;  %v2798_v6 = vunpack.c.l.s8.bf16 %v2142_v52 }
 0x561   :  { %5337 = vmatprep.subr.bf16.mxu0 %v2846_v22  ;;  %5390 = vmatprep.subr.bf16.mxu1 %v3022_v39  ;;  %v2813_v5 = vunpack.c.h.s8.bf16 %v2141_v4  ;;  %v3230_v22 = vunpack.c.h.s8.bf16 %v2350_v23  ;;  %v2349_v39 = vld [vmem:[#allocation5 + $0x760] sm:$0xff]  ;;  %v2797_v38 = vunpack.c.l.s8.bf16 %v2141_v4  ;;  %v3214_v0 = vunpack.c.l.s8.bf16 %v2350_v23 }
 0x562   :  { %v10490_v13 = vadd.f32 %v5070_v12, %v5028_v24  ;;  %v2126_v24 = vld [vmem:[#allocation5 + $0x68] sm:$0xff]  ;;  %v2125_v12 = vld [vmem:[#allocation5 + $0x60] sm:$0xff]  ;;  %v3213_v42 = vunpack.c.l.s8.bf16 %v2349_v39 }
 0x563   :  { %v2765_v4 = vunpack.c.l.s8.bf16 %v2125_v12 }
 0x564   :  { %5338 = vmatpush1.bf16.msra.mxu0 %v2845_v56  ;;  %5391 = vmatpush1.bf16.msra.mxu1 %v3021_v21  ;;  %v3229_v56 = vunpack.c.h.s8.bf16 %v2349_v39  ;;  %v2782_v21 = vunpack.c.h.s8.bf16 %v2126_v24 }
 0x565   :  { %5339 = vmatprep.subr.bf16.mxu0 %v2830_v17  ;;  %5392 = vmatprep.subr.bf16.mxu1 %v3262_v35  ;;  %v2334_v17 = vld [vmem:[#allocation5 + $0x6e8] sm:$0xff]  ;;  %v2781_v35 = vunpack.c.h.s8.bf16 %v2125_v12 }
 0x566   :  { %v3198_v52 = vunpack.c.h.s8.bf16 %v2334_v17  ;;  %v3182_v23 = vunpack.c.l.s8.bf16 %v2334_v17 }
 0x568   :  { %5340 = vmatpush1.bf16.msra.mxu0 %v2829_v44  ;;  %5393 = vmatpush2.bf16.msra.mxu1 %v3261_v18  ;;  %v2333_v44 = vld [vmem:[#allocation5 + $0x6e0] sm:$0xff]  ;;  %v2238_v18 = vld [vmem:[#allocation5 + $0x3e8] sm:$0xff] }
 0x569   :  { %5341 = vmatprep.subr.bf16.mxu0 %v2814_v27  ;;  %5394 = vmatprep.subr.bf16.mxu1 %v3246_v34  ;;  %v2766_v27 = vunpack.c.l.s8.bf16 %v2126_v24  ;;  %v3197_v34 = vunpack.c.h.s8.bf16 %v2333_v44  ;;  %v3181_v39 = vunpack.c.l.s8.bf16 %v2333_v44  ;;  %v2990_v24 = vunpack.c.l.s8.bf16 %v2238_v18 }
 0x56c   :  { %5342 = vmatpush1.bf16.msra.mxu0 %v2813_v5  ;;  %5395 = vmatpush2.bf16.msra.mxu1 %v3245_v58  ;;  %v3006_v5 = vunpack.c.h.s8.bf16 %v2238_v18  ;;  %v2237_v58 = vld [vmem:[#allocation5 + $0x3e0] sm:$0xff] }
 0x56d   :  { %5343 = vmatprep.subr.bf16.mxu0 %v2798_v6  ;;  %5396 = vmatprep.subr.bf16.mxu1 %v3230_v22  ;;  %v2318_v6 = vld [vmem:[#allocation5 + $0x668] sm:$0xff]  ;;  %v3005_v22 = vunpack.c.h.s8.bf16 %v2237_v58  ;;  %v2989_v12 = vunpack.c.l.s8.bf16 %v2237_v58 }
 0x56e   :  { %v3150_v17 = vunpack.c.l.s8.bf16 %v2318_v6 }
 0x570   :  { %5344 = vmatpush1.bf16.msra.mxu0 %v2797_v38  ;;  %5397 = vmatpush2.bf16.msra.mxu1 %v3229_v56  ;;  %v3166_v38 = vunpack.c.h.s8.bf16 %v2318_v6  ;;  %v2317_v56 = vld [vmem:[#allocation5 + $0x660] sm:$0xff] }
 0x571   :  { %5345 = vmatprep.subr.bf16.mxu0 %v2782_v21  ;;  %5398 = vmatprep.subr.bf16.mxu1 %v3214_v0  ;;  %v2222_v21 = vld [vmem:[#allocation5 + $0x368] sm:$0xff]  ;;  %v3165_v0 = vunpack.c.h.s8.bf16 %v2317_v56  ;;  %v3149_v44 = vunpack.c.l.s8.bf16 %v2317_v56 }
 0x572   :  { %v2958_v18 = vunpack.c.l.s8.bf16 %v2222_v21 }
 0x574   :  { %5346 = vmatpush1.bf16.msra.mxu0 %v2781_v35  ;;  %5399 = vmatpush2.bf16.msra.mxu1 %v3213_v42  ;;  %v2974_v35 = vunpack.c.h.s8.bf16 %v2222_v21  ;;  %v2221_v42 = vld [vmem:[#allocation5 + $0x360] sm:$0xff] }
 0x575   :  { %5347 = vmatprep.subr.bf16.mxu0 %v2766_v27  ;;  %5400 = vmatprep.subr.bf16.mxu1 %v3198_v52  ;;  %v2558_v27 = vld [vmem:[#allocation5 + $0xde8] sm:$0xff]  ;;  %v2973_v52 = vunpack.c.h.s8.bf16 %v2221_v42  ;;  %v2957_v58 = vunpack.c.l.s8.bf16 %v2221_v42 }
 0x576   :  { %v3630_v6 = vunpack.c.l.s8.bf16 %v2558_v27 }
 0x578   :  { %5348 = vmatpush1.bf16.msra.mxu0 %v2765_v4  ;;  %5401 = vmatpush2.bf16.msra.mxu1 %v3197_v34  ;;  %v3646_v4 = vunpack.c.h.s8.bf16 %v2558_v27  ;;  %v2557_v34 = vld [vmem:[#allocation5 + $0xde0] sm:$0xff] }
 0x579   :  { %5349 = vmatprep.subr.bf16.mxu0 %v3006_v5  ;;  %5402 = vmatprep.subr.bf16.mxu1 %v3182_v23  ;;  %v2206_v5 = vld [vmem:[#allocation5 + $0x2e8] sm:$0xff]  ;;  %v3645_v23 = vunpack.c.h.s8.bf16 %v2557_v34  ;;  %v3629_v56 = vunpack.c.l.s8.bf16 %v2557_v34 }
 0x57a   :  { %v2926_v21 = vunpack.c.l.s8.bf16 %v2206_v5 }
 0x57c   :  { %5350 = vmatpush2.bf16.msra.mxu0 %v3005_v22  ;;  %5403 = vmatpush2.bf16.msra.mxu1 %v3181_v39  ;;  %v2942_v22 = vunpack.c.h.s8.bf16 %v2206_v5  ;;  %v2205_v39 = vld [vmem:[#allocation5 + $0x2e0] sm:$0xff] }
 0x57d   :  { %5351 = vmatprep.subr.bf16.mxu0 %v2990_v24  ;;  %5404 = vmatprep.subr.bf16.mxu1 %v3166_v38  ;;  %v2542_v24 = vld [vmem:[#allocation5 + $0xd68] sm:$0xff]  ;;  %v2941_v38 = vunpack.c.h.s8.bf16 %v2205_v39  ;;  %v2925_v42 = vunpack.c.l.s8.bf16 %v2205_v39 }
 0x580   :  { %5352 = vmatpush2.bf16.msra.mxu0 %v2989_v12  ;;  %5405 = vmatpush2.bf16.msra.mxu1 %v3165_v0  ;;  %v3614_v12 = vunpack.c.h.s8.bf16 %v2542_v24  ;;  %v2541_v0 = vld [vmem:[#allocation5 + $0xd60] sm:$0xff] }
 0x581   :  { %5353 = vmatprep.subr.bf16.mxu0 %v2974_v35  ;;  %5406 = vmatprep.subr.bf16.mxu1 %v3150_v17  ;;  %v2190_v35 = vld [vmem:[#allocation5 + $0x268] sm:$0xff]  ;;  %v3613_v17 = vunpack.c.h.s8.bf16 %v2541_v0  ;;  %v3597_v34 = vunpack.c.l.s8.bf16 %v2541_v0 }
 0x582   :  { %v2910_v27 = vunpack.c.h.s8.bf16 %v2190_v35  ;;  %v2894_v5 = vunpack.c.l.s8.bf16 %v2190_v35  ;;  %v10494_v35 = vpop.f32.mrf.mxu0 }
 0x583   :  { %11137 = vst [vmem:[#allocation64_spill] sm:$0xff] %v10494_v35  ;;  %v2622_v35 = vld [vmem:[#allocation5 + $0xfe8] sm:$0xff] }
 0x584   :  { %5354 = vmatpush2.bf16.msra.mxu0 %v2973_v52  ;;  %5407 = vmatpush2.bf16.msra.mxu1 %v3149_v44  ;;  %v2189_v52 = vld [vmem:[#allocation5 + $0x260] sm:$0xff]  ;;  %v3598_v44 = vunpack.c.l.s8.bf16 %v2542_v24 }
 0x585   :  { %5355 = vmatprep.subr.bf16.mxu0 %v2958_v18  ;;  %5462 = vmatprep.subr.bf16.mxu1 %v3646_v4  ;;  %v2526_v18 = vld [vmem:[#allocation5 + $0xce8] sm:$0xff]  ;;  %v2909_v4 = vunpack.c.h.s8.bf16 %v2189_v52  ;;  %v2893_v39 = vunpack.c.l.s8.bf16 %v2189_v52  ;;  %v2509_v52 = vld [vmem:[#allocation5 + $0xc60] sm:$0xff] }
 0x586   :  { %v3566_v24 = vunpack.c.l.s8.bf16 %v2526_v18 }
 0x587   :  { %5409 = vmatmul.mubr.bf16.vlgmr.msra.gmra.mxu1 %v11091_v16 }
 0x588   :  { %5356 = vmatpush2.bf16.msra.mxu0 %v2957_v58  ;;  %5463 = vmatpush1.bf16.msra.mxu1 %v3645_v23  ;;  %v3582_v58 = vunpack.c.h.s8.bf16 %v2526_v18  ;;  %v2525_v23 = vld [vmem:[#allocation5 + $0xce0] sm:$0xff] }
 0x589   :  { %5357 = vmatprep.subr.bf16.mxu0 %v2942_v22  ;;  %5464 = vmatprep.subr.bf16.mxu1 %v3630_v6  ;;  %v2430_v22 = vld [vmem:[#allocation5 + $0x9e8] sm:$0xff]  ;;  %v3581_v6 = vunpack.c.h.s8.bf16 %v2525_v23  ;;  %v3565_v0 = vunpack.c.l.s8.bf16 %v2525_v23  ;;  %v3549_v23 = vunpack.c.h.s8.bf16 %v2509_v52 }
 0x58a   :  { %5494 = vmatprep.mubr.bf16.mxu1 %v11092_v11 }
 0x58c   :  { %5358 = vmatpush2.bf16.msra.mxu0 %v2941_v38  ;;  %5465 = vmatpush1.bf16.msra.mxu1 %v3629_v56  ;;  %v3390_v38 = vunpack.c.h.s8.bf16 %v2430_v22  ;;  %v2429_v56 = vld [vmem:[#allocation5 + $0x9e0] sm:$0xff] }
 0x58d   :  { %5359 = vmatprep.subr.bf16.mxu0 %v2926_v21  ;;  %5466 = vmatprep.subr.bf16.mxu1 %v3614_v12  ;;  %v2510_v21 = vld [vmem:[#allocation5 + $0xc68] sm:$0xff] }
 0x58e   :  { %v5764_v12 = vld [vmem:[#allocation7 + $0x8] sm:$0xff] }
 0x590   :  { %5360 = vmatpush2.bf16.msra.mxu0 %v2925_v42  ;;  %5467 = vmatpush1.bf16.msra.mxu1 %v3613_v17  ;;  %v3389_v42 = vunpack.c.h.s8.bf16 %v2429_v56  ;;  %v3374_v17 = vunpack.c.l.s8.bf16 %v2430_v22 }
 0x591   :  { %5361 = vmatprep.subr.bf16.mxu0 %v2910_v27  ;;  %5468 = vmatprep.subr.bf16.mxu1 %v3598_v44  ;;  %v3550_v27 = vunpack.c.h.s8.bf16 %v2510_v21  ;;  %v5802_v44 = vrot.slane %v5764_v12, %v10297_v31 }
 0x594   :  { %5362 = vmatpush2.bf16.msra.mxu0 %v2909_v4  ;;  %5469 = vmatpush1.bf16.msra.mxu1 %v3597_v34  ;;  %v2414_v4 = vld [vmem:[#allocation5 + $0x968] sm:$0xff] }
 0x595   :  { %5363 = vmatprep.subr.bf16.mxu0 %v2894_v5  ;;  %5470 = vmatprep.subr.bf16.mxu1 %v3582_v58  ;;  %v5880_v5 = vld [vmem:[#allocation8 + $0x8] sm:$0xff]  ;;  %v3373_v58 = vunpack.c.l.s8.bf16 %v2429_v56  ;;  %v3358_v22 = vunpack.c.h.s8.bf16 %v2414_v4 }
 0x596   :  { %v5918_v12 = vrot.slane %v5880_v5, %v10297_v31 }
 0x598   :  { %5364 = vmatpush2.bf16.msra.mxu0 %v2893_v39  ;;  %5471 = vmatpush1.bf16.msra.mxu1 %v3581_v6  ;;  %v2413_v6 = vld [vmem:[#allocation5 + $0x960] sm:$0xff] }
 0x599   :  { %5419 = vmatprep.subr.bf16.mxu0 %v3390_v38  ;;  %5472 = vmatprep.subr.bf16.mxu1 %v3566_v24  ;;  %v3534_v38 = vunpack.c.l.s8.bf16 %v2510_v21  ;;  %v3357_v56 = vunpack.c.h.s8.bf16 %v2413_v6  ;;  %v3341_v31 = vunpack.c.l.s8.bf16 %v2413_v6 }
 0x59b   :  { %v5109_v34 = vpop.f32.mrf.mxu0  ;;  %5366 = vmatmul.mubr.bf16.vlgmr.msra.gmra.mxu0 %v11087_v26 }
 0x59c   :  { %v5110_v18 = vadd.f32 %v5109_v34, %v10486_v40  ;;  %5420 = vmatpush1.bf16.msra.mxu0 %v3389_v42  ;;  %5473 = vmatpush1.bf16.msra.mxu1 %v3565_v0  ;;  %v3533_v42 = vunpack.c.l.s8.bf16 %v2509_v52  ;;  %v3342_v0 = vunpack.c.l.s8.bf16 %v2414_v4  ;;  %v2621_v34 = vld [vmem:[#allocation5 + $0xfe0] sm:$0xff] }
 0x59d   :  { %v10499_v39 = vpop.f32.mrf.mxu0  ;;  %5421 = vmatprep.subr.bf16.mxu0 %v3374_v17  ;;  %5474 = vmatprep.subr.bf16.mxu1 %v3550_v27  ;;  %v3774_v17 = vunpack.c.h.s8.bf16 %v2622_v35  ;;  %v3773_v5 = vunpack.c.h.s8.bf16 %v2621_v34 }
 0x59e   :  { %11138 = vst [vmem:[#allocation65_spill] sm:$0xff] %v10499_v39  ;;  %v5855_v24 = vmul.f32 %v5802_v44, %v5110_v18  ;;  %5451 = vmatprep.mubr.bf16.mxu0 %v11088_v19  ;;  %v2398_v18 = vld [vmem:[#allocation5 + $0x8e8] sm:$0xff] }
 0x59f   :  { %v5113_v32 = vpop.f32.mrf.mxu0  ;;  %v3326_v47 = vunpack.c.h.s8.bf16 %v2398_v18 }
 0x5a0   :  { %v5114_v40 = vadd.f32 %v5113_v32, %v10490_v13  ;;  %5422 = vmatpush1.bf16.msra.mxu0 %v3373_v58  ;;  %5475 = vmatpush1.bf16.msra.mxu1 %v3549_v23  ;;  %v5971_v27 = vadd.f32 %v5918_v12, %v5855_v24  ;;  %v2397_v32 = vld [vmem:[#allocation5 + $0x8e0] sm:$0xff]  ;;  %v3758_v13 = vunpack.c.l.s8.bf16 %v2622_v35  ;;  %v2606_v23 = vld [vmem:[#allocation5 + $0xf68] sm:$0xff] }
 0x5a1   :  { %5423 = vmatprep.subr.bf16.mxu0 %v3358_v22  ;;  %5476 = vmatprep.subr.bf16.mxu1 %v3534_v38  ;;  %v3325_v22 = vunpack.c.h.s8.bf16 %v2397_v32  ;;  %v3310_v38 = vunpack.c.l.s8.bf16 %v2398_v18  ;;  %v3742_v6 = vunpack.c.h.s8.bf16 %v2606_v23  ;;  %v2605_v24 = vld [vmem:[#allocation5 + $0xf60] sm:$0xff]  ;;  %v2494_v18 = vld [vmem:[#allocation5 + $0xbe8] sm:$0xff] }
 0x5a2   :  { %v5871_v21 = vmul.f32 %v5802_v44, %v5114_v40  ;;  %v6003_v58 = vmax.f32 %v5971_v27, 0.0  ;;  %v3757_v44 = vunpack.c.l.s8.bf16 %v2621_v34  ;;  %v3309_v40 = vunpack.c.l.s8.bf16 %v2397_v32 }
 0x5a3   :  { %v3725_v34 = vunpack.c.l.s8.bf16 %v2605_v24  ;;  %v3518_v32 = vunpack.c.h.s8.bf16 %v2494_v18 }
 0x5a4   :  { %v5987_v39 = vadd.f32 %v5918_v12, %v5871_v21  ;;  %5424 = vmatpush1.bf16.msra.mxu0 %v3357_v56  ;;  %5477 = vmatpush1.bf16.msra.mxu1 %v3533_v42  ;;  %v2382_v12 = vld [vmem:[#allocation5 + $0x868] sm:$0xff]  ;;  %v3741_v56 = vunpack.c.h.s8.bf16 %v2605_v24  ;;  %v3726_v42 = vunpack.c.l.s8.bf16 %v2606_v23  ;;  %v2589_v21 = vld [vmem:[#allocation5 + $0xee0] sm:$0xff] }
 0x5a5   :  { %5425 = vmatprep.subr.bf16.mxu0 %v3342_v0  ;;  %5478 = vmatprep.subr.bf16.mxu1 %v3774_v17  ;;  %v3294_v35 = vunpack.c.h.s8.bf16 %v2382_v12  ;;  %v2590_v0 = vld [vmem:[#allocation5 + $0xee8] sm:$0xff] }
 0x5a6   :  { %v6019_v52 = vmax.f32 %v5987_v39, 0.0  ;;  %v2381_v39 = vld [vmem:[#allocation5 + $0x860] sm:$0xff]  ;;  %v3710_v27 = vunpack.c.h.s8.bf16 %v2590_v0  ;;  %v2478_v24 = vld [vmem:[#allocation5 + $0xb68] sm:$0xff] }
 0x5a7   :  { %v3293_v17 = vunpack.c.h.s8.bf16 %v2381_v39 }
 0x5a8   :  { %v10504_v4 = vpack.c.bf16 %v6019_v52, %v6003_v58  ;;  %5426 = vmatpush1.bf16.msra.mxu0 %v3341_v31  ;;  %5479 = vmatpush2.bf16.msra.mxu1 %v3773_v5  ;;  %v3277_v31 = vunpack.c.l.s8.bf16 %v2381_v39  ;;  %v3709_v5 = vunpack.c.h.s8.bf16 %v2589_v21  ;;  %v3694_v58 = vunpack.c.l.s8.bf16 %v2590_v0  ;;  %v2574_v52 = vld [vmem:[#allocation5 + $0xe68] sm:$0xff] }
 0x5a9   :  { %5427 = vmatprep.subr.bf16.mxu0 %v3326_v47  ;;  %5480 = vmatprep.subr.bf16.mxu1 %v3758_v13  ;;  %v3278_v47 = vunpack.c.l.s8.bf16 %v2382_v12  ;;  %v2493_v13 = vld [vmem:[#allocation5 + $0xbe0] sm:$0xff]  ;;  %v3662_v39 = vunpack.c.l.s8.bf16 %v2574_v52 }
 0x5aa   :  { %v3517_v23 = vunpack.c.h.s8.bf16 %v2493_v13  ;;  %v3501_v12 = vunpack.c.l.s8.bf16 %v2493_v13 }
 0x5ac   :  { %5428 = vmatpush1.bf16.msra.mxu0 %v3325_v22  ;;  %5481 = vmatpush2.bf16.msra.mxu1 %v3757_v44  ;;  %v3693_v22 = vunpack.c.l.s8.bf16 %v2589_v21  ;;  %v3502_v44 = vunpack.c.l.s8.bf16 %v2494_v18  ;;  %v2462_v21 = vld [vmem:[#allocation5 + $0xae8] sm:$0xff] }
 0x5ad   :  { %5429 = vmatprep.subr.bf16.mxu0 %v3310_v38  ;;  %5482 = vmatprep.subr.bf16.mxu1 %v3742_v6  ;;  %v3678_v38 = vunpack.c.h.s8.bf16 %v2574_v52  ;;  %v2573_v6 = vld [vmem:[#allocation5 + $0xe60] sm:$0xff] }
 0x5b0   :  { %5430 = vmatpush1.bf16.msra.mxu0 %v3309_v40  ;;  %5483 = vmatpush2.bf16.msra.mxu1 %v3741_v56  ;;  %v3677_v40 = vunpack.c.h.s8.bf16 %v2573_v6  ;;  %v3486_v56 = vunpack.c.h.s8.bf16 %v2478_v24 }
 0x5b1   :  { %5431 = vmatprep.subr.bf16.mxu0 %v3294_v35  ;;  %5484 = vmatprep.subr.bf16.mxu1 %v3726_v42  ;;  %v2477_v35 = vld [vmem:[#allocation5 + $0xb60] sm:$0xff]  ;;  %v2176_v42 = vld [vmem:[#allocation5 + $0x1f8] sm:$0xff] }
 0x5b2   :  { %v3485_v0 = vunpack.c.h.s8.bf16 %v2477_v35  ;;  %v3469_v18 = vunpack.c.l.s8.bf16 %v2477_v35  ;;  %v2864_v13 = vunpack.c.l.s8.bf16 %v2176_v42 }
 0x5b4   :  { %5432 = vmatpush1.bf16.msra.mxu0 %v3293_v17  ;;  %5485 = vmatpush2.bf16.msra.mxu1 %v3725_v34  ;;  %v3661_v17 = vunpack.c.l.s8.bf16 %v2573_v6  ;;  %v3470_v34 = vunpack.c.l.s8.bf16 %v2478_v24  ;;  %v2446_v6 = vld [vmem:[#allocation5 + $0xa68] sm:$0xff] }
 0x5b5   :  { %5433 = vmatprep.subr.bf16.mxu0 %v3278_v47  ;;  %5486 = vmatprep.subr.bf16.mxu1 %v3710_v27  ;;  %v2880_v47 = vunpack.c.h.s8.bf16 %v2176_v42  ;;  %v2175_v27 = vld [vmem:[#allocation5 + $0x1f0] sm:$0xff] }
 0x5b8   :  { %5434 = vmatpush1.bf16.msra.mxu0 %v3277_v31  ;;  %5487 = vmatpush2.bf16.msra.mxu1 %v3709_v5  ;;  %v2879_v31 = vunpack.c.h.s8.bf16 %v2175_v27  ;;  %v3454_v5 = vunpack.c.h.s8.bf16 %v2462_v21 }
 0x5b9   :  { %5435 = vmatprep.subr.bf16.mxu0 %v3518_v32  ;;  %5488 = vmatprep.subr.bf16.mxu1 %v3694_v58  ;;  %v2461_v32 = vld [vmem:[#allocation5 + $0xae0] sm:$0xff]  ;;  %v2160_v58 = vld [vmem:[#allocation5 + $0x178] sm:$0xff] }
 0x5ba   :  { %v3453_v52 = vunpack.c.h.s8.bf16 %v2461_v32  ;;  %v3437_v24 = vunpack.c.l.s8.bf16 %v2461_v32  ;;  %v2832_v35 = vunpack.c.l.s8.bf16 %v2160_v58  ;;  %v2128_v32 = vld [vmem:[#allocation5 + $0x78] sm:$0xff] }
 0x5bc   :  { %5436 = vmatpush2.bf16.msra.mxu0 %v3517_v23  ;;  %5489 = vmatpush2.bf16.msra.mxu1 %v3693_v22  ;;  %v2863_v23 = vunpack.c.l.s8.bf16 %v2175_v27  ;;  %v3438_v22 = vunpack.c.l.s8.bf16 %v2462_v21 }
 0x5bd   :  { %5437 = vmatprep.subr.bf16.mxu0 %v3502_v44  ;;  %5490 = vmatprep.subr.bf16.mxu1 %v3678_v38  ;;  %v2848_v44 = vunpack.c.h.s8.bf16 %v2160_v58  ;;  %v2159_v38 = vld [vmem:[#allocation5 + $0x170] sm:$0xff] }
 0x5c0   :  { %5438 = vmatpush2.bf16.msra.mxu0 %v3501_v12  ;;  %5491 = vmatpush2.bf16.msra.mxu1 %v3677_v40  ;;  %v2847_v12 = vunpack.c.h.s8.bf16 %v2159_v38  ;;  %v3422_v40 = vunpack.c.h.s8.bf16 %v2446_v6 }
 0x5c1   :  { %5439 = vmatprep.subr.bf16.mxu0 %v3486_v56  ;;  %5492 = vmatprep.subr.bf16.mxu1 %v3662_v39  ;;  %v2445_v56 = vld [vmem:[#allocation5 + $0xa60] sm:$0xff]  ;;  %v2144_v39 = vld [vmem:[#allocation5 + $0xf8] sm:$0xff] }
 0x5c2   :  { %v3421_v42 = vunpack.c.h.s8.bf16 %v2445_v56  ;;  %v3405_v27 = vunpack.c.l.s8.bf16 %v2445_v56  ;;  %v2240_v56 = vld [vmem:[#allocation5 + $0x3f8] sm:$0xff] }
 0x5c4   :  { %5440 = vmatpush2.bf16.msra.mxu0 %v3485_v0  ;;  %5493 = vmatpush2.bf16.msra.mxu1 %v3661_v17  ;;  %v2831_v0 = vunpack.c.l.s8.bf16 %v2159_v38  ;;  %v3406_v17 = vunpack.c.l.s8.bf16 %v2446_v6 }
 0x5c5   :  { %5441 = vmatprep.subr.bf16.mxu0 %v3470_v34  ;;  %5548 = vmatprep.subr.bf16.mxu1 %v2880_v47  ;;  %v2816_v34 = vunpack.c.h.s8.bf16 %v2144_v39  ;;  %v2143_v47 = vld [vmem:[#allocation5 + $0xf0] sm:$0xff] }
 0x5c6   :  { %v2815_v21 = vunpack.c.h.s8.bf16 %v2143_v47  ;;  %v2799_v58 = vunpack.c.l.s8.bf16 %v2143_v47 }
 0x5c7   :  { %5495 = vmatmul.mubr.bf16.vlgmr.msra.gmra.mxu1 %v11093_v48 }
 0x5c8   :  { %5442 = vmatpush2.bf16.msra.mxu0 %v3469_v18  ;;  %5549 = vmatpush1.bf16.msra.mxu1 %v2879_v31  ;;  %v2685_v31 = vld [vmem:[#allocation5 + $0x11e0] sm:$0xff] }
 0x5c9   :  { %5443 = vmatprep.subr.bf16.mxu0 %v3454_v5  ;;  %5550 = vmatprep.subr.bf16.mxu1 %v2864_v13  ;;  %v2800_v5 = vunpack.c.l.s8.bf16 %v2144_v39  ;;  %v3901_v13 = vunpack.c.h.s8.bf16 %v2685_v31  ;;  %v3885_v38 = vunpack.c.l.s8.bf16 %v2685_v31  ;;  %v2224_v31 = vld [vmem:[#allocation5 + $0x378] sm:$0xff] }
 0x5ca   :  { %5580 = vmatprep.mubr.bf16.mxu1 %v11094_v10  ;;  %v2686_v10 = vld [vmem:[#allocation5 + $0x11e8] sm:$0xff] }
 0x5cb   :  { %v3902_v18 = vunpack.c.h.s8.bf16 %v2686_v10 }
 0x5cc   :  { %5444 = vmatpush2.bf16.msra.mxu0 %v3453_v52  ;;  %5551 = vmatpush1.bf16.msra.mxu1 %v2863_v23  ;;  %v3886_v52 = vunpack.c.l.s8.bf16 %v2686_v10  ;;  %v2784_v23 = vunpack.c.h.s8.bf16 %v2128_v32 }
 0x5cd   :  { %5445 = vmatprep.subr.bf16.mxu0 %v3438_v22  ;;  %5552 = vmatprep.subr.bf16.mxu1 %v2848_v44  ;;  %v2127_v22 = vld [vmem:[#allocation5 + $0x70] sm:$0xff]  ;;  %v2670_v44 = vld [vmem:[#allocation5 + $0x1168] sm:$0xff] }
 0x5ce   :  { %v2783_v6 = vunpack.c.h.s8.bf16 %v2127_v22  ;;  %v2767_v39 = vunpack.c.l.s8.bf16 %v2127_v22 }
 0x5d0   :  { %5446 = vmatpush2.bf16.msra.mxu0 %v3437_v24  ;;  %5553 = vmatpush1.bf16.msra.mxu1 %v2847_v12  ;;  %v3870_v24 = vunpack.c.h.s8.bf16 %v2670_v44  ;;  %v2669_v12 = vld [vmem:[#allocation5 + $0x1160] sm:$0xff] }
 0x5d1   :  { %5447 = vmatprep.subr.bf16.mxu0 %v3422_v40  ;;  %5554 = vmatprep.subr.bf16.mxu1 %v2832_v35  ;;  %v2768_v40 = vunpack.c.l.s8.bf16 %v2128_v32  ;;  %v3869_v35 = vunpack.c.h.s8.bf16 %v2669_v12  ;;  %v3853_v47 = vunpack.c.l.s8.bf16 %v2669_v12  ;;  %v2208_v12 = vld [vmem:[#allocation5 + $0x2f8] sm:$0xff] }
 0x5d4   :  { %5448 = vmatpush2.bf16.msra.mxu0 %v3421_v42  ;;  %5555 = vmatpush1.bf16.msra.mxu1 %v2831_v0  ;;  %v3854_v42 = vunpack.c.l.s8.bf16 %v2670_v44  ;;  %v3008_v0 = vunpack.c.h.s8.bf16 %v2240_v56 }
 0x5d5   :  { %5449 = vmatprep.subr.bf16.mxu0 %v3406_v17  ;;  %5556 = vmatprep.subr.bf16.mxu1 %v2816_v34  ;;  %v2239_v17 = vld [vmem:[#allocation5 + $0x3f0] sm:$0xff]  ;;  %v2654_v34 = vld [vmem:[#allocation5 + $0x10e8] sm:$0xff] }
 0x5d6   :  { %v3007_v10 = vunpack.c.h.s8.bf16 %v2239_v17  ;;  %v2991_v32 = vunpack.c.l.s8.bf16 %v2239_v17 }
 0x5d8   :  { %5450 = vmatpush2.bf16.msra.mxu0 %v3405_v27  ;;  %5557 = vmatpush1.bf16.msra.mxu1 %v2815_v21  ;;  %v3838_v27 = vunpack.c.h.s8.bf16 %v2654_v34  ;;  %v2653_v21 = vld [vmem:[#allocation5 + $0x10e0] sm:$0xff] }
 0x5d9   :  { %5505 = vmatprep.subr.bf16.mxu0 %v3902_v18  ;;  %5558 = vmatprep.subr.bf16.mxu1 %v2800_v5  ;;  %v2992_v18 = vunpack.c.l.s8.bf16 %v2240_v56  ;;  %v3837_v5 = vunpack.c.h.s8.bf16 %v2653_v21  ;;  %v3821_v22 = vunpack.c.l.s8.bf16 %v2653_v21  ;;  %v2192_v21 = vld [vmem:[#allocation5 + $0x278] sm:$0xff] }
 0x5db   :  { %5452 = vmatmul.mubr.bf16.vlgmr.msra.gmra.mxu0 %v11090_v33 }
 0x5dc   :  { %5506 = vmatpush1.bf16.msra.mxu0 %v3901_v13  ;;  %5559 = vmatpush1.bf16.msra.mxu1 %v2799_v58  ;;  %v3822_v13 = vunpack.c.l.s8.bf16 %v2654_v34  ;;  %v2976_v58 = vunpack.c.h.s8.bf16 %v2224_v31 }
 0x5dd   :  { %5507 = vmatprep.subr.bf16.mxu0 %v3886_v52  ;;  %5560 = vmatprep.subr.bf16.mxu1 %v2784_v23  ;;  %v2223_v52 = vld [vmem:[#allocation5 + $0x370] sm:$0xff]  ;;  %v2638_v23 = vld [vmem:[#allocation5 + $0x1068] sm:$0xff] }
 0x5de   :  { %5537 = vmatprep.mubr.bf16.mxu0 %v10165_v63  ;;  %v2975_v44 = vunpack.c.h.s8.bf16 %v2223_v52  ;;  %v2959_v56 = vunpack.c.l.s8.bf16 %v2223_v52 }
 0x5e0   :  { %5508 = vmatpush1.bf16.msra.mxu0 %v3885_v38  ;;  %5561 = vmatpush1.bf16.msra.mxu1 %v2783_v6  ;;  %v3806_v38 = vunpack.c.h.s8.bf16 %v2638_v23  ;;  %v2637_v6 = vld [vmem:[#allocation5 + $0x1060] sm:$0xff] }
 0x5e1   :  { %5509 = vmatprep.subr.bf16.mxu0 %v3870_v24  ;;  %5562 = vmatprep.subr.bf16.mxu1 %v2768_v40  ;;  %v2960_v24 = vunpack.c.l.s8.bf16 %v2224_v31  ;;  %v3805_v40 = vunpack.c.h.s8.bf16 %v2637_v6  ;;  %v3789_v17 = vunpack.c.l.s8.bf16 %v2637_v6  ;;  %v2432_v6 = vld [vmem:[#allocation5 + $0x9f8] sm:$0xff] }
 0x5e4   :  { %5510 = vmatpush1.bf16.msra.mxu0 %v3869_v35  ;;  %5563 = vmatpush1.bf16.msra.mxu1 %v2767_v39  ;;  %v3790_v35 = vunpack.c.l.s8.bf16 %v2638_v23  ;;  %v2944_v39 = vunpack.c.h.s8.bf16 %v2208_v12 }
 0x5e5   :  { %5511 = vmatprep.subr.bf16.mxu0 %v3854_v42  ;;  %5564 = vmatprep.subr.bf16.mxu1 %v3008_v0  ;;  %v2207_v42 = vld [vmem:[#allocation5 + $0x2f0] sm:$0xff]  ;;  %v2750_v0 = vld [vmem:[#allocation5 + $0x13e8] sm:$0xff] }
 0x5e6   :  { %v2943_v34 = vunpack.c.h.s8.bf16 %v2207_v42  ;;  %v2927_v31 = vunpack.c.l.s8.bf16 %v2207_v42 }
 0x5e8   :  { %5512 = vmatpush1.bf16.msra.mxu0 %v3853_v47  ;;  %5565 = vmatpush2.bf16.msra.mxu1 %v3007_v10  ;;  %v4030_v47 = vunpack.c.h.s8.bf16 %v2750_v0  ;;  %v2749_v10 = vld [vmem:[#allocation5 + $0x13e0] sm:$0xff] }
 0x5e9   :  { %5513 = vmatprep.subr.bf16.mxu0 %v3838_v27  ;;  %5566 = vmatprep.subr.bf16.mxu1 %v2992_v18  ;;  %v2928_v27 = vunpack.c.l.s8.bf16 %v2208_v12  ;;  %v4029_v18 = vunpack.c.h.s8.bf16 %v2749_v10  ;;  %v4013_v52 = vunpack.c.l.s8.bf16 %v2749_v10  ;;  %v2416_v10 = vld [vmem:[#allocation5 + $0x978] sm:$0xff] }
 0x5ec   :  { %5514 = vmatpush1.bf16.msra.mxu0 %v3837_v5  ;;  %5567 = vmatpush2.bf16.msra.mxu1 %v2991_v32  ;;  %v4014_v5 = vunpack.c.l.s8.bf16 %v2750_v0  ;;  %v2912_v32 = vunpack.c.h.s8.bf16 %v2192_v21 }
 0x5ed   :  { %5515 = vmatprep.subr.bf16.mxu0 %v3822_v13  ;;  %5568 = vmatprep.subr.bf16.mxu1 %v2976_v58  ;;  %v2191_v13 = vld [vmem:[#allocation5 + $0x270] sm:$0xff]  ;;  %v2734_v58 = vld [vmem:[#allocation5 + $0x1368] sm:$0xff] }
 0x5ee   :  { %v2911_v23 = vunpack.c.h.s8.bf16 %v2191_v13  ;;  %v2895_v12 = vunpack.c.l.s8.bf16 %v2191_v13 }
 0x5f0   :  { %5516 = vmatpush1.bf16.msra.mxu0 %v3821_v22  ;;  %5569 = vmatpush2.bf16.msra.mxu1 %v2975_v44  ;;  %v3998_v22 = vunpack.c.h.s8.bf16 %v2734_v58  ;;  %v2733_v44 = vld [vmem:[#allocation5 + $0x1360] sm:$0xff] }
 0x5f1   :  { %5517 = vmatprep.subr.bf16.mxu0 %v3806_v38  ;;  %5570 = vmatprep.subr.bf16.mxu1 %v2960_v24  ;;  %v2896_v38 = vunpack.c.l.s8.bf16 %v2192_v21  ;;  %v3997_v24 = vunpack.c.h.s8.bf16 %v2733_v44  ;;  %v3981_v42 = vunpack.c.l.s8.bf16 %v2733_v44 }
 0x5f4   :  { %5518 = vmatpush1.bf16.msra.mxu0 %v3805_v40  ;;  %5571 = vmatpush2.bf16.msra.mxu1 %v2959_v56  ;;  %v3982_v40 = vunpack.c.l.s8.bf16 %v2734_v58  ;;  %v3392_v56 = vunpack.c.h.s8.bf16 %v2432_v6 }
 0x5f5   :  { %5519 = vmatprep.subr.bf16.mxu0 %v3790_v35  ;;  %5572 = vmatprep.subr.bf16.mxu1 %v2944_v39  ;;  %v2431_v35 = vld [vmem:[#allocation5 + $0x9f0] sm:$0xff]  ;;  %v2718_v39 = vld [vmem:[#allocation5 + $0x12e8] sm:$0xff] }
 0x5f6   :  { %v3391_v0 = vunpack.c.h.s8.bf16 %v2431_v35  ;;  %v3375_v21 = vunpack.c.l.s8.bf16 %v2431_v35 }
 0x5f8   :  { %5520 = vmatpush1.bf16.msra.mxu0 %v3789_v17  ;;  %5573 = vmatpush2.bf16.msra.mxu1 %v2943_v34  ;;  %v3966_v17 = vunpack.c.h.s8.bf16 %v2718_v39  ;;  %v2717_v34 = vld [vmem:[#allocation5 + $0x12e0] sm:$0xff] }
 0x5f9   :  { %5521 = vmatprep.subr.bf16.mxu0 %v4030_v47  ;;  %5574 = vmatprep.subr.bf16.mxu1 %v2928_v27  ;;  %v3376_v47 = vunpack.c.l.s8.bf16 %v2432_v6  ;;  %v3965_v27 = vunpack.c.h.s8.bf16 %v2717_v34  ;;  %v3949_v13 = vunpack.c.l.s8.bf16 %v2717_v34 }
 0x5fc   :  { %5522 = vmatpush2.bf16.msra.mxu0 %v4029_v18  ;;  %5575 = vmatpush2.bf16.msra.mxu1 %v2927_v31  ;;  %v3950_v18 = vunpack.c.l.s8.bf16 %v2718_v39  ;;  %v3360_v31 = vunpack.c.h.s8.bf16 %v2416_v10  ;;  %v2303_v39 = vld [vmem:[#allocation5 + $0x5f0] sm:$0xff] }
 0x5fd   :  { %5523 = vmatprep.subr.bf16.mxu0 %v4014_v5  ;;  %5576 = vmatprep.subr.bf16.mxu1 %v2912_v32  ;;  %v2415_v5 = vld [vmem:[#allocation5 + $0x970] sm:$0xff]  ;;  %v2702_v32 = vld [vmem:[#allocation5 + $0x1268] sm:$0xff] }
 0x5fe   :  { %v3359_v58 = vunpack.c.h.s8.bf16 %v2415_v5  ;;  %v3918_v6 = vunpack.c.l.s8.bf16 %v2702_v32 }
 0x600   :  { %5524 = vmatpush2.bf16.msra.mxu0 %v4013_v52  ;;  %5577 = vmatpush2.bf16.msra.mxu1 %v2911_v23  ;;  %v3934_v52 = vunpack.c.h.s8.bf16 %v2702_v32  ;;  %v2701_v23 = vld [vmem:[#allocation5 + $0x1260] sm:$0xff]  ;;  %v2287_v32 = vld [vmem:[#allocation5 + $0x570] sm:$0xff] }
 0x601   :  { %5525 = vmatprep.subr.bf16.mxu0 %v3998_v22  ;;  %5578 = vmatprep.subr.bf16.mxu1 %v2896_v38  ;;  %v2400_v22 = vld [vmem:[#allocation5 + $0x8f8] sm:$0xff]  ;;  %v3933_v44 = vunpack.c.h.s8.bf16 %v2701_v23  ;;  %v3343_v38 = vunpack.c.l.s8.bf16 %v2415_v5 }
 0x604   :  { %5526 = vmatpush2.bf16.msra.mxu0 %v3997_v24  ;;  %5579 = vmatpush2.bf16.msra.mxu1 %v2895_v12  ;;  %v3328_v24 = vunpack.c.h.s8.bf16 %v2400_v22  ;;  %v2399_v12 = vld [vmem:[#allocation5 + $0x8f0] sm:$0xff] }
 0x605   :  { %5527 = vmatprep.subr.bf16.mxu0 %v3982_v40  ;;  %5634 = vmatprep.subr.bf16.mxu1 %v3392_v56  ;;  %v3917_v40 = vunpack.c.l.s8.bf16 %v2701_v23  ;;  %v3327_v56 = vunpack.c.h.s8.bf16 %v2399_v12  ;;  %v3311_v34 = vunpack.c.l.s8.bf16 %v2399_v12 }
 0x607   :  { %5581 = vmatmul.mubr.bf16.vlgmr.msra.gmra.mxu1 %v11087_v26  ;;  %v3344_v26 = vunpack.c.l.s8.bf16 %v2416_v10 }
 0x608   :  { %5528 = vmatpush2.bf16.msra.mxu0 %v3981_v42  ;;  %5635 = vmatpush1.bf16.msra.mxu1 %v3391_v0  ;;  %v3312_v42 = vunpack.c.l.s8.bf16 %v2400_v22  ;;  %v2384_v0 = vld [vmem:[#allocation5 + $0x878] sm:$0xff] }
 0x609   :  { %5529 = vmatprep.subr.bf16.mxu0 %v3966_v17  ;;  %5636 = vmatprep.subr.bf16.mxu1 %v3376_v47  ;;  %v3135_v17 = vunpack.c.h.s8.bf16 %v2303_v39  ;;  %v3296_v10 = vunpack.c.h.s8.bf16 %v2384_v0 }
 0x60a   :  { %5666 = vmatprep.mubr.bf16.mxu1 %v11088_v19  ;;  %v2304_v19 = vld [vmem:[#allocation5 + $0x5f8] sm:$0xff] }
 0x60b   :  { %v3136_v35 = vunpack.c.h.s8.bf16 %v2304_v19  ;;  %v3120_v47 = vunpack.c.l.s8.bf16 %v2304_v19  ;;  %v2271_v19 = vld [vmem:[#allocation5 + $0x4f0] sm:$0xff] }
 0x60c   :  { %5530 = vmatpush2.bf16.msra.mxu0 %v3965_v27  ;;  %5637 = vmatpush1.bf16.msra.mxu1 %v3375_v21  ;;  %v2383_v27 = vld [vmem:[#allocation5 + $0x870] sm:$0xff]  ;;  %v2288_v21 = vld [vmem:[#allocation5 + $0x578] sm:$0xff] }
 0x60d   :  { %5531 = vmatprep.subr.bf16.mxu0 %v3950_v18  ;;  %5638 = vmatprep.subr.bf16.mxu1 %v3360_v31  ;;  %v3119_v18 = vunpack.c.l.s8.bf16 %v2303_v39  ;;  %v3295_v31 = vunpack.c.h.s8.bf16 %v2383_v27  ;;  %v3104_v5 = vunpack.c.h.s8.bf16 %v2288_v21  ;;  %v3279_v23 = vunpack.c.l.s8.bf16 %v2383_v27  ;;  %v2255_v27 = vld [vmem:[#allocation5 + $0x470] sm:$0xff] }
 0x610   :  { %5532 = vmatpush2.bf16.msra.mxu0 %v3949_v13  ;;  %5639 = vmatpush1.bf16.msra.mxu1 %v3359_v58  ;;  %v3280_v13 = vunpack.c.l.s8.bf16 %v2384_v0  ;;  %v2496_v58 = vld [vmem:[#allocation5 + $0xbf8] sm:$0xff]  ;;  %v2479_v0 = vld [vmem:[#allocation5 + $0xb70] sm:$0xff] }
 0x611   :  { %5533 = vmatprep.subr.bf16.mxu0 %v3934_v52  ;;  %5640 = vmatprep.subr.bf16.mxu1 %v3344_v26  ;;  %v3103_v52 = vunpack.c.h.s8.bf16 %v2287_v32  ;;  %v3088_v26 = vunpack.c.l.s8.bf16 %v2288_v21  ;;  %v3520_v22 = vunpack.c.h.s8.bf16 %v2496_v58 }
 0x614   :  { %5534 = vmatpush2.bf16.msra.mxu0 %v3933_v44  ;;  %5641 = vmatpush1.bf16.msra.mxu1 %v3343_v38  ;;  %v2495_v44 = vld [vmem:[#allocation5 + $0xbf0] sm:$0xff]  ;;  %v2272_v38 = vld [vmem:[#allocation5 + $0x4f8] sm:$0xff] }
 0x615   :  { %5535 = vmatprep.subr.bf16.mxu0 %v3918_v6  ;;  %5642 = vmatprep.subr.bf16.mxu1 %v3328_v24  ;;  %v3087_v6 = vunpack.c.l.s8.bf16 %v2287_v32  ;;  %v3519_v24 = vunpack.c.h.s8.bf16 %v2495_v44  ;;  %v3072_v12 = vunpack.c.h.s8.bf16 %v2272_v38  ;;  %v3056_v39 = vunpack.c.l.s8.bf16 %v2272_v38 }
 0x618   :  { %5536 = vmatpush2.bf16.msra.mxu0 %v3917_v40  ;;  %5643 = vmatpush1.bf16.msra.mxu1 %v3327_v56  ;;  %v3504_v40 = vunpack.c.l.s8.bf16 %v2496_v58  ;;  %v3071_v56 = vunpack.c.h.s8.bf16 %v2271_v19  ;;  %v2463_v58 = vld [vmem:[#allocation5 + $0xaf0] sm:$0xff] }
 0x619   :  { %5591 = vmatprep.subr.bf16.mxu0 %v3136_v35  ;;  %5644 = vmatprep.subr.bf16.mxu1 %v3312_v42  ;;  %v3503_v35 = vunpack.c.l.s8.bf16 %v2495_v44  ;;  %v2367_v44 = vld [vmem:[#allocation5 + $0x7f0] sm:$0xff] }
 0x61b   :  { %5538 = vmatmul.mubr.bf16.vlgmr.msra.gmra.mxu0 %v10254_v61 }
 0x61c   :  { %5592 = vmatpush1.bf16.msra.mxu0 %v3135_v17  ;;  %5645 = vmatpush1.bf16.msra.mxu1 %v3311_v34  ;;  %v2256_v17 = vld [vmem:[#allocation5 + $0x478] sm:$0xff]  ;;  %v3055_v34 = vunpack.c.l.s8.bf16 %v2271_v19 }
 0x61d   :  { %5593 = vmatprep.subr.bf16.mxu0 %v3120_v47  ;;  %5646 = vmatprep.subr.bf16.mxu1 %v3296_v10  ;;  %v3487_v47 = vunpack.c.h.s8.bf16 %v2479_v0  ;;  %v3040_v10 = vunpack.c.h.s8.bf16 %v2256_v17  ;;  %v3024_v32 = vunpack.c.l.s8.bf16 %v2256_v17 }
 0x61e   :  { %5623 = vmatprep.mubr.bf16.mxu0 %v11089_v3  ;;  %v2480_v3 = vld [vmem:[#allocation5 + $0xb78] sm:$0xff] }
 0x61f   :  { %v3488_v42 = vunpack.c.h.s8.bf16 %v2480_v3  ;;  %v3472_v21 = vunpack.c.l.s8.bf16 %v2480_v3  ;;  %v2447_v3 = vld [vmem:[#allocation5 + $0xa70] sm:$0xff] }
 0x620   :  { %5594 = vmatpush1.bf16.msra.mxu0 %v3119_v18  ;;  %5647 = vmatpush1.bf16.msra.mxu1 %v3295_v31  ;;  %v2464_v18 = vld [vmem:[#allocation5 + $0xaf8] sm:$0xff]  ;;  %v3039_v31 = vunpack.c.h.s8.bf16 %v2255_v27 }
 0x621   :  { %5595 = vmatprep.subr.bf16.mxu0 %v3104_v5  ;;  %5648 = vmatprep.subr.bf16.mxu1 %v3280_v13  ;;  %v3471_v5 = vunpack.c.l.s8.bf16 %v2479_v0  ;;  %v3456_v13 = vunpack.c.h.s8.bf16 %v2464_v18  ;;  %v3440_v38 = vunpack.c.l.s8.bf16 %v2464_v18  ;;  %v2351_v0 = vld [vmem:[#allocation5 + $0x770] sm:$0xff] }
 0x622   :  { %v2687_v18 = vld [vmem:[#allocation5 + $0x11f0] sm:$0xff] }
 0x624   :  { %5596 = vmatpush1.bf16.msra.mxu0 %v3103_v52  ;;  %5649 = vmatpush1.bf16.msra.mxu1 %v3279_v23  ;;  %v2368_v52 = vld [vmem:[#allocation5 + $0x7f8] sm:$0xff]  ;;  %v3023_v23 = vunpack.c.l.s8.bf16 %v2255_v27 }
 0x625   :  { %5597 = vmatprep.subr.bf16.mxu0 %v3088_v26  ;;  %5650 = vmatprep.subr.bf16.mxu1 %v3520_v22  ;;  %v3455_v26 = vunpack.c.h.s8.bf16 %v2463_v58  ;;  %v3264_v22 = vunpack.c.h.s8.bf16 %v2368_v52  ;;  %v3248_v19 = vunpack.c.l.s8.bf16 %v2368_v52 }
 0x628   :  { %5598 = vmatpush1.bf16.msra.mxu0 %v3087_v6  ;;  %5651 = vmatpush2.bf16.msra.mxu1 %v3519_v24  ;;  %v2448_v6 = vld [vmem:[#allocation5 + $0xa78] sm:$0xff]  ;;  %v3263_v24 = vunpack.c.h.s8.bf16 %v2367_v44 }
 0x629   :  { %5599 = vmatprep.subr.bf16.mxu0 %v3072_v12  ;;  %5652 = vmatprep.subr.bf16.mxu1 %v3504_v40  ;;  %v3439_v12 = vunpack.c.l.s8.bf16 %v2463_v58  ;;  %v3424_v40 = vunpack.c.h.s8.bf16 %v2448_v6  ;;  %v3408_v17 = vunpack.c.l.s8.bf16 %v2448_v6  ;;  %v2335_v58 = vld [vmem:[#allocation5 + $0x6f0] sm:$0xff] }
 0x62a   :  { %v2671_v6 = vld [vmem:[#allocation5 + $0x1170] sm:$0xff] }
 0x62c   :  { %5600 = vmatpush1.bf16.msra.mxu0 %v3071_v56  ;;  %5653 = vmatpush2.bf16.msra.mxu1 %v3503_v35  ;;  %v2352_v56 = vld [vmem:[#allocation5 + $0x778] sm:$0xff]  ;;  %v3247_v35 = vunpack.c.l.s8.bf16 %v2367_v44 }
 0x62d   :  { %5601 = vmatprep.subr.bf16.mxu0 %v3056_v39  ;;  %5654 = vmatprep.subr.bf16.mxu1 %v3488_v42  ;;  %v3423_v39 = vunpack.c.h.s8.bf16 %v2447_v3  ;;  %v3232_v42 = vunpack.c.h.s8.bf16 %v2352_v56  ;;  %v3216_v27 = vunpack.c.l.s8.bf16 %v2352_v56  ;;  %v2656_v56 = vld [vmem:[#allocation5 + $0x10f8] sm:$0xff] }
 0x630   :  { %5602 = vmatpush1.bf16.msra.mxu0 %v3055_v34  ;;  %5655 = vmatpush2.bf16.msra.mxu1 %v3487_v47  ;;  %v2688_v34 = vld [vmem:[#allocation5 + $0x11f8] sm:$0xff]  ;;  %v3231_v47 = vunpack.c.h.s8.bf16 %v2351_v0 }
 0x631   :  { %5603 = vmatprep.subr.bf16.mxu0 %v3040_v10  ;;  %5656 = vmatprep.subr.bf16.mxu1 %v3472_v21  ;;  %v3407_v10 = vunpack.c.l.s8.bf16 %v2447_v3  ;;  %v3904_v21 = vunpack.c.h.s8.bf16 %v2688_v34  ;;  %v3888_v52 = vunpack.c.l.s8.bf16 %v2688_v34  ;;  %v2319_v3 = vld [vmem:[#allocation5 + $0x670] sm:$0xff] }
 0x632   :  { %v3151_v34 = vunpack.c.l.s8.bf16 %v2319_v3 }
 0x634   :  { %5604 = vmatpush1.bf16.msra.mxu0 %v3039_v31  ;;  %5657 = vmatpush2.bf16.msra.mxu1 %v3471_v5  ;;  %v2336_v31 = vld [vmem:[#allocation5 + $0x6f8] sm:$0xff]  ;;  %v3215_v5 = vunpack.c.l.s8.bf16 %v2351_v0  ;;  %v3840_v0 = vunpack.c.h.s8.bf16 %v2656_v56 }
 0x635   :  { %5605 = vmatprep.subr.bf16.mxu0 %v3024_v32  ;;  %5658 = vmatprep.subr.bf16.mxu1 %v3456_v13  ;;  %v3903_v32 = vunpack.c.h.s8.bf16 %v2687_v18  ;;  %v3200_v13 = vunpack.c.h.s8.bf16 %v2336_v31  ;;  %v3184_v44 = vunpack.c.l.s8.bf16 %v2336_v31 }
 0x638   :  { %5606 = vmatpush1.bf16.msra.mxu0 %v3023_v23  ;;  %5659 = vmatpush2.bf16.msra.mxu1 %v3455_v26  ;;  %v2672_v23 = vld [vmem:[#allocation5 + $0x1178] sm:$0xff]  ;;  %v3199_v26 = vunpack.c.h.s8.bf16 %v2335_v58 }
 0x639   :  { %5607 = vmatprep.subr.bf16.mxu0 %v3264_v22  ;;  %5660 = vmatprep.subr.bf16.mxu1 %v3440_v38  ;;  %v3887_v22 = vunpack.c.l.s8.bf16 %v2687_v18  ;;  %v3872_v38 = vunpack.c.h.s8.bf16 %v2672_v23  ;;  %v2640_v18 = vld [vmem:[#allocation5 + $0x1078] sm:$0xff] }
 0x63c   :  { %5608 = vmatpush2.bf16.msra.mxu0 %v3263_v24  ;;  %5661 = vmatpush2.bf16.msra.mxu1 %v3439_v12  ;;  %v2320_v24 = vld [vmem:[#allocation5 + $0x678] sm:$0xff]  ;;  %v3183_v12 = vunpack.c.l.s8.bf16 %v2335_v58  ;;  %v2639_v58 = vld [vmem:[#allocation5 + $0x1070] sm:$0xff] }
 0x63d   :  { %5609 = vmatprep.subr.bf16.mxu0 %v3248_v19  ;;  %5662 = vmatprep.subr.bf16.mxu1 %v3424_v40  ;;  %v3871_v19 = vunpack.c.h.s8.bf16 %v2671_v6  ;;  %v3168_v40 = vunpack.c.h.s8.bf16 %v2320_v24 }
 0x640   :  { %5610 = vmatpush2.bf16.msra.mxu0 %v3247_v35  ;;  %5663 = vmatpush2.bf16.msra.mxu1 %v3423_v39  ;;  %v3167_v35 = vunpack.c.h.s8.bf16 %v2319_v3  ;;  %v3855_v39 = vunpack.c.l.s8.bf16 %v2671_v6  ;;  %v2752_v6 = vld [vmem:[#allocation5 + $0x13f8] sm:$0xff] }
 0x641   :  { %5611 = vmatprep.subr.bf16.mxu0 %v3232_v42  ;;  %5664 = vmatprep.subr.bf16.mxu1 %v3408_v17  ;;  %v3152_v42 = vunpack.c.l.s8.bf16 %v2320_v24  ;;  %v2655_v17 = vld [vmem:[#allocation5 + $0x10f0] sm:$0xff]  ;;  %v2528_v3 = vld [vmem:[#allocation5 + $0xcf8] sm:$0xff] }
 0x644   :  { %5612 = vmatpush2.bf16.msra.mxu0 %v3231_v47  ;;  %5665 = vmatpush2.bf16.msra.mxu1 %v3407_v10  ;;  %v3839_v47 = vunpack.c.h.s8.bf16 %v2655_v17 }
 0x645   :  { %5613 = vmatprep.subr.bf16.mxu0 %v3216_v27  ;;  %5720 = vmatprep.subr.bf16.mxu1 %v3904_v21  ;;  %v2559_v27 = vld [vmem:[#allocation5 + $0xdf0] sm:$0xff]  ;;  %v3824_v21 = vunpack.c.l.s8.bf16 %v2656_v56 }
 0x646   :  { %v3647_v31 = vunpack.c.h.s8.bf16 %v2559_v27 }
 0x647   :  { %5667 = vmatmul.mubr.bf16.vlgmr.msra.gmra.mxu1 %v11090_v33  ;;  %v3856_v33 = vunpack.c.l.s8.bf16 %v2672_v23  ;;  %v3631_v23 = vunpack.c.l.s8.bf16 %v2559_v27 }
 0x648   :  { %5614 = vmatpush2.bf16.msra.mxu0 %v3215_v5  ;;  %5721 = vmatpush1.bf16.msra.mxu1 %v3903_v32  ;;  %v3823_v5 = vunpack.c.l.s8.bf16 %v2655_v17 }
 0x649   :  { %5615 = vmatprep.subr.bf16.mxu0 %v3200_v13  ;;  %5722 = vmatprep.subr.bf16.mxu1 %v3888_v52  ;;  %v3808_v13 = vunpack.c.h.s8.bf16 %v2640_v18  ;;  %v2544_v52 = vld [vmem:[#allocation5 + $0xd78] sm:$0xff] }
 0x64a   :  { %5752 = vmatprep.mubr.bf16.mxu1 %v10165_v63  ;;  %v2560_v63 = vld [vmem:[#allocation5 + $0xdf8] sm:$0xff] }
 0x64b   :  { %v3648_v10 = vunpack.c.h.s8.bf16 %v2560_v63  ;;  %v3632_v32 = vunpack.c.l.s8.bf16 %v2560_v63  ;;  %v3568_v63 = vunpack.c.l.s8.bf16 %v2528_v3 }
 0x64c   :  { %5616 = vmatpush2.bf16.msra.mxu0 %v3199_v26  ;;  %5723 = vmatpush1.bf16.msra.mxu1 %v3887_v22  ;;  %v3807_v26 = vunpack.c.h.s8.bf16 %v2639_v58  ;;  %v3616_v22 = vunpack.c.h.s8.bf16 %v2544_v52 }
 0x64d   :  { %5617 = vmatprep.subr.bf16.mxu0 %v3184_v44  ;;  %5724 = vmatprep.subr.bf16.mxu1 %v3872_v38  ;;  %v2543_v44 = vld [vmem:[#allocation5 + $0xd70] sm:$0xff]  ;;  %v3792_v38 = vunpack.c.l.s8.bf16 %v2640_v18  ;;  %v4342_v18 = vadd.f32 %v10349_v8, %v10327_v62  ;;  %v2624_v8 = vld [vmem:[#allocation5 + $0xff8] sm:$0xff] }
 0x64e   :  { %v3615_v24 = vunpack.c.h.s8.bf16 %v2543_v44  ;;  %v2719_v62 = vld [vmem:[#allocation5 + $0x12f0] sm:$0xff] }
 0x650   :  { %5618 = vmatpush2.bf16.msra.mxu0 %v3183_v12  ;;  %5725 = vmatpush1.bf16.msra.mxu1 %v3871_v19  ;;  %v3791_v12 = vunpack.c.l.s8.bf16 %v2639_v58  ;;  %v3600_v19 = vunpack.c.l.s8.bf16 %v2544_v52  ;;  %v4338_v58 = vadd.f32 %v10339_v29, %v10323_v20  ;;  %v3967_v20 = vunpack.c.h.s8.bf16 %v2719_v62 }
 0x651   :  { %5619 = vmatprep.subr.bf16.mxu0 %v3168_v40  ;;  %5726 = vmatprep.subr.bf16.mxu1 %v3856_v33  ;;  %v2751_v40 = vld [vmem:[#allocation5 + $0x13f0] sm:$0xff]  ;;  %v3599_v33 = vunpack.c.l.s8.bf16 %v2543_v44 }
 0x652   :  { %v4031_v56 = vunpack.c.h.s8.bf16 %v2751_v40  ;;  %v4015_v17 = vunpack.c.l.s8.bf16 %v2751_v40  ;;  %v2704_v40 = vld [vmem:[#allocation5 + $0x1278] sm:$0xff] }
 0x654   :  { %5620 = vmatpush2.bf16.msra.mxu0 %v3167_v35  ;;  %5727 = vmatpush1.bf16.msra.mxu1 %v3855_v39  ;;  %v3584_v35 = vunpack.c.h.s8.bf16 %v2528_v3  ;;  %v2527_v39 = vld [vmem:[#allocation5 + $0xcf0] sm:$0xff] }
 0x655   :  { %5621 = vmatprep.subr.bf16.mxu0 %v3152_v42  ;;  %5728 = vmatprep.subr.bf16.mxu1 %v3840_v0  ;;  %v4016_v42 = vunpack.c.l.s8.bf16 %v2752_v6  ;;  %v3583_v0 = vunpack.c.h.s8.bf16 %v2527_v39  ;;  %v3567_v27 = vunpack.c.l.s8.bf16 %v2527_v39  ;;  %v3936_v39 = vunpack.c.h.s8.bf16 %v2704_v40 }
 0x658   :  { %5622 = vmatpush2.bf16.msra.mxu0 %v3151_v34  ;;  %5729 = vmatpush1.bf16.msra.mxu1 %v3839_v47  ;;  %v2735_v47 = vld [vmem:[#allocation5 + $0x1370] sm:$0xff] }
 0x659   :  { %5677 = vmatprep.subr.bf16.mxu0 %v3648_v10  ;;  %5730 = vmatprep.subr.bf16.mxu1 %v3824_v21  ;;  %v2512_v10 = vld [vmem:[#allocation5 + $0xc78] sm:$0xff]  ;;  %v3999_v21 = vunpack.c.h.s8.bf16 %v2735_v47 }
 0x65b   :  { %5624 = vmatmul.mubr.bf16.vlgmr.msra.gmra.mxu0 %v11091_v16  ;;  %v4032_v16 = vunpack.c.h.s8.bf16 %v2752_v6 }
 0x65c   :  { %5678 = vmatpush1.bf16.msra.mxu0 %v3647_v31  ;;  %5731 = vmatpush1.bf16.msra.mxu1 %v3823_v5  ;;  %v3552_v31 = vunpack.c.h.s8.bf16 %v2512_v10  ;;  %v2511_v5 = vld [vmem:[#allocation5 + $0xc70] sm:$0xff] }
 0x65d   :  { %5679 = vmatprep.subr.bf16.mxu0 %v3632_v32  ;;  %5732 = vmatprep.subr.bf16.mxu1 %v3808_v13  ;;  %v2720_v13 = vld [vmem:[#allocation5 + $0x12f8] sm:$0xff]  ;;  %v3551_v52 = vunpack.c.h.s8.bf16 %v2511_v5 }
 0x65e   :  { %5709 = vmatprep.mubr.bf16.mxu0 %v11092_v11  ;;  %v2736_v11 = vld [vmem:[#allocation5 + $0x1378] sm:$0xff]  ;;  %v3968_v44 = vunpack.c.h.s8.bf16 %v2720_v13 }
 0x65f   :  { %v4000_v34 = vunpack.c.h.s8.bf16 %v2736_v11  ;;  %v3984_v32 = vunpack.c.l.s8.bf16 %v2736_v11  ;;  %v2608_v11 = vld [vmem:[#allocation5 + $0xf78] sm:$0xff] }
 0x660   :  { %5680 = vmatpush1.bf16.msra.mxu0 %v3631_v23  ;;  %5733 = vmatpush1.bf16.msra.mxu1 %v3807_v26  ;;  %v3983_v23 = vunpack.c.l.s8.bf16 %v2735_v47  ;;  %v4385_v26 = vadd.f32 %v10341_v28, %v4342_v18  ;;  %v3776_v28 = vunpack.c.h.s8.bf16 %v2624_v8  ;;  %v3744_v47 = vunpack.c.h.s8.bf16 %v2608_v11 }
 0x661   :  { %5681 = vmatprep.subr.bf16.mxu0 %v3616_v22  ;;  %5734 = vmatprep.subr.bf16.mxu1 %v3792_v38  ;;  %v3536_v22 = vunpack.c.l.s8.bf16 %v2512_v10  ;;  %v4381_v38 = vadd.f32 %v10333_v25, %v4338_v58  ;;  %v2607_v10 = vld [vmem:[#allocation5 + $0xf70] sm:$0xff]  ;;  %v4127_v58 = vadd.f32 %v10281_v41, %v10266_v9  ;;  %v10546_v9 = vsub.s32 1, %v8266_v1 }
 0x662   :  { %v4428_v6 = vadd.f32 %v10363_v51, %v4385_v26  ;;  %v3951_v51 = vunpack.c.l.s8.bf16 %v2719_v62  ;;  %v3743_v18 = vunpack.c.h.s8.bf16 %v2607_v10  ;;  %v7851_v62 = vld [vmem:[#allocation10 + $0xb8] sm:$0xff]  }
 0x663   :  { %v4424_v29 = vadd.f32 %v10357_v14, %v4381_v38 }
 0x664   :  { %5682 = vmatpush1.bf16.msra.mxu0 %v3615_v24  ;;  %5735 = vmatpush1.bf16.msra.mxu1 %v3791_v12  ;;  %v3535_v24 = vunpack.c.l.s8.bf16 %v2511_v5  ;;  %v10527_v12 = vsub.s32 3, %v8266_v1  ;;  %v4471_v3 = vadd.f32 %v10359_v15, %v4428_v6 }
 0x665   :  { %5683 = vmatprep.subr.bf16.mxu0 %v3600_v19  ;;  %5736 = vmatprep.subr.bf16.mxu1 %v4032_v16  ;;  %v2623_v19 = vld [vmem:[#allocation5 + $0xff0] sm:$0xff]  ;;  %v3952_v16 = vunpack.c.l.s8.bf16 %v2720_v13  ;;  %v7849_v13 = vld [vmem:[#allocation10 + $0xf8] sm:$0xff]  }
 0x666   :  { %v3775_v25 = vunpack.c.h.s8.bf16 %v2623_v19  ;;  %v3759_v15 = vunpack.c.l.s8.bf16 %v2623_v19 }
 0x668   :  { %5684 = vmatpush1.bf16.msra.mxu0 %v3599_v33  ;;  %5737 = vmatpush2.bf16.msra.mxu1 %v4031_v56  ;;  %v4467_v33 = vadd.f32 %v10351_v57, %v4424_v29  ;;  %v10531_v56 = vld [vmem:[#allocation7] sm:$0xff] }
 0x669   :  { %5685 = vmatprep.subr.bf16.mxu0 %v3584_v35  ;;  %5738 = vmatprep.subr.bf16.mxu1 %v4016_v42  ;;  %v5782_v14 = vrot.slane %v10531_v56, %v10527_v12  ;;  %v3760_v35 = vunpack.c.l.s8.bf16 %v2624_v8  ;;  %v2703_v42 = vld [vmem:[#allocation5 + $0x1270] sm:$0xff] }
 0x66c   :  { %5686 = vmatpush1.bf16.msra.mxu0 %v3583_v0  ;;  %5739 = vmatpush2.bf16.msra.mxu1 %v4015_v17  ;;  %v5866_v0 = vmul.f32 %v5782_v14, %v4471_v3  ;;  %v3935_v17 = vunpack.c.h.s8.bf16 %v2703_v42 }
 0x66d   :  { %5687 = vmatprep.subr.bf16.mxu0 %v3568_v63  ;;  %5740 = vmatprep.subr.bf16.mxu1 %v4000_v34  ;;  %v5850_v63 = vmul.f32 %v5782_v14, %v4467_v33  ;;  %v10535_v34 = vld [vmem:[#allocation8] sm:$0xff] }
 0x66e   :  { %v5898_v57 = vrot.slane %v10535_v34, %v10527_v12  ;;  %v2575_v33 = vld [vmem:[#allocation5 + $0xe70] sm:$0xff] }
 0x670   :  { %5688 = vmatpush1.bf16.msra.mxu0 %v3567_v27  ;;  %5741 = vmatpush2.bf16.msra.mxu1 %v3999_v21  ;;  %v3920_v27 = vunpack.c.l.s8.bf16 %v2704_v40  ;;  %v5982_v21 = vadd.f32 %v5898_v57, %v5866_v0  ;;  %v5966_v5 = vadd.f32 %v5898_v57, %v5850_v63  ;;  %v11140_v0 = vld [vmem:[#allocation47_spill] sm:$0xff]  ;;  %v7863_v63 = vld [vmem:[#allocation10 + $0xa0] sm:$0xff]  }
 0x671   :  { %5689 = vmatprep.subr.bf16.mxu0 %v3552_v31  ;;  %5742 = vmatprep.subr.bf16.mxu1 %v3984_v32  ;;  %v3919_v31 = vunpack.c.l.s8.bf16 %v2703_v42  ;;  %v3728_v32 = vunpack.c.l.s8.bf16 %v2608_v11  ;;  %v11139_v11 = vld [vmem:[#allocation29_spill] sm:$0xff] }
 0x672   :  { %v6014_v26 = vmax.f32 %v5982_v21, 0.0  ;;  %v5998_v38 = vmax.f32 %v5966_v5, 0.0  ;;  %v11144_v5 = vld [vmem:[#allocation42_spill] sm:$0xff] }
 0x674   :  { %5690 = vmatpush1.bf16.msra.mxu0 %v3551_v52  ;;  %5743 = vmatpush2.bf16.msra.mxu1 %v3983_v23  ;;  %v2592_v52 = vld [vmem:[#allocation5 + $0xef8] sm:$0xff]  ;;  %v4123_v23 = vadd.f32 %v10259_v37, %v10257_v36  ;;  %v6030_v36 = vpack.c.bf16 %v6014_v26, %v5998_v38  ;;  %v3663_v26 = vunpack.c.l.s8.bf16 %v2575_v33 }
 0x675   :  { %5691 = vmatprep.subr.bf16.mxu0 %v3536_v22  ;;  %5744 = vmatprep.subr.bf16.mxu1 %v3968_v44  ;;  %v4170_v22 = vadd.f32 %v10299_v55, %v4127_v58  ;;  %v3727_v44 = vunpack.c.l.s8.bf16 %v2607_v10  ;;  %v3712_v6 = vunpack.c.h.s8.bf16 %v2592_v52  ;;  %v7855_v55 = vld [vmem:[#allocation10 + $0xb0] sm:$0xff]   ;;  %v3696_v29 = vunpack.c.l.s8.bf16 %v2592_v52  ;;  %v11146_v52 = vld [vmem:[#allocation57_spill] sm:$0xff] }
 0x676   :  { %v4166_v8 = vadd.f32 %v10271_v46, %v4123_v23 }
 0x677   :  { %v4213_v37 = vadd.f32 %v10319_v49, %v4170_v22  ;;  %v4340_v49 = vadd.f32 %v10343_v30, %v10325_v53  ;;  %v5890_v53 = vrot.slane %v10535_v34, %v10546_v9  ;;  %v7867_v22 = vld [vmem:[#allocation10 + $0x98] sm:$0xff]  }
 0x678   :  { %5692 = vmatpush1.bf16.msra.mxu0 %v3535_v24  ;;  %5745 = vmatpush2.bf16.msra.mxu1 %v3967_v20  ;;  %v2591_v24 = vld [vmem:[#allocation5 + $0xef0] sm:$0xff]  ;;  %v4209_v46 = vadd.f32 %v10285_v54, %v4166_v8  ;;  %v7859_v54 = vld [vmem:[#allocation10 + $0xa8] sm:$0xff]  }
 0x679   :  { %5693 = vmatprep.subr.bf16.mxu0 %v3776_v28  ;;  %5746 = vmatprep.subr.bf16.mxu1 %v3952_v16  ;;  %v7853_v20 = vld [vmem:[#allocation10 + $0xf0] sm:$0xff]   ;;  %v3711_v41 = vunpack.c.h.s8.bf16 %v2591_v24  ;;  %v7857_v28 = vld [vmem:[#allocation10 + $0xe8] sm:$0xff]   ;;  %v4256_v19 = vadd.f32 %v10331_v50, %v4213_v37  ;;  %v2576_v16 = vld [vmem:[#allocation5 + $0xe78] sm:$0xff]  ;;  %v3695_v3 = vunpack.c.l.s8.bf16 %v2591_v24  ;;  %v4383_v42 = vadd.f32 %v10337_v45, %v4340_v49 }
 0x67a   :  { %v4252_v40 = vadd.f32 %v10304_v60, %v4209_v46  ;;  %v7861_v50 = vld [vmem:[#allocation10 + $0xe0] sm:$0xff]   ;;  %v4336_v60 = vadd.f32 %v10335_v43, %v10321_v7  ;;  %v3664_v7 = vunpack.c.l.s8.bf16 %v2576_v16  ;;  %v7865_v43 = vld [vmem:[#allocation10 + $0xd8] sm:$0xff]   ;;  %v10574_v45 = vsub.s32 2, %v8266_v1  ;;  %v7869_v8 = vld [vmem:[#allocation10 + $0xd0] sm:$0xff]  }
 0x67b   :  { %v10586_v37 = vsub.s32 7, %v8266_v1  ;;  %v7852_v49 = vld [vmem:[#allocation10 + $0x70] sm:$0xff]  }
 0x67c   :  { %5694 = vmatpush2.bf16.msra.mxu0 %v3775_v25  ;;  %5747 = vmatpush2.bf16.msra.mxu1 %v3951_v51  ;;  %v10557_v25 = vpop.f32.mrf.mxu1  ;;  %v3680_v51 = vunpack.c.h.s8.bf16 %v2576_v16  ;;  %v11150_v16 = vld [vmem:[#allocation55_spill] sm:$0xff] }
 0x67d   :  { %5695 = vmatprep.subr.bf16.mxu0 %v3760_v35  ;;  %5748 = vmatprep.subr.bf16.mxu1 %v3936_v39  ;;  %v4772_v35 = vadd.f32 %v10448_v2, %v10426_v59  ;;  %v11141_v2 = vld [vmem:[#allocation40_spill] sm:$0xff] }
 0x67e   :  { %v10565_v30 = vpop.f32.mrf.mxu1  ;;  %v4379_v57 = vadd.f32 %v11141_v2, %v4336_v60  ;;  %v7873_v60 = vld [vmem:[#allocation10 + $0xc8] sm:$0xff]  }
 0x680   :  { %5696 = vmatpush2.bf16.msra.mxu0 %v3759_v15  ;;  %5749 = vmatpush2.bf16.msra.mxu1 %v3935_v17  ;;  %v4768_v15 = vadd.f32 %v11140_v0, %v11139_v11  ;;  %v3679_v17 = vunpack.c.h.s8.bf16 %v2575_v33  ;;  %v7854_v0 = vld [vmem:[#allocation10 + $0x30] sm:$0xff]  }
 0x681   :  { %5697 = vmatprep.subr.bf16.mxu0 %v3744_v47  ;;  %5750 = vmatprep.subr.bf16.mxu1 %v3920_v27  ;;  %v11142_v47 = vld [vmem:[#allocation34_spill] sm:$0xff]  ;;  %v11143_v27 = vld [vmem:[#allocation48_spill] sm:$0xff] }
 0x682   :  { %v4426_v10 = vadd.f32 %v11142_v47, %v4383_v42  ;;  %v4815_v21 = vadd.f32 %v11143_v27, %v4772_v35  ;;  %v5894_v42 = vrot.slane %v10535_v34, %v10574_v45 }
 0x684   :  { %5698 = vmatpush2.bf16.msra.mxu0 %v3743_v18  ;;  %5751 = vmatpush2.bf16.msra.mxu1 %v3919_v31  ;;  %v10576_v31 = vpop.f32.mrf.mxu1  ;;  %v4858_v23 = vadd.f32 %v11146_v52, %v4815_v21  ;;  %v7860_v21 = vld [vmem:[#allocation10 + $0x60] sm:$0xff]  }
 0x685   :  { %5699 = vmatprep.subr.bf16.mxu0 %v3728_v32  ;;  %7679 = vmatprep.subr.bf16.mxu1 %v7849_v13  ;;  %v4422_v32 = vadd.f32 %v11144_v5, %v4379_v57  ;;  %v11145_v13 = vld [vmem:[#allocation44_spill] sm:$0xff] }
 0x686   :  { %v4811_v58 = vadd.f32 %v11145_v13, %v4768_v15  ;;  %v11153_v13 = vld [vmem:[#allocation24_spill] sm:$0xff] }
 0x687   :  { %5753 = vmatmul.mubr.bf16.vlgmr.msra.gmra.mxu1 %v10254_v61  ;;  %v5774_v61 = vrot.slane %v10531_v56, %v10546_v9 }
 0x688   :  { %5700 = vmatpush2.bf16.msra.mxu0 %v3727_v44  ;;  %7680 = vmatpush3.bf16.msra.mxu1 %v7851_v62  ;;  %v10581_v44 = vpop.f32.mrf.mxu0  ;;  %v7848_v62 = vld [vmem:[#allocation10 + $0x78] sm:$0xff]  }
 0x689   :  { %5701 = vmatprep.subr.bf16.mxu0 %v3712_v6  ;;  %7147 = vmatprep.mubr.bf16.mxu1 %v6030_v36  ;;  %v5864_v14 = vmul.f32 %v5774_v61, %v4256_v19  ;;  %v5848_v39 = vmul.f32 %v5774_v61, %v4252_v40  ;;  %v11147_v6 = vld [vmem:[#allocation43_spill] sm:$0xff]  ;;  %v5778_v19 = vrot.slane %v10531_v56, %v10574_v45  ;;  %v7850_v61 = vld [vmem:[#allocation10 + $0x38] sm:$0xff]  }
 0x68a   :  { %7681 = vmatprep.subr.bf16.mxu1 %v7853_v20  ;;  %v4469_v24 = vadd.f32 %v11147_v6, %v4426_v10  ;;  %v11148_v20 = vld [vmem:[#allocation54_spill] sm:$0xff]  ;;  %v4901_v40 = vadd.f32 %v11150_v16, %v4858_v23  ;;  %v7881_v23 = vld [vmem:[#allocation10 + $0x1f8] sm:$0xff]  }
 0x68b   :  { %v5980_v59 = vadd.f32 %v5890_v53, %v5864_v14  ;;  %v5964_v18 = vadd.f32 %v5890_v53, %v5848_v39  ;;  %v4854_v36 = vadd.f32 %v11148_v20, %v4811_v58  ;;  %v7858_v10 = vld [vmem:[#allocation10 + $0x28] sm:$0xff]  }
 0x68c   :  { %5702 = vmatpush2.bf16.msra.mxu0 %v3711_v41  ;;  %7682 = vmatpush3.bf16.msra.mxu1 %v7855_v55  ;;  %v10588_v41 = vpop.f32.mrf.mxu1  ;;  %v10590_v55 = vpop.f32.mrf.mxu0  ;;  %v11156_v6 = vld [vmem:[#allocation38_spill] sm:$0xff] }
 0x68d   :  { %5703 = vmatprep.subr.bf16.mxu0 %v3696_v29  ;;  %7683 = vmatprep.subr.bf16.mxu1 %v7857_v28  ;;  %v6012_v38 = vmax.f32 %v5980_v59, 0.0  ;;  %v5996_v46 = vmax.f32 %v5964_v18, 0.0  ;;  %v11149_v29 = vld [vmem:[#allocation41_spill] sm:$0xff]  ;;  %v5914_v59 = vrot.slane %v10535_v34, %v10586_v37 }
 0x68e   :  { %v4465_v28 = vadd.f32 %v11149_v29, %v4422_v32  ;;  %v10599_v35 = vpop.f32.mrf.mxu1  ;;  %v10601_v39 = vpop.f32.mrf.mxu0  ;;  %v7879_v18 = vld [vmem:[#allocation10 + $0x80] sm:$0xff]  }
 0x68f   :  { %v6028_v14 = vpack.c.bf16 %v6012_v38, %v5996_v46  ;;  %v11152_v32 = vld [vmem:[#allocation25_spill] sm:$0xff] }
 0x690   :  { %5704 = vmatpush2.bf16.msra.mxu0 %v3695_v3  ;;  %7684 = vmatpush3.bf16.msra.mxu1 %v7859_v54  ;;  %v7871_v3 = vld [vmem:[#allocation10 + $0x90] sm:$0xff]   ;;  %v5865_v54 = vmul.f32 %v5778_v19, %v4469_v24  ;;  %v5849_v53 = vmul.f32 %v5778_v19, %v4465_v28  ;;  %v10606_v15 = vpop.f32.mrf.mxu1  ;;  %v10610_v2 = vpop.f32.mrf.mxu0  ;;  %v4557_v58 = vadd.f32 %v11153_v13, %v11152_v32  ;;  %v7864_v28 = vld [vmem:[#allocation10 + $0x58] sm:$0xff]   ;;  %v7872_v13 = vld [vmem:[#allocation10 + $0x48] sm:$0xff]  }
 0x691   :  { %5705 = vmatprep.subr.bf16.mxu0 %v3680_v51  ;;  %7685 = vmatprep.subr.bf16.mxu1 %v7861_v50  ;;  %v11151_v51 = vld [vmem:[#allocation51_spill] sm:$0xff]  ;;  %v5798_v50 = vrot.slane %v10531_v56, %v10586_v37  ;;  %v7883_v19 = vld [vmem:[#allocation10 + $0x1b8] sm:$0xff]  }
 0x692   :  { %v4897_v33 = vadd.f32 %v11151_v51, %v4854_v36  ;;  %v5965_v57 = vadd.f32 %v5894_v42, %v5849_v53  ;;  %v10612_v27 = vpop.f32.mrf.mxu1  ;;  %v4600_v24 = vadd.f32 %v11156_v6, %v4557_v58  ;;  %v7862_v36 = vld [vmem:[#allocation10 + $0x20] sm:$0xff]   ;;  %v7891_v58 = vld [vmem:[#allocation10 + $0x1a8] sm:$0xff]  }
 0x693   :  { %v5870_v11 = vmul.f32 %v5798_v50, %v4901_v40  ;;  %v11157_v40 = vld [vmem:[#allocation35_spill] sm:$0xff] }
 0x694   :  { %5706 = vmatpush2.bf16.msra.mxu0 %v3679_v17  ;;  %7686 = vmatpush3.bf16.msra.mxu1 %v7863_v63  ;;  %v7856_v17 = vld [vmem:[#allocation10 + $0x68] sm:$0xff]   ;;  %v10619_v46 = vpop.f32.mrf.mxu1 }
 0x695   :  { %5707 = vmatprep.subr.bf16.mxu0 %v3664_v7  ;;  %7687 = vmatprep.subr.bf16.mxu1 %v7865_v43  ;;  %v7875_v63 = vld [vmem:[#allocation10 + $0x88] sm:$0xff]   ;;  %v5981_v7 = vadd.f32 %v5894_v42, %v5865_v54  ;;  %v5854_v43 = vmul.f32 %v5798_v50, %v4897_v33  ;;  %v5986_v47 = vadd.f32 %v5914_v59, %v5870_v11  ;;  %v10626_v33 = vsub.s32 5, %v8266_v1  ;;  %v7866_v50 = vld [vmem:[#allocation10 + $0x18] sm:$0xff]   ;;  %v7868_v42 = vld [vmem:[#allocation10 + $0x50] sm:$0xff]  }
 0x696   :  { %v11158_v54 = vld [vmem:[#allocation27_spill] sm:$0xff] }
 0x697   :  { %v6013_v5 = vmax.f32 %v5981_v7, 0.0  ;;  %v5970_v52 = vadd.f32 %v5914_v59, %v5854_v43  ;;  %v6018_v20 = vmax.f32 %v5986_v47, 0.0  ;;  %v4643_v51 = vadd.f32 %v11158_v54, %v4600_v24  ;;  %v7887_v11 = vld [vmem:[#allocation10 + $0x1b0] sm:$0xff]   ;;  %v7889_v43 = vld [vmem:[#allocation10 + $0x1e8] sm:$0xff]  }
 0x698   :  { %5708 = vmatpush2.bf16.msra.mxu0 %v3663_v26  ;;  %7688 = vmatpush3.bf16.msra.mxu1 %v7867_v22  ;;  %v5201_v26 = vpop.f32.mrf.mxu0  ;;  %v5997_v22 = vmax.f32 %v5965_v57, 0.0  ;;  %v5790_v47 = vrot.slane %v10531_v56, %v10626_v33  ;;  %v11168_v54 = vld [vmem:[#allocation56_spill] sm:$0xff] }
 0x699   :  { %7657 = vmatprep.subr.bf16.mxu0 %v7848_v62  ;;  %7689 = vmatprep.subr.bf16.mxu1 %v7869_v8  ;;  %v11154_v62 = vld [vmem:[#allocation23_spill] sm:$0xff]  ;;  %v11155_v8 = vld [vmem:[#allocation22_spill] sm:$0xff] }
 0x69a   :  { %v4553_v38 = vadd.f32 %v11155_v8, %v11154_v62  ;;  %v10621_v29 = vpop.f32.mrf.mxu0  ;;  %v6029_v16 = vpack.c.bf16 %v6013_v5, %v5997_v22  ;;  %v7870_v5 = vld [vmem:[#allocation10 + $0x10] sm:$0xff]   ;;  %v11165_v22 = vld [vmem:[#allocation45_spill] sm:$0xff]  ;;  %v5202_v8 = vadd.f32 %v5201_v26, %v10599_v35 }
 0x69b   :  { %5710 = vmatmul.mubr.bf16.vlgmr.msra.gmra.mxu0 %v11093_v48  ;;  %v7877_v48 = vld [vmem:[#allocation10 + $0xc0] sm:$0xff]  }
 0x69c   :  { %7658 = vmatpush3.bf16.msra.mxu0 %v7850_v61  ;;  %7106 = vmatprep.mubr.bf16.mxu0 %v6028_v14  ;;  %v4596_v61 = vadd.f32 %v11157_v40, %v4553_v38  ;;  %v5283_v53 = vpop.f32.mrf.mxu0  ;;  %v7893_v38 = vld [vmem:[#allocation10 + $0x1e0] sm:$0xff]  }
 0x69d   :  { %7659 = vmatprep.subr.bf16.mxu0 %v7852_v49  ;;  %7690 = vmatpush3.bf16.msra.mxu1 %v7871_v3  ;;  %v6002_v49 = vmax.f32 %v5970_v52, 0.0  ;;  %v7885_v3 = vld [vmem:[#allocation10 + $0x1f0] sm:$0xff]   ;;  %v11167_v26 = vld [vmem:[#allocation33_spill] sm:$0xff] }
 0x69e   :  { %7691 = vmatprep.subr.bf16.mxu1 %v7873_v60  ;;  %v5244_v60 = vpop.f32.mrf.mxu1  ;;  %v10637_v32 = vpop.f32.mrf.mxu0 }
 0x69f   :  { %v6034_v14 = vpack.c.bf16 %v6018_v20, %v6002_v49  ;;  %v5906_v20 = vrot.slane %v10535_v34, %v10626_v33  ;;  %v7895_v49 = vld [vmem:[#allocation10 + $0x1a0] sm:$0xff]  }
 0x6a0   :  { %7660 = vmatpush3.bf16.msra.mxu0 %v7854_v0  ;;  %v11159_v0 = vld [vmem:[#allocation36_spill] sm:$0xff]  ;;  %v10630_v59 = vpop.f32.mrf.mxu1  ;;  %v5287_v40 = vpop.f32.mrf.mxu0 }
 0x6a1   :  { %7661 = vmatprep.subr.bf16.mxu0 %v7856_v17  ;;  %7692 = vmatpush3.bf16.msra.mxu1 %v7875_v63  ;;  %v4639_v17 = vadd.f32 %v11159_v0, %v4596_v61  ;;  %v11160_v63 = vld [vmem:[#allocation26_spill] sm:$0xff] }
 0x6a2   :  { %7693 = vmatprep.subr.bf16.mxu1 %v7877_v48  ;;  %v4686_v7 = vadd.f32 %v11160_v63, %v4643_v51  ;;  %v11161_v48 = vld [vmem:[#allocation28_spill] sm:$0xff]  ;;  %v5326_v6 = vpop.f32.mrf.mxu1  ;;  %v7876_v61 = vld [vmem:[#allocation10 + $0x40] sm:$0xff]  }
 0x6a3   :  { %v4682_v57 = vadd.f32 %v11161_v48, %v4639_v17  ;;  %v7899_v48 = vld [vmem:[#allocation10 + $0x198] sm:$0xff]  }
 0x6a4   :  { %7662 = vmatpush3.bf16.msra.mxu0 %v7858_v10  ;;  %v11162_v10 = vld [vmem:[#allocation31_spill] sm:$0xff]  ;;  %v5868_v52 = vmul.f32 %v5790_v47, %v4686_v7  ;;  %v7878_v7 = vld [vmem:[#allocation10] sm:$0xff]  }
 0x6a5   :  { %7663 = vmatprep.subr.bf16.mxu0 %v7860_v21  ;;  %7694 = vmatpush3.bf16.msra.mxu1 %v7879_v18  ;;  %v11163_v21 = vld [vmem:[#allocation49_spill] sm:$0xff]  ;;  %v5852_v24 = vmul.f32 %v5790_v47, %v4682_v57 }
 0x6a6   :  { %7723 = vmatprep.subr.bf16.mxu1 %v7881_v23  ;;  %v4770_v18 = vadd.f32 %v11163_v21, %v11162_v10  ;;  %v11164_v23 = vld [vmem:[#allocation32_spill] sm:$0xff]  ;;  %v5984_v35 = vadd.f32 %v5906_v20, %v5868_v52  ;;  %v11170_v57 = vld [vmem:[#allocation53_spill] sm:$0xff] }
 0x6a7   :  { %v4766_v62 = vadd.f32 %v11165_v22, %v11164_v23  ;;  %v7882_v52 = vld [vmem:[#allocation10 + $0x138] sm:$0xff]   ;;  %v7884_v23 = vld [vmem:[#allocation10 + $0x170] sm:$0xff]  }
 0x6a8   :  { %7664 = vmatpush3.bf16.msra.mxu0 %v7862_v36  ;;  %7148 = vmatmul.mubr.bf16.vlgmr.msra.gmra.mxu1 %v6029_v16  ;;  %v11166_v36 = vld [vmem:[#allocation46_spill] sm:$0xff]  ;;  %v7903_v22 = vld [vmem:[#allocation10 + $0x190] sm:$0xff]  }
 0x6a9   :  { %7665 = vmatprep.subr.bf16.mxu0 %v7864_v28  ;;  %7724 = vmatpush3.bf16.msra.mxu1 %v7883_v19  ;;  %v4813_v28 = vadd.f32 %v11166_v36, %v4770_v18  ;;  %v5198_v19 = vadd.f32 %v10601_v39, %v10576_v31  ;;  %v7874_v16 = vld [vmem:[#allocation10 + $0x8] sm:$0xff]   ;;  %v5968_v31 = vadd.f32 %v5906_v20, %v5852_v24  ;;  %v11169_v39 = vld [vmem:[#allocation52_spill] sm:$0xff] }
 0x6aa   :  { %7229 = vmatprep.mubr.bf16.mxu1 %v6034_v14  ;;  %7725 = vmatprep.subr.bf16.mxu1 %v7885_v3  ;;  %v4809_v3 = vadd.f32 %v11167_v26, %v4766_v62  ;;  %v7897_v14 = vld [vmem:[#allocation10 + $0x1d8] sm:$0xff]   ;;  %v7905_v20 = vld [vmem:[#allocation10 + $0x1c8] sm:$0xff]  }
 0x6ab   :  { %v4856_v51 = vadd.f32 %v11168_v54, %v4813_v28  ;;  %v5241_v17 = vadd.f32 %v10612_v27, %v5198_v19  ;;  %v6000_v18 = vmax.f32 %v5968_v31, 0.0  ;;  %v11172_v36 = vld [vmem:[#allocation39_spill] sm:$0xff]  ;;  %v10671_v54 = vpop.f32.mrf.mxu0  ;;  %v7911_v31 = vld [vmem:[#allocation10 + $0x180] sm:$0xff]  }
 0x6ac   :  { %7666 = vmatpush3.bf16.msra.mxu0 %v7866_v50  ;;  %v5245_v50 = vadd.f32 %v5244_v60, %v5202_v8  ;;  %v4852_v0 = vadd.f32 %v11169_v39, %v4809_v3  ;;  %v6016_v60 = vmax.f32 %v5984_v35, 0.0  ;;  %v10667_v35 = vld [vmem:[#allocation8 + $0x8] sm:$0xff]  ;;  %v7909_v3 = vld [vmem:[#allocation10 + $0x1c0] sm:$0xff]  }
 0x6ad   :  { %7667 = vmatprep.subr.bf16.mxu0 %v7868_v42  ;;  %7726 = vmatpush3.bf16.msra.mxu1 %v7887_v11  ;;  %v10650_v42 = vsub.s32 6, %v8266_v1  ;;  %v10652_v11 = vpop.f32.mrf.mxu1  ;;  %v4899_v47 = vadd.f32 %v11170_v57, %v4856_v51  ;;  %v5284_v10 = vadd.f32 %v5283_v53, %v5241_v17  ;;  %v7901_v1 = vld [vmem:[#allocation10 + $0x1d0] sm:$0xff]   ;;  %v5930_v26 = vrot.slane %v10667_v35, %v10527_v12  ;;  %v11176_v57 = vld [vmem:[#allocation58_spill] sm:$0xff] }
 0x6ae   :  { %7727 = vmatprep.subr.bf16.mxu1 %v7889_v43  ;;  %v5288_v63 = vadd.f32 %v5287_v40, %v5245_v50  ;;  %v7880_v43 = vld [vmem:[#allocation10 + $0x178] sm:$0xff]   ;;  %v6032_v24 = vpack.c.bf16 %v6016_v60, %v6000_v18  ;;  %v7907_v40 = vld [vmem:[#allocation10 + $0x188] sm:$0xff]   ;;  %v7894_v18 = vld [vmem:[#allocation10 + $0x120] sm:$0xff]  }
 0x6af   :  { %v5330_v21 = vpop.f32.mrf.mxu1  ;;  %v5794_v27 = vrot.slane %v10531_v56, %v10650_v42  ;;  %v5327_v8 = vadd.f32 %v5326_v6, %v5284_v10  ;;  %v5910_v28 = vrot.slane %v10535_v34, %v10650_v42  ;;  %v7888_v6 = vld [vmem:[#allocation10 + $0x168] sm:$0xff]   ;;  %v11174_v17 = vld [vmem:[#allocation60_spill] sm:$0xff] }
 0x6b0   :  { %7668 = vmatpush3.bf16.msra.mxu0 %v7870_v5  ;;  %v11171_v5 = vld [vmem:[#allocation50_spill] sm:$0xff]  ;;  %v11175_v60 = vld [vmem:[#allocation59_spill] sm:$0xff]  ;;  %v11177_v10 = vld [vmem:[#allocation64_spill] sm:$0xff] }
 0x6b1   :  { %7669 = vmatprep.subr.bf16.mxu0 %v7872_v13  ;;  %7728 = vmatpush3.bf16.msra.mxu1 %v7891_v58  ;;  %v4895_v13 = vadd.f32 %v11171_v5, %v4852_v0  ;;  %v5331_v58 = vadd.f32 %v5330_v21, %v5288_v63  ;;  %v5869_v62 = vmul.f32 %v5794_v27, %v4899_v47  ;;  %v7890_v50 = vld [vmem:[#allocation10 + $0x128] sm:$0xff]   ;;  %v11173_v0 = vld [vmem:[#allocation61_spill] sm:$0xff] }
 0x6b2   :  { %7729 = vmatprep.subr.bf16.mxu1 %v7893_v38  ;;  %v10660_v38 = vld [vmem:[#allocation7 + $0x8] sm:$0xff]  ;;  %v4987_v63 = vadd.f32 %v11174_v17, %v11173_v0  ;;  %v4983_v47 = vadd.f32 %v11176_v57, %v11175_v60  ;;  %v7896_v5 = vld [vmem:[#allocation10 + $0x158] sm:$0xff]   ;;  %v7910_v57 = vld [vmem:[#allocation10 + $0x100] sm:$0xff]  }
 0x6b3   :  { %v5814_v53 = vrot.slane %v10660_v38, %v10527_v12  ;;  %v5853_v56 = vmul.f32 %v5794_v27, %v4895_v13  ;;  %v10675_v12 = vpop.f32.mrf.mxu0  ;;  %v7915_v13 = vld [vmem:[#allocation10 + $0x2b8] sm:$0xff]   ;;  %v7906_v0 = vld [vmem:[#allocation10 + $0x108] sm:$0xff]  }
 0x6b4   :  { %7670 = vmatpush3.bf16.msra.mxu0 %v7874_v16  ;;  %v7886_v16 = vld [vmem:[#allocation10 + $0x130] sm:$0xff]   ;;  %v7929_v60 = vld [vmem:[#allocation10 + $0x2d8] sm:$0xff]  }
 0x6b5   :  { %7671 = vmatprep.subr.bf16.mxu0 %v7876_v61  ;;  %7730 = vmatpush3.bf16.msra.mxu1 %v7895_v49  ;;  %v5874_v19 = vmul.f32 %v5814_v53, %v5331_v58  ;;  %v5985_v61 = vadd.f32 %v5910_v28, %v5869_v62  ;;  %v5858_v49 = vmul.f32 %v5814_v53, %v5327_v8  ;;  %v11178_v58 = vld [vmem:[#allocation62_spill] sm:$0xff]  ;;  %v10681_v62 = vpop.f32.mrf.mxu0  ;;  %v7898_v53 = vld [vmem:[#allocation10 + $0x118] sm:$0xff]  }
 0x6b6   :  { %7731 = vmatprep.subr.bf16.mxu1 %v7897_v14  ;;  %v5969_v34 = vadd.f32 %v5910_v28, %v5853_v56  ;;  %v7892_v14 = vld [vmem:[#allocation10 + $0x160] sm:$0xff]   ;;  %v11179_v56 = vld [vmem:[#allocation63_spill] sm:$0xff] }
 0x6b7   :  { %v5990_v51 = vadd.f32 %v5930_v26, %v5874_v19  ;;  %v6017_v39 = vmax.f32 %v5985_v61, 0.0 }
 0x6b8   :  { %7672 = vmatpush3.bf16.msra.mxu0 %v7878_v7  ;;  %v5974_v7 = vadd.f32 %v5930_v26, %v5858_v49  ;;  %v5200_v49 = vadd.f32 %v10610_v2, %v10588_v41  ;;  %v7902_v26 = vld [vmem:[#allocation10 + $0x110] sm:$0xff]   ;;  %v5922_v41 = vrot.slane %v10667_v35, %v10546_v9 }
 0x6b9   :  { %7701 = vmatprep.subr.bf16.mxu0 %v7880_v43  ;;  %7732 = vmatpush3.bf16.msra.mxu1 %v7899_v48  ;;  %v7913_v43 = vld [vmem:[#allocation10 + $0x2f8] sm:$0xff]   ;;  %v6001_v48 = vmax.f32 %v5969_v34, 0.0  ;;  %v6022_v21 = vmax.f32 %v5990_v51, 0.0  ;;  %v7923_v51 = vld [vmem:[#allocation10 + $0x2a8] sm:$0xff]  }
 0x6ba   :  { %7733 = vmatprep.subr.bf16.mxu1 %v7901_v1  ;;  %v5030_v1 = vadd.f32 %v11177_v10, %v4987_v63  ;;  %v5243_v2 = vadd.f32 %v10619_v46, %v5200_v49 }
 0x6bb   :  { %7107 = vmatmul.mubr.bf16.vlgmr.msra.gmra.mxu0 %v11172_v36  ;;  %v6033_v27 = vpack.c.bf16 %v6017_v39, %v6001_v48  ;;  %v7919_v36 = vld [vmem:[#allocation10 + $0x2b0] sm:$0xff]  }
 0x6bc   :  { %7702 = vmatpush3.bf16.msra.mxu0 %v7882_v52  ;;  %7188 = vmatprep.mubr.bf16.mxu0 %v6032_v24  ;;  %v5026_v52 = vadd.f32 %v11178_v58, %v4983_v47  ;;  %v5073_v8 = vadd.f32 %v10557_v25, %v5030_v1  ;;  %v5806_v25 = vrot.slane %v10660_v38, %v10546_v9  ;;  %v7912_v1 = vld [vmem:[#allocation10 + $0x278] sm:$0xff]  }
 0x6bd   :  { %7703 = vmatprep.subr.bf16.mxu0 %v7884_v23  ;;  %7734 = vmatpush3.bf16.msra.mxu1 %v7903_v22  ;;  %v6006_v23 = vmax.f32 %v5974_v7, 0.0  ;;  %v7917_v22 = vld [vmem:[#allocation10 + $0x2f0] sm:$0xff]   ;;  %v7908_v7 = vld [vmem:[#allocation10 + $0x140] sm:$0xff]  }
 0x6be   :  { %7735 = vmatprep.subr.bf16.mxu1 %v7905_v20  ;;  %v7900_v20 = vld [vmem:[#allocation10 + $0x150] sm:$0xff]   ;;  %v5069_v28 = vadd.f32 %v11179_v56, %v5026_v52  ;;  %v5116_v19 = vadd.f32 %v10581_v44, %v5073_v8  ;;  %v7904_v44 = vld [vmem:[#allocation10 + $0x148] sm:$0xff]   ;;  %v5926_v56 = vrot.slane %v10667_v35, %v10574_v45 }
 0x6bf   :  { %v6038_v24 = vpack.c.bf16 %v6022_v21, %v6006_v23  ;;  %v7931_v21 = vld [vmem:[#allocation10 + $0x298] sm:$0xff]   ;;  %v7916_v23 = vld [vmem:[#allocation10 + $0x270] sm:$0xff]  }
 0x6c0   :  { %7704 = vmatpush3.bf16.msra.mxu0 %v7886_v16  ;;  %v7921_v16 = vld [vmem:[#allocation10 + $0x2e8] sm:$0xff]  }
 0x6c1   :  { %7705 = vmatprep.subr.bf16.mxu0 %v7888_v6  ;;  %7736 = vmatpush3.bf16.msra.mxu1 %v7907_v40  ;;  %v10686_v6 = vpop.f32.mrf.mxu0  ;;  %v11180_v40 = vld [vmem:[#allocation65_spill] sm:$0xff] }
 0x6c2   :  { %7737 = vmatprep.subr.bf16.mxu1 %v7909_v3  ;;  %v5112_v61 = vadd.f32 %v11180_v40, %v5069_v28  ;;  %v10693_v3 = vpop.f32.mrf.mxu1  ;;  %v7918_v28 = vld [vmem:[#allocation10 + $0x230] sm:$0xff]  }
 0x6c3   :  { %v10695_v34 = vpop.f32.mrf.mxu0 }
 0x6c4   :  { %7706 = vmatpush3.bf16.msra.mxu0 %v7890_v50  ;;  %v5872_v50 = vmul.f32 %v5806_v25, %v5116_v19  ;;  %v5856_v39 = vmul.f32 %v5806_v25, %v5112_v61  ;;  %v10702_v17 = vpop.f32.mrf.mxu1  ;;  %v7920_v19 = vld [vmem:[#allocation10 + $0x268] sm:$0xff]   ;;  %v7941_v61 = vld [vmem:[#allocation10 + $0x2c0] sm:$0xff]  }
 0x6c5   :  { %7707 = vmatprep.subr.bf16.mxu0 %v7892_v14  ;;  %7738 = vmatpush3.bf16.msra.mxu1 %v7911_v31  ;;  %v5196_v14 = vadd.f32 %v10590_v55, %v10565_v30  ;;  %v7925_v31 = vld [vmem:[#allocation10 + $0x2e0] sm:$0xff]   ;;  %v10704_v63 = vpop.f32.mrf.mxu0  ;;  %v5286_v55 = vadd.f32 %v10637_v32, %v5243_v2  ;;  %v7933_v32 = vld [vmem:[#allocation10 + $0x2d0] sm:$0xff]  }
 0x6c6   :  { %7767 = vmatprep.subr.bf16.mxu1 %v7913_v43  ;;  %v7927_v43 = vld [vmem:[#allocation10 + $0x2a0] sm:$0xff]   ;;  %v5988_v48 = vadd.f32 %v5922_v41, %v5872_v50  ;;  %v5972_v9 = vadd.f32 %v5922_v41, %v5856_v39  ;;  %v10709_v47 = vpop.f32.mrf.mxu1 }
 0x6c7   :  { %v5239_v30 = vadd.f32 %v10606_v15, %v5196_v14  ;;  %v10711_v10 = vpop.f32.mrf.mxu0  ;;  %v5329_v15 = vadd.f32 %v10652_v11, %v5286_v55  ;;  %v7937_v11 = vld [vmem:[#allocation10 + $0x2c8] sm:$0xff]   ;;  %v7943_v50 = vld [vmem:[#allocation10 + $0x280] sm:$0xff]  }
 0x6c8   :  { %7708 = vmatpush3.bf16.msra.mxu0 %v7894_v18  ;;  %7230 = vmatmul.mubr.bf16.vlgmr.msra.gmra.mxu1 %v6033_v27  ;;  %v6020_v18 = vmax.f32 %v5988_v48, 0.0  ;;  %v7914_v27 = vld [vmem:[#allocation10 + $0x238] sm:$0xff]   ;;  %v5416_v58 = vpop.f32.mrf.mxu1 }
 0x6c9   :  { %7709 = vmatprep.subr.bf16.mxu0 %v7896_v5  ;;  %7768 = vmatpush3.bf16.msra.mxu1 %v7915_v13  ;;  %v5282_v46 = vadd.f32 %v10621_v29, %v5239_v30  ;;  %v6004_v5 = vmax.f32 %v5972_v9, 0.0  ;;  %v5810_v29 = vrot.slane %v10660_v38, %v10574_v45  ;;  %v5459_v52 = vpop.f32.mrf.mxu0  ;;  %v5417_v14 = vadd.f32 %v5416_v58, %v10686_v6  ;;  %v7928_v48 = vld [vmem:[#allocation10 + $0x258] sm:$0xff]   ;;  %v7966_v58 = vld [vmem:[#allocation10 + $0x3e0] sm:$0xff]  }
 0x6ca   :  { %7311 = vmatprep.mubr.bf16.mxu1 %v6038_v24  ;;  %7769 = vmatprep.subr.bf16.mxu1 %v7917_v22  ;;  %v7935_v22 = vld [vmem:[#allocation10 + $0x290] sm:$0xff]   ;;  %v10717_v24 = vpop.f32.mrf.mxu1  ;;  %v7961_v30 = vld [vmem:[#allocation10 + $0x3b8] sm:$0xff]  }
 0x6cb   :  { %v5325_v13 = vadd.f32 %v10630_v59, %v5282_v46  ;;  %v5873_v8 = vmul.f32 %v5810_v29, %v5329_v15  ;;  %v11181_v59 = vld [vmem:[#allocation30_spill] sm:$0xff] }
 0x6cc   :  { %7710 = vmatpush3.bf16.msra.mxu0 %v7898_v53  ;;  %v6036_v53 = vpack.c.bf16 %v6020_v18, %v6004_v5  ;;  %v5498_v25 = vpop.f32.mrf.mxu1  ;;  %v7964_v15 = vld [vmem:[#allocation10 + $0x3e8] sm:$0xff]   ;;  %v7934_v5 = vld [vmem:[#allocation10 + $0x210] sm:$0xff]  }
 0x6cd   :  { %7711 = vmatprep.subr.bf16.mxu0 %v7900_v20  ;;  %7770 = vmatpush3.bf16.msra.mxu1 %v7919_v36  ;;  %v5857_v36 = vmul.f32 %v5810_v29, %v5325_v13  ;;  %v5989_v40 = vadd.f32 %v5926_v56, %v5873_v8  ;;  %v7936_v13 = vld [vmem:[#allocation10 + $0x248] sm:$0xff]   ;;  %v7940_v8 = vld [vmem:[#allocation10 + $0x240] sm:$0xff]  }
 0x6ce   :  { %7771 = vmatprep.subr.bf16.mxu1 %v7921_v16  ;;  %v7939_v16 = vld [vmem:[#allocation10 + $0x288] sm:$0xff]   ;;  %v10725_v39 = vpop.f32.mrf.mxu1 }
 0x6cf   :  { %v6021_v45 = vmax.f32 %v5989_v40, 0.0  ;;  %v7965_v29 = vld [vmem:[#allocation10 + $0x3a8] sm:$0xff]   ;;  %v7970_v40 = vld [vmem:[#allocation10 + $0x3d0] sm:$0xff]  }
 0x6d0   :  { %7712 = vmatpush3.bf16.msra.mxu0 %v7902_v26  ;;  %v5973_v26 = vadd.f32 %v5926_v56, %v5857_v36  ;;  %v5502_v9 = vpop.f32.mrf.mxu1  ;;  %v7942_v56 = vld [vmem:[#allocation10 + $0x200] sm:$0xff]  }
 0x6d1   :  { %7713 = vmatprep.subr.bf16.mxu0 %v7904_v44  ;;  %7772 = vmatpush3.bf16.msra.mxu1 %v7923_v51  ;;  %v7922_v44 = vld [vmem:[#allocation10 + $0x228] sm:$0xff]   ;;  %v7924_v51 = vld [vmem:[#allocation10 + $0x260] sm:$0xff]  }
 0x6d2   :  { %7773 = vmatprep.subr.bf16.mxu1 %v7925_v31  ;;  %v7960_v31 = vld [vmem:[#allocation10 + $0x3f8] sm:$0xff]   ;;  %v6005_v2 = vmax.f32 %v5973_v26, 0.0 }
 0x6d4   :  { %7714 = vmatpush3.bf16.msra.mxu0 %v7906_v0  ;;  %v5413_v0 = vadd.f32 %v10702_v17, %v10675_v12  ;;  %v6037_v55 = vpack.c.bf16 %v6021_v45, %v6005_v2  ;;  %v7932_v12 = vld [vmem:[#allocation10 + $0x250] sm:$0xff]   ;;  %v7973_v45 = vld [vmem:[#allocation10 + $0x388] sm:$0xff]   ;;  %v5415_v2 = vadd.f32 %v10709_v47, %v10681_v62  ;;  %v7953_v62 = vld [vmem:[#allocation10 + $0x318] sm:$0xff]  }
 0x6d5   :  { %7715 = vmatprep.subr.bf16.mxu0 %v7908_v7  ;;  %7774 = vmatpush3.bf16.msra.mxu1 %v7927_v43  ;;  %v5460_v7 = vadd.f32 %v5459_v52, %v5417_v14  ;;  %v7926_v43 = vld [vmem:[#allocation10 + $0x220] sm:$0xff]   ;;  %v7963_v17 = vld [vmem:[#allocation10 + $0x3b0] sm:$0xff]  }
 0x6d6   :  { %7775 = vmatprep.subr.bf16.mxu1 %v7929_v60  ;;  %v5456_v6 = vadd.f32 %v10704_v63, %v5413_v0  ;;  %v7962_v60 = vld [vmem:[#allocation10 + $0x3f0] sm:$0xff]   ;;  %v5822_v63 = vrot.slane %v10660_v38, %v10626_v33  ;;  %v7974_v14 = vld [vmem:[#allocation10 + $0x3c0] sm:$0xff]  }
 0x6d7   :  { %v7950_v0 = vld [vmem:[#allocation10 + $0x360] sm:$0xff]  }
 0x6d8   :  { %7716 = vmatpush3.bf16.msra.mxu0 %v7910_v57  ;;  %v5503_v57 = vadd.f32 %v5502_v9, %v5460_v7  ;;  %v7975_v7 = vld [vmem:[#allocation10 + $0x380] sm:$0xff]   ;;  %v7954_v9 = vld [vmem:[#allocation10 + $0x350] sm:$0xff]  }
 0x6d9   :  { %7745 = vmatprep.subr.bf16.mxu0 %v7912_v1  ;;  %7776 = vmatpush3.bf16.msra.mxu1 %v7931_v21  ;;  %v7930_v1 = vld [vmem:[#allocation10 + $0x218] sm:$0xff]   ;;  %v5499_v21 = vadd.f32 %v5498_v25, %v5456_v6  ;;  %v7946_v25 = vld [vmem:[#allocation10 + $0x370] sm:$0xff]  }
 0x6da   :  { %7777 = vmatprep.subr.bf16.mxu1 %v7933_v32 }
 0x6db   :  { %v10719_v20 = vpop.f32.mrf.mxu0  ;;  %7189 = vmatmul.mubr.bf16.vlgmr.msra.gmra.mxu0 %v11181_v59  ;;  %v7968_v59 = vld [vmem:[#allocation10 + $0x3d8] sm:$0xff]  }
 0x6dc   :  { %7746 = vmatpush3.bf16.msra.mxu0 %v7914_v27  ;;  %7270 = vmatprep.mubr.bf16.mxu0 %v6036_v53  ;;  %v7967_v53 = vld [vmem:[#allocation10 + $0x3a0] sm:$0xff]  }
 0x6dd   :  { %7747 = vmatprep.subr.bf16.mxu0 %v7916_v23  ;;  %7778 = vmatpush3.bf16.msra.mxu1 %v7935_v22  ;;  %v5541_v49 = vpop.f32.mrf.mxu0  ;;  %v5938_v23 = vrot.slane %v10667_v35, %v10626_v33  ;;  %v7938_v22 = vld [vmem:[#allocation10 + $0x208] sm:$0xff]  }
 0x6de   :  { %7779 = vmatprep.subr.bf16.mxu1 %v7937_v11  ;;  %v5542_v32 = vadd.f32 %v5541_v49, %v5499_v21  ;;  %v7971_v49 = vld [vmem:[#allocation10 + $0x390] sm:$0xff]  }
 0x6df   :  { %v10727_v41 = vpop.f32.mrf.mxu0 }
 0x6e0   :  { %7748 = vmatpush3.bf16.msra.mxu0 %v7918_v28  ;;  %v5860_v52 = vmul.f32 %v5822_v63, %v5542_v32  ;;  %v7944_v28 = vld [vmem:[#allocation10 + $0x378] sm:$0xff]   ;;  %v5582_v32 = vpop.f32.mrf.mxu1 }
 0x6e1   :  { %7749 = vmatprep.subr.bf16.mxu0 %v7920_v19  ;;  %7780 = vmatpush3.bf16.msra.mxu1 %v7939_v16  ;;  %v5545_v46 = vpop.f32.mrf.mxu0  ;;  %v7969_v19 = vld [vmem:[#allocation10 + $0x398] sm:$0xff]  }
 0x6e2   :  { %7781 = vmatprep.subr.bf16.mxu1 %v7941_v61  ;;  %v5546_v18 = vadd.f32 %v5545_v46, %v5503_v57  ;;  %v5976_v36 = vadd.f32 %v5938_v23, %v5860_v52  ;;  %v7945_v61 = vld [vmem:[#allocation10 + $0x338] sm:$0xff]   ;;  %v7956_v57 = vld [vmem:[#allocation10 + $0x348] sm:$0xff]  }
 0x6e4   :  { %7750 = vmatpush3.bf16.msra.mxu0 %v7922_v44  ;;  %v5876_v27 = vmul.f32 %v5822_v63, %v5546_v18  ;;  %v6008_v33 = vmax.f32 %v5976_v36, 0.0  ;;  %v7972_v44 = vld [vmem:[#allocation10 + $0x3c8] sm:$0xff]   ;;  %v5584_v63 = vpop.f32.mrf.mxu1 }
 0x6e5   :  { %7751 = vmatprep.subr.bf16.mxu0 %v7924_v51  ;;  %7782 = vmatpush3.bf16.msra.mxu1 %v7943_v50  ;;  %v7947_v51 = vld [vmem:[#allocation10 + $0x330] sm:$0xff]   ;;  %v7948_v50 = vld [vmem:[#allocation10 + $0x368] sm:$0xff]  }
 0x6e6   :  { %7811 = vmatprep.subr.bf16.mxu1 %v7960_v31  ;;  %v5992_v11 = vadd.f32 %v5938_v23, %v5876_v27  ;;  %v7949_v31 = vld [vmem:[#allocation10 + $0x328] sm:$0xff]  }
 0x6e8   :  { %7752 = vmatpush3.bf16.msra.mxu0 %v7926_v43  ;;  %7312 = vmatmul.mubr.bf16.vlgmr.msra.gmra.mxu1 %v6037_v55  ;;  %v6024_v16 = vmax.f32 %v5992_v11, 0.0  ;;  %v5458_v43 = vadd.f32 %v10711_v10, %v5415_v2  ;;  %v7952_v55 = vld [vmem:[#allocation10 + $0x358] sm:$0xff]  }
 0x6e9   :  { %7753 = vmatprep.subr.bf16.mxu0 %v7928_v48  ;;  %7812 = vmatpush3.bf16.msra.mxu1 %v7961_v30  ;;  %v7951_v48 = vld [vmem:[#allocation10 + $0x320] sm:$0xff]  }
 0x6ea   :  { %7813 = vmatprep.subr.bf16.mxu1 %v7962_v60  ;;  %v6040_v26 = vpack.c.bf16 %v6024_v16, %v6008_v33  ;;  %v5501_v6 = vadd.f32 %v10725_v39, %v5458_v43  ;;  %v5946_v43 = vrot.slane %v10667_v35, %v10586_v37 }
 0x6ec   :  { %7754 = vmatpush3.bf16.msra.mxu0 %v7930_v1  ;;  %v5544_v60 = vadd.f32 %v10727_v41, %v5501_v6  ;;  %v7958_v41 = vld [vmem:[#allocation10 + $0x340] sm:$0xff]   ;;  %v5942_v6 = vrot.slane %v10667_v35, %v10650_v42 }
 0x6ed   :  { %7755 = vmatprep.subr.bf16.mxu0 %v7932_v12  ;;  %7814 = vmatpush3.bf16.msra.mxu1 %v7963_v17 }
 0x6ee   :  { %7815 = vmatprep.subr.bf16.mxu1 %v7964_v15 }
 0x6f0   :  { %7756 = vmatpush3.bf16.msra.mxu0 %v7934_v5  ;;  %v5586_v5 = vpop.f32.mrf.mxu1 }
 0x6f1   :  { %7757 = vmatprep.subr.bf16.mxu0 %v7936_v13  ;;  %7816 = vmatpush3.bf16.msra.mxu1 %v7965_v29 }
 0x6f2   :  { %7817 = vmatprep.subr.bf16.mxu1 %v7966_v58  ;;  %v5588_v13 = vpop.f32.mrf.mxu1 }
 0x6f4   :  { %7758 = vmatpush3.bf16.msra.mxu0 %v7938_v22 }
 0x6f5   :  { %7759 = vmatprep.subr.bf16.mxu0 %v7940_v8  ;;  %7818 = vmatpush3.bf16.msra.mxu1 %v7967_v53 }
 0x6f6   :  { %7819 = vmatprep.subr.bf16.mxu1 %v7968_v59 }
 0x6f8   :  { %7760 = vmatpush3.bf16.msra.mxu0 %v7942_v56 }
 0x6f9   :  { %7789 = vmatprep.subr.bf16.mxu0 %v7944_v28  ;;  %7820 = vmatpush3.bf16.msra.mxu1 %v7969_v19 }
 0x6fa   :  { %7821 = vmatprep.subr.bf16.mxu1 %v7970_v40 }
 0x6fb   :  { %7271 = vmatmul.mubr.bf16.vlgmr.msra.gmra.mxu0 %v10504_v4  ;;  %v5411_v4 = vadd.f32 %v10693_v3, %v10671_v54  ;;  %v11182_v3 = vld [vmem:[#allocation37_spill] sm:$0xff] }
 0x6fc   :  { %7790 = vmatpush3.bf16.msra.mxu0 %v7945_v61  ;;  %7352 = vmatprep.mubr.bf16.mxu0 %v6040_v26  ;;  %v5818_v10 = vrot.slane %v10660_v38, %v11182_v3  ;;  %v5934_v39 = vrot.slane %v10667_v35, %v11182_v3 }
 0x6fd   :  { %7791 = vmatprep.subr.bf16.mxu0 %v7946_v25  ;;  %7822 = vmatpush3.bf16.msra.mxu1 %v7971_v49  ;;  %v5454_v30 = vadd.f32 %v10695_v34, %v5411_v4  ;;  %v7955_v34 = vld [vmem:[#allocation10 + $0x310] sm:$0xff]  }
 0x6fe   :  { %7823 = vmatprep.subr.bf16.mxu1 %v7972_v44  ;;  %v5875_v46 = vmul.f32 %v5818_v10, %v5544_v60  ;;  %v5830_v44 = vrot.slane %v10660_v38, %v10586_v37 }
 0x6ff   :  { %v5497_v47 = vadd.f32 %v10717_v24, %v5454_v30  ;;  %v7957_v24 = vld [vmem:[#allocation10 + $0x308] sm:$0xff]  }
 0x700   :  { %7792 = vmatpush3.bf16.msra.mxu0 %v7947_v51  ;;  %v5991_v12 = vadd.f32 %v5934_v39, %v5875_v46 }
 0x701   :  { %7793 = vmatprep.subr.bf16.mxu0 %v7948_v50  ;;  %7824 = vmatpush3.bf16.msra.mxu1 %v7973_v45  ;;  %v5540_v54 = vadd.f32 %v10719_v20, %v5497_v47  ;;  %v7959_v20 = vld [vmem:[#allocation10 + $0x300] sm:$0xff]   ;;  %v5826_v50 = vrot.slane %v10660_v38, %v10650_v42 }
 0x702   :  { %7825 = vmatprep.subr.bf16.mxu1 %v7974_v14  ;;  %v6023_v21 = vmax.f32 %v5991_v12, 0.0 }
 0x703   :  { %v5859_v1 = vmul.f32 %v5818_v10, %v5540_v54 }
 0x704   :  { %7794 = vmatpush3.bf16.msra.mxu0 %v7949_v31 }
 0x705   :  { %7795 = vmatprep.subr.bf16.mxu0 %v7950_v0  ;;  %7826 = vmatpush3.bf16.msra.mxu1 %v7975_v7  ;;  %v5975_v17 = vadd.f32 %v5934_v39, %v5859_v1 }
 0x707   :  { %v6007_v18 = vmax.f32 %v5975_v17, 0.0  ;;  %v5668_v29 = vpop.f32.mrf.mxu1 }
 0x708   :  { %7796 = vmatpush3.bf16.msra.mxu0 %v7951_v48 }
 0x709   :  { %7797 = vmatprep.subr.bf16.mxu0 %v7952_v55  ;;  %v6039_v15 = vpack.c.bf16 %v6023_v21, %v6007_v18  ;;  %v5670_v58 = vpop.f32.mrf.mxu1 }
 0x70b   :  { %v5672_v23 = vpop.f32.mrf.mxu1 }
 0x70c   :  { %7798 = vmatpush3.bf16.msra.mxu0 %v7953_v62 }
 0x70d   :  { %7799 = vmatprep.subr.bf16.mxu0 %v7954_v9  ;;  %v5674_v8 = vpop.f32.mrf.mxu1 }
 0x710   :  { %7800 = vmatpush3.bf16.msra.mxu0 %v7955_v34 }
 0x711   :  { %7801 = vmatprep.subr.bf16.mxu0 %v7956_v57 }
 0x714   :  { %7802 = vmatpush3.bf16.msra.mxu0 %v7957_v24 }
 0x715   :  { %7803 = vmatprep.subr.bf16.mxu0 %v7958_v41 }
 0x718   :  { %7804 = vmatpush3.bf16.msra.mxu0 %v7959_v20 }
 0x71b   :  { %7353 = vmatmul.mubr.bf16.vlgmr.msra.gmra.mxu0 %v6039_v15  ;;  %v5625_v27 = vpop.f32.mrf.mxu0 }
 0x71c   :  { %v5626_v53 = vadd.f32 %v5625_v27, %v5582_v32 }
 0x71d   :  { %v5627_v52 = vpop.f32.mrf.mxu0 }
 0x71e   :  { %v5628_v59 = vadd.f32 %v5627_v52, %v5584_v63  ;;  %v5669_v56 = vadd.f32 %v5668_v29, %v5626_v53 }
 0x71f   :  { %v5629_v22 = vpop.f32.mrf.mxu0 }
 0x720   :  { %v5630_v28 = vadd.f32 %v5629_v22, %v5586_v5  ;;  %v5671_v40 = vadd.f32 %v5670_v58, %v5628_v59 }
 0x721   :  { %v5631_v36 = vpop.f32.mrf.mxu0 }
 0x722   :  { %v5632_v33 = vadd.f32 %v5631_v36, %v5588_v13  ;;  %v5673_v49 = vadd.f32 %v5672_v23, %v5630_v28  ;;  %v7524_v23 = vld [vmem:[#allocation11] ss:$0 sm:$0xff] }
 0x724   :  { %v5675_v31 = vadd.f32 %v5674_v8, %v5632_v33 }
 0x747   :  { %v5754_v11 = vpop.f32.mrf.mxu1 }
 0x749   :  { %v5756_v16 = vpop.f32.mrf.mxu1 }
 0x74b   :  { %v5758_v14 = vpop.f32.mrf.mxu1 }
 0x74d   :  { %v5760_v62 = vpop.f32.mrf.mxu1 }
 0x75b   :  { %v5711_v19 = vpop.f32.mrf.mxu0 }
 0x75c   :  { %v5712_v61 = vadd.f32 %v5711_v19, %v5669_v56 }
 0x75d   :  { %v5713_v25 = vpop.f32.mrf.mxu0 }
 0x75e   :  { %v5714_v26 = vadd.f32 %v5713_v25, %v5671_v40  ;;  %v5755_v51 = vadd.f32 %v5754_v11, %v5712_v61 }
 0x75f   :  { %v5715_v45 = vpop.f32.mrf.mxu0 }
 0x760   :  { %v5757_v2 = vadd.f32 %v5756_v16, %v5714_v26  ;;  %v5716_v0 = vadd.f32 %v5715_v45, %v5673_v49  ;;  %v5861_v55 = vmul.f32 %v5826_v50, %v5755_v51 }
 0x761   :  { %v5717_v7 = vpop.f32.mrf.mxu0 }
 0x762   :  { %v5862_v4 = vmul.f32 %v5830_v44, %v5757_v2  ;;  %v5759_v48 = vadd.f32 %v5758_v14, %v5716_v0  ;;  %v5718_v30 = vadd.f32 %v5717_v7, %v5675_v31  ;;  %v5977_v3 = vadd.f32 %v5942_v6, %v5861_v55 }
 0x764   :  { %v5877_v47 = vmul.f32 %v5826_v50, %v5759_v48  ;;  %v5761_v60 = vadd.f32 %v5760_v62, %v5718_v30  ;;  %v5978_v38 = vadd.f32 %v5946_v43, %v5862_v4  ;;  %v6009_v1 = vmax.f32 %v5977_v3, 0.0 }
 0x766   :  { %v5993_v9 = vadd.f32 %v5942_v6, %v5877_v47  ;;  %v5878_v54 = vmul.f32 %v5830_v44, %v5761_v60  ;;  %v6010_v46 = vmax.f32 %v5978_v38, 0.0 }
 0x768   :  { %v5994_v10 = vadd.f32 %v5946_v43, %v5878_v54  ;;  %v6025_v34 = vmax.f32 %v5993_v9, 0.0  ;;  %v7695_v42 = vpop.f32.mrf.mxu1 }
 0x76a   :  { %v6026_v57 = vmax.f32 %v5994_v10, 0.0  ;;  %v6041_v37 = vpack.c.bf16 %v6025_v34, %v6009_v1  ;;  %v7696_v20 = vpop.f32.mrf.mxu1 }
 0x76b   :  { %v7697_v56 = vadd.f32 %v7696_v20, %v7695_v42 }
 0x76c   :  { %v6042_v39 = vpack.c.bf16 %v6026_v57, %v6010_v46  ;;  %v7698_v18 = vpop.f32.mrf.mxu1 }
 0x76e   :  { %7393 = vmatprep.mubr.bf16.mxu1 %v6042_v39  ;;  %v7699_v32 = vpop.f32.mrf.mxu1 }
 0x76f   :  { %7394 = vmatmul.mubr.bf16.vlgmr.msra.gmra.mxu1 %v6041_v37  ;;  %v7700_v61 = vadd.f32 %v7699_v32, %v7698_v18 }
 0x77b   :  { %v7673_v24 = vpop.f32.mrf.mxu0 }
 0x77d   :  { %v7674_v12 = vpop.f32.mrf.mxu0 }
 0x77e   :  { %v7675_v52 = vadd.f32 %v7674_v12, %v7673_v24 }
 0x77f   :  { %v7676_v41 = vpop.f32.mrf.mxu0 }
 0x780   :  { %v7109_v53 = vadd.f32 %v7675_v52, %v7524_v23 }
 0x781   :  { %v7677_v35 = vpop.f32.mrf.mxu0 }
 0x782   :  { %v7678_v11 = vadd.f32 %v7677_v35, %v7676_v41  ;;  %v7150_v16 = vadd.f32 %v7697_v56, %v7109_v53 }
 0x784   :  { %v7112_v40 = vadd.f32 %v7678_v11, %v7524_v23 }
 0x786   :  { %v7153_v44 = vadd.f32 %v7700_v61, %v7112_v40 }
 0x788   :  { %v7739_v63 = vpop.f32.mrf.mxu1 }
 0x78a   :  { %v7740_v29 = vpop.f32.mrf.mxu1 }
 0x78b   :  { %v7741_v51 = vadd.f32 %v7740_v29, %v7739_v63 }
 0x78c   :  { %v7742_v58 = vpop.f32.mrf.mxu1 }
 0x78e   :  { %v7743_v8 = vpop.f32.mrf.mxu1 }
 0x78f   :  { %v7744_v0 = vadd.f32 %v7743_v8, %v7742_v58 }
 0x79b   :  { %v7717_v17 = vpop.f32.mrf.mxu0 }
 0x79d   :  { %v7718_v21 = vpop.f32.mrf.mxu0 }
 0x79e   :  { %v7719_v28 = vadd.f32 %v7718_v21, %v7717_v17 }
 0x79f   :  { %v7720_v15 = vpop.f32.mrf.mxu0 }
 0x7a0   :  { %v7191_v25 = vadd.f32 %v7719_v28, %v7150_v16 }
 0x7a1   :  { %v7721_v5 = vpop.f32.mrf.mxu0 }
 0x7a2   :  { %v7722_v49 = vadd.f32 %v7721_v5, %v7720_v15  ;;  %v7232_v14 = vadd.f32 %v7741_v51, %v7191_v25 }
 0x7a4   :  { %v7194_v31 = vadd.f32 %v7722_v49, %v7153_v44 }
 0x7a6   :  { %v7235_v48 = vadd.f32 %v7744_v0, %v7194_v31 }
 0x7a8   :  { %v7783_v59 = vpop.f32.mrf.mxu1 }
 0x7aa   :  { %v7784_v33 = vpop.f32.mrf.mxu1 }
 0x7ab   :  { %v7785_v30 = vadd.f32 %v7784_v33, %v7783_v59 }
 0x7ac   :  { %v7786_v45 = vpop.f32.mrf.mxu1 }
 0x7ae   :  { %v7787_v43 = vpop.f32.mrf.mxu1 }
 0x7af   :  { %v7788_v9 = vadd.f32 %v7787_v43, %v7786_v45 }
 0x7bb   :  { %v7761_v13 = vpop.f32.mrf.mxu0 }
 0x7bd   :  { %v7762_v27 = vpop.f32.mrf.mxu0 }
 0x7be   :  { %v7763_v50 = vadd.f32 %v7762_v27, %v7761_v13 }
 0x7bf   :  { %v7764_v22 = vpop.f32.mrf.mxu0 }
 0x7c0   :  { %v7273_v7 = vadd.f32 %v7763_v50, %v7232_v14 }
 0x7c1   :  { %v7765_v36 = vpop.f32.mrf.mxu0 }
 0x7c2   :  { %v7766_v4 = vadd.f32 %v7765_v36, %v7764_v22  ;;  %v7314_v47 = vadd.f32 %v7785_v30, %v7273_v7 }
 0x7c4   :  { %v7276_v60 = vadd.f32 %v7766_v4, %v7235_v48 }
 0x7c6   :  { %v7317_v46 = vadd.f32 %v7788_v9, %v7276_v60 }
 0x7db   :  { %v7805_v19 = vpop.f32.mrf.mxu0 }
 0x7dd   :  { %v7806_v26 = vpop.f32.mrf.mxu0 }
 0x7de   :  { %v7807_v55 = vadd.f32 %v7806_v26, %v7805_v19 }
 0x7df   :  { %v7808_v2 = vpop.f32.mrf.mxu0 }
 0x7e0   :  { %v7355_v54 = vadd.f32 %v7807_v55, %v7314_v47 }
 0x7e1   :  { %v7809_v6 = vpop.f32.mrf.mxu0 }
 0x7e2   :  { %v7810_v3 = vadd.f32 %v7809_v6, %v7808_v2 }
 0x7e4   :  { %v7358_v39 = vadd.f32 %v7810_v3, %v7317_v46 }
 0x82f   :  { %v7827_v62 = vpop.f32.mrf.mxu1 }
 0x831   :  { %v7828_v38 = vpop.f32.mrf.mxu1 }
 0x832   :  { %v7829_v10 = vadd.f32 %v7828_v38, %v7827_v62 }
 0x833   :  { %v7830_v34 = vpop.f32.mrf.mxu1 }
 0x834   :  { %v7396_v57 = vadd.f32 %v7829_v10, %v7355_v54 }
 0x835   :  { %v7831_v1 = vpop.f32.mrf.mxu1 }
 0x836   :  { %v7832_v37 = vadd.f32 %v7831_v1, %v7830_v34  ;;  %7440 = vrot.lane.b32.xlu0 %v7396_v57, %s8205_s4  ;;  %v7653_v12 = vclamps-f32 %v7396_v57, 10.0 }
 0x838   :  { %v7399_v24 = vadd.f32 %v7832_v37, %v7358_v39  ;;  %v7406_v42 = vrot.slane %v7653_v12, 4 }
 0x83a   :  { %7442 = vrot.lane.b32.xlu0 %v7399_v24, %s8205_s4  ;;  %v7654_v41 = vclamps-f32 %v7399_v24, 10.0  ;;  %v7407_v17 = vmax.f32 %v7653_v12, %v7406_v42 }
 0x83c   :  { %v7412_v35 = vrot.slane %v7654_v41, 4  ;;  %v7408_v21 = vrot.slane %v7407_v17, 2 }
 0x83e   :  { %v7413_v20 = vmax.f32 %v7654_v41, %v7412_v35  ;;  %v7409_v15 = vmax.f32 %v7407_v17, %v7408_v21 }
 0x840   :  { %v7414_v18 = vrot.slane %v7413_v20, 2  ;;  %v7410_v63 = vrot.slane %v7409_v15, 1 }
 0x842   :  { %v7415_v32 = vmax.f32 %v7413_v20, %v7414_v18  ;;  %v7411_v13 = vmax.f32 %v7409_v15, %v7410_v63 }
 0x844   :  { %v7416_v5 = vrot.slane %v7415_v32, 1  ;;  %v7418_v27 = vsub.f32 %v7653_v12, %v7411_v13 }
 0x846   :  { %v7417_v29 = vmax.f32 %v7415_v32, %v7416_v5  ;;  %v7420_v52 = vmul.f32 1.442695, %v7418_v27 }
 0x848   :  { %v7419_v58 = vsub.f32 %v7654_v41, %v7417_v29  ;;  %7976 = vpow2.f32 %v7420_v52 }
 0x84a   :  { %v7422_v23 = vmul.f32 1.442695, %v7419_v58 }
 0x84c   :  { %7978 = vpow2.f32 %v7422_v23 }
 0x855   :  { %v7977_v22 = vpop.eup %7976 }
 0x856   :  { %v7424_v53 = vrot.slane %v7977_v22, 4 }
 0x858   :  { %v7425_v59 = vadd.f32 %v7977_v22, %v7424_v53 }
 0x859   :  { %v7979_v8 = vpop.eup %7978 }
 0x85a   :  { %v7430_v11 = vrot.slane %v7979_v8, 4  ;;  %v7426_v56 = vrot.slane %v7425_v59, 2 }
 0x85c   :  { %v7431_v36 = vadd.f32 %v7979_v8, %v7430_v11  ;;  %v7427_v40 = vadd.f32 %v7426_v56, %v7425_v59 }
 0x85e   :  { %v7432_v16 = vrot.slane %v7431_v36, 2  ;;  %v7428_v49 = vrot.slane %v7427_v40, 1 }
 0x860   :  { %v7433_v25 = vadd.f32 %v7432_v16, %v7431_v36  ;;  %v7429_v44 = vadd.f32 %v7428_v49, %v7427_v40 }
 0x862   :  { %v7434_v26 = vrot.slane %v7433_v25, 1 }
 0x864   :  { %v7435_v51 = vadd.f32 %v7434_v26, %v7433_v25 }
 0x8a8   :  { %v7441_v28 = vpop.permute.xlu0 %7440 }
 0x8a9   :  { %v7655_v19 = vmul.f32 -1.442695, %v7441_v28 }
 0x8ab   :  { %7980 = vpow2.f32 %v7655_v19 }
 0x8ac   :  { %v7443_v33 = vpop.permute.xlu0 %7442 }
 0x8ad   :  { %v7656_v61 = vmul.f32 -1.442695, %v7443_v33 }
 0x8af   :  { %7982 = vpow2.f32 %v7656_v61 }
 0x8b0   :  { %7984 = vrcp.f32 %v7429_v44 }
 0x8b1   :  { %7986 = vrcp.f32 %v7435_v51 }
 0x8b8   :  { %v7981_v50 = vpop.eup %7980 }
 0x8b9   :  { %v7450_v45 = vadd.f32 1.0, %v7981_v50 }
 0x8bb   :  { %7988 = vrcp.f32 %v7450_v45 }
 0x8bc   :  { %v7983_v14 = vpop.eup %7982 }
 0x8bd   :  { %v7451_v31 = vadd.f32 1.0, %v7983_v14  ;;  %v7985_v2 = vpop.eup %7984 }
 0x8be   :  { %v7987_v0 = vpop.eup %7986  ;;  %v7438_v7 = vmul.f32 %v7985_v2, %v7977_v22 }
 0x8bf   :  { %7990 = vrcp.f32 %v7451_v31  ;;  %v7439_v30 = vmul.f32 %v7987_v0, %v7979_v8 }
 0x8c8   :  { %v7989_v4 = vpop.eup %7988 }
 0x8c9   :  { %v7456_v43 = vmul.f32 %v7989_v4, %v7438_v7  ;;  %v7475_v48 = vrot.slane %v7989_v4, 4 }
 0x8cb   :  { %v7458_v55 = vrot.slane %v7456_v43, 4  ;;  %v7476_v6 = vmax.f32 %v7989_v4, %v7475_v48 }
 0x8cc   :  { %v7991_v62 = vpop.eup %7990 }
 0x8cd   :  { %v7457_v47 = vmul.f32 %v7991_v62, %v7439_v30  ;;  %v7459_v60 = vadd.f32 %v7458_v55, %v7456_v43  ;;  %v7477_v38 = vrot.slane %v7476_v6, 2  ;;  %v7481_v9 = vrot.slane %v7991_v62, 4 }
 0x8cf   :  { %v7460_v54 = vrot.slane %v7459_v60, 2  ;;  %v7464_v3 = vrot.slane %v7457_v47, 4  ;;  %v7478_v10 = vmax.f32 %v7476_v6, %v7477_v38  ;;  %v7482_v34 = vmax.f32 %v7991_v62, %v7481_v9 }
 0x8d1   :  { %v7461_v46 = vadd.f32 %v7460_v54, %v7459_v60  ;;  %v7465_v57 = vadd.f32 %v7464_v3, %v7457_v47  ;;  %v7483_v1 = vrot.slane %v7482_v34, 2  ;;  %v7479_v37 = vrot.slane %v7478_v10, 1 }
 0x8d3   :  { %v7466_v39 = vrot.slane %v7465_v57, 2  ;;  %v7484_v24 = vmax.f32 %v7482_v34, %v7483_v1  ;;  %v7462_v12 = vrot.slane %v7461_v46, 1  ;;  %v7480_v17 = vmax.f32 %v7478_v10, %v7479_v37 }
 0x8d5   :  { %v7467_v41 = vadd.f32 %v7466_v39, %v7465_v57  ;;  %v7485_v42 = vrot.slane %v7484_v24, 1  ;;  %v7463_v21 = vadd.f32 %v7462_v12, %v7461_v46 }
 0x8d7   :  { %v7468_v35 = vrot.slane %v7467_v41, 1  ;;  %v7486_v20 = vmax.f32 %v7484_v24, %v7485_v42 }
 0x8d9   :  { %v7469_v18 = vadd.f32 %v7468_v35, %v7467_v41  ;;  %v7489_v15 = vsel %vm1625_vm0, %v7486_v20, %v7480_v17 }
 0x8da   :  { %7491 = vst [vmem:[#allocation14] sm:$0x3] %v7489_v15 }
 0x8db   :  { %v7472_v32 = vsel %vm1625_vm0, %v7469_v18, %v7463_v21 }
 0x8dc   :  { %8152 = shalt.err (!%p8149_p6)
}
 0x8dd   :  { %7511 = dma.vmem_to_hbm [thread:$0]  %s7509_s11, 32, %s10774_s7, [#allocation15]   ;;  %7474 = vst [vmem:[#allocation13] sm:$0x3] %v7472_v32 }
 0x8de   :  { %s8161_s16 = scalar_lea.vmem %s7499_s13, 32  ;;  %p8166_p8 = scmp.lt.s32.totalorder %s7499_s13, %s7499_s13 }
 0x8df   :  { %p8162_p7 = scmp.ne.s32.totalorder %s7499_s13, %s8161_s16  ;;  %p8167_p9 = scmp.lt.s32.totalorder %s8161_s16, %s8161_s16 }
 0x8e1   :  { %p8168_p10 = por %p8167_p9, %p8166_p8 }
 0x8e3   :  { %p8169_p11 = pnand %p8168_p10, %p8162_p7 }
 0x8e5   :  { %8172 = shalt.err (!%p8169_p11)
}
 0x8e6   :  { %7501 = dma.vmem_to_hbm [thread:$0]  %s7499_s13, 32, %s10773_s6, [#allocation4]  }
 0x8e7   :  { %8189 = dma.done.wait [#allocation4], 32  }
 0x8e8   :  { %8190 = vsyncadd [#allocation4], 4294967264 }
 0x8e9   :  { %8191 = dma.done.wait [#allocation15], 32  }
 0x8ea   :  { %8192 = vsyncadd [#allocation15], 4294967264 }
 0x8eb   :  { %7518 = vsyncpa [#allocation3], 1 }
 0x8ec   :  { %7519 = vsyncpa [#allocation6], 1 }
 0x8ed   :  { %7520 = vsyncpa [#allocation9], 1 }
 0x8ee   :  { %7521 = vsyncpa [#allocation12], 1 }
 0x8ef   :  { %7522 = vsyncpa [#allocation4], 1 }
 0x8f0   :  { %7523 = vsyncpa [#allocation15], 1 }

</bundles_post_ra>
